<compile_context>
chip_gen: v6e
topology: v6e:2x2x1
jax: 0.10.0
libtpu: 0.0.40
codegen_flags: <defaults>
</compile_context>

<pallas_src>
from functools import partial

import numpy as np
import jax
import jax.numpy as jnp
from jax import lax
from jax.experimental import pallas as pl
from jax.experimental.pallas import tpu as pltpu

# ----------------------- constants lifted from the PyTorch module -----------------------
SAMPLE_RATE = 44100
N_FFT = 512
N_HOP = 64
N_BINS = 32
NUM_CHAN = 38
LOW_FREQ = 100
WINDOW_MS = 20
MAXITD_MS = 1.0
COHTHRESH = 0.9
COMPRESS1 = 0.23
COMPRESS2 = 2.0            # applied as x*x in-kernel
LP_CUTOFF = 425.0
LP_ORDER = 4
LP_NUMTAPS = 256
GAMMA_NUMTAPS = 512        # FIR approximation length of the ERB gammatone bank
EPS = 1e-12                # float32-scale guard (torch reference used float64 eps)

LANES = 128
MAXLAG = int(np.floor(MAXITD_MS * SAMPLE_RATE / 1000.0))                   # 44
NLAGS = 2 * MAXLAG + 1                                                     # 89
NLAGS_PAD = 96                                                             # sublane-rounded
FRAME_LEN = int(2 ** np.ceil(np.log2(WINDOW_MS / 1000.0 * SAMPLE_RATE)))   # 1024
FRAME_HOP = FRAME_LEN // 2

FT = 128          # STFT frames per tile
NB = N_FFT // 2 + 1
NB_PAD = 384      # 257 bins zero-padded so the DFT output is lane-dense
GAMMA_TM = 512    # gammatone matmul rows (time samples) per tile
LPF_TM = 256      # Bernstein lowpass output rows per tile
BIN_TB = 64       # binaural kernel in-kernel time chunk


def _cparams(n_parallel):
    return pltpu.CompilerParams(
        dimension_semantics=("parallel",) * n_parallel,
        vmem_limit_bytes=32 * 1024 * 1024,
    )


# =============================== Pallas kernels ===============================

def _gamma_matmul_kernel(w_ref, t_ref, o_ref):
    """Gammatone FIR as MXU matmul: (TM, 512) windows @ (512, 128) flipped taps."""
    o_ref[...] = jnp.dot(w_ref[...], t_ref[...], preferred_element_type=jnp.float32)


def gammatone_matmul(windows, taps_pad):
    rows, k = windows.shape
    return pl.pallas_call(
        _gamma_matmul_kernel,
        out_shape=jax.ShapeDtypeStruct((rows, LANES), jnp.float32),
        grid=(rows // GAMMA_TM,),
        in_specs=[pl.BlockSpec((GAMMA_TM, k), lambda i: (i, 0)),
                  pl.BlockSpec((k, LANES), lambda i: (0, 0))],
        out_specs=pl.BlockSpec((GAMMA_TM, LANES), lambda i: (i, 0)),
        compiler_params=_cparams(1),
    )(windows, taps_pad)


def _stft_kernel(a_ref, b_ref, basis_ref, out_ref):
    """In-kernel framing (hop=64) + windowed DFT (bf16 MXU) -> centroid & bandwidth.

    a_ref: (1, FT, 64)  hop rows of this frame tile
    b_ref: (1, 8, 64)   the following 8 hop rows (frame overlap)
    basis_ref: (512, 2*NB_PAD) bf16, Hann window folded in, [cos | -sin]
    out_ref: (1, FT, 128) lane-dense; col 0 = centroid, col 1 = bandwidth
    """
    chunk = jnp.concatenate([a_ref[0], b_ref[0]], axis=0)          # (FT+8, 64) f32
    nphase = N_FFT // N_HOP                                        # 8
    acc = jnp.zeros((FT, 2 * NB_PAD), jnp.float32)
    for j in range(nphase):
        # frame[:, j*64:(j+1)*64] == chunk[j:j+FT, :]  -> split the DFT over 8 phases
        acc = acc + jnp.dot(chunk[j:j + FT, :].astype(jnp.bfloat16),
                            basis_ref[j * N_HOP:(j + 1) * N_HOP, :],
                            preferred_element_type=jnp.float32)
    re = acc[:, :NB_PAD]
    im = acc[:, NB_PAD:]
    mag = jnp.sqrt(re * re + im * im)                              # padded bins give 0
    freqs = lax.broadcasted_iota(jnp.int32, mag.shape, 1).astype(jnp.float32) \
        * (float(SAMPLE_RATE) / float(N_FFT))
    tot = jnp.sum(mag, axis=-1, keepdims=True) + EPS
    cent = jnp.sum(mag * freqs, axis=-1, keepdims=True) / tot      # spectral centroid
    dev = freqs - cent
    bw = jnp.sqrt(jnp.sum(mag * dev * dev, axis=-1, keepdims=True) / tot)
    lane = lax.broadcasted_iota(jnp.int32, (FT, LANES), 1)
    out_ref[0] = jnp.where(lane == 0, cent, 0.0) + jnp.where(lane == 1, bw, 0.0)


def stft_centroid_bandwidth(signal, dft_basis):
    """signal (2, T) -> per-frame spectral centroid & bandwidth, both ears."""
    T = signal.shape[1]
    pad = N_FFT // 2
    nfr = 1 + T // N_HOP
    n_tiles = -(-nfr // FT)
    hp = (n_tiles + 1) * FT                       # hop rows after zero padding
    total = hp * N_HOP
    x = jnp.pad(signal, ((0, 0), (pad, total - pad - T)))   # librosa center=True (zeros)
    hop_arr = x.reshape(2, hp, N_HOP)
    out = pl.pallas_call(
        _stft_kernel,
        out_shape=jax.ShapeDtypeStruct((2, n_tiles * FT, LANES), jnp.float32),
        grid=(2, n_tiles),
        in_specs=[pl.BlockSpec((1, FT, N_HOP), lambda e, m: (e, m, 0)),
                  pl.BlockSpec((1, 8, N_HOP), lambda e, m: (e, (m + 1) * (FT // 8), 0)),
                  pl.BlockSpec((N_FFT, 2 * NB_PAD), lambda e, m: (0, 0))],
        out_specs=pl.BlockSpec((1, FT, LANES), lambda e, m: (e, m, 0)),
        compiler_params=_cparams(2),
    )(hop_arr, hop_arr, dft_basis)
    return out[:, :nfr, 0], out[:, :nfr, 1]


def _bernstein_kernel(ea_ref, eb_ref, fa_ref, fb_ref, tmat_ref, out_ref):
    """Fused Bernstein envelope compression + 'same' lowpass FIR as a Toeplitz matmul."""
    env = jnp.concatenate([ea_ref[...], eb_ref[...]], axis=0)      # (2*LPF_TM, 128)
    sig = jnp.concatenate([fa_ref[...], fb_ref[...]], axis=0)
    comp = jnp.exp((COMPRESS1 - 1.0) * jnp.log(env + EPS)) * sig   # env**(c1-1) * sig
    rect = jnp.maximum(comp, 0.0)
    rect = rect * rect                                             # ** COMPRESS2 (= 2)
    out_ref[...] = jnp.dot(tmat_ref[...], rect, preferred_element_type=jnp.float32)


def bernstein_compress_lowpass(fbank, env, lpf_toeplitz):
    """fbank/env: (T, nch<=128).  Returns compressed + lowpassed (T, nch)."""
    T, nch = fbank.shape
    n_tiles = -(-T // LPF_TM)
    rows = (n_tiles + 1) * LPF_TM
    pad_front = LP_NUMTAPS // 2                                     # 128 ('same' centering)

    def _pad(a):
        return jnp.pad(a, ((pad_front, rows - pad_front - T), (0, LANES - nch)))

    env_p = _pad(env)
    fb_p = _pad(fbank)
    out = pl.pallas_call(
        _bernstein_kernel,
        out_shape=jax.ShapeDtypeStruct((n_tiles * LPF_TM, LANES), jnp.float32),
        grid=(n_tiles,),
        in_specs=[pl.BlockSpec((LPF_TM, LANES), lambda m: (m, 0)),
                  pl.BlockSpec((LPF_TM, LANES), lambda m: (m + 1, 0)),
                  pl.BlockSpec((LPF_TM, LANES), lambda m: (m, 0)),
                  pl.BlockSpec((LPF_TM, LANES), lambda m: (m + 1, 0)),
                  pl.BlockSpec((LPF_TM, 2 * LPF_TM), lambda m: (0, 0))],
        out_specs=pl.BlockSpec((LPF_TM, LANES), lambda m: (m, 0)),
        compiler_params=_cparams(1),
    )(env_p, env_p, fb_p, fb_p, lpf_toeplitz)
    return out[:T, :nch]


def _binaural_kernel(l_ref, rp_ref, coh_ref, en_ref):
    """Per-column interaural coherence at 89 static lags + frame energies.

    l_ref:  (1024, 128)  left frames, columns = flattened (frame, chan)
    rp_ref: (1120, 128)  right frames zero-padded by 44 front / 52 back
    coh_ref:(96, 128)    rows 0..88 = coherence at lag (row-44) samples
    en_ref: (8, 128)     row 0 = left energy, row 1 = right energy
    """
    c = LANES
    nchunks = FRAME_LEN // BIN_TB

    def chunk(u, carry):
        acc, le, re = carry
        row0 = pl.multiple_of(u * BIN_TB, BIN_TB)
        l_c = l_ref[pl.ds(row0, BIN_TB), :]                        # (64, 128)
        rp_c = rp_ref[pl.ds(row0, BIN_TB + NLAGS_PAD), :]          # (160, 128), aligned
        le = le + jnp.sum(l_c * l_c, axis=0, keepdims=True)
        r_c = rp_c[MAXLAG:MAXLAG + BIN_TB, :]
        re = re + jnp.sum(r_c * r_c, axis=0, keepdims=True)

        groups = []
        for g in range(NLAGS_PAD // 8):                            # 12 groups of 8 lags
            rows = []
            for b in range(8):
                lag = 8 * g + b
                if lag < NLAGS:
                    s = 2 * MAXLAG - lag                           # static start in [0, 88]
                    rows.append(jnp.sum(l_c * rp_c[s:s + BIN_TB, :],
                                        axis=0, keepdims=True))
                else:
                    rows.append(jnp.zeros((1, c), jnp.float32))
            groups.append(jnp.concatenate(rows, axis=0))           # (8, 128)
        acc = acc + jnp.concatenate(groups, axis=0)                # (96, 128)
        return acc, le, re

    acc0 = jnp.zeros((NLAGS_PAD, c), jnp.float32)
    e0 = jnp.zeros((1, c), jnp.float32)
    acc, le, re = lax.fori_loop(0, nchunks, chunk, (acc0, e0, e0))
    denom = lax.rsqrt(le * re + EPS)
    coh_ref[...] = acc * denom                                     # one bulk store
    en_ref[...] = jnp.concatenate([le, re, jnp.zeros((6, c), jnp.float32)], axis=0)


def binaural_coherence(lf, rpad):
    cp = lf.shape[1]
    return pl.pallas_call(
        _binaural_kernel,
        out_shape=(jax.ShapeDtypeStruct((NLAGS_PAD, cp), jnp.float32),
                   jax.ShapeDtypeStruct((8, cp), jnp.float32)),
        grid=(cp // LANES,),
        in_specs=[pl.BlockSpec((FRAME_LEN, LANES), lambda j: (0, j)),
                  pl.BlockSpec((FRAME_LEN + NLAGS_PAD, LANES), lambda j: (0, j))],
        out_specs=(pl.BlockSpec((NLAGS_PAD, LANES), lambda j: (0, j)),
                   pl.BlockSpec((8, LANES), lambda j: (0, j))),
        compiler_params=_cparams(1),
    )(lf, rpad)


# ===================== deterministic parameter setup (numpy) =====================

def _firwin2_hamming(numtaps, f, m):
    # frequency-sampling FIR design, equivalent of scipy.signal.firwin2(..., window='hamming')
    nfreqs = 1 + 2 ** int(np.ceil(np.log2(numtaps)))
    x = np.linspace(0.0, 1.0, nfreqs)
    fx = np.interp(x, f, m)
    shift = np.exp(-(numtaps - 1) / 2.0 * 1j * np.pi * x)
    h = np.fft.irfft(fx * shift)[:numtaps]
    return (h * np.hamming(numtaps)).astype(np.float32)


def bernstein_lowpass_taps():
    lpf = np.linspace(0, SAMPLE_RATE / 2, 10000)
    f0 = LP_CUTOFF * (1.0 / (2 ** (1.0 / LP_ORDER) - 1) ** 0.5)
    lpmag = 1.0 / (1.0 + (lpf / f0) ** 2) ** (LP_ORDER / 2)
    lpf = lpf / (SAMPLE_RATE / 2)
    lpmag[-1] = 0.0
    return _firwin2_hamming(LP_NUMTAPS, lpf, lpmag)


def gammatone_fir_bank(sr, num_chan, low_freq, numtaps):
    # TODO(synk): pat.MakeErbFilters/ErbFilterBank is a recursive IIR gammatone cascade
    # (sequential recurrence, no clean Pallas equivalent); approximated with an FIR
    # gammatone bank (same ERB center frequencies/bandwidths) applied by the MXU kernel.
    ear_q, min_bw = 9.26449, 24.7
    i = np.arange(1, num_chan + 1)
    cf = -(ear_q * min_bw) + np.exp(
        i * (-np.log(sr / 2 + ear_q * min_bw) + np.log(low_freq + ear_q * min_bw)) / num_chan
    ) * (sr / 2 + ear_q * min_bw)
    erb = cf / ear_q + min_bw
    b = 1.019 * 2.0 * np.pi * erb
    t = np.arange(numtaps) / sr
    ir = (t[None, :] ** 3) * np.exp(-b[:, None] * t[None, :]) * np.cos(2 * np.pi * cf[:, None] * t[None, :])
    gain = np.abs(np.fft.rfft(ir, n=4 * numtaps, axis=1)).max(axis=1, keepdims=True)
    return (ir / gain).astype(np.float32)                    # (num_chan, numtaps)


# ================================ JAX glue ================================

@partial(jax.jit, static_argnums=(1, 2))
def _fir_windows(x, numtaps, t_pad):
    """im2col windows for a causal FIR: windows[n, k] = xpad[n + k], xpad front-padded."""
    T = x.shape[0]
    xp = jnp.pad(x, (numtaps - 1, t_pad - T))
    cols = [lax.slice_in_dim(xp, k, k + t_pad) for k in range(numtaps)]
    return jnp.stack(cols, axis=1)                            # (t_pad, numtaps)


def histproportion(x, nbins):
    dens, be = jnp.histogram(jnp.ravel(x), bins=nbins, density=True)
    return dens * jnp.diff(be), be


def hilbert_envelope(x):
    # TODO(synk): scipy.signal.hilbert is FFT-based; done with jnp.fft glue (no Pallas FFT).
    T = x.shape[0]
    h = np.zeros(T, np.float32)
    h[0] = 1.0
    if T % 2 == 0:
        h[T // 2] = 1.0
        h[1:T // 2] = 2.0
    else:
        h[1:(T + 1) // 2] = 2.0
    analytic = jnp.fft.ifft(jnp.fft.fft(x, axis=0) * h[:, None], axis=0)
    return jnp.abs(analytic).astype(jnp.float32)


def _nan_cov(a, b):
    valid = jnp.logical_not(jnp.isnan(a) | jnp.isnan(b))
    n = valid.sum()
    nf = jnp.maximum(n, 1).astype(jnp.float32)
    ma = jnp.where(valid, a, 0.0).sum() / nf
    mb = jnp.where(valid, b, 0.0).sum() / nf
    num = jnp.where(valid, (a - ma) * (b - mb), 0.0).sum()
    c = num / jnp.maximum(n - 1, 1).astype(jnp.float32)
    return jnp.where(n >= 2, c, jnp.nan)


def pairwise_cov(x, y):
    def one(a, b):
        return jnp.array([[_nan_cov(a, a), _nan_cov(a, b)],
                          [_nan_cov(b, a), _nan_cov(b, b)]])
    return jax.vmap(one)(x, y)


def binaural_analysis(comp):
    """comp: (T, 76) compressed filterbank, left channels then right channels."""
    T = comp.shape[0]
    nframes = 1 + (T - FRAME_LEN) // FRAME_HOP
    comp_l = comp[:, :NUM_CHAN]
    comp_r = comp[:, NUM_CHAN:]

    def frame(x):
        fr = jnp.stack([x[f * FRAME_HOP:f * FRAME_HOP + FRAME_LEN, :] for f in range(nframes)],
                       axis=1)
        return fr.reshape(FRAME_LEN, nframes * NUM_CHAN)      # (1024, NF*NCH)

    lf = frame(comp_l)
    rf = frame(comp_r)
    cols = nframes * NUM_CHAN
    cp = -(-cols // LANES) * LANES
    lf = jnp.pad(lf, ((0, 0), (0, cp - cols)))
    rpad = jnp.pad(rf, ((MAXLAG, NLAGS_PAD - MAXLAG), (0, cp - cols)))   # (1120, cp)

    coh, en = binaural_coherence(lf, rpad)                    # Pallas
    coh = coh[:NLAGS, :cols].reshape(NLAGS, nframes, NUM_CHAN).transpose(2, 1, 0)  # (NCH, NF, NLAGS)
    le = en[0, :cols].reshape(nframes, NUM_CHAN).T            # (NCH, NF)
    re = en[1, :cols].reshape(nframes, NUM_CHAN).T

    ildest = 10.0 * jnp.log10((le / FRAME_LEN + EPS) / (re / FRAME_LEN + EPS))
    iamaxcoh = jnp.max(coh, axis=-1)
    itdest = (jnp.argmax(coh, axis=-1).astype(jnp.float32) - MAXLAG) * (1000.0 / SAMPLE_RATE)

    lowcoh = iamaxcoh < COHTHRESH
    itd = jnp.where(lowcoh, jnp.nan, itdest)
    ild = jnp.where(lowcoh, jnp.nan, ildest)

    prophighcoh = 1.0 - jnp.sum(lowcoh, axis=-1) / nframes
    meancoh = jnp.mean(iamaxcoh, axis=-1)
    q = jnp.array([10.0, 25.0, 75.0, 90.0])
    meanselitd = jnp.nanmean(itd, axis=-1)
    medselitd = jnp.nanmedian(itd, axis=-1)
    itdpct = jnp.nanpercentile(itd, q, axis=-1)
    meanselild = jnp.nanmean(ild, axis=-1)
    medselild = jnp.nanmedian(ild, axis=-1)
    ildpct = jnp.nanpercentile(ild, q, axis=-1)

    covmats = pairwise_cov(itd, ild)
    unselcov = pairwise_cov(itdest, ildest)

    return jnp.concatenate([
        prophighcoh, meancoh,
        meanselitd, medselitd, itdpct.ravel(),
        meanselild, medselild, ildpct.ravel(),
        covmats.ravel(), unselcov.ravel(),
    ]).astype(jnp.float32)


class FeaturesCalculator:
    """JAX/Pallas port of the torch FeaturesCalculator forward pass (float32)."""

    def __init__(self):
        # Windowed DFT basis: [cos | -sin], Hann folded in, 257 bins zero-padded to 384, bf16.
        k = np.arange(NB)
        n = np.arange(N_FFT)
        ang = 2.0 * np.pi * np.outer(n, k) / N_FFT
        win = 0.5 * (1.0 - np.cos(2.0 * np.pi * n / N_FFT))          # periodic Hann
        cosb = np.zeros((N_FFT, NB_PAD), np.float32)
        sinb = np.zeros((N_FFT, NB_PAD), np.float32)
        cosb[:, :NB] = np.cos(ang) * win[:, None]
        sinb[:, :NB] = -np.sin(ang) * win[:, None]
        self.dft_basis = jnp.asarray(np.concatenate([cosb, sinb], axis=1), jnp.bfloat16)

        # Gammatone taps, time-flipped for windows @ taps, zero-padded to 128 lanes.
        ir = gammatone_fir_bank(SAMPLE_RATE, NUM_CHAN, LOW_FREQ, GAMMA_NUMTAPS)  # (38, 512)
        taps = np.zeros((GAMMA_NUMTAPS, LANES), np.float32)
        taps[:, :NUM_CHAN] = ir[:, ::-1].T
        self.gamma_taps = jnp.asarray(taps)

        # Bernstein lowpass as a (256, 512) banded Toeplitz matrix ('same' centering).
        h = bernstein_lowpass_taps()                                  # (256,)
        tmat = np.zeros((LPF_TM, 2 * LPF_TM), np.float32)
        for i in range(LPF_TM):
            tmat[i, i:i + LP_NUMTAPS] = h[::-1]
        self.lpf_toeplitz = jnp.asarray(tmat)

    def __call__(self, signal):
        # signal: (2, T) float32 stereo waveform (same convention as the torch module)
        signal = jnp.asarray(signal, jnp.float32)
        T = signal.shape[1]

        # -------- monaural spectral features (STFT centroid / bandwidth histograms) --------
        cent, bw = stft_centroid_bandwidth(signal, self.dft_basis)    # Pallas (MXU DFT)
        dcent, bec = histproportion(cent, N_BINS)
        dbw, beb = histproportion(bw, N_BINS)
        # TODO(synk): librosa.feature.spectral_contrast (per-octave-band sorted quantile
        # contrast) omitted — no clean Pallas equivalent for its sort/quantile machinery.
        monfeats = jnp.concatenate([dcent, bec / 1000.0, dbw, beb / 1000.0]).astype(jnp.float32)

        # -------- ERB (gammatone) filterbank, both ears, one MXU matmul kernel --------
        t_pad = -(-T // GAMMA_TM) * GAMMA_TM
        wl = _fir_windows(signal[0], GAMMA_NUMTAPS, t_pad)
        wr = _fir_windows(signal[1], GAMMA_NUMTAPS, t_pad)
        windows = jnp.concatenate([wl, wr], axis=0)                   # (2*t_pad, 512)
        fbo = gammatone_matmul(windows, self.gamma_taps)              # Pallas, (2*t_pad, 128)
        fbank = jnp.concatenate(
            [fbo[:T, :NUM_CHAN], fbo[t_pad:t_pad + T, :NUM_CHAN]], axis=1)  # (T, 76)

        # -------- fused Bernstein compression + lowpass, then binaural analysis --------
        env = hilbert_envelope(fbank)                                 # (T, 76)
        comp = bernstein_compress_lowpass(fbank, env, self.lpf_toeplitz)   # Pallas (fused)
        binfeats = binaural_analysis(comp)
        # Note: torch version returns float64; we keep TPU-native float32.
        return jnp.concatenate([monfeats, binfeats])


if __name__ == "__main__":
    key = jax.random.PRNGKey(0)
    T = 4096
    k1, k2 = jax.random.split(key)
    left = jax.random.normal(k1, (T,), jnp.float32)
    noise = jax.random.normal(k2, (T,), jnp.float32)
    right = 0.7 * jnp.roll(left, 5) + 0.3 * noise                 # correlated stereo pair
    signal = jnp.stack([left, right], axis=0)                     # (2, T)

    calc = FeaturesCalculator()
    feat = calc(signal)
    feat = jax.block_until_ready(feat)

    expected_len = 2 * (N_BINS + (N_BINS + 1)) + NUM_CHAN * 22    # 130 monaural + 836 binaural
    assert feat.ndim == 1 and feat.shape[0] == expected_len, feat.shape
    print("KERNEL_OK")
</pallas_src>

<mosaic_0001>
module attributes {stable_mosaic.version = 11 : i64} {
  func.func @_stft_kernel(%arg0: i32, %arg1: i32, %arg2: memref<1x128x64xf32, #tpu.memory_space<vmem>>, %arg3: memref<1x8x64xf32, #tpu.memory_space<vmem>>, %arg4: memref<512x768xbf16, #tpu.memory_space<vmem>>, %arg5: memref<1x128x128xf32, #tpu.memory_space<vmem>>) attributes {dimension_semantics = [#tpu.dimension_semantics<parallel>, #tpu.dimension_semantics<parallel>], iteration_bounds = array<i64: 2, 1>, scalar_prefetch = 0 : i64, scratch_operands = 0 : i64, tpu.core_type = #tpu.core_type<tc>, window_params = [{transform_indices = @transform_0, window_bounds = array<i64: 1, 128, 64>}, {transform_indices = @transform_1, window_bounds = array<i64: 1, 8, 64>}, {pipeline_mode = #tpu.pipeline_mode<synchronous>, transform_indices = @transform_2, window_bounds = array<i64: 512, 768>}, {transform_indices = @transform_3, window_bounds = array<i64: 1, 128, 128>}]} {
    %c0 = arith.constant 0 : index
    %c0_0 = arith.constant 0 : index
    %c0_1 = arith.constant 0 : index
    %0 = vector.load %arg2[%c0, %c0_0, %c0_1] : memref<1x128x64xf32, #tpu.memory_space<vmem>>, vector<1x128x64xf32>
    %1 = vector.shape_cast %0 : vector<1x128x64xf32> to vector<128x64xf32>
    %c0_2 = arith.constant 0 : index
    %c0_3 = arith.constant 0 : index
    %c0_4 = arith.constant 0 : index
    %2 = vector.load %arg3[%c0_2, %c0_3, %c0_4] : memref<1x8x64xf32, #tpu.memory_space<vmem>>, vector<1x8x64xf32>
    %3 = vector.shape_cast %2 : vector<1x8x64xf32> to vector<8x64xf32>
    %4 = tpu.concatenate %1, %3 in 0 : vector<128x64xf32>, vector<8x64xf32> -> vector<136x64xf32>
    %cst = arith.constant 0.000000e+00 : f32
    %5 = vector.broadcast %cst : f32 to vector<128x768xf32>
    %6 = vector.extract_strided_slice %4 {offsets = [0, 0], sizes = [128, 64], strides = [1, 1]} : vector<136x64xf32> to vector<128x64xf32>
    %7 = arith.truncf %6 : vector<128x64xf32> to vector<128x64xbf16>
    %c0_5 = arith.constant 0 : index
    %c0_6 = arith.constant 0 : index
    %8 = vector.load %arg4[%c0_5, %c0_6] : memref<512x768xbf16, #tpu.memory_space<vmem>>, vector<64x768xbf16>
    %cst_7 = arith.constant dense<0.000000e+00> : vector<128x768xf32>
    %9 = tpu.matmul %7, %8, %cst_7 {dimension_numbers = #tpu.dot_dimension_numbers<[1], [0], [0], [1], [0, 0, 1, 1], [], []>} : vector<128x64xbf16>, vector<64x768xbf16>, vector<128x768xf32> -> vector<128x768xf32>
    %10 = arith.addf %5, %9 : vector<128x768xf32>
    %11 = vector.extract_strided_slice %4 {offsets = [1, 0], sizes = [128, 64], strides = [1, 1]} : vector<136x64xf32> to vector<128x64xf32>
    %12 = arith.truncf %11 : vector<128x64xf32> to vector<128x64xbf16>
    %c64 = arith.constant 64 : index
    %c0_8 = arith.constant 0 : index
    %13 = vector.load %arg4[%c64, %c0_8] : memref<512x768xbf16, #tpu.memory_space<vmem>>, vector<64x768xbf16>
    %cst_9 = arith.constant dense<0.000000e+00> : vector<128x768xf32>
    %14 = tpu.matmul %12, %13, %cst_9 {dimension_numbers = #tpu.dot_dimension_numbers<[1], [0], [0], [1], [0, 0, 1, 1], [], []>} : vector<128x64xbf16>, vector<64x768xbf16>, vector<128x768xf32> -> vector<128x768xf32>
    %15 = arith.addf %10, %14 : vector<128x768xf32>
    %16 = vector.extract_strided_slice %4 {offsets = [2, 0], sizes = [128, 64], strides = [1, 1]} : vector<136x64xf32> to vector<128x64xf32>
    %17 = arith.truncf %16 : vector<128x64xf32> to vector<128x64xbf16>
    %c128 = arith.constant 128 : index
    %c0_10 = arith.constant 0 : index
    %18 = vector.load %arg4[%c128, %c0_10] : memref<512x768xbf16, #tpu.memory_space<vmem>>, vector<64x768xbf16>
    %cst_11 = arith.constant dense<0.000000e+00> : vector<128x768xf32>
    %19 = tpu.matmul %17, %18, %cst_11 {dimension_numbers = #tpu.dot_dimension_numbers<[1], [0], [0], [1], [0, 0, 1, 1], [], []>} : vector<128x64xbf16>, vector<64x768xbf16>, vector<128x768xf32> -> vector<128x768xf32>
    %20 = arith.addf %15, %19 : vector<128x768xf32>
    %21 = vector.extract_strided_slice %4 {offsets = [3, 0], sizes = [128, 64], strides = [1, 1]} : vector<136x64xf32> to vector<128x64xf32>
    %22 = arith.truncf %21 : vector<128x64xf32> to vector<128x64xbf16>
    %c192 = arith.constant 192 : index
    %c0_12 = arith.constant 0 : index
    %23 = vector.load %arg4[%c192, %c0_12] : memref<512x768xbf16, #tpu.memory_space<vmem>>, vector<64x768xbf16>
    %cst_13 = arith.constant dense<0.000000e+00> : vector<128x768xf32>
    %24 = tpu.matmul %22, %23, %cst_13 {dimension_numbers = #tpu.dot_dimension_numbers<[1], [0], [0], [1], [0, 0, 1, 1], [], []>} : vector<128x64xbf16>, vector<64x768xbf16>, vector<128x768xf32> -> vector<128x768xf32>
    %25 = arith.addf %20, %24 : vector<128x768xf32>
    %26 = vector.extract_strided_slice %4 {offsets = [4, 0], sizes = [128, 64], strides = [1, 1]} : vector<136x64xf32> to vector<128x64xf32>
    %27 = arith.truncf %26 : vector<128x64xf32> to vector<128x64xbf16>
    %c256 = arith.constant 256 : index
    %c0_14 = arith.constant 0 : index
    %28 = vector.load %arg4[%c256, %c0_14] : memref<512x768xbf16, #tpu.memory_space<vmem>>, vector<64x768xbf16>
    %cst_15 = arith.constant dense<0.000000e+00> : vector<128x768xf32>
    %29 = tpu.matmul %27, %28, %cst_15 {dimension_numbers = #tpu.dot_dimension_numbers<[1], [0], [0], [1], [0, 0, 1, 1], [], []>} : vector<128x64xbf16>, vector<64x768xbf16>, vector<128x768xf32> -> vector<128x768xf32>
    %30 = arith.addf %25, %29 : vector<128x768xf32>
    %31 = vector.extract_strided_slice %4 {offsets = [5, 0], sizes = [128, 64], strides = [1, 1]} : vector<136x64xf32> to vector<128x64xf32>
    %32 = arith.truncf %31 : vector<128x64xf32> to vector<128x64xbf16>
    %c320 = arith.constant 320 : index
    %c0_16 = arith.constant 0 : index
    %33 = vector.load %arg4[%c320, %c0_16] : memref<512x768xbf16, #tpu.memory_space<vmem>>, vector<64x768xbf16>
    %cst_17 = arith.constant dense<0.000000e+00> : vector<128x768xf32>
    %34 = tpu.matmul %32, %33, %cst_17 {dimension_numbers = #tpu.dot_dimension_numbers<[1], [0], [0], [1], [0, 0, 1, 1], [], []>} : vector<128x64xbf16>, vector<64x768xbf16>, vector<128x768xf32> -> vector<128x768xf32>
    %35 = arith.addf %30, %34 : vector<128x768xf32>
    %36 = vector.extract_strided_slice %4 {offsets = [6, 0], sizes = [128, 64], strides = [1, 1]} : vector<136x64xf32> to vector<128x64xf32>
    %37 = arith.truncf %36 : vector<128x64xf32> to vector<128x64xbf16>
    %c384 = arith.constant 384 : index
    %c0_18 = arith.constant 0 : index
    %38 = vector.load %arg4[%c384, %c0_18] : memref<512x768xbf16, #tpu.memory_space<vmem>>, vector<64x768xbf16>
    %cst_19 = arith.constant dense<0.000000e+00> : vector<128x768xf32>
    %39 = tpu.matmul %37, %38, %cst_19 {dimension_numbers = #tpu.dot_dimension_numbers<[1], [0], [0], [1], [0, 0, 1, 1], [], []>} : vector<128x64xbf16>, vector<64x768xbf16>, vector<128x768xf32> -> vector<128x768xf32>
    %40 = arith.addf %35, %39 : vector<128x768xf32>
    %41 = vector.extract_strided_slice %4 {offsets = [7, 0], sizes = [128, 64], strides = [1, 1]} : vector<136x64xf32> to vector<128x64xf32>
    %42 = arith.truncf %41 : vector<128x64xf32> to vector<128x64xbf16>
    %c448 = arith.constant 448 : index
    %c0_20 = arith.constant 0 : index
    %43 = vector.load %arg4[%c448, %c0_20] : memref<512x768xbf16, #tpu.memory_space<vmem>>, vector<64x768xbf16>
    %cst_21 = arith.constant dense<0.000000e+00> : vector<128x768xf32>
    %44 = tpu.matmul %42, %43, %cst_21 {dimension_numbers = #tpu.dot_dimension_numbers<[1], [0], [0], [1], [0, 0, 1, 1], [], []>} : vector<128x64xbf16>, vector<64x768xbf16>, vector<128x768xf32> -> vector<128x768xf32>
    %45 = arith.addf %40, %44 : vector<128x768xf32>
    %46 = vector.extract_strided_slice %45 {offsets = [0, 0], sizes = [128, 384], strides = [1, 1]} : vector<128x768xf32> to vector<128x384xf32>
    %47 = vector.extract_strided_slice %45 {offsets = [0, 384], sizes = [128, 384], strides = [1, 1]} : vector<128x768xf32> to vector<128x384xf32>
    %48 = arith.mulf %46, %46 : vector<128x384xf32>
    %49 = arith.mulf %47, %47 : vector<128x384xf32>
    %50 = arith.addf %48, %49 : vector<128x384xf32>
    %51 = math.sqrt %50 : vector<128x384xf32>
    %52 = tpu.iota {dimensions = array<i32: 1>} : vector<128x384xi32>
    %53 = arith.sitofp %52 : vector<128x384xi32> to vector<128x384xf32>
    %cst_22 = arith.constant 86.1328125 : f32
    %54 = vector.broadcast %cst_22 : f32 to vector<128x384xf32>
    %55 = arith.mulf %53, %54 : vector<128x384xf32>
    %cst_23 = arith.constant dense<0.000000e+00> : vector<128xf32>
    %56 = vector.multi_reduction <add>, %51, %cst_23 [1] : vector<128x384xf32> to vector<128xf32>
    %57 = vector.shape_cast %56 : vector<128xf32> to vector<128x1xf32>
    %cst_24 = arith.constant 9.99999996E-13 : f32
    %58 = vector.broadcast %cst_24 : f32 to vector<128x1xf32>
    %59 = arith.addf %57, %58 : vector<128x1xf32>
    %60 = arith.mulf %51, %55 : vector<128x384xf32>
    %cst_25 = arith.constant dense<0.000000e+00> : vector<128xf32>
    %61 = vector.multi_reduction <add>, %60, %cst_25 [1] : vector<128x384xf32> to vector<128xf32>
    %62 = vector.shape_cast %61 : vector<128xf32> to vector<128x1xf32>
    %63 = arith.divf %62, %59 : vector<128x1xf32>
    %64 = vector.broadcast %63 : vector<128x1xf32> to vector<128x384xf32>
    %65 = arith.subf %55, %64 : vector<128x384xf32>
    %66 = arith.mulf %51, %65 : vector<128x384xf32>
    %67 = arith.mulf %66, %65 : vector<128x384xf32>
    %cst_26 = arith.constant dense<0.000000e+00> : vector<128xf32>
    %68 = vector.multi_reduction <add>, %67, %cst_26 [1] : vector<128x384xf32> to vector<128xf32>
    %69 = vector.shape_cast %68 : vector<128xf32> to vector<128x1xf32>
    %70 = arith.divf %69, %59 : vector<128x1xf32>
    %71 = math.sqrt %70 : vector<128x1xf32>
    %72 = tpu.iota {dimensions = array<i32: 1>} : vector<128x128xi32>
    %c0_i32 = arith.constant 0 : i32
    %73 = vector.broadcast %c0_i32 : i32 to vector<128x128xi32>
    %74 = arith.cmpi eq, %72, %73 : vector<128x128xi32>
    %cst_27 = arith.constant 0.000000e+00 : f32
    %75 = vector.shape_cast %63 : vector<128x1xf32> to vector<128x1xf32>
    %76 = vector.broadcast %75 : vector<128x1xf32> to vector<128x128xf32>
    %77 = vector.broadcast %cst_27 : f32 to vector<128x128xf32>
    %78 = arith.select %74, %76, %77 : vector<128x128xi1>, vector<128x128xf32>
    %c1_i32 = arith.constant 1 : i32
    %79 = vector.broadcast %c1_i32 : i32 to vector<128x128xi32>
    %80 = arith.cmpi eq, %72, %79 : vector<128x128xi32>
    %cst_28 = arith.constant 0.000000e+00 : f32
    %81 = vector.shape_cast %71 : vector<128x1xf32> to vector<128x1xf32>
    %82 = vector.broadcast %81 : vector<128x1xf32> to vector<128x128xf32>
    %83 = vector.broadcast %cst_28 : f32 to vector<128x128xf32>
    %84 = arith.select %80, %82, %83 : vector<128x128xi1>, vector<128x128xf32>
    %85 = arith.addf %78, %84 : vector<128x128xf32>
    %c0_29 = arith.constant 0 : index
    %c0_30 = arith.constant 0 : index
    %c0_31 = arith.constant 0 : index
    %86 = vector.load %arg5[%c0_29, %c0_30, %c0_31] : memref<1x128x128xf32, #tpu.memory_space<vmem>>, vector<1x128x128xf32>
    %87 = vector.shape_cast %86 : vector<1x128x128xf32> to vector<128x128xf32>
    %88 = vector.shape_cast %85 : vector<128x128xf32> to vector<1x128x128xf32>
    tpu.vector_store %arg5[%c0_29, %c0_30, %c0_31], %88 {strides = array<i32>} : memref<1x128x128xf32, #tpu.memory_space<vmem>>, vector<1x128x128xf32>,
    return
  }
  func.func @transform_0(%arg0: i32, %arg1: i32) -> (i32, i32, i32) {
    %c0_i32 = arith.constant 0 : i32
    %c0_i32_0 = arith.constant 0 : i32
    return %arg0, %arg1, %c0_i32 : i32, i32, i32
  }
  func.func @transform_1(%arg0: i32, %arg1: i32) -> (i32, i32, i32) {
    %c1_i32 = arith.constant 1 : i32
    %0 = arith.addi %arg1, %c1_i32 : i32
    %c16_i32 = arith.constant 16 : i32
    %1 = arith.muli %0, %c16_i32 : i32
    %c0_i32 = arith.constant 0 : i32
    %c0_i32_0 = arith.constant 0 : i32
    return %arg0, %1, %c0_i32 : i32, i32, i32
  }
  func.func @transform_2(%arg0: i32, %arg1: i32) -> (i32, i32) {
    %c0_i32 = arith.constant 0 : i32
    %c0_i32_0 = arith.constant 0 : i32
    %c0_i32_1 = arith.constant 0 : i32
    return %c0_i32, %c0_i32_0 : i32, i32
  }
  func.func @transform_3(%arg0: i32, %arg1: i32) -> (i32, i32, i32) {
    %c0_i32 = arith.constant 0 : i32
    %c0_i32_0 = arith.constant 0 : i32
    return %arg0, %arg1, %c0_i32 : i32, i32, i32
  }
}

</mosaic_0001>

<bundles_post_ra>
// kernel: tpu_custom_call.1
= control target key start
LH: loop header
LB: loop body
LE: loop exit
PB: predicated region body
PF: predicated region fallthrough
CT: control target
= control target key end

     0   :  { %8 = vsyncpa [#allocation3], 0  ;;  %s12409_s0 = inlined_call_operand.vmem [shape: f32[2,256,64], index: 0, kind: input, shape index: {}]   ;;  %s12410_s1 = inlined_call_operand.vmem [shape: f32[2,256,64], index: 1, kind: input, shape index: {}]   ;;  %s12411_s2 = inlined_call_operand.vmem [shape: bf16[512,768], index: 2, kind: input, shape index: {}]   ;;  %s12412_s3 = inlined_call_operand.hbm [shape: f32[2,128,128], index: 3, kind: output, shape index: {}]  }
   0x1   :  { %10 = vsyncpa [#allocation3 + $0x1], 0  ;;  %s7380_s12 = smov 0   ;;  %s7382_s13 = smov 0  }
   0x2   :  { %s7384_s14 = smov 0   ;;  %s7386_s15 = smov 0  }
   0x3   :  { %s7388_s16 = smov 0   ;;  %s7390_s17 = smov 0  }
   0x4 LB: > { %s6368_s18 = sadd.s32 4294967295, %s7354_s17   ;;  %s6369_s19 = sadd.s32 4294967294, %s7354_s17   ;;  %s7354_s17 = sphi %s7390_s17, %s16_s17   ;;  %s7350_s16 = sphi %s7388_s16, %s13308_s16   ;;  %s7346_s15 = sphi %s7386_s15, %s13307_s15   ;;  %s7342_s14 = sphi %s7384_s14, %s13306_s14   ;;  %s7338_s13 = sphi %s7382_s13, %s13305_s13   ;;  %s7334_s12 = sphi %s7380_s12, %s13304_s12  }
   0x5   : > { %s28_s20 = sadd.s32 1, %s7350_s16  ;;  %s118_s21 = sadd.s32 1, %s7342_s14 }
   0x6   : > { %p30_p0 = scmp.ge.s32.totalorder %s28_s20, 2  ;;  %p128_p1 = scmp.ne.s32.totalorder %s7342_s14, %s7338_s13 }
   0x7   : > { %p129_p2 = scmp.eq.s32.totalorder %s6368_s18, 1  ;;  %p134_p3 = scmp.ne.s32.totalorder %s7338_s13, %s7334_s12 }
   0x8   : > { %s13310_s20 = smov (%p30_p0, %s28_s20), 0  ;;  %p135_p5 = scmp.eq.s32.totalorder %s6369_s19, 1 }
   0x9   : > { %p7420_p4 = por %p129_p2, %p128_p1  ;;  %s113_s23 = ssub.s32 %s7350_s16, %s13310_s20 }
   0xa   : > { %p6372_p6 = scmp.ge.s32.totalorder %s7354_s17, 1  ;;  %p116_p7 = scmp.eq.s32.totalorder %s113_s23, 0 }
   0xb   : > { %p7427_p8 = por %p135_p5, %p134_p3  ;;  %p184_p9 = scmp.lt.s32.totalorder %s7354_s17, 3 }
   0xc   : > { %s7433_s25 = scalar_select %p116_p7, %s7342_s14, %s118_s21  }
   0xd   : > { %p185_p10 = pnand %p6372_p6, %p184_p9 }
   0xf   : > { %188 = sbr.rel (%p185_p10) target bundleno = 1435 (0x59b), region = 32 }
  0x14   : > { %v6830_v0 = vld [vmem:[%s12411_s2 + $0x154] ss:$24 sps:$4 sm:$0xff]   ;;  %p223_p11 = scmp.lt.s32.totalorder %s7346_s15, 1  ;;  %v12413_v2 = vmov 0   ;;  %v6834_v3 = vld [vmem:[%s12411_s2 + $0x150] ss:$24 sps:$4 sm:$0xff]  }
  0x15   : > { %v6832_v1 = vld [vmem:[%s12411_s2 + $0x15c] ss:$24 sps:$4 sm:$0xff]   ;;  %566 = vmatprep.mubr.bf16.mxu0 %v12413_v2  ;;  %679 = vmatprep.mubr.bf16.mxu1 %v12413_v2  ;;  %v6835_v4 = vld [vmem:[%s12411_s2 + $0x158] ss:$24 sps:$4 sm:$0xff]   ;;  %v6838_v6 = vld [vmem:[%s12411_s2 + $0x12c] ss:$24 sps:$4 sm:$0xff]  }
  0x16   : > { %542 = vmatprep.subr.bf16.mxu0 %v6830_v0  ;;  %s7451_s7 = scalar_select %p223_p11, %s7346_s15, 1  ;;  %655 = vmatprep.subr.bf16.mxu1 %v6832_v1  ;;  %v6836_v5 = vld [vmem:[%s12411_s2 + $0x124] ss:$24 sps:$4 sm:$0xff]   ;;  %v6840_v7 = vld [vmem:[%s12411_s2 + $0x120] ss:$24 sps:$4 sm:$0xff]   ;;  %vm509_vm1 = vcmask 523264  }
  0x17   : > { %543 = vmatpush1.bf16.msra.mxu0 %v6834_v3  ;;  %656 = vmatpush1.bf16.msra.mxu1 %v6835_v4  ;;  %v6841_v8 = vld [vmem:[%s12411_s2 + $0x128] ss:$24 sps:$4 sm:$0xff]   ;;  %v6842_v9 = vld [vmem:[%s12411_s2 + $0xf4] ss:$24 sps:$4 sm:$0xff]   ;;  %v6847_v12 = vld [vmem:[%s12411_s2 + $0xf8] ss:$24 sps:$4 sm:$0xff]  }
  0x18   : > { %s6767_s21 = sshll.u32 %s7451_s7, 8  ;;  %544 = vmatprep.subr.bf16.mxu0 %v6836_v5  ;;  %657 = vmatprep.subr.bf16.mxu1 %v6838_v6  ;;  %v6844_v10 = vld [vmem:[%s12411_s2 + $0xfc] ss:$24 sps:$4 sm:$0xff]   ;;  %v6846_v11 = vld [vmem:[%s12411_s2 + $0xf0] ss:$24 sps:$4 sm:$0xff]   ;;  %vm1381_vm2 = vcmask 1046528  }
  0x19   : > { %s7483_s11 = scalar_lea.vmem %s12409_s0, %s6767_s21  ;;  %v6848_v13 = vld [vmem:[%s12411_s2 + $0xc4] ss:$24 sps:$4 sm:$0xff]   ;;  %v6852_v15 = vld [vmem:[%s12411_s2 + $0xc0] ss:$24 sps:$4 sm:$0xff]   ;;  %v6859_v28 = vld [vmem:[%s12411_s2 + $0x94] ss:$24 sps:$4 sm:$0xff]  }
  0x1a   : > { %v6850_v14 = vld [vmem:[%s12411_s2 + $0xcc] ss:$24 sps:$4 sm:$0xff]   ;;  %v248_v18 = vld [vmem:[%s7483_s11 + $0x10] sm:$0xff]  ;;  %v249_v19 = vld [vmem:[%s7483_s11 + $0x18] sm:$0xff]  ;;  %vm320_vm0 = vsmask.f32 7424 }
  0x1b   : > { %545 = vmatpush1.bf16.msra.mxu0 %v6840_v7  ;;  %658 = vmatpush1.bf16.msra.mxu1 %v6841_v8  ;;  %v246_v16 = vld [vmem:[%s7483_s11] sm:$0xff]  ;;  %v247_v17 = vld [vmem:[%s7483_s11 + $0x8] sm:$0xff]  ;;  %v7503_v22 = vpack.c.bf16 %v249_v19, %v248_v18  ;;  %v252_v38 = vld [vmem:[%s7483_s11 + $0x30] sm:$0xff]  ;;  %s6769_s23 = sadd.s32 128, %s6767_s21  ;;  %vm2002_vm3 = vsmask.f32 6400 }
  0x1c   : > { %546 = vmatprep.subr.bf16.mxu0 %v6842_v9  ;;  %659 = vmatprep.subr.bf16.mxu1 %v6844_v10  ;;  %v6853_v20 = vld [vmem:[%s12411_s2 + $0xc8] ss:$24 sps:$4 sm:$0xff]   ;;  %v7501_v21 = vpack.c.bf16 %v247_v17, %v246_v16  ;;  %v6856_v23 = vld [vmem:[%s12411_s2 + $0x164] ss:$24 sps:$4 sm:$0xff]   ;;  %v6862_v40 = vld [vmem:[%s12411_s2 + $0x134] ss:$24 sps:$4 sm:$0xff]   ;;  %s241_s7 = scalar_lea.vmem %s12410_s1, %s6769_s23 }
  0x1d   : > { %12521 = vst [vmem:[#allocation6_spill] sm:$0xff] %v7503_v22  ;;  %v7515_v26 = vshll.u32 %v7503_v22, 16  ;;  %v250_v27 = vld [vmem:[%s7483_s11 + $0x20] sm:$0xff]  ;;  %v251_v29 = vld [vmem:[%s7483_s11 + $0x28] sm:$0xff]  ;;  %v7534_v36 = vshrl.u32 %v7503_v22, 16  ;;  %v253_v39 = vld [vmem:[%s7483_s11 + $0x38] sm:$0xff] }
  0x1e   : > { %12520 = vst [vmem:[#allocation5_spill] sm:$0xff] %v7501_v21  ;;  %v7509_v24 = vshrl.u32 %v7501_v21, 16  ;;  %v7512_v25 = vshll.u32 %v7501_v21, 16  ;;  %v7524_v32 = vpack.c.bf16 %v251_v29, %v250_v27  ;;  %v6854_v33 = vld [vmem:[%s12411_s2 + $0x160] ss:$24 sps:$4 sm:$0xff]   ;;  %v7556_v45 = vpack.c.bf16 %v253_v39, %v252_v38  ;;  %v255_v54 = vld [vmem:[%s7483_s11 + $0x48] sm:$0xff] }
  0x1f   : > { %547 = vmatpush1.bf16.msra.mxu0 %v6846_v11  ;;  %660 = vmatpush1.bf16.msra.mxu1 %v6847_v12  ;;  %12524 = vst [vmem:[#allocation9_spill] sm:$0xff] %v7515_v26  ;;  %v331_v31 = vrot.slane %v7515_v26, 1  ;;  %v6857_v35 = vld [vmem:[%s12411_s2 + $0x90] ss:$24 sps:$4 sm:$0xff]   ;;  %12526 = vst [vmem:[#allocation11_spill] sm:$0xff] %v7534_v36  ;;  %v254_v50 = vld [vmem:[%s7483_s11 + $0x40] sm:$0xff] }
  0x20   : > { %548 = vmatprep.subr.bf16.mxu0 %v6848_v13  ;;  %661 = vmatprep.subr.bf16.mxu1 %v6850_v14  ;;  %12522 = vst [vmem:[#allocation7_spill] sm:$0xff] %v7509_v24  ;;  %12523 = vst [vmem:[#allocation8_spill] sm:$0xff] %v7512_v25  ;;  %v326_v30 = vrot.slane %v7512_v25, 1  ;;  %v7537_v37 = vshll.u32 %v7524_v32, 16  ;;  %v6865_v42 = vld [vmem:[%s12411_s2 + $0x64] ss:$24 sps:$4 sm:$0xff]   ;;  %v7603_v61 = vpack.c.bf16 %v255_v54, %v254_v50 }
  0x21   : > { %12525 = vst [vmem:[#allocation10_spill] sm:$0xff] %v7524_v32  ;;  %v335_v43 = vor.u32 %v7534_v36, %v331_v31  ;;  %12528 = vst [vmem:[#allocation13_spill] sm:$0xff] %v7556_v45  ;;  %v6860_v46 = vld [vmem:[%s12411_s2 + $0x130] ss:$24 sps:$4 sm:$0xff]   ;;  %v6863_v47 = vld [vmem:[%s12411_s2 + $0x60] ss:$24 sps:$4 sm:$0xff]  }
  0x22   : > { %v327_v34 = vor.u32 %v326_v30, %v7509_v24  ;;  %12527 = vst [vmem:[#allocation12_spill] sm:$0xff] %v7537_v37  ;;  %v339_v44 = vrot.slane %v7537_v37, 1  ;;  %v6868_v48 = vld [vmem:[%s12411_s2 + $0x104] ss:$24 sps:$4 sm:$0xff]   ;;  %v6871_v49 = vld [vmem:[%s12411_s2 + $0x34] ss:$24 sps:$4 sm:$0xff]  }
  0x23   : > { %549 = vmatpush1.bf16.msra.mxu0 %v6852_v15  ;;  %662 = vmatpush1.bf16.msra.mxu1 %v6853_v20  ;;  %v7577_v52 = vshrl.u32 %v7524_v32, 16  ;;  %v7580_v53 = vshll.u32 %v7556_v45, 16  ;;  %v6866_v55 = vld [vmem:[%s12411_s2 + $0x100] ss:$24 sps:$4 sm:$0xff]   ;;  %v6869_v56 = vld [vmem:[%s12411_s2 + $0x30] ss:$24 sps:$4 sm:$0xff]  }
  0x24   : > { %768 = vmatprep.subr.bf16.mxu0 %v6856_v23  ;;  %1017 = vmatprep.subr.bf16.mxu1 %v6859_v28  ;;  %v7545_v41 = vsel %vm320_vm0, %v327_v34, %v331_v31  ;;  %v7574_v51 = vsel %vm320_vm0, %v335_v43, %v339_v44  ;;  %v6874_v57 = vld [vmem:[%s12411_s2 + $0xd4] ss:$24 sps:$4 sm:$0xff]   ;;  %v6877_v58 = vld [vmem:[%s12411_s2 + $0x4] ss:$24 sps:$4 sm:$0xff]   ;;  %12531 = vst [vmem:[#allocation16_spill] sm:$0xff] %v7603_v61  ;;  %v7621_v4 = vshrl.u32 %v7556_v45, 16 }
  0x25   : > { %12529 = vst [vmem:[#allocation14_spill] sm:$0xff] %v7577_v52  ;;  %12530 = vst [vmem:[#allocation15_spill] sm:$0xff] %v7580_v53  ;;  %v343_v59 = vor.u32 %v7577_v52, %v339_v44  ;;  %v347_v60 = vrot.slane %v7580_v53, 1  ;;  %v6872_v62 = vld [vmem:[%s12411_s2 + $0xd0] ss:$24 sps:$4 sm:$0xff]   ;;  %v7624_v5 = vshll.u32 %v7603_v61, 16 }
  0x26   : > { %6402 = vmatmul.mubr.msk.bf16.vlgmr.msra.gmra.mxu0 %vm509_vm1, %v7545_v41  ;;  %6410 = vmatmul.mubr.msk.bf16.vlgmr.msra.gmra.mxu1 %vm509_vm1, %v7545_v41  ;;  %v6875_v63 = vld [vmem:[%s12411_s2] ss:$24 sps:$4 sm:$0xff]   ;;  %v6880_v0 = vld [vmem:[%s12411_s2 + $0x9c] ss:$24 sps:$4 sm:$0xff]   ;;  %12532 = vst [vmem:[#allocation17_spill] sm:$0xff] %v7621_v4  ;;  %v7642_v12 = vshrl.u32 %v7603_v61, 16 }
  0x27   : > { %769 = vmatpush1.bf16.msra.mxu0 %v6854_v33  ;;  %1018 = vmatpush1.bf16.msra.mxu1 %v6857_v35  ;;  %v6883_v1 = vld [vmem:[%s12411_s2 + $0xa4] ss:$24 sps:$4 sm:$0xff]   ;;  %v7618_v3 = vsel %vm320_vm0, %v343_v59, %v347_v60  ;;  %12533 = vst [vmem:[#allocation18_spill] sm:$0xff] %v7624_v5  ;;  %v256_v6 = vld [vmem:[%s7483_s11 + $0x50] sm:$0xff]  ;;  %v351_v8 = vor.u32 %v7621_v4, %v347_v60  ;;  %v355_v9 = vrot.slane %v7624_v5, 1  ;;  %v259_v15 = vld [vmem:[%s7483_s11 + $0x68] sm:$0xff] }
  0x28   : > { %576 = vmatprep.mubr.bf16.mxu0 %v12413_v2  ;;  %689 = vmatprep.mubr.bf16.mxu1 %v12413_v2  ;;  %v257_v7 = vld [vmem:[%s7483_s11 + $0x58] sm:$0xff]  ;;  %12535 = vst [vmem:[#allocation20_spill] sm:$0xff] %v7642_v12  ;;  %v258_v14 = vld [vmem:[%s7483_s11 + $0x60] sm:$0xff]  ;;  %v260_v19 = vld [vmem:[%s7483_s11 + $0x70] sm:$0xff]  ;;  %vm2643_vm4 = vcmask 1045504   ;;  %vm3903_vm6 = vcmask 1044480  }
  0x29   : > { %770 = vmatprep.subr.bf16.mxu0 %v6862_v40  ;;  %1019 = vmatprep.subr.bf16.mxu1 %v6865_v42  ;;  %v7636_v10 = vpack.c.bf16 %v257_v7, %v256_v6  ;;  %v7639_v11 = vsel %vm320_vm0, %v351_v8, %v355_v9  ;;  %v359_v16 = vor.u32 %v7642_v12, %v355_v9  ;;  %v261_v20 = vld [vmem:[%s7483_s11 + $0x78] sm:$0xff]  ;;  %v262_v33 = vld [vmem:[%s241_s7] sm:$0xff]  ;;  %v6899_v6 = vld [vmem:[%s12411_s2 + $0x10] ss:$24 sps:$4 sm:$0xff]   ;;  %vm3264_vm5 = vsmask.f32 5376 }
  0x2a   : > { %v7657_v18 = vpack.c.bf16 %v259_v15, %v258_v14  ;;  %v7680_v31 = vpack.c.bf16 %v261_v20, %v260_v19  ;;  %v7702_v42 = vpack.c.bf16 %v262_v33, %v262_v33  ;;  %v6878_v50 = vld [vmem:[%s12411_s2 + $0x98] ss:$24 sps:$4 sm:$0xff]   ;;  %v6895_v59 = vld [vmem:[%s12411_s2 + $0x44] ss:$24 sps:$4 sm:$0xff]   ;;  %v6911_v15 = vld [vmem:[%s12411_s2 + $0x1e8] ss:$24 sps:$4 sm:$0xff]  }
  0x2b   : > { %771 = vmatpush1.bf16.msra.mxu0 %v6860_v46  ;;  %1020 = vmatpush1.bf16.msra.mxu1 %v6863_v47  ;;  %12534 = vst [vmem:[#allocation19_spill] sm:$0xff] %v7636_v10  ;;  %v7645_v13 = vshll.u32 %v7636_v10, 16  ;;  %v7665_v27 = vshrl.u32 %v7636_v10, 16  ;;  %v6881_v54 = vld [vmem:[%s12411_s2 + $0xa0] ss:$24 sps:$4 sm:$0xff]   ;;  %s219_s10 = sand.u32 1, %s7338_s13  }
  0x2c   : > { %772 = vmatprep.subr.bf16.mxu0 %v6868_v48  ;;  %1021 = vmatprep.subr.bf16.mxu1 %v6871_v49  ;;  %12537 = vst [vmem:[#allocation22_spill] sm:$0xff] %v7657_v18  ;;  %v7668_v28 = vshll.u32 %v7657_v18, 16  ;;  %12540 = vst [vmem:[#allocation25_spill] sm:$0xff] %v7680_v31  ;;  %v7689_v35 = vshrl.u32 %v7657_v18, 16  ;;  %v7692_v38 = vshll.u32 %v7680_v31, 16  ;;  %v7708_v44 = vshrl.u32 %v7680_v31, 16 }
  0x2d   : > { %12536 = vst [vmem:[#allocation21_spill] sm:$0xff] %v7645_v13  ;;  %v363_v17 = vrot.slane %v7645_v13, 1  ;;  %12538 = vst [vmem:[#allocation23_spill] sm:$0xff] %v7665_v27  ;;  %v7711_v46 = vshll.u32 %v7702_v42, 16  ;;  %v6890_v60 = vld [vmem:[%s12411_s2 + $0x38] ss:$24 sps:$4 sm:$0xff]  }
  0x2e   : > { %6403 = vmatmul.mubr.msk.bf16.gmra.mxu0 %vm509_vm1, %v7574_v51  ;;  %6411 = vmatmul.mubr.msk.bf16.gmra.mxu1 %vm509_vm1, %v7574_v51  ;;  %12539 = vst [vmem:[#allocation24_spill] sm:$0xff] %v7668_v28  ;;  %v371_v30 = vrot.slane %v7668_v28, 1  ;;  %12541 = vst [vmem:[#allocation26_spill] sm:$0xff] %v7689_v35  ;;  %v379_v40 = vrot.slane %v7692_v38, 1  ;;  %v6907_v7 = vld [vmem:[%s12411_s2 + $0x21c] ss:$24 sps:$4 sm:$0xff]  }
  0x2f   : > { %586 = vmatprep.mubr.bf16.mxu0 %v12413_v2  ;;  %699 = vmatprep.mubr.bf16.mxu1 %v12413_v2  ;;  %v7662_v23 = vsel %vm320_vm0, %v359_v16, %v363_v17  ;;  %v367_v29 = vor.u32 %v7665_v27, %v363_v17  ;;  %12542 = vst [vmem:[#allocation27_spill] sm:$0xff] %v7692_v38  ;;  %12543 = vst [vmem:[#allocation28_spill] sm:$0xff] %v7702_v42  ;;  %v387_v48 = vrot.slane %v7711_v46, 1  ;;  %v6905_v8 = vld [vmem:[%s12411_s2 + $0x218] ss:$24 sps:$4 sm:$0xff]   ;;  %s6373_s18 = sshll.u32 %s219_s10, 7 }
  0x30   : > { %773 = vmatpush1.bf16.msra.mxu0 %v6866_v55  ;;  %1022 = vmatpush1.bf16.msra.mxu1 %v6869_v56  ;;  %v375_v39 = vor.u32 %v7689_v35, %v371_v30  ;;  %12544 = vst [vmem:[#allocation29_spill] sm:$0xff] %v7708_v44  ;;  %12545 = vst [vmem:[#allocation30_spill] sm:$0xff] %v7711_v46  ;;  %v383_v47 = vor.u32 %v7708_v44, %v379_v40  ;;  %v6886_v55 = vld [vmem:[%s12411_s2 + $0x6c] ss:$24 sps:$4 sm:$0xff]   ;;  %v6908_v14 = vld [vmem:[%s12411_s2 + $0x1e0] ss:$24 sps:$4 sm:$0xff]  }
  0x31   : > { %774 = vmatprep.subr.bf16.mxu0 %v6874_v57  ;;  %1023 = vmatprep.subr.bf16.mxu1 %v6877_v58  ;;  %v7686_v34 = vsel %vm320_vm0, %v367_v29, %v371_v30  ;;  %v6889_v56 = vld [vmem:[%s12411_s2 + $0x74] ss:$24 sps:$4 sm:$0xff]   ;;  %v6884_v57 = vld [vmem:[%s12411_s2 + $0x68] ss:$24 sps:$4 sm:$0xff]   ;;  %v6910_v9 = vld [vmem:[%s12411_s2 + $0x1e4] ss:$24 sps:$4 sm:$0xff]  }
  0x32   : > { %v7705_v43 = vsel %vm320_vm0, %v375_v39, %v379_v40  ;;  %v7722_v49 = vsel %vm320_vm0, %v383_v47, %v387_v48  ;;  %v6887_v58 = vld [vmem:[%s12411_s2 + $0x70] ss:$24 sps:$4 sm:$0xff]   ;;  %v6916_v16 = vld [vmem:[%s12411_s2 + $0x1b4] ss:$24 sps:$4 sm:$0xff]   ;;  %v6920_v30 = vld [vmem:[%s12411_s2 + $0x180] ss:$24 sps:$4 sm:$0xff]  }
  0x33   : > { %v6919_v17 = vld [vmem:[%s12411_s2 + $0x1bc] ss:$24 sps:$4 sm:$0xff]   ;;  %v6914_v19 = vld [vmem:[%s12411_s2 + $0x1b0] ss:$24 sps:$4 sm:$0xff]   ;;  %v6925_v29 = vld [vmem:[%s12411_s2 + $0x18c] ss:$24 sps:$4 sm:$0xff]  }
  0x34   : > { %775 = vmatpush1.bf16.msra.mxu0 %v6872_v62  ;;  %1024 = vmatpush1.bf16.msra.mxu1 %v6875_v63  ;;  %v6893_v62 = vld [vmem:[%s12411_s2 + $0x40] ss:$24 sps:$4 sm:$0xff]   ;;  %v6898_v63 = vld [vmem:[%s12411_s2 + $0xc] ss:$24 sps:$4 sm:$0xff]   ;;  %v1382_v40 = vrot.slane %v7501_v21, 1  ;;  %s12214_s19 = scalar_lea.vmem [#allocation2], %s6373_s18 }
  0x35   : > { %1130 = vmatprep.subr.bf16.mxu0 %v6880_v0  ;;  %1243 = vmatprep.subr.bf16.mxu1 %v6883_v1  ;;  %v6901_v0 = vld [vmem:[%s12411_s2 + $0x14] ss:$24 sps:$4 sm:$0xff]   ;;  %v6896_v1 = vld [vmem:[%s12411_s2 + $0x8] ss:$24 sps:$4 sm:$0xff]   ;;  %v6917_v20 = vld [vmem:[%s12411_s2 + $0x1b8] ss:$24 sps:$4 sm:$0xff]  }
  0x36   : > { %6404 = vmatmul.mubr.msk.bf16.gmra.mxu0 %vm509_vm1, %v7618_v3  ;;  %6412 = vmatmul.mubr.msk.bf16.gmra.mxu1 %vm509_vm1, %v7618_v3  ;;  %v6923_v33 = vld [vmem:[%s12411_s2 + $0x188] ss:$24 sps:$4 sm:$0xff]   ;;  %v6931_v39 = vld [vmem:[%s12411_s2 + $0x2d4] ss:$24 sps:$4 sm:$0xff]   ;;  %vm4524_vm7 = vsmask.f32 4352 }
  0x37   : > { %596 = vmatprep.mubr.bf16.mxu0 %v12413_v2  ;;  %709 = vmatprep.mubr.bf16.mxu1 %v12413_v2  ;;  %v6926_v48 = vld [vmem:[%s12411_s2 + $0x220] ss:$24 sps:$4 sm:$0xff]   ;;  %s6770_s23 = sshll.u32 %s7346_s15, 11  ;;  %s6271_s11 = sshll.u32 %s12214_s19, 4  ;;  %s12359_s11 = int_to_ptr.vmem [resolvable:$true] %s6271_s11 }
  0x38   : > { %s12357_s15 = scalar_lea.hbm %s12412_s3, %s6770_s23  ;;  %s12364_s21 = scalar_lea.sflag [#allocation3], %s219_s10 }
  0x39   : > { %s7278_s27 = scalar_lea.vmem %s12359_s11, 2048  ;;  %s7357_s28 = smov [#allocation2]  }
  0x3a   : > { %p7279_p12 = scmp.ne.s32.totalorder %s12359_s11, %s7278_s27  ;;  %s7282_s29 = sshll.u32 %s7357_s28, 4  ;;  %s7283_s29 = int_to_ptr.vmem [resolvable:$false] %s7282_s29 }
  0x3b   : > { %s7284_s30 = scalar_lea.vmem %s7283_s29, 4096  ;;  %p7285_p1 = scmp.lt.s32.totalorder %s12359_s11, %s7283_s29 }
  0x3c   : > { %p7280_p13 = pnand %p7279_p12, %p7420_p4  ;;  %p7286_p2 = scmp.lt.s32.totalorder %s7284_s30, %s7278_s27 }
  0x3e   : > { %6405 = vmatmul.mubr.msk.bf16.gmra.mxu0 %vm509_vm1, %v7639_v11  ;;  %6413 = vmatmul.mubr.msk.bf16.gmra.mxu1 %vm509_vm1, %v7639_v11  ;;  %p7281_p0 = pneg %p7280_p13  ;;  %p7287_p3 = por %p7286_p2, %p7285_p1 }
  0x3f   : > { %606 = vmatprep.mubr.bf16.mxu0 %v12413_v2  ;;  %719 = vmatprep.mubr.bf16.mxu1 %v12413_v2 }
  0x40   : > { %p7288_p5 = pnand %p7287_p3, %p7281_p0 }
  0x46   : > { %6406 = vmatmul.mubr.msk.bf16.gmra.mxu0 %vm509_vm1, %v7662_v23  ;;  %6414 = vmatmul.mubr.msk.bf16.gmra.mxu1 %vm509_vm1, %v7662_v23 }
  0x47   : > { %616 = vmatprep.mubr.bf16.mxu0 %v12413_v2  ;;  %729 = vmatprep.mubr.bf16.mxu1 %v12413_v2 }
  0x4e   : > { %6407 = vmatmul.mubr.msk.bf16.gmra.mxu0 %vm509_vm1, %v7686_v34  ;;  %6415 = vmatmul.mubr.msk.bf16.gmra.mxu1 %vm509_vm1, %v7686_v34 }
  0x4f   : > { %626 = vmatprep.mubr.bf16.mxu0 %v12413_v2  ;;  %739 = vmatprep.mubr.bf16.mxu1 %v12413_v2 }
  0x56   : > { %6408 = vmatmul.mubr.msk.bf16.gmra.mxu0 %vm509_vm1, %v7705_v43  ;;  %6416 = vmatmul.mubr.msk.bf16.gmra.mxu1 %vm509_vm1, %v7705_v43 }
  0x57   : > { %636 = vmatprep.mubr.bf16.mxu0 %v12413_v2  ;;  %749 = vmatprep.mubr.bf16.mxu1 %v12413_v2 }
  0x5e   : > { %6409 = vmatmul.mubr.msk.bf16.gmra.mxu0 %vm509_vm1, %v7722_v49  ;;  %6417 = vmatmul.mubr.msk.bf16.gmra.mxu1 %vm509_vm1, %v7722_v49 }
  0x5f   : > { %792 = vmatprep.mubr.bf16.mxu0 %v12413_v2  ;;  %1041 = vmatprep.mubr.bf16.mxu1 %v12413_v2 }
  0x66   : > { %6418 = vmatmul.mubr.msk.bf16.vlgmr.msra.gmra.mxu0 %vm509_vm1, %v7545_v41  ;;  %6450 = vmatmul.mubr.msk.bf16.vlgmr.msra.gmra.mxu1 %vm509_vm1, %v7501_v21  ;;  %v6892_v41 = vld [vmem:[%s12411_s2 + $0x3c] ss:$24 sps:$4 sm:$0xff]  }
  0x67   : > { %1131 = vmatpush1.bf16.msra.mxu0 %v6878_v50  ;;  %1244 = vmatpush1.bf16.msra.mxu1 %v6881_v54  ;;  %v6934_v50 = vld [vmem:[%s12411_s2 + $0x1f4] ss:$24 sps:$4 sm:$0xff]   ;;  %v6937_v54 = vld [vmem:[%s12411_s2 + $0x2a4] ss:$24 sps:$4 sm:$0xff]  }
  0x68   : > { %802 = vmatprep.mubr.bf16.mxu0 %v12413_v2  ;;  %1051 = vmatprep.mubr.bf16.mxu1 %v12413_v2 }
  0x69   : > { %1132 = vmatprep.subr.bf16.mxu0 %v6886_v55  ;;  %1245 = vmatprep.subr.bf16.mxu1 %v6889_v56 }
  0x6b   : > { %1133 = vmatpush1.bf16.msra.mxu0 %v6884_v57  ;;  %1246 = vmatpush1.bf16.msra.mxu1 %v6887_v58  ;;  %v1385_v57 = vrot.slane %v7524_v32, 1  ;;  %v6932_v58 = vld [vmem:[%s12411_s2 + $0x1f0] ss:$24 sps:$4 sm:$0xff]  }
  0x6c   : > { %1134 = vmatprep.subr.bf16.mxu0 %v6892_v41  ;;  %1247 = vmatprep.subr.bf16.mxu1 %v6895_v59  ;;  %v6935_v41 = vld [vmem:[%s12411_s2 + $0x2a0] ss:$24 sps:$4 sm:$0xff]  }
  0x6e   : > { %6419 = vmatmul.mubr.msk.bf16.gmra.mxu0 %vm509_vm1, %v7574_v51  ;;  %6451 = vmatmul.mubr.msk.bf16.gmra.mxu1 %vm509_vm1, %v7503_v22  ;;  %v6904_v51 = vld [vmem:[%s12411_s2 + $0x214] ss:$24 sps:$4 sm:$0xff]  }
  0x6f   : > { %812 = vmatprep.mubr.bf16.mxu0 %v12413_v2  ;;  %1061 = vmatprep.mubr.bf16.mxu1 %v12413_v2 }
  0x70   : > { %1135 = vmatpush1.bf16.msra.mxu0 %v6890_v60  ;;  %1248 = vmatpush1.bf16.msra.mxu1 %v6893_v62  ;;  %v6940_v62 = vld [vmem:[%s12411_s2 + $0x1c4] ss:$24 sps:$4 sm:$0xff]  }
  0x71   : > { %1136 = vmatprep.subr.bf16.mxu0 %v6898_v63  ;;  %1249 = vmatprep.subr.bf16.mxu1 %v6901_v0  ;;  %v6943_v63 = vld [vmem:[%s12411_s2 + $0x274] ss:$24 sps:$4 sm:$0xff]  }
  0x74   : > { %1137 = vmatpush1.bf16.msra.mxu0 %v6896_v1  ;;  %1250 = vmatpush1.bf16.msra.mxu1 %v6899_v6 }
  0x75   : > { %1551 = vmatprep.subr.bf16.mxu0 %v6904_v51  ;;  %1664 = vmatprep.subr.bf16.mxu1 %v6907_v7 }
  0x76   : > { %6420 = vmatmul.mubr.msk.bf16.gmra.mxu0 %vm509_vm1, %v7618_v3  ;;  %6452 = vmatmul.mubr.msk.bf16.gmra.mxu1 %vm509_vm1, %v7524_v32  ;;  %v6902_v3 = vld [vmem:[%s12411_s2 + $0x210] ss:$24 sps:$4 sm:$0xff]  }
  0x77   : > { %822 = vmatprep.mubr.bf16.mxu0 %v12413_v2  ;;  %1071 = vmatprep.mubr.bf16.mxu1 %v12413_v2 }
  0x7e   : > { %6421 = vmatmul.mubr.msk.bf16.gmra.mxu0 %vm509_vm1, %v7639_v11  ;;  %6453 = vmatmul.mubr.msk.bf16.gmra.mxu1 %vm509_vm1, %v7556_v45  ;;  %v6913_v11 = vld [vmem:[%s12411_s2 + $0x1ec] ss:$24 sps:$4 sm:$0xff]  }
  0x7f   : > { %832 = vmatprep.mubr.bf16.mxu0 %v12413_v2  ;;  %1081 = vmatprep.mubr.bf16.mxu1 %v12413_v2 }
  0x86   : > { %6422 = vmatmul.mubr.msk.bf16.gmra.mxu0 %vm509_vm1, %v7662_v23  ;;  %6454 = vmatmul.mubr.msk.bf16.gmra.mxu1 %vm509_vm1, %v7603_v61  ;;  %v6922_v23 = vld [vmem:[%s12411_s2 + $0x184] ss:$24 sps:$4 sm:$0xff]  }
  0x87   : > { %842 = vmatprep.mubr.bf16.mxu0 %v12413_v2  ;;  %1091 = vmatprep.mubr.bf16.mxu1 %v12413_v2 }
  0x8e   : > { %6423 = vmatmul.mubr.msk.bf16.gmra.mxu0 %vm509_vm1, %v7686_v34  ;;  %6455 = vmatmul.mubr.msk.bf16.gmra.mxu1 %vm509_vm1, %v7636_v10  ;;  %v6928_v34 = vld [vmem:[%s12411_s2 + $0x224] ss:$24 sps:$4 sm:$0xff]  }
  0x8f   : > { %852 = vmatprep.mubr.bf16.mxu0 %v12413_v2  ;;  %1101 = vmatprep.mubr.bf16.mxu1 %v12413_v2 }
  0x96   : > { %6424 = vmatmul.mubr.msk.bf16.gmra.mxu0 %vm509_vm1, %v7705_v43  ;;  %6456 = vmatmul.mubr.msk.bf16.gmra.mxu1 %vm509_vm1, %v7657_v18  ;;  %v1383_v43 = vrot.slane %v7503_v22, 1 }
  0x97   : > { %862 = vmatprep.mubr.bf16.mxu0 %v12413_v2  ;;  %1111 = vmatprep.mubr.bf16.mxu1 %v12413_v2 }
  0x98   : > { %v7925_v47 = vsel %vm1381_vm2, %v1382_v40, %v1383_v43  ;;  %v7971_v6 = vsel %vm1381_vm2, %v1383_v43, %v1385_v57 }
  0x9e   : > { %6425 = vmatmul.mubr.msk.bf16.gmra.mxu0 %vm509_vm1, %v7722_v49  ;;  %6457 = vmatmul.mubr.msk.bf16.gmra.mxu1 %vm509_vm1, %v7680_v31  ;;  %v6929_v49 = vld [vmem:[%s12411_s2 + $0x2d0] ss:$24 sps:$4 sm:$0xff]  }
  0x9f   : > { %1154 = vmatprep.mubr.bf16.mxu0 %v12413_v2  ;;  %1267 = vmatprep.mubr.bf16.mxu1 %v12413_v2 }
  0xa6   : > { %6458 = vmatmul.mubr.msk.bf16.vlgmr.msra.gmra.mxu0 %vm509_vm1, %v7501_v21  ;;  %6466 = vmatmul.mubr.msk.bf16.vlgmr.msra.gmra.mxu1 %vm509_vm1, %v7501_v21 }
  0xa7   : > { %1552 = vmatpush1.bf16.msra.mxu0 %v6902_v3  ;;  %1665 = vmatpush1.bf16.msra.mxu1 %v6905_v8  ;;  %v6938_v3 = vld [vmem:[%s12411_s2 + $0x1c0] ss:$24 sps:$4 sm:$0xff]   ;;  %v6941_v8 = vld [vmem:[%s12411_s2 + $0x270] ss:$24 sps:$4 sm:$0xff]  }
  0xa8   : > { %1164 = vmatprep.mubr.bf16.mxu0 %v12413_v2  ;;  %1277 = vmatprep.mubr.bf16.mxu1 %v12413_v2 }
  0xa9   : > { %1553 = vmatprep.subr.bf16.mxu0 %v6910_v9  ;;  %1666 = vmatprep.subr.bf16.mxu1 %v6913_v11  ;;  %v6946_v9 = vld [vmem:[%s12411_s2 + $0x194] ss:$24 sps:$4 sm:$0xff]   ;;  %v6949_v11 = vld [vmem:[%s12411_s2 + $0x244] ss:$24 sps:$4 sm:$0xff]  }
  0xab   : > { %1554 = vmatpush1.bf16.msra.mxu0 %v6908_v14  ;;  %1667 = vmatpush1.bf16.msra.mxu1 %v6911_v15 }
  0xac   : > { %1555 = vmatprep.subr.bf16.mxu0 %v6916_v16  ;;  %1668 = vmatprep.subr.bf16.mxu1 %v6919_v17  ;;  %v1387_v16 = vrot.slane %v7556_v45, 1 }
  0xae   : > { %6459 = vmatmul.mubr.msk.bf16.gmra.mxu0 %vm509_vm1, %v7503_v22  ;;  %6467 = vmatmul.mubr.msk.bf16.gmra.mxu1 %vm509_vm1, %v7503_v22 }
  0xaf   : > { %1174 = vmatprep.mubr.bf16.mxu0 %v12413_v2  ;;  %1287 = vmatprep.mubr.bf16.mxu1 %v12413_v2 }
  0xb0   : > { %1556 = vmatpush1.bf16.msra.mxu0 %v6914_v19  ;;  %1669 = vmatpush1.bf16.msra.mxu1 %v6917_v20  ;;  %v6944_v20 = vld [vmem:[%s12411_s2 + $0x190] ss:$24 sps:$4 sm:$0xff]  }
  0xb1   : > { %1557 = vmatprep.subr.bf16.mxu0 %v6922_v23  ;;  %1670 = vmatprep.subr.bf16.mxu1 %v6925_v29  ;;  %v6947_v23 = vld [vmem:[%s12411_s2 + $0x240] ss:$24 sps:$4 sm:$0xff]   ;;  %v6952_v29 = vld [vmem:[%s12411_s2 + $0x2dc] ss:$24 sps:$4 sm:$0xff]  }
  0xb4   : > { %1558 = vmatpush1.bf16.msra.mxu0 %v6920_v30  ;;  %1671 = vmatpush1.bf16.msra.mxu1 %v6923_v33  ;;  %v6955_v30 = vld [vmem:[%s12411_s2 + $0x2e4] ss:$24 sps:$4 sm:$0xff]  }
  0xb5   : > { %1777 = vmatprep.subr.bf16.mxu0 %v6928_v34  ;;  %2192 = vmatprep.subr.bf16.mxu1 %v6931_v39  ;;  %v8021_v39 = vsel %vm1381_vm2, %v1385_v57, %v1387_v16 }
  0xb6   : > { %6460 = vmatmul.mubr.msk.bf16.gmra.mxu0 %vm509_vm1, %v7524_v32  ;;  %6468 = vmatmul.mubr.msk.bf16.gmra.mxu1 %vm509_vm1, %v7524_v32  ;;  %v2006_v32 = vrot.slane %v7534_v36, 1 }
  0xb7   : > { %1184 = vmatprep.mubr.bf16.mxu0 %v12413_v2  ;;  %1297 = vmatprep.mubr.bf16.mxu1 %v12413_v2 }
  0xbe   : > { %6461 = vmatmul.mubr.msk.bf16.gmra.mxu0 %vm509_vm1, %v7556_v45  ;;  %6469 = vmatmul.mubr.msk.bf16.gmra.mxu1 %vm509_vm1, %v7556_v45 }
  0xbf   : > { %1194 = vmatprep.mubr.bf16.mxu0 %v12413_v2  ;;  %1307 = vmatprep.mubr.bf16.mxu1 %v12413_v2 }
  0xc6   : > { %6462 = vmatmul.mubr.msk.bf16.gmra.mxu0 %vm509_vm1, %v7603_v61  ;;  %6470 = vmatmul.mubr.msk.bf16.gmra.mxu1 %vm509_vm1, %v7603_v61 }
  0xc7   : > { %1204 = vmatprep.mubr.bf16.mxu0 %v12413_v2  ;;  %1317 = vmatprep.mubr.bf16.mxu1 %v12413_v2 }
  0xce   : > { %6463 = vmatmul.mubr.msk.bf16.gmra.mxu0 %vm509_vm1, %v7636_v10  ;;  %6471 = vmatmul.mubr.msk.bf16.gmra.mxu1 %vm509_vm1, %v7636_v10 }
  0xcf   : > { %1214 = vmatprep.mubr.bf16.mxu0 %v12413_v2  ;;  %1327 = vmatprep.mubr.bf16.mxu1 %v12413_v2 }
  0xd6   : > { %6464 = vmatmul.mubr.msk.bf16.gmra.mxu0 %vm509_vm1, %v7657_v18  ;;  %6472 = vmatmul.mubr.msk.bf16.gmra.mxu1 %vm509_vm1, %v7657_v18 }
  0xd7   : > { %1224 = vmatprep.mubr.bf16.mxu0 %v12413_v2  ;;  %1337 = vmatprep.mubr.bf16.mxu1 %v12413_v2 }
  0xde   : > { %6465 = vmatmul.mubr.msk.bf16.gmra.mxu0 %vm509_vm1, %v7680_v31  ;;  %6473 = vmatmul.mubr.msk.bf16.gmra.mxu1 %vm509_vm1, %v7680_v31 }
  0xdf   : > { %1575 = vmatprep.mubr.bf16.mxu0 %v12413_v2  ;;  %1688 = vmatprep.mubr.bf16.mxu1 %v12413_v2 }
  0xe6   : > { %v7939_v55 = vpop.f32.mrf.mxu0  ;;  %v7941_v56 = vpop.f32.mrf.mxu1  ;;  %6498 = vmatmul.mubr.msk.bf16.vlgmr.msra.gmra.mxu0 %vm509_vm1, %v7925_v47  ;;  %6506 = vmatmul.mubr.msk.bf16.vlgmr.msra.gmra.mxu1 %vm509_vm1, %v7925_v47 }
  0xe7   : > { %12546 = vst [vmem:[#allocation31_spill] sm:$0xff] %v7941_v56  ;;  %1778 = vmatpush1.bf16.msra.mxu0 %v6926_v48  ;;  %2193 = vmatpush1.bf16.msra.mxu1 %v6929_v49  ;;  %v2007_v56 = vrot.slane %v7515_v26, 2 }
  0xe8   : > { %v7954_v59 = vpop.f32.mrf.mxu0  ;;  %v7956_v60 = vpop.f32.mrf.mxu1  ;;  %1585 = vmatprep.mubr.bf16.mxu0 %v12413_v2  ;;  %1698 = vmatprep.mubr.bf16.mxu1 %v12413_v2 }
  0xe9   : > { %12547 = vst [vmem:[#allocation32_spill] sm:$0xff] %v7956_v60  ;;  %1779 = vmatprep.subr.bf16.mxu0 %v6934_v50  ;;  %2194 = vmatprep.subr.bf16.mxu1 %v6937_v54  ;;  %v1389_v50 = vrot.slane %v7603_v61, 1  ;;  %v2004_v60 = vrot.slane %v7512_v25, 2 }
  0xea   : > { %v7966_v0 = vpop.f32.mrf.mxu0  ;;  %v7968_v1 = vpop.f32.mrf.mxu1 }
  0xeb   : > { %12548 = vst [vmem:[#allocation33_spill] sm:$0xff] %v7968_v1  ;;  %1780 = vmatpush1.bf16.msra.mxu0 %v6932_v58  ;;  %2195 = vmatpush1.bf16.msra.mxu1 %v6935_v41  ;;  %v2003_v1 = vrot.slane %v7509_v24, 1  ;;  %v6950_v24 = vld [vmem:[%s12411_s2 + $0x2d8] ss:$24 sps:$4 sm:$0xff]  }
  0xec   : > { %v7973_v51 = vpop.f32.mrf.mxu0  ;;  %v7975_v7 = vpop.f32.mrf.mxu1  ;;  %1781 = vmatprep.subr.bf16.mxu0 %v6940_v62  ;;  %2196 = vmatprep.subr.bf16.mxu1 %v6943_v63  ;;  %v8047_v62 = vsel %vm1381_vm2, %v1387_v16, %v1389_v50 }
  0xed   : > { %12549 = vst [vmem:[#allocation34_spill] sm:$0xff] %v7975_v7 }
  0xee   : > { %v7989_v14 = vpop.f32.mrf.mxu0  ;;  %v7991_v15 = vpop.f32.mrf.mxu1  ;;  %6499 = vmatmul.mubr.msk.bf16.gmra.mxu0 %vm509_vm1, %v7971_v6  ;;  %6507 = vmatmul.mubr.msk.bf16.gmra.mxu1 %vm509_vm1, %v7971_v6 }
  0xef   : > { %12550 = vst [vmem:[#allocation35_spill] sm:$0xff] %v7991_v15  ;;  %1595 = vmatprep.mubr.bf16.mxu0 %v12413_v2  ;;  %1708 = vmatprep.mubr.bf16.mxu1 %v12413_v2 }
  0xf0   : > { %v8000_v17 = vpop.f32.mrf.mxu0  ;;  %v8002_v19 = vpop.f32.mrf.mxu1  ;;  %1782 = vmatpush1.bf16.msra.mxu0 %v6938_v3  ;;  %2197 = vmatpush1.bf16.msra.mxu1 %v6941_v8 }
  0xf1   : > { %12551 = vst [vmem:[#allocation36_spill] sm:$0xff] %v8002_v19  ;;  %1783 = vmatprep.subr.bf16.mxu0 %v6946_v9  ;;  %2198 = vmatprep.subr.bf16.mxu1 %v6949_v11  ;;  %v1391_v11 = vrot.slane %v7636_v10, 1  ;;  %v12563_v10 = vmov 0  }
  0xf2   : > { %v8016_v33 = vpop.f32.mrf.mxu0  ;;  %v8018_v34 = vpop.f32.mrf.mxu1 }
  0xf3   : > { %12552 = vst [vmem:[#allocation37_spill] sm:$0xff] %v8018_v34 }
  0xf4   : > { %v8023_v40 = vpop.f32.mrf.mxu0  ;;  %v8025_v43 = vpop.f32.mrf.mxu1  ;;  %1784 = vmatpush1.bf16.msra.mxu0 %v6944_v20  ;;  %2199 = vmatpush1.bf16.msra.mxu1 %v6947_v23 }
  0xf5   : > { %12553 = vst [vmem:[#allocation38_spill] sm:$0xff] %v8025_v43  ;;  %2305 = vmatprep.subr.bf16.mxu0 %v6952_v29  ;;  %2418 = vmatprep.subr.bf16.mxu1 %v6955_v30  ;;  %v8073_v30 = vsel %vm1381_vm2, %v1389_v50, %v1391_v11  ;;  %v1393_v50 = vrot.slane %v7657_v18, 1 }
  0xf6   : > { %v8027_v48 = vpop.f32.mrf.mxu0  ;;  %v8029_v49 = vpop.f32.mrf.mxu1  ;;  %6500 = vmatmul.mubr.msk.bf16.gmra.mxu0 %vm509_vm1, %v8021_v39  ;;  %6508 = vmatmul.mubr.msk.bf16.gmra.mxu1 %vm509_vm1, %v8021_v39 }
  0xf7   : > { %12554 = vst [vmem:[#allocation39_spill] sm:$0xff] %v8029_v49  ;;  %1605 = vmatprep.mubr.bf16.mxu0 %v12413_v2  ;;  %1718 = vmatprep.mubr.bf16.mxu1 %v12413_v2 }
  0xf8   : > { %v8038_v54 = vpop.f32.mrf.mxu0  ;;  %v8040_v57 = vpop.f32.mrf.mxu1 }
  0xf9   : > { %12555 = vst [vmem:[#allocation40_spill] sm:$0xff] %v8040_v57 }
  0xfa   : > { %v8042_v58 = vpop.f32.mrf.mxu0  ;;  %v8044_v41 = vpop.f32.mrf.mxu1 }
  0xfb   : > { %12556 = vst [vmem:[#allocation41_spill] sm:$0xff] %v8044_v41 }
  0xfc   : > { %v8049_v63 = vpop.f32.mrf.mxu0  ;;  %v8051_v3 = vpop.f32.mrf.mxu1 }
  0xfd   : > { %12557 = vst [vmem:[#allocation42_spill] sm:$0xff] %v8051_v3 }
  0xfe   : > { %v8053_v8 = vpop.f32.mrf.mxu0  ;;  %v8055_v9 = vpop.f32.mrf.mxu1  ;;  %6501 = vmatmul.mubr.msk.bf16.gmra.mxu0 %vm509_vm1, %v8047_v62  ;;  %6509 = vmatmul.mubr.msk.bf16.gmra.mxu1 %vm509_vm1, %v8047_v62 }
  0xff   : > { %12558 = vst [vmem:[#allocation43_spill] sm:$0xff] %v8055_v9  ;;  %1615 = vmatprep.mubr.bf16.mxu0 %v12413_v2  ;;  %1728 = vmatprep.mubr.bf16.mxu1 %v12413_v2 }
 0x100   : > { %v8064_v16 = vpop.f32.mrf.mxu0  ;;  %v8066_v20 = vpop.f32.mrf.mxu1 }
 0x101   : > { %12559 = vst [vmem:[#allocation44_spill] sm:$0xff] %v8066_v20 }
 0x102   : > { %v8068_v23 = vpop.f32.mrf.mxu0  ;;  %v8070_v29 = vpop.f32.mrf.mxu1 }
 0x103   : > { %12560 = vst [vmem:[#allocation45_spill] sm:$0xff] %v8070_v29 }
 0x104   : > { %v8075_v9 = vpop.f32.mrf.mxu0  ;;  %v8077_v3 = vpop.f32.mrf.mxu1 }
 0x105   : > { %12561 = vst [vmem:[#allocation46_spill] sm:$0xff] %v8077_v3 }
 0x106   : > { %v8079_v41 = vpop.f32.mrf.mxu0  ;;  %v8081_v2 = vpop.f32.mrf.mxu1  ;;  %6502 = vmatmul.mubr.msk.bf16.gmra.mxu0 %vm509_vm1, %v8073_v30  ;;  %6510 = vmatmul.mubr.msk.bf16.gmra.mxu1 %vm509_vm1, %v8073_v30 }
 0x107   : > { %12562 = vst [vmem:[#allocation47_spill] sm:$0xff] %v8081_v2  ;;  %1625 = vmatprep.mubr.bf16.mxu0 %v12563_v10  ;;  %1738 = vmatprep.mubr.bf16.mxu1 %v12563_v10  ;;  %v8099_v2 = vsel %vm1381_vm2, %v1391_v11, %v1393_v50  ;;  %v1395_v11 = vrot.slane %v7680_v31, 1  ;;  %v1397_v31 = vrot.slane %v7702_v42, 1 }
 0x108   : > { %v8090_v29 = vpop.f32.mrf.mxu0  ;;  %v8092_v20 = vpop.f32.mrf.mxu1 }
 0x109   : > { %12564 = vst [vmem:[#allocation48_spill] sm:$0xff] %v8092_v20 }
 0x10a   : > { %v8094_v3 = vpop.f32.mrf.mxu0  ;;  %v8096_v61 = vpop.f32.mrf.mxu1 }
 0x10b   : > { %12565 = vst [vmem:[#allocation49_spill] sm:$0xff] %v8096_v61 }
 0x10c   : > { %v8101_v57 = vpop.f32.mrf.mxu0  ;;  %v8103_v49 = vpop.f32.mrf.mxu1 }
 0x10d   : > { %12566 = vst [vmem:[#allocation50_spill] sm:$0xff] %v8103_v49 }
 0x10e   : > { %v8105_v43 = vpop.f32.mrf.mxu0  ;;  %v8107_v34 = vpop.f32.mrf.mxu1  ;;  %6503 = vmatmul.mubr.msk.bf16.gmra.mxu0 %vm509_vm1, %v8099_v2  ;;  %6511 = vmatmul.mubr.msk.bf16.gmra.mxu1 %vm509_vm1, %v8099_v2 }
 0x10f   : > { %12567 = vst [vmem:[#allocation51_spill] sm:$0xff] %v8107_v34  ;;  %1635 = vmatprep.mubr.bf16.mxu0 %v12563_v10  ;;  %1748 = vmatprep.mubr.bf16.mxu1 %v12563_v10  ;;  %v8125_v34 = vsel %vm1381_vm2, %v1393_v50, %v1395_v11 }
 0x110   : > { %v8116_v61 = vpop.f32.mrf.mxu0  ;;  %v8118_v18 = vpop.f32.mrf.mxu1 }
 0x111   : > { %12568 = vst [vmem:[#allocation52_spill] sm:$0xff] %v8118_v18 }
 0x112   : > { %v8120_v49 = vpop.f32.mrf.mxu0  ;;  %v8122_v20 = vpop.f32.mrf.mxu1 }
 0x113   : > { %12569 = vst [vmem:[#allocation53_spill] sm:$0xff] %v8122_v20 }
 0x114   : > { %v8127_v45 = vpop.f32.mrf.mxu0  ;;  %v8129_v19 = vpop.f32.mrf.mxu1 }
 0x115   : > { %12570 = vst [vmem:[#allocation54_spill] sm:$0xff] %v8129_v19 }
 0x116   : > { %v8131_v15 = vpop.f32.mrf.mxu0  ;;  %v8133_v7 = vpop.f32.mrf.mxu1  ;;  %6504 = vmatmul.mubr.msk.bf16.gmra.mxu0 %vm509_vm1, %v8125_v34  ;;  %6512 = vmatmul.mubr.msk.bf16.gmra.mxu1 %vm509_vm1, %v8125_v34 }
 0x117   : > { %12571 = vst [vmem:[#allocation55_spill] sm:$0xff] %v8133_v7  ;;  %1645 = vmatprep.mubr.bf16.mxu0 %v12563_v10  ;;  %1758 = vmatprep.mubr.bf16.mxu1 %v12563_v10  ;;  %v8151_v7 = vsel %vm1381_vm2, %v1395_v11, %v1397_v31  ;;  %v2005_v31 = vor.u32 %v2004_v60, %v2003_v1  ;;  %v2011_v60 = vrot.slane %v7537_v37, 2 }
 0x118   : > { %v8142_v50 = vpop.f32.mrf.mxu0  ;;  %v8144_v20 = vpop.f32.mrf.mxu1  ;;  %v2008_v11 = vor.u32 %v2007_v56, %v2006_v32  ;;  %v6953_v32 = vld [vmem:[%s12411_s2 + $0x2e0] ss:$24 sps:$4 sm:$0xff]   ;;  %v2010_v56 = vrot.slane %v7577_v52, 1 }
 0x119   : > { %12572 = vst [vmem:[#allocation56_spill] sm:$0xff] %v8144_v20  ;;  %v6956_v52 = vld [vmem:[%s12411_s2 + $0x2a8] ss:$24 sps:$4 sm:$0xff]  }
 0x11a   : > { %v8146_v19 = vpop.f32.mrf.mxu0  ;;  %v8148_v18 = vpop.f32.mrf.mxu1  ;;  %v8180_v25 = vsel %vm2002_vm3, %v2005_v31, %v2008_v11  ;;  %v6958_v31 = vld [vmem:[%s12411_s2 + $0x2ac] ss:$24 sps:$4 sm:$0xff]  }
 0x11b   : > { %12573 = vst [vmem:[#allocation57_spill] sm:$0xff] %v8146_v19  ;;  %12574 = vst [vmem:[#allocation58_spill] sm:$0xff] %v8148_v18 }
 0x11c   : > { %v8157_v22 = vpop.f32.mrf.mxu0  ;;  %v8159_v21 = vpop.f32.mrf.mxu1  ;;  %12581 = vst [vmem:[#allocation65_spill] sm:$0xff] %v8180_v25 }
 0x11d   : > { %12575 = vst [vmem:[#allocation59_spill] sm:$0xff] %v8159_v21 }
 0x11e   : > { %v8161_v20 = vpop.f32.mrf.mxu0  ;;  %v8163_v19 = vpop.f32.mrf.mxu1  ;;  %6505 = vmatmul.mubr.msk.bf16.gmra.mxu0 %vm509_vm1, %v8151_v7  ;;  %6513 = vmatmul.mubr.msk.bf16.gmra.mxu1 %vm509_vm1, %v8151_v7 }
 0x11f   : > { %12576 = vst [vmem:[#allocation60_spill] sm:$0xff] %v8163_v19  ;;  %1801 = vmatprep.mubr.bf16.mxu0 %v12563_v10  ;;  %2216 = vmatprep.mubr.bf16.mxu1 %v12563_v10 }
 0x120   : > { %v8171_v26 = vpop.f32.mrf.mxu0  ;;  %v8173_v36 = vpop.f32.mrf.mxu1 }
 0x121   : > { %12577 = vst [vmem:[#allocation61_spill] sm:$0xff] %v8171_v26  ;;  %12578 = vst [vmem:[#allocation62_spill] sm:$0xff] %v8173_v36 }
 0x122   : > { %v8175_v21 = vpop.f32.mrf.mxu0  ;;  %v8177_v19 = vpop.f32.mrf.mxu1 }
 0x123   : > { %12579 = vst [vmem:[#allocation63_spill] sm:$0xff] %v8175_v21  ;;  %12580 = vst [vmem:[#allocation64_spill] sm:$0xff] %v8177_v19  ;;  %v6961_v19 = vld [vmem:[%s12411_s2 + $0x2b4] ss:$24 sps:$4 sm:$0xff]  }
 0x124   : > { %v8190_v1 = vpop.f32.mrf.mxu0  ;;  %v8192_v36 = vpop.f32.mrf.mxu1 }
 0x125   : > { %12582 = vst [vmem:[#allocation66_spill] sm:$0xff] %v8190_v1  ;;  %12583 = vst [vmem:[#allocation67_spill] sm:$0xff] %v8192_v36  ;;  %v2012_v36 = vor.u32 %v2011_v60, %v2010_v56 }
 0x126   : > { %v8200_v18 = vpop.f32.mrf.mxu0  ;;  %v1043_v21 = vpop.f32.mrf.mxu1  ;;  %6514 = vmatmul.mubr.msk.bf16.vlgmr.msra.gmra.mxu0 %vm509_vm1, %v7925_v47  ;;  %6546 = vmatmul.mubr.msk.bf16.vlgmr.msra.gmra.mxu1 %vm509_vm1, %v8180_v25  ;;  %v2015_v25 = vrot.slane %v7580_v53, 2 }
 0x127   : > { %12584 = vst [vmem:[#allocation68_spill] sm:$0xff] %v8200_v18  ;;  %v8207_v37 = vadd.f32 %v1043_v21, %v7939_v55  ;;  %2306 = vmatpush1.bf16.msra.mxu0 %v6950_v24  ;;  %2419 = vmatpush1.bf16.msra.mxu1 %v6953_v32  ;;  %v6959_v18 = vld [vmem:[%s12411_s2 + $0x2b0] ss:$24 sps:$4 sm:$0xff]   ;;  %v6964_v21 = vld [vmem:[%s12411_s2 + $0x27c] ss:$24 sps:$4 sm:$0xff]  }
 0x128   : > { %v8215_v1 = vpop.f32.mrf.mxu0  ;;  %v1045_v47 = vpop.f32.mrf.mxu1  ;;  %1811 = vmatprep.mubr.bf16.mxu0 %v12563_v10  ;;  %2226 = vmatprep.mubr.bf16.mxu1 %v12563_v10  ;;  %v6967_v24 = vld [vmem:[%s12411_s2 + $0x284] ss:$24 sps:$4 sm:$0xff]  }
 0x129   : > { %12585 = vst [vmem:[#allocation69_spill] sm:$0xff] %v8207_v37  ;;  %12586 = vst [vmem:[#allocation70_spill] sm:$0xff] %v8215_v1  ;;  %v8226_v55 = vadd.f32 %v1045_v47, %v7954_v59  ;;  %2307 = vmatprep.subr.bf16.mxu0 %v6958_v31  ;;  %2420 = vmatprep.subr.bf16.mxu1 %v6961_v19  ;;  %v8234_v37 = vsel %vm2002_vm3, %v2008_v11, %v2012_v36  ;;  %v2014_v1 = vrot.slane %v7621_v4, 1  ;;  %v6962_v19 = vld [vmem:[%s12411_s2 + $0x278] ss:$24 sps:$4 sm:$0xff]  }
 0x12a   : > { %v8228_v32 = vpop.f32.mrf.mxu0  ;;  %v1047_v56 = vpop.f32.mrf.mxu1 }
 0x12b   : > { %v8231_v60 = vadd.f32 %v1047_v56, %v7966_v0  ;;  %2308 = vmatpush1.bf16.msra.mxu0 %v6956_v52  ;;  %2421 = vmatpush1.bf16.msra.mxu1 %v6959_v18  ;;  %v6965_v0 = vld [vmem:[%s12411_s2 + $0x280] ss:$24 sps:$4 sm:$0xff]   ;;  %v6970_v52 = vld [vmem:[%s12411_s2 + $0x24c] ss:$24 sps:$4 sm:$0xff]  }
 0x12c   : > { %v8238_v26 = vpop.f32.mrf.mxu0  ;;  %v1049_v59 = vpop.f32.mrf.mxu1  ;;  %2309 = vmatprep.subr.bf16.mxu0 %v6964_v21  ;;  %2422 = vmatprep.subr.bf16.mxu1 %v6967_v24  ;;  %v6973_v18 = vld [vmem:[%s12411_s2 + $0x254] ss:$24 sps:$4 sm:$0xff]   ;;  %v2016_v21 = vor.u32 %v2015_v25, %v2014_v1 }
 0x12d   : > { %v8247_v11 = vadd.f32 %v1049_v59, %v7973_v51  ;;  %v6971_v59 = vld [vmem:[%s12411_s2 + $0x250] ss:$24 sps:$4 sm:$0xff]   ;;  %v6976_v25 = vld [vmem:[%s12411_s2 + $0x394] ss:$24 sps:$4 sm:$0xff]  }
 0x12e   : > { %v8255_v31 = vpop.f32.mrf.mxu0  ;;  %v1053_v47 = vpop.f32.mrf.mxu1  ;;  %6515 = vmatmul.mubr.msk.bf16.gmra.mxu0 %vm509_vm1, %v7971_v6  ;;  %6547 = vmatmul.mubr.msk.bf16.gmra.mxu1 %vm509_vm1, %v8234_v37  ;;  %v6968_v6 = vld [vmem:[%s12411_s2 + $0x248] ss:$24 sps:$4 sm:$0xff]   ;;  %v6979_v1 = vld [vmem:[%s12411_s2 + $0x39c] ss:$24 sps:$4 sm:$0xff]   ;;  %v8289_v53 = vsel %vm2002_vm3, %v2012_v36, %v2016_v21 }
 0x12f   : > { %v8262_v51 = vadd.f32 %v1053_v47, %v7989_v14  ;;  %1821 = vmatprep.mubr.bf16.mxu0 %v12563_v10  ;;  %2236 = vmatprep.mubr.bf16.mxu1 %v12563_v10 }
 0x130   : > { %v8266_v24 = vpop.f32.mrf.mxu0  ;;  %v1055_v56 = vpop.f32.mrf.mxu1  ;;  %2310 = vmatpush1.bf16.msra.mxu0 %v6962_v19  ;;  %2423 = vmatpush1.bf16.msra.mxu1 %v6965_v0 }
 0x131   : > { %v8275_v14 = vadd.f32 %v1055_v56, %v8000_v17  ;;  %2311 = vmatprep.subr.bf16.mxu0 %v6970_v52  ;;  %2424 = vmatprep.subr.bf16.mxu1 %v6973_v18  ;;  %v2018_v17 = vrot.slane %v7642_v12, 1  ;;  %v2019_v52 = vrot.slane %v7624_v5, 2  ;;  %v2027_v12 = vrot.slane %v7668_v28, 2 }
 0x132   : > { %v8283_v19 = vpop.f32.mrf.mxu0  ;;  %v1057_v0 = vpop.f32.mrf.mxu1 }
 0x133   : > { %12587 = vst [vmem:[#allocation71_spill] sm:$0xff] %v8275_v14  ;;  %v8286_v47 = vadd.f32 %v1057_v0, %v8016_v33 }
 0x134   : > { %v8293_v18 = vpop.f32.mrf.mxu0  ;;  %v1059_v56 = vpop.f32.mrf.mxu1  ;;  %2312 = vmatpush1.bf16.msra.mxu0 %v6968_v6  ;;  %2425 = vmatpush1.bf16.msra.mxu1 %v6971_v59 }
 0x135   : > { %v8296_v4 = vadd.f32 %v1059_v56, %v8023_v40  ;;  %2813 = vmatprep.subr.bf16.mxu0 %v6976_v25  ;;  %2926 = vmatprep.subr.bf16.mxu1 %v6979_v1  ;;  %v2020_v40 = vor.u32 %v2019_v52, %v2018_v17  ;;  %v2022_v56 = vrot.slane %v7665_v27, 1 }
 0x136   : > { %v8298_v14 = vpop.f32.mrf.mxu0  ;;  %v1063_v33 = vpop.f32.mrf.mxu1  ;;  %6516 = vmatmul.mubr.msk.bf16.gmra.mxu0 %vm509_vm1, %v8021_v39  ;;  %6548 = vmatmul.mubr.msk.bf16.gmra.mxu1 %vm509_vm1, %v8289_v53 }
 0x137   : > { %v8305_v36 = vadd.f32 %v1063_v33, %v8027_v48  ;;  %1831 = vmatprep.mubr.bf16.mxu0 %v12563_v10  ;;  %2246 = vmatprep.mubr.bf16.mxu1 %v12563_v10  ;;  %v8320_v48 = vsel %vm2002_vm3, %v2016_v21, %v2020_v40  ;;  %v2023_v33 = vrot.slane %v7645_v13, 2 }
 0x138   : > { %v8309_v6 = vpop.f32.mrf.mxu0  ;;  %v1065_v59 = vpop.f32.mrf.mxu1 }
 0x139   : > { %v8312_v25 = vadd.f32 %v1065_v59, %v8038_v54  ;;  %v2024_v21 = vor.u32 %v2023_v33, %v2022_v56 }
 0x13a   : > { %v8314_v1 = vpop.f32.mrf.mxu0  ;;  %v1067_v39 = vpop.f32.mrf.mxu1 }
 0x13b   : > { %v8317_v0 = vadd.f32 %v1067_v39, %v8042_v58 }
 0x13c   : > { %v8324_v17 = vpop.f32.mrf.mxu0  ;;  %v1069_v52 = vpop.f32.mrf.mxu1 }
 0x13d   : > { %v8327_v5 = vadd.f32 %v1069_v52, %v8049_v63 }
 0x13e   : > { %v8329_v54 = vpop.f32.mrf.mxu0  ;;  %v1073_v59 = vpop.f32.mrf.mxu1  ;;  %6517 = vmatmul.mubr.msk.bf16.gmra.mxu0 %vm509_vm1, %v8047_v62  ;;  %6549 = vmatmul.mubr.msk.bf16.gmra.mxu1 %vm509_vm1, %v8320_v48 }
 0x13f   : > { %12588 = vst [vmem:[#allocation72_spill] sm:$0xff] %v8327_v5  ;;  %v8336_v58 = vadd.f32 %v1073_v59, %v8053_v8  ;;  %1841 = vmatprep.mubr.bf16.mxu0 %v12563_v10  ;;  %2256 = vmatprep.mubr.bf16.mxu1 %v12563_v10  ;;  %v8351_v8 = vsel %vm2002_vm3, %v2020_v40, %v2024_v21  ;;  %v2026_v59 = vrot.slane %v7689_v35, 1  ;;  %v6986_v5 = vld [vmem:[%s12411_s2 + $0x330] ss:$24 sps:$4 sm:$0xff]  }
 0x140   : > { %v8340_v39 = vpop.f32.mrf.mxu0  ;;  %v1075_v63 = vpop.f32.mrf.mxu1 }
 0x141   : > { %12589 = vst [vmem:[#allocation73_spill] sm:$0xff] %v8336_v58  ;;  %v8343_v52 = vadd.f32 %v1075_v63, %v8064_v16  ;;  %v2028_v40 = vor.u32 %v2027_v12, %v2026_v59 }
 0x142   : > { %v8345_v13 = vpop.f32.mrf.mxu0  ;;  %v1077_v62 = vpop.f32.mrf.mxu1 }
 0x143   : > { %12590 = vst [vmem:[#allocation74_spill] sm:$0xff] %v8343_v52  ;;  %v8348_v27 = vadd.f32 %v1077_v62, %v8068_v23 }
 0x144   : > { %v8355_v56 = vpop.f32.mrf.mxu0  ;;  %v1079_v33 = vpop.f32.mrf.mxu1 }
 0x145   : > { %12591 = vst [vmem:[#allocation75_spill] sm:$0xff] %v8348_v27  ;;  %v8358_v58 = vadd.f32 %v1079_v33, %v8075_v9 }
 0x146   : > { %v8360_v16 = vpop.f32.mrf.mxu0  ;;  %v1083_v63 = vpop.f32.mrf.mxu1  ;;  %6518 = vmatmul.mubr.msk.bf16.gmra.mxu0 %vm509_vm1, %v8073_v30  ;;  %6550 = vmatmul.mubr.msk.bf16.gmra.mxu1 %vm509_vm1, %v8351_v8 }
 0x147   : > { %12592 = vst [vmem:[#allocation76_spill] sm:$0xff] %v8358_v58  ;;  %v8367_v23 = vadd.f32 %v1083_v63, %v8079_v41  ;;  %1851 = vmatprep.mubr.bf16.mxu0 %v12563_v10  ;;  %2266 = vmatprep.mubr.bf16.mxu1 %v12563_v10  ;;  %v8382_v41 = vsel %vm2002_vm3, %v2024_v21, %v2028_v40  ;;  %v2030_v63 = vrot.slane %v7708_v44, 1 }
 0x148   : > { %v8371_v62 = vpop.f32.mrf.mxu0  ;;  %v1085_v9 = vpop.f32.mrf.mxu1 }
 0x149   : > { %12593 = vst [vmem:[#allocation77_spill] sm:$0xff] %v8367_v23  ;;  %v8374_v33 = vadd.f32 %v1085_v9, %v8090_v29  ;;  %v2031_v23 = vrot.slane %v7692_v38, 2 }
 0x14a   : > { %v8376_v28 = vpop.f32.mrf.mxu0  ;;  %v1087_v30 = vpop.f32.mrf.mxu1 }
 0x14b   : > { %12594 = vst [vmem:[#allocation78_spill] sm:$0xff] %v8374_v33  ;;  %v8379_v35 = vadd.f32 %v1087_v30, %v8094_v3  ;;  %v2032_v21 = vor.u32 %v2031_v23, %v2030_v63  ;;  %v2037_v63 = vrot.slane %v7711_v46, 2 }
 0x14c   : > { %v8386_v12 = vpop.f32.mrf.mxu0  ;;  %v1089_v59 = vpop.f32.mrf.mxu1 }
 0x14d   : > { %12595 = vst [vmem:[#allocation79_spill] sm:$0xff] %v8379_v35  ;;  %v8389_v58 = vadd.f32 %v1089_v59, %v8101_v57  ;;  %v8403_v57 = vshrl.u32 %v7702_v42, 16 }
 0x14e   : > { %v8391_v29 = vpop.f32.mrf.mxu0  ;;  %v1093_v9 = vpop.f32.mrf.mxu1  ;;  %6519 = vmatmul.mubr.msk.bf16.gmra.mxu0 %vm509_vm1, %v8099_v2  ;;  %6551 = vmatmul.mubr.msk.bf16.gmra.mxu1 %vm509_vm1, %v8382_v41 }
 0x14f   : > { %12596 = vst [vmem:[#allocation80_spill] sm:$0xff] %v8389_v58  ;;  %v8398_v3 = vadd.f32 %v1093_v9, %v8105_v43  ;;  %1861 = vmatprep.mubr.bf16.mxu0 %v12563_v10  ;;  %2276 = vmatprep.mubr.bf16.mxu1 %v12563_v10  ;;  %12598 = vst [vmem:[#allocation82_spill] sm:$0xff] %v8403_v57  ;;  %v8416_v9 = vsel %vm2002_vm3, %v2028_v40, %v2032_v21  ;;  %v2036_v23 = vrot.slane %v8403_v57, 1  ;;  %v12604_v57 = vld [vmem:[#allocation57_spill] sm:$0xff] }
 0x150   : > { %v8405_v30 = vpop.f32.mrf.mxu0  ;;  %v1095_v59 = vpop.f32.mrf.mxu1 }
 0x151   : > { %12597 = vst [vmem:[#allocation81_spill] sm:$0xff] %v8398_v3  ;;  %v8408_v38 = vadd.f32 %v1095_v59, %v8116_v61 }
 0x152   : > { %v8410_v2 = vpop.f32.mrf.mxu0  ;;  %v1097_v44 = vpop.f32.mrf.mxu1 }
 0x153   : > { %12599 = vst [vmem:[#allocation83_spill] sm:$0xff] %v8408_v38  ;;  %v8413_v43 = vadd.f32 %v1097_v44, %v8120_v49  ;;  %v2038_v49 = vor.u32 %v2037_v63, %v2036_v23 }
 0x154   : > { %v8420_v42 = vpop.f32.mrf.mxu0  ;;  %v1099_v3 = vpop.f32.mrf.mxu1 }
 0x155   : > { %12600 = vst [vmem:[#allocation84_spill] sm:$0xff] %v8413_v43  ;;  %v8423_v58 = vadd.f32 %v1099_v3, %v8127_v45 }
 0x156   : > { %v8425_v61 = vpop.f32.mrf.mxu0  ;;  %v1103_v59 = vpop.f32.mrf.mxu1  ;;  %6520 = vmatmul.mubr.msk.bf16.gmra.mxu0 %vm509_vm1, %v8125_v34  ;;  %6552 = vmatmul.mubr.msk.bf16.gmra.mxu1 %vm509_vm1, %v8416_v9 }
 0x157   : > { %12601 = vst [vmem:[#allocation85_spill] sm:$0xff] %v8423_v58  ;;  %v8432_v44 = vadd.f32 %v1103_v59, %v8131_v15  ;;  %1871 = vmatprep.mubr.bf16.mxu0 %v12563_v10  ;;  %2286 = vmatprep.mubr.bf16.mxu1 %v12563_v10  ;;  %v8447_v15 = vsel %vm2002_vm3, %v2032_v21, %v2038_v49 }
 0x158   : > { %v8436_v40 = vpop.f32.mrf.mxu0  ;;  %v1105_v45 = vpop.f32.mrf.mxu1 }
 0x159   : > { %12602 = vst [vmem:[#allocation86_spill] sm:$0xff] %v8432_v44  ;;  %v8439_v3 = vadd.f32 %v1105_v45, %v8142_v50 }
 0x15a   : > { %v8441_v46 = vpop.f32.mrf.mxu0  ;;  %v1107_v34 = vpop.f32.mrf.mxu1 }
 0x15b   : > { %12603 = vst [vmem:[#allocation87_spill] sm:$0xff] %v8439_v3  ;;  %v8444_v58 = vadd.f32 %v1107_v34, %v12604_v57  ;;  %v12608_v57 = vld [vmem:[#allocation61_spill] sm:$0xff]  ;;  %v12615_v3 = vld [vmem:[#allocation68_spill] sm:$0xff] }
 0x15c   : > { %v8449_v59 = vpop.f32.mrf.mxu0  ;;  %v1109_v44 = vpop.f32.mrf.mxu1 }
 0x15d   : > { %12605 = vst [vmem:[#allocation57_spill] sm:$0xff] %v8444_v58  ;;  %v8452_v23 = vadd.f32 %v1109_v44, %v8157_v22  ;;  %v12612_v58 = vld [vmem:[#allocation66_spill] sm:$0xff] }
 0x15e   : > { %v8454_v63 = vpop.f32.mrf.mxu0  ;;  %v1113_v43 = vpop.f32.mrf.mxu1  ;;  %6521 = vmatmul.mubr.msk.bf16.gmra.mxu0 %vm509_vm1, %v8151_v7  ;;  %6553 = vmatmul.mubr.msk.bf16.gmra.mxu1 %vm509_vm1, %v8447_v15  ;;  %v12610_v7 = vld [vmem:[#allocation63_spill] sm:$0xff] }
 0x15f   : > { %12606 = vst [vmem:[#allocation88_spill] sm:$0xff] %v8452_v23  ;;  %v8461_v50 = vadd.f32 %v1113_v43, %v8161_v20  ;;  %2329 = vmatprep.mubr.bf16.mxu0 %v12563_v10  ;;  %2442 = vmatprep.mubr.bf16.mxu1 %v12563_v10  ;;  %v6974_v20 = vld [vmem:[%s12411_s2 + $0x390] ss:$24 sps:$4 sm:$0xff]  }
 0x160   : > { %v8465_v21 = vpop.f32.mrf.mxu0  ;;  %v1115_v22 = vpop.f32.mrf.mxu1  ;;  %v6977_v43 = vld [vmem:[%s12411_s2 + $0x398] ss:$24 sps:$4 sm:$0xff]  }
 0x161   : > { %12607 = vst [vmem:[#allocation89_spill] sm:$0xff] %v8461_v50  ;;  %v8468_v44 = vadd.f32 %v1115_v22, %v12608_v57  ;;  %v6982_v57 = vld [vmem:[%s12411_s2 + $0x364] ss:$24 sps:$4 sm:$0xff]  }
 0x162   : > { %v8470_v49 = vpop.f32.mrf.mxu0  ;;  %v1117_v45 = vpop.f32.mrf.mxu1 }
 0x163   : > { %12609 = vst [vmem:[#allocation61_spill] sm:$0xff] %v8468_v44  ;;  %v8473_v34 = vadd.f32 %v1117_v45, %v12610_v7  ;;  %v6985_v45 = vld [vmem:[%s12411_s2 + $0x36c] ss:$24 sps:$4 sm:$0xff]  }
 0x164   : > { %v8481_v50 = vpop.f32.mrf.mxu0  ;;  %v1119_v23 = vpop.f32.mrf.mxu1  ;;  %v12614_v44 = vld [vmem:[#allocation65_spill] sm:$0xff] }
 0x165   : > { %12611 = vst [vmem:[#allocation63_spill] sm:$0xff] %v8473_v34  ;;  %v8484_v22 = vadd.f32 %v1119_v23, %v12612_v58  ;;  %v6980_v23 = vld [vmem:[%s12411_s2 + $0x360] ss:$24 sps:$4 sm:$0xff]  }
 0x166   : > { %v8492_v7 = vpop.f32.mrf.mxu0  ;;  %v1269_v34 = vpop.f32.mrf.mxu1  ;;  %6554 = vmatmul.mubr.msk.bf16.vlgmr.msra.gmra.mxu0 %vm509_vm1, %v12614_v44  ;;  %6562 = vmatmul.mubr.msk.bf16.vlgmr.msra.gmra.mxu1 %vm509_vm1, %v12614_v44  ;;  %v6991_v44 = vld [vmem:[%s12411_s2 + $0x33c] ss:$24 sps:$4 sm:$0xff]  }
 0x167   : > { %12613 = vst [vmem:[#allocation66_spill] sm:$0xff] %v8484_v22  ;;  %v8499_v58 = vadd.f32 %v1269_v34, %v12615_v3  ;;  %2814 = vmatpush1.bf16.msra.mxu0 %v6974_v20  ;;  %2927 = vmatpush1.bf16.msra.mxu1 %v6977_v43  ;;  %v6983_v22 = vld [vmem:[%s12411_s2 + $0x368] ss:$24 sps:$4 sm:$0xff]   ;;  %v6988_v3 = vld [vmem:[%s12411_s2 + $0x334] ss:$24 sps:$4 sm:$0xff]  }
 0x168   : > { %v8507_v38 = vpop.f32.mrf.mxu0  ;;  %v1271_v35 = vpop.f32.mrf.mxu1  ;;  %2339 = vmatprep.mubr.bf16.mxu0 %v12563_v10  ;;  %2452 = vmatprep.mubr.bf16.mxu1 %v12563_v10  ;;  %v12617_v34 = vld [vmem:[#allocation70_spill] sm:$0xff] }
 0x169   : > { %12616 = vst [vmem:[#allocation65_spill] sm:$0xff] %v8499_v58  ;;  %v8518_v20 = vadd.f32 %v1271_v35, %v12617_v34  ;;  %2815 = vmatprep.subr.bf16.mxu0 %v6982_v57  ;;  %2928 = vmatprep.subr.bf16.mxu1 %v6985_v45  ;;  %v6989_v35 = vld [vmem:[%s12411_s2 + $0x338] ss:$24 sps:$4 sm:$0xff]  }
 0x16a   : > { %v8520_v43 = vpop.f32.mrf.mxu0  ;;  %v1273_v58 = vpop.f32.mrf.mxu1 }
 0x16b   : > { %12618 = vst [vmem:[#allocation68_spill] sm:$0xff] %v8518_v20  ;;  %v8523_v33 = vadd.f32 %v1273_v58, %v8228_v32  ;;  %2816 = vmatpush1.bf16.msra.mxu0 %v6980_v23  ;;  %2929 = vmatpush1.bf16.msra.mxu1 %v6983_v22  ;;  %v6994_v32 = vld [vmem:[%s12411_s2 + $0x304] ss:$24 sps:$4 sm:$0xff]  }
 0x16c   : > { %v8525_v27 = vpop.f32.mrf.mxu0  ;;  %v1275_v52 = vpop.f32.mrf.mxu1  ;;  %2817 = vmatprep.subr.bf16.mxu0 %v6988_v3  ;;  %2930 = vmatprep.subr.bf16.mxu1 %v6991_v44  ;;  %v6997_v22 = vld [vmem:[%s12411_s2 + $0x30c] ss:$24 sps:$4 sm:$0xff]   ;;  %v6992_v3 = vld [vmem:[%s12411_s2 + $0x300] ss:$24 sps:$4 sm:$0xff]  }
 0x16d   : > { %12619 = vst [vmem:[#allocation70_spill] sm:$0xff] %v8523_v33  ;;  %v8534_v57 = vadd.f32 %v1275_v52, %v8238_v26  ;;  %v7000_v44 = vld [vmem:[%s12411_s2 + $0x3a4] ss:$24 sps:$4 sm:$0xff]  }
 0x16e   : > { %v8542_v45 = vpop.f32.mrf.mxu0  ;;  %v1279_v58 = vpop.f32.mrf.mxu1  ;;  %6555 = vmatmul.mubr.msk.bf16.gmra.mxu0 %vm509_vm1, %v8234_v37  ;;  %6563 = vmatmul.mubr.msk.bf16.gmra.mxu1 %vm509_vm1, %v8234_v37  ;;  %v6995_v37 = vld [vmem:[%s12411_s2 + $0x308] ss:$24 sps:$4 sm:$0xff]  }
 0x16f   : > { %12620 = vst [vmem:[#allocation90_spill] sm:$0xff] %v8534_v57  ;;  %v8549_v26 = vadd.f32 %v1279_v58, %v8255_v31  ;;  %2349 = vmatprep.mubr.bf16.mxu0 %v12563_v10  ;;  %2462 = vmatprep.mubr.bf16.mxu1 %v12563_v10  ;;  %v12658_v57 = vld [vmem:[#allocation34_spill] sm:$0xff] }
 0x170   : > { %v8553_v52 = vpop.f32.mrf.mxu0  ;;  %v1281_v23 = vpop.f32.mrf.mxu1  ;;  %2818 = vmatpush1.bf16.msra.mxu0 %v6986_v5  ;;  %2931 = vmatpush1.bf16.msra.mxu1 %v6989_v35  ;;  %v7003_v5 = vld [vmem:[%s12411_s2 + $0x454] ss:$24 sps:$4 sm:$0xff]   ;;  %v1163_v33 = vadd.f32 %v8525_v27, %v12658_v57 }
 0x171   : > { %12621 = vst [vmem:[#allocation91_spill] sm:$0xff] %v8549_v26  ;;  %v8562_v31 = vadd.f32 %v1281_v23, %v8266_v24  ;;  %2819 = vmatprep.subr.bf16.mxu0 %v6994_v32  ;;  %2932 = vmatprep.subr.bf16.mxu1 %v6997_v22  ;;  %v12660_v27 = vld [vmem:[#allocation35_spill] sm:$0xff] }
 0x172   : > { %v8570_v34 = vpop.f32.mrf.mxu0  ;;  %v1283_v35 = vpop.f32.mrf.mxu1 }
 0x173   : > { %12622 = vst [vmem:[#allocation92_spill] sm:$0xff] %v8562_v31  ;;  %v8573_v58 = vadd.f32 %v1283_v35, %v8283_v19 }
 0x174   : > { %v8575_v26 = vpop.f32.mrf.mxu0  ;;  %v1285_v24 = vpop.f32.mrf.mxu1  ;;  %2820 = vmatpush1.bf16.msra.mxu0 %v6992_v3  ;;  %2933 = vmatpush1.bf16.msra.mxu1 %v6995_v37 }
 0x175   : > { %12623 = vst [vmem:[#allocation93_spill] sm:$0xff] %v8573_v58  ;;  %v8578_v32 = vadd.f32 %v1285_v24, %v8293_v18  ;;  %3039 = vmatprep.subr.bf16.mxu0 %v7000_v44  ;;  %3452 = vmatprep.subr.bf16.mxu1 %v7003_v5 }
 0x176   : > { %v8580_v22 = vpop.f32.mrf.mxu0  ;;  %v1289_v23 = vpop.f32.mrf.mxu1  ;;  %6556 = vmatmul.mubr.msk.bf16.gmra.mxu0 %vm509_vm1, %v8289_v53  ;;  %6564 = vmatmul.mubr.msk.bf16.gmra.mxu1 %vm509_vm1, %v8289_v53 }
 0x177   : > { %12624 = vst [vmem:[#allocation94_spill] sm:$0xff] %v8578_v32  ;;  %v8587_v19 = vadd.f32 %v1289_v23, %v8298_v14  ;;  %2359 = vmatprep.mubr.bf16.mxu0 %v12563_v10  ;;  %2472 = vmatprep.mubr.bf16.mxu1 %v12563_v10  ;;  %v7007_v32 = vld [vmem:[%s12411_s2 + $0x420] ss:$24 sps:$4 sm:$0xff]  }
 0x178   : > { %v8591_v18 = vpop.f32.mrf.mxu0  ;;  %v1291_v3 = vpop.f32.mrf.mxu1 }
 0x179   : > { %12625 = vst [vmem:[#allocation95_spill] sm:$0xff] %v8587_v19  ;;  %v8594_v37 = vadd.f32 %v1291_v3, %v8309_v6 }
 0x17a   : > { %v8596_v44 = vpop.f32.mrf.mxu0  ;;  %v1293_v5 = vpop.f32.mrf.mxu1 }
 0x17b   : > { %12626 = vst [vmem:[#allocation96_spill] sm:$0xff] %v8594_v37  ;;  %v8599_v35 = vadd.f32 %v1293_v5, %v8314_v1  ;;  %v7004_v37 = vld [vmem:[%s12411_s2 + $0x370] ss:$24 sps:$4 sm:$0xff]  }
 0x17c   : > { %v8601_v53 = vpop.f32.mrf.mxu0  ;;  %v1295_v14 = vpop.f32.mrf.mxu1 }
 0x17d   : > { %12627 = vst [vmem:[#allocation97_spill] sm:$0xff] %v8599_v35  ;;  %v8604_v24 = vadd.f32 %v1295_v14, %v8324_v17 }
 0x17e   : > { %v8606_v23 = vpop.f32.mrf.mxu0  ;;  %v1299_v19 = vpop.f32.mrf.mxu1  ;;  %6557 = vmatmul.mubr.msk.bf16.gmra.mxu0 %vm509_vm1, %v8320_v48  ;;  %6565 = vmatmul.mubr.msk.bf16.gmra.mxu1 %vm509_vm1, %v8320_v48 }
 0x17f   : > { %12628 = vst [vmem:[#allocation98_spill] sm:$0xff] %v8604_v24  ;;  %v8613_v6 = vadd.f32 %v1299_v19, %v8329_v54  ;;  %2369 = vmatprep.mubr.bf16.mxu0 %v12563_v10  ;;  %2482 = vmatprep.mubr.bf16.mxu1 %v12563_v10 }
 0x180   : > { %v8617_v1 = vpop.f32.mrf.mxu0  ;;  %v1301_v17 = vpop.f32.mrf.mxu1 }
 0x181   : > { %12629 = vst [vmem:[#allocation99_spill] sm:$0xff] %v8613_v6  ;;  %v8620_v3 = vadd.f32 %v1301_v17, %v8340_v39 }
 0x182   : > { %v8622_v5 = vpop.f32.mrf.mxu0  ;;  %v1303_v14 = vpop.f32.mrf.mxu1 }
 0x183   : > { %12630 = vst [vmem:[#allocation100_spill] sm:$0xff] %v8620_v3  ;;  %v8625_v24 = vadd.f32 %v1303_v14, %v8345_v13 }
 0x184   : > { %v8627_v48 = vpop.f32.mrf.mxu0  ;;  %v1305_v54 = vpop.f32.mrf.mxu1 }
 0x185   : > { %12631 = vst [vmem:[#allocation101_spill] sm:$0xff] %v8625_v24  ;;  %v8630_v19 = vadd.f32 %v1305_v54, %v8355_v56 }
 0x186   : > { %v8632_v6 = vpop.f32.mrf.mxu0  ;;  %v1309_v35 = vpop.f32.mrf.mxu1  ;;  %6558 = vmatmul.mubr.msk.bf16.gmra.mxu0 %vm509_vm1, %v8351_v8  ;;  %6566 = vmatmul.mubr.msk.bf16.gmra.mxu1 %vm509_vm1, %v8351_v8 }
 0x187   : > { %12632 = vst [vmem:[#allocation102_spill] sm:$0xff] %v8630_v19  ;;  %v8639_v39 = vadd.f32 %v1309_v35, %v8360_v16  ;;  %2379 = vmatprep.mubr.bf16.mxu0 %v12563_v10  ;;  %2492 = vmatprep.mubr.bf16.mxu1 %v12563_v10 }
 0x188   : > { %v8643_v13 = vpop.f32.mrf.mxu0  ;;  %v1311_v56 = vpop.f32.mrf.mxu1 }
 0x189   : > { %12633 = vst [vmem:[#allocation103_spill] sm:$0xff] %v8639_v39  ;;  %v8646_v17 = vadd.f32 %v1311_v56, %v8371_v62 }
 0x18a   : > { %v8648_v14 = vpop.f32.mrf.mxu0  ;;  %v1313_v54 = vpop.f32.mrf.mxu1 }
 0x18b   : > { %12634 = vst [vmem:[#allocation104_spill] sm:$0xff] %v8646_v17  ;;  %v8651_v19 = vadd.f32 %v1313_v54, %v8376_v28 }
 0x18c   : > { %v8653_v8 = vpop.f32.mrf.mxu0  ;;  %v1315_v16 = vpop.f32.mrf.mxu1 }
 0x18d   : > { %12635 = vst [vmem:[#allocation105_spill] sm:$0xff] %v8651_v19  ;;  %v8656_v35 = vadd.f32 %v1315_v16, %v8386_v12 }
 0x18e   : > { %v8658_v39 = vpop.f32.mrf.mxu0  ;;  %v1319_v24 = vpop.f32.mrf.mxu1  ;;  %6559 = vmatmul.mubr.msk.bf16.gmra.mxu0 %vm509_vm1, %v8382_v41  ;;  %6567 = vmatmul.mubr.msk.bf16.gmra.mxu1 %vm509_vm1, %v8382_v41 }
 0x18f   : > { %12636 = vst [vmem:[#allocation106_spill] sm:$0xff] %v8656_v35  ;;  %v8665_v62 = vadd.f32 %v1319_v24, %v8391_v29  ;;  %2389 = vmatprep.mubr.bf16.mxu0 %v12563_v10  ;;  %2502 = vmatprep.mubr.bf16.mxu1 %v12563_v10 }
 0x190   : > { %v8669_v28 = vpop.f32.mrf.mxu0  ;;  %v1321_v12 = vpop.f32.mrf.mxu1 }
 0x191   : > { %12637 = vst [vmem:[#allocation107_spill] sm:$0xff] %v8665_v62  ;;  %v8672_v56 = vadd.f32 %v1321_v12, %v8405_v30 }
 0x192   : > { %v8674_v54 = vpop.f32.mrf.mxu0  ;;  %v1323_v16 = vpop.f32.mrf.mxu1 }
 0x193   : > { %12638 = vst [vmem:[#allocation108_spill] sm:$0xff] %v8672_v56  ;;  %v8677_v35 = vadd.f32 %v1323_v16, %v8410_v2 }
 0x194   : > { %v8679_v41 = vpop.f32.mrf.mxu0  ;;  %v1325_v29 = vpop.f32.mrf.mxu1 }
 0x195   : > { %12639 = vst [vmem:[#allocation109_spill] sm:$0xff] %v8677_v35  ;;  %v8682_v24 = vadd.f32 %v1325_v29, %v8420_v42 }
 0x196   : > { %v8684_v62 = vpop.f32.mrf.mxu0  ;;  %v1329_v19 = vpop.f32.mrf.mxu1  ;;  %6560 = vmatmul.mubr.msk.bf16.gmra.mxu0 %vm509_vm1, %v8416_v9  ;;  %6568 = vmatmul.mubr.msk.bf16.gmra.mxu1 %vm509_vm1, %v8416_v9 }
 0x197   : > { %12640 = vst [vmem:[#allocation110_spill] sm:$0xff] %v8682_v24  ;;  %v8691_v30 = vadd.f32 %v1329_v19, %v8425_v61  ;;  %2399 = vmatprep.mubr.bf16.mxu0 %v12563_v10  ;;  %2512 = vmatprep.mubr.bf16.mxu1 %v12563_v10 }
 0x198   : > { %v8695_v2 = vpop.f32.mrf.mxu0  ;;  %v1331_v42 = vpop.f32.mrf.mxu1 }
 0x199   : > { %12641 = vst [vmem:[#allocation111_spill] sm:$0xff] %v8691_v30  ;;  %v8698_v12 = vadd.f32 %v1331_v42, %v8436_v40 }
 0x19a   : > { %v8700_v16 = vpop.f32.mrf.mxu0  ;;  %v1333_v29 = vpop.f32.mrf.mxu1 }
 0x19b   : > { %12642 = vst [vmem:[#allocation112_spill] sm:$0xff] %v8698_v12  ;;  %v8703_v24 = vadd.f32 %v1333_v29, %v8441_v46  ;;  %v12646_v46 = vld [vmem:[#allocation5_spill] sm:$0xff] }
 0x19c   : > { %v8705_v9 = vpop.f32.mrf.mxu0  ;;  %v1335_v61 = vpop.f32.mrf.mxu1  ;;  %v2644_v42 = vrot.slane %v12646_v46, 2  ;;  %v7001_v46 = vld [vmem:[%s12411_s2 + $0x450] ss:$24 sps:$4 sm:$0xff]  }
 0x19d   : > { %12643 = vst [vmem:[#allocation113_spill] sm:$0xff] %v8703_v24  ;;  %v8708_v19 = vadd.f32 %v1335_v61, %v8449_v59  ;;  %v12647_v59 = vld [vmem:[#allocation6_spill] sm:$0xff] }
 0x19e   : > { %v8710_v30 = vpop.f32.mrf.mxu0  ;;  %v1339_v35 = vpop.f32.mrf.mxu1  ;;  %6561 = vmatmul.mubr.msk.bf16.gmra.mxu0 %vm509_vm1, %v8447_v15  ;;  %6569 = vmatmul.mubr.msk.bf16.gmra.mxu1 %vm509_vm1, %v8447_v15  ;;  %v2645_v29 = vrot.slane %v12647_v59, 2  ;;  %v6998_v59 = vld [vmem:[%s12411_s2 + $0x3a0] ss:$24 sps:$4 sm:$0xff]  }
 0x19f   : > { %12644 = vst [vmem:[#allocation114_spill] sm:$0xff] %v8708_v19  ;;  %v8717_v40 = vadd.f32 %v1339_v35, %v8454_v63  ;;  %2837 = vmatprep.mubr.bf16.mxu0 %v12563_v10  ;;  %2950 = vmatprep.mubr.bf16.mxu1 %v12563_v10 }
 0x1a0   : > { %v8723_v61 = vpop.f32.mrf.mxu0  ;;  %v1341_v19 = vpop.f32.mrf.mxu1  ;;  %v8734_v35 = vsel %vm2643_vm4, %v2644_v42, %v2645_v29  ;;  %v7006_v42 = vld [vmem:[%s12411_s2 + $0x374] ss:$24 sps:$4 sm:$0xff]  }
 0x1a1   : > { %12645 = vst [vmem:[#allocation115_spill] sm:$0xff] %v8717_v40  ;;  %v8726_v24 = vadd.f32 %v1341_v19, %v8465_v21  ;;  %v12650_v19 = vld [vmem:[#allocation31_spill] sm:$0xff] }
 0x1a2   : > { %v8728_v12 = vpop.f32.mrf.mxu0  ;;  %v1343_v15 = vpop.f32.mrf.mxu1 }
 0x1a3   : > { %12648 = vst [vmem:[#allocation116_spill] sm:$0xff] %v8726_v24  ;;  %v8731_v63 = vadd.f32 %v1343_v15, %v8470_v49  ;;  %v1157_v24 = vadd.f32 %v8492_v7, %v12650_v19  ;;  %v7009_v15 = vld [vmem:[%s12411_s2 + $0x424] ss:$24 sps:$4 sm:$0xff]   ;;  %v12652_v7 = vld [vmem:[#allocation10_spill] sm:$0xff] }
 0x1a4   : > { %v8742_v40 = vpop.f32.mrf.mxu0  ;;  %v1345_v21 = vpop.f32.mrf.mxu1 }
 0x1a5   : > { %12649 = vst [vmem:[#allocation117_spill] sm:$0xff] %v8731_v63  ;;  %v8747_v49 = vadd.f32 %v1345_v21, %v8481_v50  ;;  %v12653_v50 = vld [vmem:[#allocation32_spill] sm:$0xff] }
 0x1a6   : > { %v1577_v63 = vpop.f32.mrf.mxu0  ;;  %v1690_v56 = vpop.f32.mrf.mxu1  ;;  %6594 = vmatmul.mubr.msk.bf16.vlgmr.msra.gmra.mxu0 %vm509_vm1, %v8734_v35  ;;  %6602 = vmatmul.mubr.msk.bf16.vlgmr.msra.gmra.mxu1 %vm509_vm1, %v8734_v35  ;;  %v1159_v21 = vadd.f32 %v8507_v38, %v12653_v50  ;;  %v7012_v38 = vld [vmem:[%s12411_s2 + $0x344] ss:$24 sps:$4 sm:$0xff]  }
 0x1a7   : > { %12651 = vst [vmem:[#allocation31_spill] sm:$0xff] %v8747_v49  ;;  %v12654_v49 = vld [vmem:[#allocation69_spill] sm:$0xff]  ;;  %v8765_v3 = vadd.f32 %v1690_v56, %v1157_v24  ;;  %3040 = vmatpush1.bf16.msra.mxu0 %v6998_v59  ;;  %3453 = vmatpush1.bf16.msra.mxu1 %v7001_v46  ;;  %v7015_v56 = vld [vmem:[%s12411_s2 + $0x3f4] ss:$24 sps:$4 sm:$0xff]  }
 0x1a8   : > { %v8763_v17 = vadd.f32 %v1577_v63, %v12654_v49  ;;  %v1579_v58 = vpop.f32.mrf.mxu0  ;;  %v1692_v19 = vpop.f32.mrf.mxu1  ;;  %2847 = vmatprep.mubr.bf16.mxu0 %v12563_v10  ;;  %2960 = vmatprep.mubr.bf16.mxu1 %v12563_v10  ;;  %v12656_v24 = vld [vmem:[#allocation33_spill] sm:$0xff] }
 0x1a9   : > { %12655 = vst [vmem:[#allocation32_spill] sm:$0xff] %v8765_v3  ;;  %v1161_v46 = vadd.f32 %v8520_v43, %v12656_v24  ;;  %v8784_v59 = vadd.f32 %v1579_v58, %v8226_v55  ;;  %v8786_v63 = vadd.f32 %v1692_v19, %v1159_v21  ;;  %3041 = vmatprep.subr.bf16.mxu0 %v7006_v42  ;;  %v12657_v3 = vrot.slane %v12652_v7, 2  ;;  %v7010_v42 = vld [vmem:[%s12411_s2 + $0x340] ss:$24 sps:$4 sm:$0xff]  }
 0x1aa   : > { %3454 = vmatprep.subr.bf16.mxu1 %v7009_v15  ;;  %v1581_v49 = vpop.f32.mrf.mxu0  ;;  %v1694_v50 = vpop.f32.mrf.mxu1 }
 0x1ab   : > { %v8791_v31 = vsel %vm2643_vm4, %v2645_v29, %v12657_v3  ;;  %v8796_v20 = vadd.f32 %v1581_v49, %v8231_v60  ;;  %v8798_v43 = vadd.f32 %v1694_v50, %v1161_v46  ;;  %3042 = vmatpush1.bf16.msra.mxu0 %v7004_v37  ;;  %3455 = vmatpush1.bf16.msra.mxu1 %v7007_v32  ;;  %v7013_v3 = vld [vmem:[%s12411_s2 + $0x3f0] ss:$24 sps:$4 sm:$0xff]   ;;  %v7018_v32 = vld [vmem:[%s12411_s2 + $0x314] ss:$24 sps:$4 sm:$0xff]   ;;  %v7021_v29 = vld [vmem:[%s12411_s2 + $0x3c4] ss:$24 sps:$4 sm:$0xff]  }
 0x1ac   : > { %v1583_v55 = vpop.f32.mrf.mxu0  ;;  %v1696_v58 = vpop.f32.mrf.mxu1  ;;  %3043 = vmatprep.subr.bf16.mxu0 %v7012_v38  ;;  %3456 = vmatprep.subr.bf16.mxu1 %v7015_v56  ;;  %v1167_v60 = vadd.f32 %v8542_v45, %v12660_v27  ;;  %v12664_v38 = vld [vmem:[#allocation13_spill] sm:$0xff]  ;;  %v7016_v49 = vld [vmem:[%s12411_s2 + $0x310] ss:$24 sps:$4 sm:$0xff]  }
 0x1ad   : > { %12659 = vst [vmem:[#allocation69_spill] sm:$0xff] %v8798_v43  ;;  %v8809_v57 = vadd.f32 %v1583_v55, %v8247_v11  ;;  %v8811_v37 = vadd.f32 %v1696_v58, %v1163_v33  ;;  %v12662_v11 = vld [vmem:[#allocation36_spill] sm:$0xff]  ;;  %v2649_v56 = vrot.slane %v12664_v38, 2  ;;  %v12666_v55 = vld [vmem:[#allocation71_spill] sm:$0xff] }
 0x1ae   : > { %v1587_v15 = vpop.f32.mrf.mxu0  ;;  %v1700_v19 = vpop.f32.mrf.mxu1  ;;  %6595 = vmatmul.mubr.msk.bf16.gmra.mxu0 %vm509_vm1, %v8791_v31  ;;  %6603 = vmatmul.mubr.msk.bf16.gmra.mxu1 %vm509_vm1, %v8791_v31  ;;  %v1169_v33 = vadd.f32 %v8553_v52, %v12662_v11  ;;  %v12665_v52 = vld [vmem:[#allocation37_spill] sm:$0xff] }
 0x1af   : > { %12661 = vst [vmem:[#allocation33_spill] sm:$0xff] %v8811_v37  ;;  %v8826_v45 = vadd.f32 %v1587_v15, %v8262_v51  ;;  %v8828_v21 = vadd.f32 %v1700_v19, %v1167_v60  ;;  %2857 = vmatprep.mubr.bf16.mxu0 %v12563_v10  ;;  %2970 = vmatprep.mubr.bf16.mxu1 %v12563_v10  ;;  %v7019_v51 = vld [vmem:[%s12411_s2 + $0x3c0] ss:$24 sps:$4 sm:$0xff]   ;;  %v12668_v19 = vld [vmem:[#allocation38_spill] sm:$0xff] }
 0x1b0   : > { %v1589_v24 = vpop.f32.mrf.mxu0  ;;  %v1702_v46 = vpop.f32.mrf.mxu1  ;;  %3044 = vmatpush1.bf16.msra.mxu0 %v7010_v42  ;;  %3457 = vmatpush1.bf16.msra.mxu1 %v7013_v3  ;;  %v1171_v50 = vadd.f32 %v8570_v34, %v12665_v52  ;;  %v7024_v42 = vld [vmem:[%s12411_s2 + $0x45c] ss:$24 sps:$4 sm:$0xff]   ;;  %v1173_v34 = vadd.f32 %v8575_v26, %v12668_v19  ;;  %v12676_v19 = vld [vmem:[#allocation41_spill] sm:$0xff] }
 0x1b1   : > { %12663 = vst [vmem:[#allocation34_spill] sm:$0xff] %v8828_v21  ;;  %v8842_v58 = vadd.f32 %v1589_v24, %v12666_v55  ;;  %v8844_v27 = vadd.f32 %v1702_v46, %v1169_v33  ;;  %3045 = vmatprep.subr.bf16.mxu0 %v7018_v32  ;;  %3458 = vmatprep.subr.bf16.mxu1 %v7021_v29  ;;  %v7027_v3 = vld [vmem:[%s12411_s2 + $0x464] ss:$24 sps:$4 sm:$0xff]   ;;  %v12670_v32 = vrot.slane %v12652_v7, 2  ;;  %v12671_v52 = vld [vmem:[#allocation39_spill] sm:$0xff] }
 0x1b2   : > { %v1591_v60 = vpop.f32.mrf.mxu0  ;;  %v1704_v15 = vpop.f32.mrf.mxu1  ;;  %v1177_v55 = vadd.f32 %v8580_v22, %v12671_v52  ;;  %v12734_v37 = vld [vmem:[#allocation57_spill] sm:$0xff] }
 0x1b3   : > { %12667 = vst [vmem:[#allocation35_spill] sm:$0xff] %v8844_v27  ;;  %v8855_v11 = vadd.f32 %v1591_v60, %v8286_v47  ;;  %v8857_v33 = vadd.f32 %v1704_v15, %v1171_v50  ;;  %v8862_v29 = vsel %vm2643_vm4, %v12670_v32, %v2649_v56  ;;  %v12733_v27 = vld [vmem:[#allocation59_spill] sm:$0xff] }
 0x1b4   : > { %v1593_v24 = vpop.f32.mrf.mxu0  ;;  %v1706_v46 = vpop.f32.mrf.mxu1  ;;  %3046 = vmatpush1.bf16.msra.mxu0 %v7016_v49  ;;  %3459 = vmatpush1.bf16.msra.mxu1 %v7019_v51  ;;  %v12673_v49 = vld [vmem:[#allocation40_spill] sm:$0xff]  ;;  %v1223_v21 = vadd.f32 %v8705_v9, %v12733_v27 }
 0x1b5   : > { %12669 = vst [vmem:[#allocation36_spill] sm:$0xff] %v8857_v33  ;;  %v8867_v38 = vadd.f32 %v1593_v24, %v8296_v4  ;;  %v8869_v26 = vadd.f32 %v1706_v46, %v1173_v34  ;;  %3565 = vmatprep.subr.bf16.mxu0 %v7024_v42  ;;  %3678 = vmatprep.subr.bf16.mxu1 %v7027_v3  ;;  %v12675_v42 = vld [vmem:[#allocation16_spill] sm:$0xff]  ;;  %v12678_v46 = vld [vmem:[#allocation42_spill] sm:$0xff]  ;;  %v12732_v33 = vld [vmem:[#allocation9_spill] sm:$0xff] }
 0x1b6   : > { %v1597_v47 = vpop.f32.mrf.mxu0  ;;  %v1710_v50 = vpop.f32.mrf.mxu1  ;;  %6596 = vmatmul.mubr.msk.bf16.gmra.mxu0 %vm509_vm1, %v8862_v29  ;;  %6604 = vmatmul.mubr.msk.bf16.gmra.mxu1 %vm509_vm1, %v8862_v29  ;;  %v1179_v51 = vadd.f32 %v8591_v18, %v12673_v49  ;;  %v2651_v3 = vrot.slane %v12675_v42, 2  ;;  %v1181_v34 = vadd.f32 %v8596_v44, %v12676_v19  ;;  %v1183_v52 = vadd.f32 %v8601_v53, %v12678_v46  ;;  %v12680_v19 = vld [vmem:[#allocation43_spill] sm:$0xff] }
 0x1b7   : > { %12672 = vst [vmem:[#allocation37_spill] sm:$0xff] %v8869_v26  ;;  %v8878_v22 = vadd.f32 %v1597_v47, %v8305_v36  ;;  %v8880_v4 = vadd.f32 %v1710_v50, %v1177_v55  ;;  %2867 = vmatprep.mubr.bf16.mxu0 %v12563_v10  ;;  %2980 = vmatprep.mubr.bf16.mxu1 %v12563_v10 }
 0x1b8   : > { %v1599_v60 = vpop.f32.mrf.mxu0  ;;  %v1712_v15 = vpop.f32.mrf.mxu1  ;;  %v8900_v50 = vsel %vm2643_vm4, %v2649_v56, %v2651_v3 }
 0x1b9   : > { %12674 = vst [vmem:[#allocation71_spill] sm:$0xff] %v8880_v4  ;;  %v8888_v32 = vadd.f32 %v1599_v60, %v8312_v25  ;;  %v8890_v18 = vadd.f32 %v1712_v15, %v1179_v51  ;;  %v1187_v25 = vadd.f32 %v8606_v23, %v12680_v19  ;;  %v12681_v51 = vld [vmem:[#allocation72_spill] sm:$0xff] }
 0x1ba   : > { %v1601_v36 = vpop.f32.mrf.mxu0  ;;  %v1714_v24 = vpop.f32.mrf.mxu1 }
 0x1bb   : > { %12677 = vst [vmem:[#allocation38_spill] sm:$0xff] %v8890_v18  ;;  %v8895_v55 = vadd.f32 %v1601_v36, %v8317_v0  ;;  %v8897_v47 = vadd.f32 %v1714_v24, %v1181_v34  ;;  %v12683_v0 = vld [vmem:[#allocation44_spill] sm:$0xff]  ;;  %v12684_v34 = vld [vmem:[#allocation73_spill] sm:$0xff]  ;;  %v12686_v24 = vld [vmem:[#allocation19_spill] sm:$0xff] }
 0x1bc   : > { %v1603_v49 = vpop.f32.mrf.mxu0  ;;  %v1716_v44 = vpop.f32.mrf.mxu1  ;;  %v1189_v56 = vadd.f32 %v8617_v1, %v12683_v0  ;;  %v2653_v46 = vrot.slane %v12686_v24, 2 }
 0x1bd   : > { %12679 = vst [vmem:[#allocation39_spill] sm:$0xff] %v8897_v47  ;;  %v8905_v60 = vadd.f32 %v1603_v49, %v12681_v51  ;;  %v8907_v15 = vadd.f32 %v1716_v44, %v1183_v52  ;;  %v12687_v44 = vld [vmem:[#allocation45_spill] sm:$0xff]  ;;  %v12688_v51 = vld [vmem:[#allocation74_spill] sm:$0xff] }
 0x1be   : > { %v1607_v42 = vpop.f32.mrf.mxu0  ;;  %v1720_v53 = vpop.f32.mrf.mxu1  ;;  %6597 = vmatmul.mubr.msk.bf16.gmra.mxu0 %vm509_vm1, %v8900_v50  ;;  %6605 = vmatmul.mubr.msk.bf16.gmra.mxu1 %vm509_vm1, %v8900_v50  ;;  %v1191_v19 = vadd.f32 %v8622_v5, %v12687_v44  ;;  %v8938_v24 = vsel %vm2643_vm4, %v2651_v3, %v2653_v46  ;;  %v12693_v44 = vld [vmem:[#allocation47_spill] sm:$0xff]  ;;  %v12696_v3 = vld [vmem:[#allocation48_spill] sm:$0xff] }
 0x1bf   : > { %12682 = vst [vmem:[#allocation40_spill] sm:$0xff] %v8907_v15  ;;  %v8916_v36 = vadd.f32 %v1607_v42, %v12684_v34  ;;  %v8918_v23 = vadd.f32 %v1720_v53, %v1187_v25  ;;  %2877 = vmatprep.mubr.bf16.mxu0 %v12563_v10  ;;  %2990 = vmatprep.mubr.bf16.mxu1 %v12563_v10  ;;  %v12690_v25 = vld [vmem:[#allocation46_spill] sm:$0xff]  ;;  %v12691_v34 = vld [vmem:[#allocation75_spill] sm:$0xff] }
 0x1c0   : > { %v1609_v52 = vpop.f32.mrf.mxu0  ;;  %v1722_v49 = vpop.f32.mrf.mxu1  ;;  %v1193_v53 = vadd.f32 %v8627_v48, %v12690_v25 }
 0x1c1   : > { %12685 = vst [vmem:[#allocation41_spill] sm:$0xff] %v8918_v23  ;;  %v8926_v7 = vadd.f32 %v1609_v52, %v12688_v51  ;;  %v8928_v1 = vadd.f32 %v1722_v49, %v1189_v56  ;;  %v1197_v52 = vadd.f32 %v8632_v6, %v12693_v44  ;;  %v12694_v56 = vld [vmem:[#allocation76_spill] sm:$0xff] }
 0x1c2   : > { %v1611_v42 = vpop.f32.mrf.mxu0  ;;  %v1724_v0 = vpop.f32.mrf.mxu1 }
 0x1c3   : > { %12689 = vst [vmem:[#allocation42_spill] sm:$0xff] %v8928_v1  ;;  %v8933_v23 = vadd.f32 %v1611_v42, %v12691_v34  ;;  %v8935_v15 = vadd.f32 %v1724_v0, %v1191_v19  ;;  %v1199_v19 = vadd.f32 %v8643_v13, %v12696_v3  ;;  %v12697_v42 = vld [vmem:[#allocation77_spill] sm:$0xff] }
 0x1c4   : > { %v1613_v47 = vpop.f32.mrf.mxu0  ;;  %v1726_v5 = vpop.f32.mrf.mxu1 }
 0x1c5   : > { %12692 = vst [vmem:[#allocation43_spill] sm:$0xff] %v8935_v15  ;;  %v8943_v49 = vadd.f32 %v1613_v47, %v12694_v56  ;;  %v8945_v51 = vadd.f32 %v1726_v5, %v1193_v53  ;;  %v12699_v47 = vld [vmem:[#allocation22_spill] sm:$0xff]  ;;  %v12700_v5 = vld [vmem:[#allocation49_spill] sm:$0xff] }
 0x1c6   : > { %v1617_v1 = vpop.f32.mrf.mxu0  ;;  %v1730_v48 = vpop.f32.mrf.mxu1  ;;  %6598 = vmatmul.mubr.msk.bf16.gmra.mxu0 %vm509_vm1, %v8938_v24  ;;  %6606 = vmatmul.mubr.msk.bf16.gmra.mxu1 %vm509_vm1, %v8938_v24  ;;  %v2655_v25 = vrot.slane %v12699_v47, 2  ;;  %v1201_v44 = vadd.f32 %v8648_v14, %v12700_v5  ;;  %v12701_v56 = vld [vmem:[#allocation78_spill] sm:$0xff]  ;;  %v12706_v5 = vld [vmem:[#allocation51_spill] sm:$0xff] }
 0x1c7   : > { %12695 = vst [vmem:[#allocation72_spill] sm:$0xff] %v8945_v51  ;;  %v8954_v0 = vadd.f32 %v1617_v1, %v12697_v42  ;;  %v8956_v6 = vadd.f32 %v1730_v48, %v1197_v52  ;;  %2887 = vmatprep.mubr.bf16.mxu0 %v12563_v10  ;;  %3000 = vmatprep.mubr.bf16.mxu1 %v12563_v10  ;;  %v12703_v52 = vld [vmem:[#allocation50_spill] sm:$0xff]  ;;  %v12704_v42 = vld [vmem:[#allocation79_spill] sm:$0xff] }
 0x1c8   : > { %v1619_v53 = vpop.f32.mrf.mxu0  ;;  %v1732_v34 = vpop.f32.mrf.mxu1  ;;  %v1203_v48 = vadd.f32 %v8653_v8, %v12703_v52  ;;  %v8976_v47 = vsel %vm2643_vm4, %v2653_v46, %v2655_v25  ;;  %v12709_v46 = vld [vmem:[#allocation52_spill] sm:$0xff] }
 0x1c9   : > { %12698 = vst [vmem:[#allocation44_spill] sm:$0xff] %v8956_v6  ;;  %v8964_v51 = vadd.f32 %v1619_v53, %v12701_v56  ;;  %v8966_v13 = vadd.f32 %v1732_v34, %v1199_v19  ;;  %v1207_v53 = vadd.f32 %v8658_v39, %v12706_v5  ;;  %v12707_v19 = vld [vmem:[#allocation80_spill] sm:$0xff] }
 0x1ca   : > { %v1621_v1 = vpop.f32.mrf.mxu0  ;;  %v1734_v3 = vpop.f32.mrf.mxu1 }
 0x1cb   : > { %12702 = vst [vmem:[#allocation73_spill] sm:$0xff] %v8966_v13  ;;  %v8971_v6 = vadd.f32 %v1621_v1, %v12704_v42  ;;  %v8973_v15 = vadd.f32 %v1734_v3, %v1201_v44  ;;  %v1209_v44 = vadd.f32 %v8669_v28, %v12709_v46  ;;  %v12710_v1 = vld [vmem:[#allocation81_spill] sm:$0xff] }
 0x1cc   : > { %v1623_v18 = vpop.f32.mrf.mxu0  ;;  %v1736_v14 = vpop.f32.mrf.mxu1 }
 0x1cd   : > { %12705 = vst [vmem:[#allocation45_spill] sm:$0xff] %v8973_v15  ;;  %v8981_v34 = vadd.f32 %v1623_v18, %v12707_v19  ;;  %v8983_v56 = vadd.f32 %v1736_v14, %v1203_v48  ;;  %v12712_v18 = vld [vmem:[#allocation25_spill] sm:$0xff]  ;;  %v12714_v19 = vld [vmem:[#allocation83_spill] sm:$0xff] }
 0x1ce   : > { %v1627_v13 = vpop.f32.mrf.mxu0  ;;  %v1740_v8 = vpop.f32.mrf.mxu1  ;;  %6599 = vmatmul.mubr.msk.bf16.gmra.mxu0 %vm509_vm1, %v8976_v47  ;;  %6607 = vmatmul.mubr.msk.bf16.gmra.mxu1 %vm509_vm1, %v8976_v47  ;;  %v2657_v52 = vrot.slane %v12712_v18, 2  ;;  %v12713_v14 = vld [vmem:[#allocation53_spill] sm:$0xff] }
 0x1cf   : > { %12708 = vst [vmem:[#allocation74_spill] sm:$0xff] %v8983_v56  ;;  %v8992_v3 = vadd.f32 %v1627_v13, %v12710_v1  ;;  %v8994_v39 = vadd.f32 %v1740_v8, %v1207_v53  ;;  %2897 = vmatprep.mubr.bf16.mxu0 %v12563_v10  ;;  %3010 = vmatprep.mubr.bf16.mxu1 %v12563_v10  ;;  %v12716_v53 = vld [vmem:[#allocation54_spill] sm:$0xff]  ;;  %v12717_v1 = vld [vmem:[#allocation84_spill] sm:$0xff] }
 0x1d0   : > { %v1629_v48 = vpop.f32.mrf.mxu0  ;;  %v1742_v42 = vpop.f32.mrf.mxu1  ;;  %v1211_v5 = vadd.f32 %v8674_v54, %v12713_v14  ;;  %v1213_v8 = vadd.f32 %v8679_v41, %v12716_v53  ;;  %v9014_v18 = vsel %vm2643_vm4, %v2655_v25, %v2657_v52  ;;  %v12719_v14 = vld [vmem:[#allocation55_spill] sm:$0xff]  ;;  %v12722_v25 = vld [vmem:[#allocation56_spill] sm:$0xff] }
 0x1d1   : > { %12711 = vst [vmem:[#allocation46_spill] sm:$0xff] %v8994_v39  ;;  %v9002_v56 = vadd.f32 %v1629_v48, %v12714_v19  ;;  %v9004_v28 = vadd.f32 %v1742_v42, %v1209_v44  ;;  %v1217_v48 = vadd.f32 %v8684_v62, %v12719_v14  ;;  %v12720_v44 = vld [vmem:[#allocation85_spill] sm:$0xff] }
 0x1d2   : > { %v1631_v13 = vpop.f32.mrf.mxu0  ;;  %v1744_v46 = vpop.f32.mrf.mxu1 }
 0x1d3   : > { %12715 = vst [vmem:[#allocation75_spill] sm:$0xff] %v9004_v28  ;;  %v9009_v39 = vadd.f32 %v1631_v13, %v12717_v1  ;;  %v9011_v15 = vadd.f32 %v1744_v46, %v1211_v5  ;;  %v1219_v5 = vadd.f32 %v8695_v2, %v12722_v25  ;;  %v12723_v13 = vld [vmem:[#allocation86_spill] sm:$0xff] }
 0x1d4   : > { %v1633_v4 = vpop.f32.mrf.mxu0  ;;  %v1746_v54 = vpop.f32.mrf.mxu1 }
 0x1d5   : > { %12718 = vst [vmem:[#allocation47_spill] sm:$0xff] %v9011_v15  ;;  %v9019_v42 = vadd.f32 %v1633_v4, %v12720_v44  ;;  %v9021_v19 = vadd.f32 %v1746_v54, %v1213_v8  ;;  %v12725_v4 = vld [vmem:[#allocation28_spill] sm:$0xff]  ;;  %v12726_v54 = vld [vmem:[#allocation58_spill] sm:$0xff]  ;;  %v12727_v44 = vld [vmem:[#allocation87_spill] sm:$0xff] }
 0x1d6   : > { %v1637_v28 = vpop.f32.mrf.mxu0  ;;  %v1750_v41 = vpop.f32.mrf.mxu1  ;;  %6600 = vmatmul.mubr.msk.bf16.gmra.mxu0 %vm509_vm1, %v9014_v18  ;;  %6608 = vmatmul.mubr.msk.bf16.gmra.mxu1 %vm509_vm1, %v9014_v18  ;;  %v2659_v53 = vrot.slane %v12725_v4, 2  ;;  %v1221_v14 = vadd.f32 %v8700_v16, %v12726_v54  ;;  %v12731_v15 = vld [vmem:[#allocation11_spill] sm:$0xff]  ;;  %v3269_v4 = vrot.slane %v12732_v33, 3 }
 0x1d7   : > { %12721 = vst [vmem:[#allocation76_spill] sm:$0xff] %v9021_v19  ;;  %v9030_v46 = vadd.f32 %v1637_v28, %v12723_v13  ;;  %v9032_v62 = vadd.f32 %v1750_v41, %v1217_v48  ;;  %2907 = vmatprep.mubr.bf16.mxu0 %v12563_v10  ;;  %3020 = vmatprep.mubr.bf16.mxu1 %v12563_v10  ;;  %v12729_v48 = vld [vmem:[#allocation7_spill] sm:$0xff]  ;;  %v12730_v13 = vld [vmem:[#allocation8_spill] sm:$0xff]  ;;  %v3268_v26 = vrot.slane %v12731_v15, 2 }
 0x1d8   : > { %v1639_v8 = vpop.f32.mrf.mxu0  ;;  %v1752_v1 = vpop.f32.mrf.mxu1  ;;  %v3265_v41 = vrot.slane %v12729_v48, 2  ;;  %v12737_v48 = vld [vmem:[#allocation88_spill] sm:$0xff] }
 0x1d9   : > { %12724 = vst [vmem:[#allocation48_spill] sm:$0xff] %v9032_v62  ;;  %v9040_v19 = vadd.f32 %v1639_v8, %v12727_v44  ;;  %v9042_v2 = vadd.f32 %v1752_v1, %v1219_v5  ;;  %v3266_v62 = vrot.slane %v12730_v13, 3  ;;  %v9056_v5 = vsel %vm2643_vm4, %v2657_v52, %v2659_v53  ;;  %v12736_v44 = vld [vmem:[#allocation60_spill] sm:$0xff]  ;;  %v12739_v52 = vld [vmem:[#allocation62_spill] sm:$0xff] }
 0x1da   : > { %v1641_v28 = vpop.f32.mrf.mxu0  ;;  %v1754_v25 = vpop.f32.mrf.mxu1  ;;  %v1227_v13 = vadd.f32 %v8710_v30, %v12736_v44  ;;  %v3270_v27 = vor.u32 %v3269_v4, %v3268_v26  ;;  %v1229_v53 = vadd.f32 %v8723_v61, %v12739_v52  ;;  %v12746_v44 = vld [vmem:[#allocation67_spill] sm:$0xff] }
 0x1db   : > { %12728 = vst [vmem:[#allocation77_spill] sm:$0xff] %v9042_v2  ;;  %v9051_v16 = vadd.f32 %v1641_v28, %v12734_v37  ;;  %v9053_v8 = vadd.f32 %v1754_v25, %v1221_v14  ;;  %v3267_v37 = vor.u32 %v3266_v62, %v3265_v41  ;;  %v12740_v14 = vld [vmem:[#allocation89_spill] sm:$0xff]  ;;  %v12747_v52 = vld [vmem:[#allocation63_spill] sm:$0xff] }
 0x1dc   : > { %v1643_v1 = vpop.f32.mrf.mxu0  ;;  %v1756_v54 = vpop.f32.mrf.mxu1  ;;  %v12743_v62 = vld [vmem:[#allocation61_spill] sm:$0xff] }
 0x1dd   : > { %12735 = vst [vmem:[#allocation49_spill] sm:$0xff] %v9053_v8  ;;  %v9061_v15 = vadd.f32 %v1643_v1, %v12737_v48  ;;  %v9063_v33 = vadd.f32 %v1756_v54, %v1223_v21  ;;  %v12742_v48 = vld [vmem:[#allocation64_spill] sm:$0xff]  ;;  %v9086_v41 = vsel %vm3264_vm5, %v3267_v37, %v3270_v27 }
 0x1de   : > { %v1647_v2 = vpop.f32.mrf.mxu0  ;;  %v1760_v9 = vpop.f32.mrf.mxu1  ;;  %6601 = vmatmul.mubr.msk.bf16.gmra.mxu0 %vm509_vm1, %v9056_v5  ;;  %6609 = vmatmul.mubr.msk.bf16.gmra.mxu1 %vm509_vm1, %v9056_v5  ;;  %v1231_v1 = vadd.f32 %v8728_v12, %v12742_v48  ;;  %v7022_v12 = vld [vmem:[%s12411_s2 + $0x458] ss:$24 sps:$4 sm:$0xff]  }
 0x1df   : > { %12738 = vst [vmem:[#allocation78_spill] sm:$0xff] %v9063_v33  ;;  %v9072_v30 = vadd.f32 %v1647_v2, %v12740_v14  ;;  %v9074_v28 = vadd.f32 %v1760_v9, %v1227_v13  ;;  %3063 = vmatprep.mubr.bf16.mxu0 %v12563_v10  ;;  %3476 = vmatprep.mubr.bf16.mxu1 %v12563_v10  ;;  %v12745_v13 = vld [vmem:[#allocation14_spill] sm:$0xff]  ;;  %v12749_v37 = vld [vmem:[#allocation12_spill] sm:$0xff] }
 0x1e0   : > { %v1649_v21 = vpop.f32.mrf.mxu0  ;;  %v1762_v25 = vpop.f32.mrf.mxu1  ;;  %v3272_v54 = vrot.slane %v12745_v13, 2  ;;  %v1233_v9 = vadd.f32 %v8742_v40, %v12746_v44  ;;  %v12757_v33 = vld [vmem:[#allocation70_spill] sm:$0xff] }
 0x1e1   : > { %12741 = vst [vmem:[#allocation50_spill] sm:$0xff] %v9074_v28  ;;  %v9081_v26 = vadd.f32 %v1649_v21, %v12743_v62  ;;  %v9083_v4 = vadd.f32 %v1762_v25, %v1229_v53  ;;  %v7025_v53 = vld [vmem:[%s12411_s2 + $0x460] ss:$24 sps:$4 sm:$0xff]   ;;  %v3273_v21 = vrot.slane %v12749_v37, 3  ;;  %v12750_v62 = vld [vmem:[#allocation66_spill] sm:$0xff] }
 0x1e2   : > { %v1651_v61 = vpop.f32.mrf.mxu0  ;;  %v1764_v2 = vpop.f32.mrf.mxu1 }
 0x1e3   : > { %12744 = vst [vmem:[#allocation79_spill] sm:$0xff] %v9083_v4  ;;  %v9092_v14 = vadd.f32 %v1651_v61, %v12747_v52  ;;  %v9094_v28 = vadd.f32 %v1764_v2, %v1231_v1  ;;  %v7030_v1 = vld [vmem:[%s12411_s2 + $0x42c] ss:$24 sps:$4 sm:$0xff]  }
 0x1e4   : > { %v1653_v25 = vpop.f32.mrf.mxu0  ;;  %v1766_v48 = vpop.f32.mrf.mxu1  ;;  %v7033_v61 = vld [vmem:[%s12411_s2 + $0x434] ss:$24 sps:$4 sm:$0xff]   ;;  %v12752_v52 = vld [vmem:[#allocation65_spill] sm:$0xff] }
 0x1e5   : > { %12748 = vst [vmem:[#allocation51_spill] sm:$0xff] %v9094_v28  ;;  %v9104_v13 = vadd.f32 %v1653_v25, %v12750_v62  ;;  %v9106_v40 = vadd.f32 %v1766_v48, %v1233_v9  ;;  %v3274_v48 = vor.u32 %v3273_v21, %v3272_v54  ;;  %v7028_v62 = vld [vmem:[%s12411_s2 + $0x428] ss:$24 sps:$4 sm:$0xff]   ;;  %v7039_v54 = vld [vmem:[%s12411_s2 + $0x404] ss:$24 sps:$4 sm:$0xff]   ;;  %v12756_v28 = vld [vmem:[#allocation15_spill] sm:$0xff] }
 0x1e6   : > { %v1803_v2 = vpop.f32.mrf.mxu0  ;;  %v2218_v44 = vpop.f32.mrf.mxu1  ;;  %6610 = vmatmul.mubr.msk.bf16.vlgmr.msra.gmra.mxu0 %vm509_vm1, %v8734_v35  ;;  %6642 = vmatmul.mubr.msk.bf16.vlgmr.msra.gmra.mxu1 %vm509_vm1, %v9086_v41  ;;  %v7031_v35 = vld [vmem:[%s12411_s2 + $0x430] ss:$24 sps:$4 sm:$0xff]   ;;  %v3277_v4 = vrot.slane %v12756_v28, 3 }
 0x1e7   : > { %12751 = vst [vmem:[#allocation80_spill] sm:$0xff] %v9106_v40  ;;  %v9119_v25 = vadd.f32 %v1803_v2, %v12752_v52  ;;  %v9122_v9 = vadd.f32 %v2218_v44, %v8763_v17  ;;  %3566 = vmatpush1.bf16.msra.mxu0 %v7022_v12  ;;  %3679 = vmatpush1.bf16.msra.mxu1 %v7025_v53  ;;  %v7036_v17 = vld [vmem:[%s12411_s2 + $0x3fc] ss:$24 sps:$4 sm:$0xff]   ;;  %v12755_v52 = vld [vmem:[#allocation17_spill] sm:$0xff] }
 0x1e8   : > { %v1805_v37 = vpop.f32.mrf.mxu0  ;;  %v2220_v40 = vpop.f32.mrf.mxu1  ;;  %3073 = vmatprep.mubr.bf16.mxu0 %v12563_v10  ;;  %3486 = vmatprep.mubr.bf16.mxu1 %v12563_v10  ;;  %v12754_v12 = vld [vmem:[#allocation68_spill] sm:$0xff] }
 0x1e9   : > { %12753 = vst [vmem:[#allocation52_spill] sm:$0xff] %v9122_v9  ;;  %v9139_v53 = vadd.f32 %v1805_v37, %v12754_v12  ;;  %v9142_v21 = vadd.f32 %v2220_v40, %v8784_v59  ;;  %3567 = vmatprep.subr.bf16.mxu0 %v7030_v1  ;;  %3680 = vmatprep.subr.bf16.mxu1 %v7033_v61  ;;  %v3276_v9 = vrot.slane %v12755_v52, 2  ;;  %v7034_v1 = vld [vmem:[%s12411_s2 + $0x3f8] ss:$24 sps:$4 sm:$0xff]   ;;  %v12758_v61 = vld [vmem:[#allocation90_spill] sm:$0xff] }
 0x1ea   : > { %v1807_v2 = vpop.f32.mrf.mxu0  ;;  %v2222_v44 = vpop.f32.mrf.mxu1  ;;  %v9153_v37 = vsel %vm3264_vm5, %v3270_v27, %v3274_v48 }
 0x1eb   : > { %v9147_v8 = vadd.f32 %v1807_v2, %v12757_v33  ;;  %v9150_v43 = vadd.f32 %v2222_v44, %v8796_v20  ;;  %3568 = vmatpush1.bf16.msra.mxu0 %v7028_v62  ;;  %3681 = vmatpush1.bf16.msra.mxu1 %v7031_v35  ;;  %v7037_v33 = vld [vmem:[%s12411_s2 + $0x400] ss:$24 sps:$4 sm:$0xff]   ;;  %v7042_v62 = vld [vmem:[%s12411_s2 + $0x3cc] ss:$24 sps:$4 sm:$0xff]   ;;  %v12760_v2 = vld [vmem:[#allocation91_spill] sm:$0xff] }
 0x1ec   : > { %v1809_v59 = vpop.f32.mrf.mxu0  ;;  %v2224_v40 = vpop.f32.mrf.mxu1  ;;  %3569 = vmatprep.subr.bf16.mxu0 %v7036_v17  ;;  %3682 = vmatprep.subr.bf16.mxu1 %v7039_v54  ;;  %v7045_v35 = vld [vmem:[%s12411_s2 + $0x3d4] ss:$24 sps:$4 sm:$0xff]   ;;  %v3278_v54 = vor.u32 %v3277_v4, %v3276_v9  ;;  %v7043_v4 = vld [vmem:[%s12411_s2 + $0x3d0] ss:$24 sps:$4 sm:$0xff]   ;;  %v12762_v9 = vld [vmem:[#allocation92_spill] sm:$0xff] }
 0x1ed   : > { %v9162_v20 = vadd.f32 %v1809_v59, %v12758_v61  ;;  %v9165_v27 = vadd.f32 %v2224_v40, %v8809_v57 }
 0x1ee   : > { %v1813_v17 = vpop.f32.mrf.mxu0  ;;  %v2228_v12 = vpop.f32.mrf.mxu1  ;;  %6611 = vmatmul.mubr.msk.bf16.gmra.mxu0 %vm509_vm1, %v8791_v31  ;;  %6643 = vmatmul.mubr.msk.bf16.gmra.mxu1 %vm509_vm1, %v9153_v37  ;;  %v7040_v31 = vld [vmem:[%s12411_s2 + $0x3c8] ss:$24 sps:$4 sm:$0xff]  }
 0x1ef   : > { %12759 = vst [vmem:[#allocation81_spill] sm:$0xff] %v9165_v27  ;;  %v9178_v57 = vadd.f32 %v1813_v17, %v12760_v2  ;;  %v9181_v44 = vadd.f32 %v2228_v12, %v8826_v45  ;;  %3083 = vmatprep.mubr.bf16.mxu0 %v12563_v10  ;;  %3496 = vmatprep.mubr.bf16.mxu1 %v12563_v10 }
 0x1f0   : > { %v1815_v59 = vpop.f32.mrf.mxu0  ;;  %v2230_v40 = vpop.f32.mrf.mxu1  ;;  %3570 = vmatpush1.bf16.msra.mxu0 %v7034_v1  ;;  %3683 = vmatpush1.bf16.msra.mxu1 %v7037_v33  ;;  %v7048_v1 = vld [vmem:[%s12411_s2 + $0x514] ss:$24 sps:$4 sm:$0xff]   ;;  %v9204_v2 = vsel %vm3264_vm5, %v3274_v48, %v3278_v54 }
 0x1f1   : > { %12761 = vst [vmem:[#allocation53_spill] sm:$0xff] %v9181_v44  ;;  %v9192_v61 = vadd.f32 %v1815_v59, %v12762_v9  ;;  %v9195_v45 = vadd.f32 %v2230_v40, %v8842_v58  ;;  %3571 = vmatprep.subr.bf16.mxu0 %v7042_v62  ;;  %3684 = vmatprep.subr.bf16.mxu1 %v7045_v35  ;;  %v7051_v33 = vld [vmem:[%s12411_s2 + $0x51c] ss:$24 sps:$4 sm:$0xff]   ;;  %v12764_v59 = vld [vmem:[#allocation93_spill] sm:$0xff]  ;;  %v12766_v40 = vld [vmem:[#allocation18_spill] sm:$0xff] }
 0x1f2   : > { %v1817_v17 = vpop.f32.mrf.mxu0  ;;  %v2232_v12 = vpop.f32.mrf.mxu1  ;;  %v12765_v62 = vld [vmem:[#allocation20_spill] sm:$0xff]  ;;  %v3281_v28 = vrot.slane %v12766_v40, 3  ;;  %v12767_v44 = vld [vmem:[#allocation94_spill] sm:$0xff]  ;;  %v12773_v40 = vld [vmem:[#allocation21_spill] sm:$0xff] }
 0x1f3   : > { %12763 = vst [vmem:[#allocation83_spill] sm:$0xff] %v9195_v45  ;;  %v9207_v9 = vadd.f32 %v1817_v17, %v12764_v59  ;;  %v9210_v58 = vadd.f32 %v2232_v12, %v8855_v11  ;;  %v3280_v35 = vrot.slane %v12765_v62, 2  ;;  %v12768_v11 = vld [vmem:[#allocation95_spill] sm:$0xff] }
 0x1f4   : > { %v1819_v52 = vpop.f32.mrf.mxu0  ;;  %v2234_v45 = vpop.f32.mrf.mxu1  ;;  %3572 = vmatpush1.bf16.msra.mxu0 %v7040_v31  ;;  %3685 = vmatpush1.bf16.msra.mxu1 %v7043_v4  ;;  %v12770_v4 = vld [vmem:[#allocation96_spill] sm:$0xff] }
 0x1f5   : > { %v9215_v27 = vadd.f32 %v1819_v52, %v12767_v44  ;;  %v9218_v48 = vadd.f32 %v2234_v45, %v8867_v38  ;;  %4073 = vmatprep.subr.bf16.mxu0 %v7048_v1  ;;  %4186 = vmatprep.subr.bf16.mxu1 %v7051_v33  ;;  %v3282_v38 = vor.u32 %v3281_v28, %v3280_v35 }
 0x1f6   : > { %v1823_v17 = vpop.f32.mrf.mxu0  ;;  %v2238_v59 = vpop.f32.mrf.mxu1  ;;  %6612 = vmatmul.mubr.msk.bf16.gmra.mxu0 %vm509_vm1, %v8862_v29  ;;  %6644 = vmatmul.mubr.msk.bf16.gmra.mxu1 %vm509_vm1, %v9204_v2 }
 0x1f7   : > { %v9225_v12 = vadd.f32 %v1823_v17, %v12768_v11  ;;  %v9228_v31 = vadd.f32 %v2238_v59, %v8878_v22  ;;  %3093 = vmatprep.mubr.bf16.mxu0 %v12563_v10  ;;  %3506 = vmatprep.mubr.bf16.mxu1 %v12563_v10  ;;  %v12772_v17 = vld [vmem:[#allocation23_spill] sm:$0xff]  ;;  %v3285_v22 = vrot.slane %v12773_v40, 3  ;;  %v12774_v59 = vld [vmem:[#allocation97_spill] sm:$0xff]  ;;  %v9247_v28 = vsel %vm3264_vm5, %v3278_v54, %v3282_v38 }
 0x1f8   : > { %v1825_v52 = vpop.f32.mrf.mxu0  ;;  %v2240_v44 = vpop.f32.mrf.mxu1  ;;  %v3284_v11 = vrot.slane %v12772_v17, 2 }
 0x1f9   : > { %12769 = vst [vmem:[#allocation54_spill] sm:$0xff] %v9228_v31  ;;  %v9233_v45 = vadd.f32 %v1825_v52, %v12770_v4  ;;  %v9236_v29 = vadd.f32 %v2240_v44, %v8888_v32  ;;  %v12776_v4 = vld [vmem:[#allocation98_spill] sm:$0xff] }
 0x1fa   : > { %v1827_v1 = vpop.f32.mrf.mxu0  ;;  %v2242_v33 = vpop.f32.mrf.mxu1 }
 0x1fb   : > { %12771 = vst [vmem:[#allocation84_spill] sm:$0xff] %v9236_v29  ;;  %v9241_v62 = vadd.f32 %v1827_v1, %v12774_v59  ;;  %v9244_v31 = vadd.f32 %v2242_v33, %v8895_v55  ;;  %v3286_v55 = vor.u32 %v3285_v22, %v3284_v11  ;;  %v12778_v1 = vld [vmem:[#allocation99_spill] sm:$0xff]  ;;  %v12782_v22 = vld [vmem:[#allocation101_spill] sm:$0xff] }
 0x1fc   : > { %v1829_v35 = vpop.f32.mrf.mxu0  ;;  %v2244_v52 = vpop.f32.mrf.mxu1 }
 0x1fd   : > { %12775 = vst [vmem:[#allocation55_spill] sm:$0xff] %v9244_v31  ;;  %v9250_v32 = vadd.f32 %v1829_v35, %v12776_v4  ;;  %v9253_v44 = vadd.f32 %v2244_v52, %v8905_v60  ;;  %v12780_v35 = vld [vmem:[#allocation100_spill] sm:$0xff]  ;;  %v12786_v31 = vld [vmem:[#allocation102_spill] sm:$0xff] }
 0x1fe   : > { %v1833_v17 = vpop.f32.mrf.mxu0  ;;  %v2248_v29 = vpop.f32.mrf.mxu1  ;;  %6613 = vmatmul.mubr.msk.bf16.gmra.mxu0 %vm509_vm1, %v8900_v50  ;;  %6645 = vmatmul.mubr.msk.bf16.gmra.mxu1 %vm509_vm1, %v9247_v28 }
 0x1ff   : > { %12777 = vst [vmem:[#allocation85_spill] sm:$0xff] %v9253_v44  ;;  %v9260_v54 = vadd.f32 %v1833_v17, %v12778_v1  ;;  %v9263_v33 = vadd.f32 %v2248_v29, %v8916_v36  ;;  %3103 = vmatprep.mubr.bf16.mxu0 %v12563_v10  ;;  %3516 = vmatprep.mubr.bf16.mxu1 %v12563_v10  ;;  %v12784_v1 = vld [vmem:[#allocation26_spill] sm:$0xff] }
 0x200   : > { %v1835_v60 = vpop.f32.mrf.mxu0  ;;  %v2250_v59 = vpop.f32.mrf.mxu1  ;;  %v9274_v17 = vsel %vm3264_vm5, %v3282_v38, %v3286_v55  ;;  %v3288_v40 = vrot.slane %v12784_v1, 2 }
 0x201   : > { %12779 = vst [vmem:[#allocation56_spill] sm:$0xff] %v9263_v33  ;;  %v9268_v52 = vadd.f32 %v1835_v60, %v12780_v35  ;;  %v9271_v50 = vadd.f32 %v2250_v59, %v8926_v7  ;;  %v12785_v33 = vld [vmem:[#allocation24_spill] sm:$0xff] }
 0x202   : > { %v1837_v4 = vpop.f32.mrf.mxu0  ;;  %v2252_v11 = vpop.f32.mrf.mxu1  ;;  %v3289_v44 = vrot.slane %v12785_v33, 3 }
 0x203   : > { %12781 = vst [vmem:[#allocation86_spill] sm:$0xff] %v9271_v50  ;;  %v9277_v36 = vadd.f32 %v1837_v4, %v12782_v22  ;;  %v9280_v29 = vadd.f32 %v2252_v11, %v8933_v23  ;;  %v12788_v23 = vld [vmem:[#allocation103_spill] sm:$0xff] }
 0x204   : > { %v1839_v60 = vpop.f32.mrf.mxu0  ;;  %v2254_v35 = vpop.f32.mrf.mxu1 }
 0x205   : > { %12783 = vst [vmem:[#allocation58_spill] sm:$0xff] %v9280_v29  ;;  %v9285_v7 = vadd.f32 %v1839_v60, %v12786_v31  ;;  %v9288_v59 = vadd.f32 %v2254_v35, %v8943_v49  ;;  %v3290_v49 = vor.u32 %v3289_v44, %v3288_v40  ;;  %v12790_v60 = vld [vmem:[#allocation104_spill] sm:$0xff] }
 0x206   : > { %v1843_v38 = vpop.f32.mrf.mxu0  ;;  %v2258_v50 = vpop.f32.mrf.mxu1  ;;  %6614 = vmatmul.mubr.msk.bf16.gmra.mxu0 %vm509_vm1, %v8938_v24  ;;  %6646 = vmatmul.mubr.msk.bf16.gmra.mxu1 %vm509_vm1, %v9274_v17 }
 0x207   : > { %12787 = vst [vmem:[#allocation87_spill] sm:$0xff] %v9288_v59  ;;  %v9295_v4 = vadd.f32 %v1843_v38, %v12788_v23  ;;  %v9298_v11 = vadd.f32 %v2258_v50, %v8954_v0  ;;  %3113 = vmatprep.mubr.bf16.mxu0 %v12563_v10  ;;  %3526 = vmatprep.mubr.bf16.mxu1 %v12563_v10  ;;  %v12792_v38 = vld [vmem:[#allocation29_spill] sm:$0xff]  ;;  %v12793_v59 = vld [vmem:[#allocation27_spill] sm:$0xff] }
 0x208   : > { %v1845_v31 = vpop.f32.mrf.mxu0  ;;  %v2260_v22 = vpop.f32.mrf.mxu1  ;;  %v3292_v23 = vrot.slane %v12792_v38, 2  ;;  %v3293_v0 = vrot.slane %v12793_v59, 3  ;;  %v12794_v50 = vld [vmem:[#allocation105_spill] sm:$0xff]  ;;  %v9317_v40 = vsel %vm3264_vm5, %v3286_v55, %v3290_v49 }
 0x209   : > { %12789 = vst [vmem:[#allocation59_spill] sm:$0xff] %v9298_v11  ;;  %v9303_v35 = vadd.f32 %v1845_v31, %v12790_v60  ;;  %v9306_v24 = vadd.f32 %v2260_v22, %v8964_v51  ;;  %v12796_v60 = vld [vmem:[#allocation106_spill] sm:$0xff] }
 0x20a   : > { %v1847_v33 = vpop.f32.mrf.mxu0  ;;  %v2262_v1 = vpop.f32.mrf.mxu1 }
 0x20b   : > { %12791 = vst [vmem:[#allocation57_spill] sm:$0xff] %v9306_v24  ;;  %v9311_v11 = vadd.f32 %v1847_v33, %v12794_v50  ;;  %v9314_v29 = vadd.f32 %v2262_v1, %v8971_v6  ;;  %v3294_v6 = vor.u32 %v3293_v0, %v3292_v23  ;;  %v12798_v33 = vld [vmem:[#allocation107_spill] sm:$0xff]  ;;  %v12802_v0 = vld [vmem:[#allocation109_spill] sm:$0xff] }
 0x20c   : > { %v1849_v44 = vpop.f32.mrf.mxu0  ;;  %v2264_v31 = vpop.f32.mrf.mxu1 }
 0x20d   : > { %12795 = vst [vmem:[#allocation60_spill] sm:$0xff] %v9314_v29  ;;  %v9320_v51 = vadd.f32 %v1849_v44, %v12796_v60  ;;  %v9323_v22 = vadd.f32 %v2264_v31, %v8981_v34  ;;  %v12800_v44 = vld [vmem:[#allocation108_spill] sm:$0xff]  ;;  %v12805_v29 = vld [vmem:[#allocation110_spill] sm:$0xff] }
 0x20e   : > { %v1853_v38 = vpop.f32.mrf.mxu0  ;;  %v2268_v24 = vpop.f32.mrf.mxu1  ;;  %6615 = vmatmul.mubr.msk.bf16.gmra.mxu0 %vm509_vm1, %v8976_v47  ;;  %6647 = vmatmul.mubr.msk.bf16.gmra.mxu1 %vm509_vm1, %v9317_v40 }
 0x20f   : > { %12797 = vst [vmem:[#allocation88_spill] sm:$0xff] %v9323_v22  ;;  %v9330_v55 = vadd.f32 %v1853_v38, %v12798_v33  ;;  %v9333_v1 = vadd.f32 %v2268_v24, %v8992_v3  ;;  %3123 = vmatprep.mubr.bf16.mxu0 %v12563_v10  ;;  %3536 = vmatprep.mubr.bf16.mxu1 %v12563_v10  ;;  %v12803_v33 = vld [vmem:[#allocation82_spill] sm:$0xff] }
 0x210   : > { %v1855_v34 = vpop.f32.mrf.mxu0  ;;  %v2270_v50 = vpop.f32.mrf.mxu1  ;;  %v9344_v38 = vsel %vm3264_vm5, %v3290_v49, %v3294_v6  ;;  %v3296_v59 = vrot.slane %v12803_v33, 2 }
 0x211   : > { %12799 = vst [vmem:[#allocation62_spill] sm:$0xff] %v9333_v1  ;;  %v9338_v31 = vadd.f32 %v1855_v34, %v12800_v44  ;;  %v9341_v47 = vadd.f32 %v2270_v50, %v9002_v56  ;;  %v12804_v1 = vld [vmem:[#allocation30_spill] sm:$0xff] }
 0x212   : > { %v1857_v60 = vpop.f32.mrf.mxu0  ;;  %v2272_v23 = vpop.f32.mrf.mxu1  ;;  %v3297_v22 = vrot.slane %v12804_v1, 3 }
 0x213   : > { %12801 = vst [vmem:[#allocation89_spill] sm:$0xff] %v9341_v47  ;;  %v9347_v3 = vadd.f32 %v1857_v60, %v12802_v0  ;;  %v9350_v24 = vadd.f32 %v2272_v23, %v9009_v39  ;;  %v12807_v39 = vld [vmem:[#allocation111_spill] sm:$0xff] }
 0x214   : > { %v1859_v34 = vpop.f32.mrf.mxu0  ;;  %v2274_v44 = vpop.f32.mrf.mxu1 }
 0x215   : > { %v9355_v56 = vadd.f32 %v1859_v34, %v12805_v29  ;;  %v9358_v50 = vadd.f32 %v2274_v44, %v9019_v42  ;;  %v3298_v42 = vor.u32 %v3297_v22, %v3296_v59  ;;  %v12809_v34 = vld [vmem:[#allocation112_spill] sm:$0xff] }
 0x216   : > { %v1863_v49 = vpop.f32.mrf.mxu0  ;;  %v2278_v47 = vpop.f32.mrf.mxu1  ;;  %6616 = vmatmul.mubr.msk.bf16.gmra.mxu0 %vm509_vm1, %v9014_v18  ;;  %6648 = vmatmul.mubr.msk.bf16.gmra.mxu1 %vm509_vm1, %v9344_v38 }
 0x217   : > { %12806 = vst [vmem:[#allocation64_spill] sm:$0xff] %v9358_v50  ;;  %v9365_v60 = vadd.f32 %v1863_v49, %v12807_v39  ;;  %v9368_v23 = vadd.f32 %v2278_v47, %v9030_v46  ;;  %3133 = vmatprep.mubr.bf16.mxu0 %v12563_v10  ;;  %3546 = vmatprep.mubr.bf16.mxu1 %v12563_v10  ;;  %v12810_v49 = vld [vmem:[#allocation113_spill] sm:$0xff] }
 0x218   : > { %v1865_v29 = vpop.f32.mrf.mxu0  ;;  %v2280_v0 = vpop.f32.mrf.mxu1  ;;  %v9385_v47 = vsel %vm3264_vm5, %v3294_v6, %v3298_v42 }
 0x219   : > { %12808 = vst [vmem:[#allocation61_spill] sm:$0xff] %v9368_v23  ;;  %v9373_v44 = vadd.f32 %v1865_v29, %v12809_v34  ;;  %v9376_v18 = vadd.f32 %v2280_v0, %v9040_v19  ;;  %v12812_v23 = vld [vmem:[#allocation114_spill] sm:$0xff] }
 0x21a   : > { %v1867_v1 = vpop.f32.mrf.mxu0  ;;  %v2282_v33 = vpop.f32.mrf.mxu1 }
 0x21b   : > { %v9379_v39 = vadd.f32 %v1867_v1, %v12810_v49  ;;  %v9382_v46 = vadd.f32 %v2282_v33, %v9051_v16  ;;  %v12814_v16 = vld [vmem:[#allocation115_spill] sm:$0xff] }
 0x21c   : > { %v1869_v59 = vpop.f32.mrf.mxu0  ;;  %v2284_v22 = vpop.f32.mrf.mxu1 }
 0x21d   : > { %12811 = vst [vmem:[#allocation67_spill] sm:$0xff] %v9382_v46  ;;  %v9388_v50 = vadd.f32 %v1869_v59, %v12812_v23  ;;  %v9391_v29 = vadd.f32 %v2284_v22, %v9061_v15  ;;  %v12816_v23 = vld [vmem:[#allocation116_spill] sm:$0xff]  ;;  %v12818_v59 = vld [vmem:[#allocation117_spill] sm:$0xff] }
 0x21e   : > { %v1873_v19 = vpop.f32.mrf.mxu0  ;;  %v2288_v0 = vpop.f32.mrf.mxu1  ;;  %6617 = vmatmul.mubr.msk.bf16.gmra.mxu0 %vm509_vm1, %v9056_v5  ;;  %6649 = vmatmul.mubr.msk.bf16.gmra.mxu1 %vm509_vm1, %v9385_v47 }
 0x21f   : > { %12813 = vst [vmem:[#allocation63_spill] sm:$0xff] %v9391_v29  ;;  %v9398_v1 = vadd.f32 %v1873_v19, %v12814_v16  ;;  %v9401_v6 = vadd.f32 %v2288_v0, %v9072_v30  ;;  %3589 = vmatprep.mubr.bf16.mxu0 %v12563_v10  ;;  %3702 = vmatprep.mubr.bf16.mxu1 %v12563_v10  ;;  %v7046_v19 = vld [vmem:[%s12411_s2 + $0x510] ss:$24 sps:$4 sm:$0xff]  }
 0x220   : > { %v1875_v15 = vpop.f32.mrf.mxu0  ;;  %v2290_v33 = vpop.f32.mrf.mxu1  ;;  %v7049_v0 = vld [vmem:[%s12411_s2 + $0x518] ss:$24 sps:$4 sm:$0xff]  }
 0x221   : > { %12815 = vst [vmem:[#allocation66_spill] sm:$0xff] %v9401_v6  ;;  %v9406_v42 = vadd.f32 %v1875_v15, %v12816_v23  ;;  %v9409_v5 = vadd.f32 %v2290_v33, %v9081_v26  ;;  %v12820_v26 = vld [vmem:[#allocation31_spill] sm:$0xff] }
 0x222   : > { %v1877_v34 = vpop.f32.mrf.mxu0  ;;  %v2292_v49 = vpop.f32.mrf.mxu1 }
 0x223   : > { %12817 = vst [vmem:[#allocation65_spill] sm:$0xff] %v9409_v5  ;;  %v9412_v22 = vadd.f32 %v1877_v34, %v12818_v59  ;;  %v9415_v30 = vadd.f32 %v2292_v49, %v9092_v14  ;;  %v7054_v14 = vld [vmem:[%s12411_s2 + $0x4e4] ss:$24 sps:$4 sm:$0xff]  }
 0x224   : > { %v1879_v16 = vpop.f32.mrf.mxu0  ;;  %v2294_v15 = vpop.f32.mrf.mxu1  ;;  %v7057_v34 = vld [vmem:[%s12411_s2 + $0x4ec] ss:$24 sps:$4 sm:$0xff]  }
 0x225   : > { %12819 = vst [vmem:[#allocation68_spill] sm:$0xff] %v9415_v30  ;;  %v9424_v33 = vadd.f32 %v1879_v16, %v12820_v26  ;;  %v9427_v23 = vadd.f32 %v2294_v15, %v9104_v13  ;;  %v12822_v16 = vld [vmem:[#allocation32_spill] sm:$0xff] }
 0x226   : > { %v2331_v49 = vpop.f32.mrf.mxu0  ;;  %v2444_v59 = vpop.f32.mrf.mxu1  ;;  %6650 = vmatmul.mubr.msk.bf16.vlgmr.msra.gmra.mxu0 %vm509_vm1, %v9086_v41  ;;  %6658 = vmatmul.mubr.msk.bf16.vlgmr.msra.gmra.mxu1 %vm509_vm1, %v9086_v41  ;;  %v7052_v15 = vld [vmem:[%s12411_s2 + $0x4e0] ss:$24 sps:$4 sm:$0xff]   ;;  %v7060_v41 = vld [vmem:[%s12411_s2 + $0x4b4] ss:$24 sps:$4 sm:$0xff]  }
 0x227   : > { %12821 = vst [vmem:[#allocation70_spill] sm:$0xff] %v9427_v23  ;;  %v9440_v26 = vadd.f32 %v2331_v49, %v12822_v16  ;;  %v9443_v13 = vadd.f32 %v2444_v59, %v9119_v25  ;;  %4074 = vmatpush1.bf16.msra.mxu0 %v7046_v19  ;;  %4187 = vmatpush1.bf16.msra.mxu1 %v7049_v0  ;;  %v7055_v23 = vld [vmem:[%s12411_s2 + $0x4e8] ss:$24 sps:$4 sm:$0xff]   ;;  %v7063_v25 = vld [vmem:[%s12411_s2 + $0x4bc] ss:$24 sps:$4 sm:$0xff]  }
 0x228   : > { %v2333_v30 = vpop.f32.mrf.mxu0  ;;  %v2446_v5 = vpop.f32.mrf.mxu1  ;;  %3599 = vmatprep.mubr.bf16.mxu0 %v12563_v10  ;;  %3712 = vmatprep.mubr.bf16.mxu1 %v12563_v10  ;;  %v12824_v16 = vld [vmem:[#allocation69_spill] sm:$0xff] }
 0x229   : > { %12823 = vst [vmem:[#allocation90_spill] sm:$0xff] %v9443_v13  ;;  %v9460_v19 = vadd.f32 %v2333_v30, %v8786_v63  ;;  %v9463_v0 = vadd.f32 %v2446_v5, %v9139_v53  ;;  %4075 = vmatprep.subr.bf16.mxu0 %v7054_v14  ;;  %4188 = vmatprep.subr.bf16.mxu1 %v7057_v34  ;;  %v7058_v63 = vld [vmem:[%s12411_s2 + $0x4b0] ss:$24 sps:$4 sm:$0xff]   ;;  %v12825_v5 = vld [vmem:[#allocation33_spill] sm:$0xff] }
 0x22a   : > { %v2335_v49 = vpop.f32.mrf.mxu0  ;;  %v2448_v59 = vpop.f32.mrf.mxu1  ;;  %v7061_v53 = vld [vmem:[%s12411_s2 + $0x4b8] ss:$24 sps:$4 sm:$0xff]   ;;  %v7069_v14 = vld [vmem:[%s12411_s2 + $0x48c] ss:$24 sps:$4 sm:$0xff]  }
 0x22b   : > { %v9466_v13 = vadd.f32 %v2335_v49, %v12824_v16  ;;  %v9469_v6 = vadd.f32 %v2448_v59, %v9147_v8  ;;  %4076 = vmatpush1.bf16.msra.mxu0 %v7052_v15  ;;  %4189 = vmatpush1.bf16.msra.mxu1 %v7055_v23  ;;  %v7066_v23 = vld [vmem:[%s12411_s2 + $0x484] ss:$24 sps:$4 sm:$0xff]   ;;  %v7064_v49 = vld [vmem:[%s12411_s2 + $0x480] ss:$24 sps:$4 sm:$0xff]   ;;  %v12828_v59 = vld [vmem:[#allocation35_spill] sm:$0xff] }
 0x22c   : > { %v2337_v29 = vpop.f32.mrf.mxu0  ;;  %v2450_v46 = vpop.f32.mrf.mxu1  ;;  %4077 = vmatprep.subr.bf16.mxu0 %v7060_v41  ;;  %4190 = vmatprep.subr.bf16.mxu1 %v7063_v25 }
 0x22d   : > { %v9478_v30 = vadd.f32 %v2337_v29, %v12825_v5  ;;  %v9481_v8 = vadd.f32 %v2450_v46, %v9162_v20  ;;  %v12826_v29 = vld [vmem:[#allocation34_spill] sm:$0xff] }
 0x22e   : > { %v2341_v34 = vpop.f32.mrf.mxu0  ;;  %v2454_v15 = vpop.f32.mrf.mxu1  ;;  %6651 = vmatmul.mubr.msk.bf16.gmra.mxu0 %vm509_vm1, %v9153_v37  ;;  %6659 = vmatmul.mubr.msk.bf16.gmra.mxu1 %vm509_vm1, %v9153_v37  ;;  %v7067_v37 = vld [vmem:[%s12411_s2 + $0x488] ss:$24 sps:$4 sm:$0xff]  }
 0x22f   : > { %v9494_v41 = vadd.f32 %v2341_v34, %v12826_v29  ;;  %v9497_v20 = vadd.f32 %v2454_v15, %v9178_v57  ;;  %3609 = vmatprep.mubr.bf16.mxu0 %v12563_v10  ;;  %3722 = vmatprep.mubr.bf16.mxu1 %v12563_v10  ;;  %v12830_v15 = vld [vmem:[#allocation36_spill] sm:$0xff] }
 0x230   : > { %v2343_v46 = vpop.f32.mrf.mxu0  ;;  %v2456_v25 = vpop.f32.mrf.mxu1  ;;  %4078 = vmatpush1.bf16.msra.mxu0 %v7058_v63  ;;  %4191 = vmatpush1.bf16.msra.mxu1 %v7061_v53  ;;  %v7072_v63 = vld [vmem:[%s12411_s2 + $0x524] ss:$24 sps:$4 sm:$0xff]   ;;  %v7075_v53 = vld [vmem:[%s12411_s2 + $0x5d4] ss:$24 sps:$4 sm:$0xff]  }
 0x231   : > { %12827 = vst [vmem:[#allocation91_spill] sm:$0xff] %v9497_v20  ;;  %v9508_v16 = vadd.f32 %v2343_v46, %v12828_v59  ;;  %v9511_v57 = vadd.f32 %v2456_v25, %v9192_v61  ;;  %4079 = vmatprep.subr.bf16.mxu0 %v7066_v23  ;;  %4192 = vmatprep.subr.bf16.mxu1 %v7069_v14  ;;  %v12831_v23 = vld [vmem:[#allocation37_spill] sm:$0xff] }
 0x232   : > { %v2345_v5 = vpop.f32.mrf.mxu0  ;;  %v2458_v34 = vpop.f32.mrf.mxu1 }
 0x233   : > { %12829 = vst [vmem:[#allocation92_spill] sm:$0xff] %v9511_v57  ;;  %v9520_v29 = vadd.f32 %v2345_v5, %v12830_v15  ;;  %v9523_v46 = vadd.f32 %v2458_v34, %v9207_v9  ;;  %v12832_v9 = vld [vmem:[#allocation71_spill] sm:$0xff] }
 0x234   : > { %v2347_v61 = vpop.f32.mrf.mxu0  ;;  %v2460_v25 = vpop.f32.mrf.mxu1  ;;  %4080 = vmatpush1.bf16.msra.mxu0 %v7064_v49  ;;  %4193 = vmatpush1.bf16.msra.mxu1 %v7067_v37 }
 0x235   : > { %v9526_v14 = vadd.f32 %v2347_v61, %v12831_v23  ;;  %v9529_v59 = vadd.f32 %v2460_v25, %v9215_v27  ;;  %4299 = vmatprep.subr.bf16.mxu0 %v7072_v63  ;;  %4712 = vmatprep.subr.bf16.mxu1 %v7075_v53  ;;  %v12834_v63 = vld [vmem:[#allocation38_spill] sm:$0xff]  ;;  %v12835_v61 = vld [vmem:[#allocation39_spill] sm:$0xff]  ;;  %v12837_v23 = vld [vmem:[#allocation40_spill] sm:$0xff] }
 0x236   : > { %v2351_v57 = vpop.f32.mrf.mxu0  ;;  %v2464_v20 = vpop.f32.mrf.mxu1  ;;  %6652 = vmatmul.mubr.msk.bf16.gmra.mxu0 %vm509_vm1, %v9204_v2  ;;  %6660 = vmatmul.mubr.msk.bf16.gmra.mxu1 %vm509_vm1, %v9204_v2 }
 0x237   : > { %v9536_v5 = vadd.f32 %v2351_v57, %v12832_v9  ;;  %v9539_v49 = vadd.f32 %v2464_v20, %v9225_v12  ;;  %3619 = vmatprep.mubr.bf16.mxu0 %v12563_v10  ;;  %3732 = vmatprep.mubr.bf16.mxu1 %v12563_v10 }
 0x238   : > { %v2353_v27 = vpop.f32.mrf.mxu0  ;;  %v2466_v37 = vpop.f32.mrf.mxu1 }
 0x239   : > { %12833 = vst [vmem:[#allocation93_spill] sm:$0xff] %v9539_v49  ;;  %v9544_v53 = vadd.f32 %v2353_v27, %v12834_v63  ;;  %v9547_v34 = vadd.f32 %v2466_v37, %v9233_v45  ;;  %v12839_v45 = vld [vmem:[#allocation41_spill] sm:$0xff] }
 0x23a   : > { %v2355_v15 = vpop.f32.mrf.mxu0  ;;  %v2468_v2 = vpop.f32.mrf.mxu1 }
 0x23b   : > { %v9550_v57 = vadd.f32 %v2355_v15, %v12835_v61  ;;  %v9553_v12 = vadd.f32 %v2468_v2, %v9241_v62  ;;  %v12841_v2 = vld [vmem:[#allocation42_spill] sm:$0xff] }
 0x23c   : > { %v2357_v20 = vpop.f32.mrf.mxu0  ;;  %v2470_v25 = vpop.f32.mrf.mxu1 }
 0x23d   : > { %12836 = vst [vmem:[#allocation94_spill] sm:$0xff] %v9553_v12  ;;  %v9556_v9 = vadd.f32 %v2357_v20, %v12837_v23  ;;  %v9559_v49 = vadd.f32 %v2470_v25, %v9250_v32  ;;  %v12842_v23 = vld [vmem:[#allocation43_spill] sm:$0xff] }
 0x23e   : > { %v2361_v27 = vpop.f32.mrf.mxu0  ;;  %v2474_v63 = vpop.f32.mrf.mxu1  ;;  %6653 = vmatmul.mubr.msk.bf16.gmra.mxu0 %vm509_vm1, %v9247_v28  ;;  %6661 = vmatmul.mubr.msk.bf16.gmra.mxu1 %vm509_vm1, %v9247_v28 }
 0x23f   : > { %12838 = vst [vmem:[#allocation95_spill] sm:$0xff] %v9559_v49  ;;  %v9566_v37 = vadd.f32 %v2361_v27, %v12839_v45  ;;  %v9569_v62 = vadd.f32 %v2474_v63, %v9260_v54  ;;  %3629 = vmatprep.mubr.bf16.mxu0 %v12563_v10  ;;  %3742 = vmatprep.mubr.bf16.mxu1 %v12563_v10 }
 0x240   : > { %v2363_v32 = vpop.f32.mrf.mxu0  ;;  %v2476_v15 = vpop.f32.mrf.mxu1 }
 0x241   : > { %12840 = vst [vmem:[#allocation96_spill] sm:$0xff] %v9569_v62  ;;  %v9574_v61 = vadd.f32 %v2363_v32, %v12841_v2  ;;  %v9577_v20 = vadd.f32 %v2476_v15, %v9268_v52  ;;  %v12844_v62 = vld [vmem:[#allocation72_spill] sm:$0xff] }
 0x242   : > { %v2365_v25 = vpop.f32.mrf.mxu0  ;;  %v2478_v28 = vpop.f32.mrf.mxu1  ;;  %v12846_v52 = vld [vmem:[#allocation44_spill] sm:$0xff] }
 0x243   : > { %v9580_v27 = vadd.f32 %v2365_v25, %v12842_v23  ;;  %v9583_v54 = vadd.f32 %v2478_v28, %v9277_v36  ;;  %v12848_v25 = vld [vmem:[#allocation73_spill] sm:$0xff] }
 0x244   : > { %v2367_v63 = vpop.f32.mrf.mxu0  ;;  %v2480_v45 = vpop.f32.mrf.mxu1 }
 0x245   : > { %12843 = vst [vmem:[#allocation97_spill] sm:$0xff] %v9583_v54  ;;  %v9586_v49 = vadd.f32 %v2367_v63, %v12844_v62  ;;  %v9589_v12 = vadd.f32 %v2480_v45, %v9285_v7  ;;  %v12850_v45 = vld [vmem:[#allocation45_spill] sm:$0xff] }
 0x246   : > { %v2371_v32 = vpop.f32.mrf.mxu0  ;;  %v2484_v2 = vpop.f32.mrf.mxu1  ;;  %6654 = vmatmul.mubr.msk.bf16.gmra.mxu0 %vm509_vm1, %v9274_v17  ;;  %6662 = vmatmul.mubr.msk.bf16.gmra.mxu1 %vm509_vm1, %v9274_v17 }
 0x247   : > { %12845 = vst [vmem:[#allocation98_spill] sm:$0xff] %v9589_v12  ;;  %v9596_v15 = vadd.f32 %v2371_v32, %v12846_v52  ;;  %v9599_v36 = vadd.f32 %v2484_v2, %v9295_v4  ;;  %3639 = vmatprep.mubr.bf16.mxu0 %v12563_v10  ;;  %3752 = vmatprep.mubr.bf16.mxu1 %v12563_v10 }
 0x248   : > { %v2373_v7 = vpop.f32.mrf.mxu0  ;;  %v2486_v62 = vpop.f32.mrf.mxu1 }
 0x249   : > { %12847 = vst [vmem:[#allocation99_spill] sm:$0xff] %v9599_v36  ;;  %v9604_v28 = vadd.f32 %v2373_v7, %v12848_v25  ;;  %v9607_v23 = vadd.f32 %v2486_v62, %v9303_v35  ;;  %v12852_v36 = vld [vmem:[#allocation74_spill] sm:$0xff] }
 0x24a   : > { %v2375_v63 = vpop.f32.mrf.mxu0  ;;  %v2488_v17 = vpop.f32.mrf.mxu1  ;;  %v12854_v35 = vld [vmem:[#allocation46_spill] sm:$0xff] }
 0x24b   : > { %12849 = vst [vmem:[#allocation100_spill] sm:$0xff] %v9607_v23  ;;  %v9610_v32 = vadd.f32 %v2375_v63, %v12850_v45  ;;  %v9613_v4 = vadd.f32 %v2488_v17, %v9311_v11  ;;  %v12856_v63 = vld [vmem:[#allocation75_spill] sm:$0xff] }
 0x24c   : > { %v2377_v2 = vpop.f32.mrf.mxu0  ;;  %v2490_v52 = vpop.f32.mrf.mxu1 }
 0x24d   : > { %12851 = vst [vmem:[#allocation101_spill] sm:$0xff] %v9613_v4  ;;  %v9616_v12 = vadd.f32 %v2377_v2, %v12852_v36  ;;  %v9619_v54 = vadd.f32 %v2490_v52, %v9320_v51  ;;  %v12858_v52 = vld [vmem:[#allocation47_spill] sm:$0xff] }
 0x24e   : > { %v2381_v7 = vpop.f32.mrf.mxu0  ;;  %v2494_v25 = vpop.f32.mrf.mxu1  ;;  %6655 = vmatmul.mubr.msk.bf16.gmra.mxu0 %vm509_vm1, %v9317_v40  ;;  %6663 = vmatmul.mubr.msk.bf16.gmra.mxu1 %vm509_vm1, %v9317_v40 }
 0x24f   : > { %12853 = vst [vmem:[#allocation102_spill] sm:$0xff] %v9619_v54  ;;  %v9626_v62 = vadd.f32 %v2381_v7, %v12854_v35  ;;  %v9629_v11 = vadd.f32 %v2494_v25, %v9330_v55  ;;  %3649 = vmatprep.mubr.bf16.mxu0 %v12563_v10  ;;  %3762 = vmatprep.mubr.bf16.mxu1 %v12563_v10 }
 0x250   : > { %v2383_v51 = vpop.f32.mrf.mxu0  ;;  %v2496_v36 = vpop.f32.mrf.mxu1 }
 0x251   : > { %12855 = vst [vmem:[#allocation103_spill] sm:$0xff] %v9629_v11  ;;  %v9634_v17 = vadd.f32 %v2383_v51, %v12856_v63  ;;  %v9637_v45 = vadd.f32 %v2496_v36, %v9338_v31  ;;  %v12860_v11 = vld [vmem:[#allocation76_spill] sm:$0xff] }
 0x252   : > { %v2385_v2 = vpop.f32.mrf.mxu0  ;;  %v2498_v40 = vpop.f32.mrf.mxu1  ;;  %v12862_v31 = vld [vmem:[#allocation48_spill] sm:$0xff] }
 0x253   : > { %12857 = vst [vmem:[#allocation104_spill] sm:$0xff] %v9637_v45  ;;  %v9640_v7 = vadd.f32 %v2385_v2, %v12858_v52  ;;  %v9643_v55 = vadd.f32 %v2498_v40, %v9347_v3  ;;  %v12864_v2 = vld [vmem:[#allocation77_spill] sm:$0xff] }
 0x254   : > { %v2387_v25 = vpop.f32.mrf.mxu0  ;;  %v2500_v35 = vpop.f32.mrf.mxu1 }
 0x255   : > { %12859 = vst [vmem:[#allocation105_spill] sm:$0xff] %v9643_v55  ;;  %v9646_v54 = vadd.f32 %v2387_v25, %v12860_v11  ;;  %v9649_v4 = vadd.f32 %v2500_v35, %v9355_v56  ;;  %v12866_v35 = vld [vmem:[#allocation49_spill] sm:$0xff] }
 0x256   : > { %v2391_v51 = vpop.f32.mrf.mxu0  ;;  %v2504_v63 = vpop.f32.mrf.mxu1  ;;  %6656 = vmatmul.mubr.msk.bf16.gmra.mxu0 %vm509_vm1, %v9344_v38  ;;  %6664 = vmatmul.mubr.msk.bf16.gmra.mxu1 %vm509_vm1, %v9344_v38 }
 0x257   : > { %12861 = vst [vmem:[#allocation106_spill] sm:$0xff] %v9649_v4  ;;  %v9656_v36 = vadd.f32 %v2391_v51, %v12862_v31  ;;  %v9659_v3 = vadd.f32 %v2504_v63, %v9365_v60  ;;  %3659 = vmatprep.mubr.bf16.mxu0 %v12563_v10  ;;  %3772 = vmatprep.mubr.bf16.mxu1 %v12563_v10 }
 0x258   : > { %v2393_v56 = vpop.f32.mrf.mxu0  ;;  %v2506_v11 = vpop.f32.mrf.mxu1 }
 0x259   : > { %12863 = vst [vmem:[#allocation107_spill] sm:$0xff] %v9659_v3  ;;  %v9664_v40 = vadd.f32 %v2393_v56, %v12864_v2  ;;  %v9667_v52 = vadd.f32 %v2506_v11, %v9373_v44  ;;  %v12868_v3 = vld [vmem:[#allocation78_spill] sm:$0xff] }
 0x25a   : > { %v2395_v25 = vpop.f32.mrf.mxu0  ;;  %v2508_v38 = vpop.f32.mrf.mxu1  ;;  %v12870_v44 = vld [vmem:[#allocation50_spill] sm:$0xff] }
 0x25b   : > { %12865 = vst [vmem:[#allocation108_spill] sm:$0xff] %v9667_v52  ;;  %v9670_v51 = vadd.f32 %v2395_v25, %v12866_v35  ;;  %v9673_v60 = vadd.f32 %v2508_v38, %v9379_v39  ;;  %v12873_v25 = vld [vmem:[#allocation6_spill] sm:$0xff] }
 0x25c   : > { %v2397_v63 = vpop.f32.mrf.mxu0  ;;  %v2510_v31 = vpop.f32.mrf.mxu1  ;;  %v3905_v38 = vrot.slane %v12873_v25, 3  ;;  %v7070_v25 = vld [vmem:[%s12411_s2 + $0x520] ss:$24 sps:$4 sm:$0xff]  }
 0x25d   : > { %12867 = vst [vmem:[#allocation109_spill] sm:$0xff] %v9673_v60  ;;  %v9676_v4 = vadd.f32 %v2397_v63, %v12868_v3  ;;  %v9679_v55 = vadd.f32 %v2510_v31, %v9388_v50  ;;  %v12872_v50 = vld [vmem:[#allocation5_spill] sm:$0xff]  ;;  %v12874_v31 = vld [vmem:[#allocation79_spill] sm:$0xff] }
 0x25e   : > { %v2401_v56 = vpop.f32.mrf.mxu0  ;;  %v2514_v2 = vpop.f32.mrf.mxu1  ;;  %6657 = vmatmul.mubr.msk.bf16.gmra.mxu0 %vm509_vm1, %v9385_v47  ;;  %6665 = vmatmul.mubr.msk.bf16.gmra.mxu1 %vm509_vm1, %v9385_v47  ;;  %v3904_v3 = vrot.slane %v12872_v50, 3  ;;  %v7079_v60 = vld [vmem:[%s12411_s2 + $0x5a0] ss:$24 sps:$4 sm:$0xff]  }
 0x25f   : > { %12869 = vst [vmem:[#allocation110_spill] sm:$0xff] %v9679_v55  ;;  %v9686_v11 = vadd.f32 %v2401_v56, %v12870_v44  ;;  %v9689_v39 = vadd.f32 %v2514_v2, %v9398_v1  ;;  %4097 = vmatprep.mubr.bf16.mxu0 %v12563_v10  ;;  %4210 = vmatprep.mubr.bf16.mxu1 %v12563_v10  ;;  %v12876_v2 = vld [vmem:[#allocation51_spill] sm:$0xff] }
 0x260   : > { %v2403_v35 = vpop.f32.mrf.mxu0  ;;  %v2516_v63 = vpop.f32.mrf.mxu1  ;;  %v9708_v50 = vsel %vm3903_vm6, %v3904_v3, %v3905_v38  ;;  %v7081_v3 = vld [vmem:[%s12411_s2 + $0x5a4] ss:$24 sps:$4 sm:$0xff]  }
 0x261   : > { %12871 = vst [vmem:[#allocation111_spill] sm:$0xff] %v9689_v39  ;;  %v9696_v55 = vadd.f32 %v2403_v35, %v12874_v31  ;;  %v9699_v47 = vadd.f32 %v2516_v63, %v9406_v42  ;;  %v7073_v42 = vld [vmem:[%s12411_s2 + $0x5d0] ss:$24 sps:$4 sm:$0xff]   ;;  %v12878_v31 = vld [vmem:[#allocation80_spill] sm:$0xff] }
 0x262   : > { %v2405_v56 = vpop.f32.mrf.mxu0  ;;  %v2518_v1 = vpop.f32.mrf.mxu1 }
 0x263   : > { %12875 = vst [vmem:[#allocation112_spill] sm:$0xff] %v9699_v47  ;;  %v9702_v44 = vadd.f32 %v2405_v56, %v12876_v2  ;;  %v9705_v39 = vadd.f32 %v2518_v1, %v9412_v22  ;;  %v7078_v22 = vld [vmem:[%s12411_s2 + $0x4f4] ss:$24 sps:$4 sm:$0xff]  }
 0x264   : > { %v2407_v35 = vpop.f32.mrf.mxu0  ;;  %v2520_v63 = vpop.f32.mrf.mxu1 }
 0x265   : > { %12877 = vst [vmem:[#allocation113_spill] sm:$0xff] %v9705_v39  ;;  %v9717_v47 = vadd.f32 %v2407_v35, %v12878_v31  ;;  %v9720_v56 = vadd.f32 %v2520_v63, %v9424_v33  ;;  %v12880_v35 = vld [vmem:[#allocation52_spill] sm:$0xff]  ;;  %v12882_v63 = vld [vmem:[#allocation10_spill] sm:$0xff] }
 0x266   : > { %v2839_v1 = vpop.f32.mrf.mxu0  ;;  %v2952_v2 = vpop.f32.mrf.mxu1  ;;  %6690 = vmatmul.mubr.msk.bf16.vlgmr.msra.gmra.mxu0 %vm509_vm1, %v9708_v50  ;;  %6698 = vmatmul.mubr.msk.bf16.vlgmr.msra.gmra.mxu1 %vm509_vm1, %v9708_v50  ;;  %v7076_v39 = vld [vmem:[%s12411_s2 + $0x4f0] ss:$24 sps:$4 sm:$0xff]  }
 0x267   : > { %12879 = vst [vmem:[#allocation114_spill] sm:$0xff] %v9720_v56  ;;  %v9733_v31 = vadd.f32 %v2839_v1, %v12880_v35  ;;  %v9736_v33 = vadd.f32 %v2952_v2, %v9440_v26  ;;  %4300 = vmatpush1.bf16.msra.mxu0 %v7070_v25  ;;  %4713 = vmatpush1.bf16.msra.mxu1 %v7073_v42  ;;  %v3907_v56 = vrot.slane %v12882_v63, 3  ;;  %v7084_v26 = vld [vmem:[%s12411_s2 + $0x4c4] ss:$24 sps:$4 sm:$0xff]   ;;  %v7087_v25 = vld [vmem:[%s12411_s2 + $0x574] ss:$24 sps:$4 sm:$0xff]  }
 0x268   : > { %v2841_v52 = vpop.f32.mrf.mxu0  ;;  %v2954_v45 = vpop.f32.mrf.mxu1  ;;  %4107 = vmatprep.mubr.bf16.mxu0 %v12563_v10  ;;  %4220 = vmatprep.mubr.bf16.mxu1 %v12563_v10 }
 0x269   : > { %12881 = vst [vmem:[#allocation115_spill] sm:$0xff] %v9736_v33  ;;  %v9754_v42 = vadd.f32 %v2841_v52, %v9142_v21  ;;  %v9757_v1 = vadd.f32 %v2954_v45, %v9460_v19  ;;  %4301 = vmatprep.subr.bf16.mxu0 %v7078_v22  ;;  %4714 = vmatprep.subr.bf16.mxu1 %v7081_v3  ;;  %v7082_v19 = vld [vmem:[%s12411_s2 + $0x4c0] ss:$24 sps:$4 sm:$0xff]  }
 0x26a   : > { %v2843_v2 = vpop.f32.mrf.mxu0  ;;  %v2956_v35 = vpop.f32.mrf.mxu1  ;;  %v9766_v23 = vsel %vm3903_vm6, %v3905_v38, %v3907_v56  ;;  %v12885_v45 = vld [vmem:[#allocation81_spill] sm:$0xff] }
 0x26b   : > { %12883 = vst [vmem:[#allocation116_spill] sm:$0xff] %v9757_v1  ;;  %v9760_v63 = vadd.f32 %v2843_v2, %v9150_v43  ;;  %v9763_v33 = vadd.f32 %v2956_v35, %v9466_v13  ;;  %4302 = vmatpush1.bf16.msra.mxu0 %v7076_v39  ;;  %4715 = vmatpush1.bf16.msra.mxu1 %v7079_v60  ;;  %v7085_v43 = vld [vmem:[%s12411_s2 + $0x570] ss:$24 sps:$4 sm:$0xff]   ;;  %v7090_v60 = vld [vmem:[%s12411_s2 + $0x494] ss:$24 sps:$4 sm:$0xff]   ;;  %v12889_v2 = vld [vmem:[#allocation13_spill] sm:$0xff] }
 0x26c   : > { %v2845_v21 = vpop.f32.mrf.mxu0  ;;  %v2958_v52 = vpop.f32.mrf.mxu1  ;;  %4303 = vmatprep.subr.bf16.mxu0 %v7084_v26  ;;  %4716 = vmatprep.subr.bf16.mxu1 %v7087_v25  ;;  %v7093_v39 = vld [vmem:[%s12411_s2 + $0x544] ss:$24 sps:$4 sm:$0xff]   ;;  %v3909_v35 = vrot.slane %v12889_v2, 3 }
 0x26d   : > { %12884 = vst [vmem:[#allocation117_spill] sm:$0xff] %v9763_v33  ;;  %v9775_v13 = vadd.f32 %v2845_v21, %v12885_v45  ;;  %v9778_v38 = vadd.f32 %v2958_v52, %v9478_v30  ;;  %v12887_v26 = vld [vmem:[#allocation53_spill] sm:$0xff]  ;;  %v7088_v45 = vld [vmem:[%s12411_s2 + $0x490] ss:$24 sps:$4 sm:$0xff]  }
 0x26e   : > { %v2849_v22 = vpop.f32.mrf.mxu0  ;;  %v2962_v3 = vpop.f32.mrf.mxu1  ;;  %6691 = vmatmul.mubr.msk.bf16.gmra.mxu0 %vm509_vm1, %v9766_v23  ;;  %6699 = vmatmul.mubr.msk.bf16.gmra.mxu1 %vm509_vm1, %v9766_v23 }
 0x26f   : > { %12886 = vst [vmem:[#allocation31_spill] sm:$0xff] %v9778_v38  ;;  %v9791_v25 = vadd.f32 %v2849_v22, %v12887_v26  ;;  %v9794_v30 = vadd.f32 %v2962_v3, %v9494_v41  ;;  %4117 = vmatprep.mubr.bf16.mxu0 %v12563_v10  ;;  %4230 = vmatprep.mubr.bf16.mxu1 %v12563_v10  ;;  %v7091_v22 = vld [vmem:[%s12411_s2 + $0x540] ss:$24 sps:$4 sm:$0xff]   ;;  %v12890_v41 = vld [vmem:[#allocation83_spill] sm:$0xff] }
 0x270   : > { %v2851_v21 = vpop.f32.mrf.mxu0  ;;  %v2964_v52 = vpop.f32.mrf.mxu1  ;;  %4304 = vmatpush1.bf16.msra.mxu0 %v7082_v19  ;;  %4717 = vmatpush1.bf16.msra.mxu1 %v7085_v43  ;;  %v7096_v19 = vld [vmem:[%s12411_s2 + $0x5dc] ss:$24 sps:$4 sm:$0xff]  }
 0x271   : > { %12888 = vst [vmem:[#allocation32_spill] sm:$0xff] %v9794_v30  ;;  %v9806_v3 = vadd.f32 %v2851_v21, %v12890_v41  ;;  %v9809_v26 = vadd.f32 %v2964_v52, %v9508_v16  ;;  %4305 = vmatprep.subr.bf16.mxu0 %v7090_v60  ;;  %4718 = vmatprep.subr.bf16.mxu1 %v7093_v39  ;;  %v7099_v43 = vld [vmem:[%s12411_s2 + $0x5e4] ss:$24 sps:$4 sm:$0xff]  }
 0x272   : > { %v2853_v2 = vpop.f32.mrf.mxu0  ;;  %v2966_v30 = vpop.f32.mrf.mxu1  ;;  %v9824_v16 = vsel %vm3903_vm6, %v3907_v56, %v3909_v35 }
 0x273   : > { %12891 = vst [vmem:[#allocation69_spill] sm:$0xff] %v9809_v26  ;;  %v9818_v38 = vadd.f32 %v2853_v2, %v9210_v58  ;;  %v9821_v21 = vadd.f32 %v2966_v30, %v9520_v29  ;;  %v12894_v29 = vld [vmem:[#allocation54_spill] sm:$0xff] }
 0x274   : > { %v2855_v60 = vpop.f32.mrf.mxu0  ;;  %v2968_v39 = vpop.f32.mrf.mxu1  ;;  %4306 = vmatpush1.bf16.msra.mxu0 %v7088_v45  ;;  %4719 = vmatpush1.bf16.msra.mxu1 %v7091_v22 }
 0x275   : > { %12892 = vst [vmem:[#allocation33_spill] sm:$0xff] %v9821_v21  ;;  %v9827_v52 = vadd.f32 %v2855_v60, %v9218_v48  ;;  %v9830_v41 = vadd.f32 %v2968_v39, %v9526_v14  ;;  %4825 = vmatprep.subr.bf16.mxu0 %v7096_v19  ;;  %4938 = vmatprep.subr.bf16.mxu1 %v7099_v43  ;;  %v12896_v48 = vld [vmem:[#allocation16_spill] sm:$0xff]  ;;  %v12901_v21 = vld [vmem:[#allocation85_spill] sm:$0xff] }
 0x276   : > { %v2859_v58 = vpop.f32.mrf.mxu0  ;;  %v2972_v2 = vpop.f32.mrf.mxu1  ;;  %6692 = vmatmul.mubr.msk.bf16.gmra.mxu0 %vm509_vm1, %v9824_v16  ;;  %6700 = vmatmul.mubr.msk.bf16.gmra.mxu1 %vm509_vm1, %v9824_v16  ;;  %v3911_v14 = vrot.slane %v12896_v48, 3  ;;  %v12897_v19 = vld [vmem:[#allocation84_spill] sm:$0xff] }
 0x277   : > { %12893 = vst [vmem:[#allocation34_spill] sm:$0xff] %v9830_v41  ;;  %v9837_v56 = vadd.f32 %v2859_v58, %v12894_v29  ;;  %v9840_v30 = vadd.f32 %v2972_v2, %v9536_v5  ;;  %4127 = vmatprep.mubr.bf16.mxu0 %v12563_v10  ;;  %4240 = vmatprep.mubr.bf16.mxu1 %v12563_v10  ;;  %v12899_v29 = vld [vmem:[#allocation55_spill] sm:$0xff] }
 0x278   : > { %v2861_v45 = vpop.f32.mrf.mxu0  ;;  %v2974_v22 = vpop.f32.mrf.mxu1  ;;  %v9858_v2 = vsel %vm3903_vm6, %v3909_v35, %v3911_v14 }
 0x279   : > { %12895 = vst [vmem:[#allocation35_spill] sm:$0xff] %v9840_v30  ;;  %v9846_v43 = vadd.f32 %v2861_v45, %v12897_v19  ;;  %v9849_v60 = vadd.f32 %v2974_v22, %v9544_v53 }
 0x27a   : > { %v2863_v39 = vpop.f32.mrf.mxu0  ;;  %v2976_v58 = vpop.f32.mrf.mxu1 }
 0x27b   : > { %12898 = vst [vmem:[#allocation36_spill] sm:$0xff] %v9849_v60  ;;  %v9852_v41 = vadd.f32 %v2863_v39, %v12899_v29  ;;  %v9855_v5 = vadd.f32 %v2976_v58, %v9550_v57  ;;  %v12903_v57 = vld [vmem:[#allocation56_spill] sm:$0xff]  ;;  %v12906_v58 = vld [vmem:[#allocation86_spill] sm:$0xff]  ;;  %v12910_v60 = vld [vmem:[#allocation87_spill] sm:$0xff] }
 0x27c   : > { %v2865_v48 = vpop.f32.mrf.mxu0  ;;  %v2978_v30 = vpop.f32.mrf.mxu1 }
 0x27d   : > { %12900 = vst [vmem:[#allocation37_spill] sm:$0xff] %v9855_v5  ;;  %v9861_v26 = vadd.f32 %v2865_v48, %v12901_v21  ;;  %v9864_v45 = vadd.f32 %v2978_v30, %v9556_v9  ;;  %v12905_v9 = vld [vmem:[#allocation19_spill] sm:$0xff] }
 0x27e   : > { %v2869_v53 = vpop.f32.mrf.mxu0  ;;  %v2982_v22 = vpop.f32.mrf.mxu1  ;;  %6693 = vmatmul.mubr.msk.bf16.gmra.mxu0 %vm509_vm1, %v9858_v2  ;;  %6701 = vmatmul.mubr.msk.bf16.gmra.mxu1 %vm509_vm1, %v9858_v2  ;;  %v3913_v21 = vrot.slane %v12905_v9, 3 }
 0x27f   : > { %12902 = vst [vmem:[#allocation71_spill] sm:$0xff] %v9864_v45  ;;  %v9871_v19 = vadd.f32 %v2869_v53, %v12903_v57  ;;  %v9874_v35 = vadd.f32 %v2982_v22, %v9566_v37  ;;  %4137 = vmatprep.mubr.bf16.mxu0 %v12563_v10  ;;  %4250 = vmatprep.mubr.bf16.mxu1 %v12563_v10  ;;  %v12908_v57 = vld [vmem:[#allocation58_spill] sm:$0xff] }
 0x280   : > { %v2871_v30 = vpop.f32.mrf.mxu0  ;;  %v2984_v39 = vpop.f32.mrf.mxu1  ;;  %v9892_v22 = vsel %vm3903_vm6, %v3911_v14, %v3913_v21 }
 0x281   : > { %12904 = vst [vmem:[#allocation38_spill] sm:$0xff] %v9874_v35  ;;  %v9880_v29 = vadd.f32 %v2871_v30, %v12906_v58  ;;  %v9883_v48 = vadd.f32 %v2984_v39, %v9574_v61 }
 0x282   : > { %v2873_v45 = vpop.f32.mrf.mxu0  ;;  %v2986_v53 = vpop.f32.mrf.mxu1 }
 0x283   : > { %12907 = vst [vmem:[#allocation39_spill] sm:$0xff] %v9883_v48  ;;  %v9886_v5 = vadd.f32 %v2873_v45, %v12908_v57  ;;  %v9889_v37 = vadd.f32 %v2986_v53, %v9580_v27  ;;  %v12912_v27 = vld [vmem:[#allocation59_spill] sm:$0xff]  ;;  %v12915_v53 = vld [vmem:[#allocation57_spill] sm:$0xff]  ;;  %v12919_v48 = vld [vmem:[#allocation88_spill] sm:$0xff] }
 0x284   : > { %v2875_v9 = vpop.f32.mrf.mxu0  ;;  %v2988_v35 = vpop.f32.mrf.mxu1 }
 0x285   : > { %12909 = vst [vmem:[#allocation40_spill] sm:$0xff] %v9889_v37  ;;  %v9895_v33 = vadd.f32 %v2875_v9, %v12910_v60  ;;  %v9898_v30 = vadd.f32 %v2988_v35, %v9586_v49  ;;  %v12914_v49 = vld [vmem:[#allocation22_spill] sm:$0xff] }
 0x286   : > { %v2879_v61 = vpop.f32.mrf.mxu0  ;;  %v2992_v39 = vpop.f32.mrf.mxu1  ;;  %6694 = vmatmul.mubr.msk.bf16.gmra.mxu0 %vm509_vm1, %v9892_v22  ;;  %6702 = vmatmul.mubr.msk.bf16.gmra.mxu1 %vm509_vm1, %v9892_v22  ;;  %v3915_v60 = vrot.slane %v12914_v49, 3 }
 0x287   : > { %12911 = vst [vmem:[#allocation41_spill] sm:$0xff] %v9898_v30  ;;  %v9905_v45 = vadd.f32 %v2879_v61, %v12912_v27  ;;  %v9908_v14 = vadd.f32 %v2992_v39, %v9596_v15  ;;  %4147 = vmatprep.mubr.bf16.mxu0 %v12563_v10  ;;  %4260 = vmatprep.mubr.bf16.mxu1 %v12563_v10  ;;  %v12917_v27 = vld [vmem:[#allocation60_spill] sm:$0xff] }
 0x288   : > { %v2881_v35 = vpop.f32.mrf.mxu0  ;;  %v2994_v58 = vpop.f32.mrf.mxu1  ;;  %v9926_v39 = vsel %vm3903_vm6, %v3913_v21, %v3915_v60 }
 0x289   : > { %12913 = vst [vmem:[#allocation42_spill] sm:$0xff] %v9908_v14  ;;  %v9914_v57 = vadd.f32 %v2881_v35, %v12915_v53  ;;  %v9917_v9 = vadd.f32 %v2994_v58, %v9604_v28 }
 0x28a   : > { %v2883_v30 = vpop.f32.mrf.mxu0  ;;  %v2996_v61 = vpop.f32.mrf.mxu1 }
 0x28b   : > { %12916 = vst [vmem:[#allocation43_spill] sm:$0xff] %v9917_v9  ;;  %v9920_v37 = vadd.f32 %v2883_v30, %v12917_v27  ;;  %v9923_v15 = vadd.f32 %v2996_v61, %v9610_v32  ;;  %v12921_v32 = vld [vmem:[#allocation62_spill] sm:$0xff]  ;;  %v12924_v61 = vld [vmem:[#allocation89_spill] sm:$0xff] }
 0x28c   : > { %v2885_v49 = vpop.f32.mrf.mxu0  ;;  %v2998_v14 = vpop.f32.mrf.mxu1 }
 0x28d   : > { %12918 = vst [vmem:[#allocation72_spill] sm:$0xff] %v9923_v15  ;;  %v9929_v1 = vadd.f32 %v2885_v49, %v12919_v48  ;;  %v9932_v35 = vadd.f32 %v2998_v14, %v9616_v12  ;;  %v12923_v12 = vld [vmem:[#allocation25_spill] sm:$0xff]  ;;  %v12928_v15 = vld [vmem:[#allocation64_spill] sm:$0xff] }
 0x28e   : > { %v2889_v28 = vpop.f32.mrf.mxu0  ;;  %v3002_v58 = vpop.f32.mrf.mxu1  ;;  %6695 = vmatmul.mubr.msk.bf16.gmra.mxu0 %vm509_vm1, %v9926_v39  ;;  %6703 = vmatmul.mubr.msk.bf16.gmra.mxu1 %vm509_vm1, %v9926_v39  ;;  %v3917_v48 = vrot.slane %v12923_v12, 3 }
 0x28f   : > { %12920 = vst [vmem:[#allocation44_spill] sm:$0xff] %v9932_v35  ;;  %v9939_v30 = vadd.f32 %v2889_v28, %v12921_v32  ;;  %v9942_v21 = vadd.f32 %v3002_v58, %v9626_v62  ;;  %4157 = vmatprep.mubr.bf16.mxu0 %v12563_v10  ;;  %4270 = vmatprep.mubr.bf16.mxu1 %v12563_v10 }
 0x290   : > { %v2891_v14 = vpop.f32.mrf.mxu0  ;;  %v3004_v53 = vpop.f32.mrf.mxu1  ;;  %v9960_v58 = vsel %vm3903_vm6, %v3915_v60, %v3917_v48 }
 0x291   : > { %12922 = vst [vmem:[#allocation73_spill] sm:$0xff] %v9942_v21  ;;  %v9948_v27 = vadd.f32 %v2891_v14, %v12924_v61  ;;  %v9951_v49 = vadd.f32 %v3004_v53, %v9634_v17  ;;  %12927 = vst [vmem:[#allocation46_spill] sm:$0xff] %v9960_v58 }
 0x292   : > { %v2893_v35 = vpop.f32.mrf.mxu0  ;;  %v3006_v28 = vpop.f32.mrf.mxu1 }
 0x293   : > { %12925 = vst [vmem:[#allocation45_spill] sm:$0xff] %v9951_v49  ;;  %v9954_v32 = vadd.f32 %v2893_v35, %v9350_v24  ;;  %v9957_v62 = vadd.f32 %v3006_v28, %v9640_v7  ;;  %v12931_v24 = vld [vmem:[#allocation61_spill] sm:$0xff] }
 0x294   : > { %v2895_v12 = vpop.f32.mrf.mxu0  ;;  %v3008_v21 = vpop.f32.mrf.mxu1  ;;  %v12939_v49 = vld [vmem:[#allocation9_spill] sm:$0xff] }
 0x295   : > { %12926 = vst [vmem:[#allocation74_spill] sm:$0xff] %v9957_v62  ;;  %v9963_v9 = vadd.f32 %v2895_v12, %v12928_v15  ;;  %v9966_v14 = vadd.f32 %v3008_v21, %v9646_v54  ;;  %v12934_v54 = vld [vmem:[#allocation28_spill] sm:$0xff] }
 0x296   : > { %v2899_v17 = vpop.f32.mrf.mxu0  ;;  %v3012_v53 = vpop.f32.mrf.mxu1  ;;  %6696 = vmatmul.mubr.msk.bf16.gmra.mxu0 %vm509_vm1, %v9960_v58  ;;  %6704 = vmatmul.mubr.msk.bf16.gmra.mxu1 %vm509_vm1, %v9960_v58  ;;  %v3919_v15 = vrot.slane %v12934_v54, 3  ;;  %v12940_v58 = vld [vmem:[#allocation67_spill] sm:$0xff] }
 0x297   : > { %12929 = vst [vmem:[#allocation75_spill] sm:$0xff] %v9963_v9  ;;  %12930 = vst [vmem:[#allocation47_spill] sm:$0xff] %v9966_v14  ;;  %v9973_v7 = vadd.f32 %v2899_v17, %v12931_v24  ;;  %v9976_v60 = vadd.f32 %v3012_v53, %v9656_v36  ;;  %4167 = vmatprep.mubr.bf16.mxu0 %v12563_v10  ;;  %4280 = vmatprep.mubr.bf16.mxu1 %v12563_v10  ;;  %v12936_v24 = vld [vmem:[#allocation7_spill] sm:$0xff]  ;;  %v12937_v36 = vld [vmem:[#allocation8_spill] sm:$0xff] }
 0x298   : > { %v2901_v35 = vpop.f32.mrf.mxu0  ;;  %v3014_v21 = vpop.f32.mrf.mxu1  ;;  %v4525_v14 = vrot.slane %v12936_v24, 3  ;;  %v4526_v53 = vrot.slane %v12937_v36, 4 }
 0x299   : > { %12932 = vst [vmem:[#allocation76_spill] sm:$0xff] %v9973_v7  ;;  %12933 = vst [vmem:[#allocation48_spill] sm:$0xff] %v9976_v60  ;;  %v9982_v61 = vadd.f32 %v2901_v35, %v9376_v18  ;;  %v9985_v28 = vadd.f32 %v3014_v21, %v9664_v40  ;;  %v12938_v60 = vld [vmem:[#allocation11_spill] sm:$0xff]  ;;  %v4529_v7 = vrot.slane %v12939_v49, 4  ;;  %v9998_v18 = vsel %vm3903_vm6, %v3917_v48, %v3919_v15  ;;  %v12944_v48 = vld [vmem:[#allocation66_spill] sm:$0xff] }
 0x29a   : > { %v2903_v12 = vpop.f32.mrf.mxu0  ;;  %v3016_v17 = vpop.f32.mrf.mxu1  ;;  %v4528_v62 = vrot.slane %v12938_v60, 3  ;;  %v12942_v21 = vld [vmem:[#allocation63_spill] sm:$0xff] }
 0x29b   : > { %12935 = vst [vmem:[#allocation77_spill] sm:$0xff] %v9985_v28  ;;  %v9992_v54 = vadd.f32 %v2903_v12, %v12940_v58  ;;  %v9995_v9 = vadd.f32 %v3016_v17, %v9670_v51  ;;  %v4527_v51 = vor.u32 %v4526_v53, %v4525_v14  ;;  %v12946_v17 = vld [vmem:[#allocation65_spill] sm:$0xff] }
 0x29c   : > { %v2905_v40 = vpop.f32.mrf.mxu0  ;;  %v3018_v35 = vpop.f32.mrf.mxu1  ;;  %v4530_v49 = vor.u32 %v4529_v7, %v4528_v62 }
 0x29d   : > { %12941 = vst [vmem:[#allocation49_spill] sm:$0xff] %v9995_v9  ;;  %v10001_v28 = vadd.f32 %v2905_v40, %v12942_v21  ;;  %v10004_v24 = vadd.f32 %v3018_v35, %v9676_v4 }
 0x29e   : > { %v2909_v60 = vpop.f32.mrf.mxu0  ;;  %v3022_v36 = vpop.f32.mrf.mxu1  ;;  %6697 = vmatmul.mubr.msk.bf16.gmra.mxu0 %vm509_vm1, %v9998_v18  ;;  %6705 = vmatmul.mubr.msk.bf16.gmra.mxu1 %vm509_vm1, %v9998_v18  ;;  %v10025_v7 = vsel %vm4524_vm7, %v4527_v51, %v4530_v49 }
 0x29f   : > { %12943 = vst [vmem:[#allocation78_spill] sm:$0xff] %v10004_v24  ;;  %v10011_v58 = vadd.f32 %v2909_v60, %v12944_v48  ;;  %v10014_v15 = vadd.f32 %v3022_v36, %v9686_v11  ;;  %4323 = vmatprep.mubr.bf16.mxu0 %v12563_v10  ;;  %4736 = vmatprep.mubr.bf16.mxu1 %v12563_v10  ;;  %v12948_v11 = vld [vmem:[#allocation68_spill] sm:$0xff]  ;;  %v12950_v36 = vld [vmem:[#allocation14_spill] sm:$0xff] }
 0x2a0   : > { %v2911_v4 = vpop.f32.mrf.mxu0  ;;  %v3024_v12 = vpop.f32.mrf.mxu1  ;;  %v7094_v60 = vld [vmem:[%s12411_s2 + $0x5d8] ss:$24 sps:$4 sm:$0xff]   ;;  %v4532_v48 = vrot.slane %v12950_v36, 3 }
 0x2a1   : > { %12945 = vst [vmem:[#allocation50_spill] sm:$0xff] %v10014_v15  ;;  %v10019_v40 = vadd.f32 %v2911_v4, %v12946_v17  ;;  %v10022_v35 = vadd.f32 %v3024_v12, %v9696_v55  ;;  %v7097_v55 = vld [vmem:[%s12411_s2 + $0x5e0] ss:$24 sps:$4 sm:$0xff]  }
 0x2a2   : > { %v2913_v62 = vpop.f32.mrf.mxu0  ;;  %v3026_v14 = vpop.f32.mrf.mxu1  ;;  %v12951_v4 = vld [vmem:[#allocation12_spill] sm:$0xff] }
 0x2a3   : > { %12947 = vst [vmem:[#allocation5_spill] sm:$0xff] %v10022_v35  ;;  %v10028_v53 = vadd.f32 %v2913_v62, %v12948_v11  ;;  %v10031_v21 = vadd.f32 %v3026_v14, %v9702_v44  ;;  %v4533_v12 = vrot.slane %v12951_v4, 4  ;;  %v12952_v35 = vld [vmem:[#allocation70_spill] sm:$0xff] }
 0x2a4   : > { %v2915_v51 = vpop.f32.mrf.mxu0  ;;  %v3028_v17 = vpop.f32.mrf.mxu1  ;;  %v7102_v14 = vld [vmem:[%s12411_s2 + $0x5ac] ss:$24 sps:$4 sm:$0xff]  }
 0x2a5   : > { %12949 = vst [vmem:[#allocation6_spill] sm:$0xff] %v10031_v21  ;;  %v10042_v62 = vadd.f32 %v2915_v51, %v12952_v35  ;;  %v10045_v44 = vadd.f32 %v3028_v17, %v9717_v47  ;;  %v7105_v11 = vld [vmem:[%s12411_s2 + $0x5b4] ss:$24 sps:$4 sm:$0xff]   ;;  %v4534_v51 = vor.u32 %v4533_v12, %v4532_v48  ;;  %v7100_v17 = vld [vmem:[%s12411_s2 + $0x5a8] ss:$24 sps:$4 sm:$0xff]  }
 0x2a6   : > { %v3065_v21 = vpop.f32.mrf.mxu0  ;;  %v3478_v36 = vpop.f32.mrf.mxu1  ;;  %6706 = vmatmul.mubr.msk.bf16.vlgmr.msra.gmra.mxu0 %vm509_vm1, %v9708_v50  ;;  %6738 = vmatmul.mubr.msk.bf16.vlgmr.msra.gmra.mxu1 %vm509_vm1, %v10025_v7  ;;  %v12954_v35 = vld [vmem:[#allocation90_spill] sm:$0xff] }
 0x2a7   : > { %12953 = vst [vmem:[#allocation79_spill] sm:$0xff] %v10045_v44  ;;  %v10058_v4 = vadd.f32 %v3065_v21, %v12954_v35  ;;  %v10061_v47 = vadd.f32 %v3478_v36, %v9733_v31  ;;  %4826 = vmatpush1.bf16.msra.mxu0 %v7094_v60  ;;  %4939 = vmatpush1.bf16.msra.mxu1 %v7097_v55  ;;  %v7103_v50 = vld [vmem:[%s12411_s2 + $0x5b0] ss:$24 sps:$4 sm:$0xff]   ;;  %v7108_v31 = vld [vmem:[%s12411_s2 + $0x57c] ss:$24 sps:$4 sm:$0xff]   ;;  %v12957_v36 = vld [vmem:[#allocation17_spill] sm:$0xff] }
 0x2a8   : > { %v3067_v44 = vpop.f32.mrf.mxu0  ;;  %v3480_v15 = vpop.f32.mrf.mxu1  ;;  %4333 = vmatprep.mubr.bf16.mxu0 %v12563_v10  ;;  %4746 = vmatprep.mubr.bf16.mxu1 %v12563_v10  ;;  %v7111_v21 = vld [vmem:[%s12411_s2 + $0x584] ss:$24 sps:$4 sm:$0xff]   ;;  %v4536_v35 = vrot.slane %v12957_v36, 3 }
 0x2a9   : > { %12955 = vst [vmem:[#allocation51_spill] sm:$0xff] %v10058_v4  ;;  %12956 = vst [vmem:[#allocation80_spill] sm:$0xff] %v10061_v47  ;;  %v10078_v60 = vadd.f32 %v3067_v44, %v9463_v0  ;;  %v10081_v55 = vadd.f32 %v3480_v15, %v9754_v42  ;;  %4827 = vmatprep.subr.bf16.mxu0 %v7102_v14  ;;  %4940 = vmatprep.subr.bf16.mxu1 %v7105_v11  ;;  %v12958_v47 = vld [vmem:[#allocation15_spill] sm:$0xff]  ;;  %v7114_v14 = vld [vmem:[%s12411_s2 + $0x54c] ss:$24 sps:$4 sm:$0xff]  }
 0x2aa   : > { %v3069_v48 = vpop.f32.mrf.mxu0  ;;  %v3482_v12 = vpop.f32.mrf.mxu1  ;;  %v4537_v24 = vrot.slane %v12958_v47, 4  ;;  %v10092_v0 = vsel %vm4524_vm7, %v4530_v49, %v4534_v51  ;;  %v7106_v44 = vld [vmem:[%s12411_s2 + $0x578] ss:$24 sps:$4 sm:$0xff]   ;;  %v7117_v11 = vld [vmem:[%s12411_s2 + $0x554] ss:$24 sps:$4 sm:$0xff]  }
 0x2ab   : > { %v10086_v9 = vadd.f32 %v3069_v48, %v9469_v6  ;;  %v10089_v4 = vadd.f32 %v3482_v12, %v9760_v63  ;;  %4828 = vmatpush1.bf16.msra.mxu0 %v7100_v17  ;;  %4941 = vmatpush1.bf16.msra.mxu1 %v7103_v50  ;;  %v7109_v6 = vld [vmem:[%s12411_s2 + $0x580] ss:$24 sps:$4 sm:$0xff]   ;;  %v12959_v50 = vld [vmem:[#allocation91_spill] sm:$0xff] }
 0x2ac   : > { %v3071_v42 = vpop.f32.mrf.mxu0  ;;  %v3484_v15 = vpop.f32.mrf.mxu1  ;;  %4829 = vmatprep.subr.bf16.mxu0 %v7108_v31  ;;  %4942 = vmatprep.subr.bf16.mxu1 %v7111_v21  ;;  %v12960_v12 = vld [vmem:[#allocation92_spill] sm:$0xff] }
 0x2ad   : > { %v10101_v63 = vadd.f32 %v3071_v42, %v9481_v8  ;;  %v10104_v49 = vadd.f32 %v3484_v15, %v9775_v13  ;;  %v4538_v8 = vor.u32 %v4537_v24, %v4536_v35  ;;  %v7115_v24 = vld [vmem:[%s12411_s2 + $0x550] ss:$24 sps:$4 sm:$0xff]  }
 0x2ae   : > { %v3075_v47 = vpop.f32.mrf.mxu0  ;;  %v3488_v17 = vpop.f32.mrf.mxu1  ;;  %6707 = vmatmul.mubr.msk.bf16.gmra.mxu0 %vm509_vm1, %v9766_v23  ;;  %6739 = vmatmul.mubr.msk.bf16.gmra.mxu1 %vm509_vm1, %v10092_v0  ;;  %v7112_v23 = vld [vmem:[%s12411_s2 + $0x548] ss:$24 sps:$4 sm:$0xff]  }
 0x2af   : > { %v10117_v13 = vadd.f32 %v3075_v47, %v12959_v50  ;;  %v10120_v31 = vadd.f32 %v3488_v17, %v9791_v25  ;;  %4343 = vmatprep.mubr.bf16.mxu0 %v12563_v10  ;;  %4756 = vmatprep.mubr.bf16.mxu1 %v12563_v10  ;;  %v10137_v15 = vsel %vm4524_vm7, %v4534_v51, %v4538_v8  ;;  %v12961_v47 = vld [vmem:[#allocation20_spill] sm:$0xff]  ;;  %v12962_v50 = vld [vmem:[#allocation18_spill] sm:$0xff] }
 0x2b0   : > { %v3077_v21 = vpop.f32.mrf.mxu0  ;;  %v3490_v48 = vpop.f32.mrf.mxu1  ;;  %4830 = vmatpush1.bf16.msra.mxu0 %v7106_v44  ;;  %4943 = vmatpush1.bf16.msra.mxu1 %v7109_v6  ;;  %v4540_v17 = vrot.slane %v12961_v47, 3 }
 0x2b1   : > { %v10131_v36 = vadd.f32 %v3077_v21, %v12960_v12  ;;  %v10134_v25 = vadd.f32 %v3490_v48, %v9806_v3  ;;  %4831 = vmatprep.subr.bf16.mxu0 %v7114_v14  ;;  %4944 = vmatprep.subr.bf16.mxu1 %v7117_v11  ;;  %v4541_v21 = vrot.slane %v12962_v50, 4  ;;  %v12966_v50 = vld [vmem:[#allocation23_spill] sm:$0xff] }
 0x2b2   : > { %v3079_v35 = vpop.f32.mrf.mxu0  ;;  %v3492_v42 = vpop.f32.mrf.mxu1 }
 0x2b3   : > { %v10140_v44 = vadd.f32 %v3079_v35, %v9523_v46  ;;  %v10143_v6 = vadd.f32 %v3492_v42, %v9818_v38  ;;  %v12963_v38 = vld [vmem:[#allocation93_spill] sm:$0xff] }
 0x2b4   : > { %v3081_v12 = vpop.f32.mrf.mxu0  ;;  %v3494_v3 = vpop.f32.mrf.mxu1  ;;  %4832 = vmatpush1.bf16.msra.mxu0 %v7112_v23  ;;  %4945 = vmatpush1.bf16.msra.mxu1 %v7115_v24 }
 0x2b5   : > { %v10148_v14 = vadd.f32 %v3081_v12, %v9529_v59  ;;  %v10151_v51 = vadd.f32 %v3494_v3, %v9827_v52  ;;  %v4542_v59 = vor.u32 %v4541_v21, %v4540_v17  ;;  %v4544_v12 = vrot.slane %v12966_v50, 3  ;;  %v12967_v3 = vld [vmem:[#allocation21_spill] sm:$0xff] }
 0x2b6   : > { %v3085_v11 = vpop.f32.mrf.mxu0  ;;  %v3498_v46 = vpop.f32.mrf.mxu1  ;;  %6708 = vmatmul.mubr.msk.bf16.gmra.mxu0 %vm509_vm1, %v9824_v16  ;;  %6740 = vmatmul.mubr.msk.bf16.gmra.mxu1 %vm509_vm1, %v10137_v15 }
 0x2b7   : > { %v10158_v48 = vadd.f32 %v3085_v11, %v12963_v38  ;;  %v10161_v23 = vadd.f32 %v3498_v46, %v9837_v56  ;;  %4353 = vmatprep.mubr.bf16.mxu0 %v12563_v10  ;;  %4766 = vmatprep.mubr.bf16.mxu1 %v12563_v10  ;;  %v4545_v56 = vrot.slane %v12967_v3, 4  ;;  %v12968_v11 = vld [vmem:[#allocation94_spill] sm:$0xff]  ;;  %v10180_v17 = vsel %vm4524_vm7, %v4538_v8, %v4542_v59 }
 0x2b8   : > { %v3087_v52 = vpop.f32.mrf.mxu0  ;;  %v3500_v24 = vpop.f32.mrf.mxu1 }
 0x2b9   : > { %12964 = vst [vmem:[#allocation52_spill] sm:$0xff] %v10161_v23  ;;  %v10166_v35 = vadd.f32 %v3087_v52, %v9547_v34  ;;  %v10169_v16 = vadd.f32 %v3500_v24, %v9846_v43  ;;  %v12970_v52 = vld [vmem:[#allocation95_spill] sm:$0xff]  ;;  %v13002_v23 = vld [vmem:[#allocation46_spill] sm:$0xff] }
 0x2ba   : > { %v3089_v42 = vpop.f32.mrf.mxu0  ;;  %v3502_v47 = vpop.f32.mrf.mxu1 }
 0x2bb   : > { %12965 = vst [vmem:[#allocation10_spill] sm:$0xff] %v10169_v16  ;;  %v10174_v46 = vadd.f32 %v3089_v42, %v12968_v11  ;;  %v10177_v38 = vadd.f32 %v3502_v47, %v9852_v41  ;;  %v4546_v41 = vor.u32 %v4545_v56, %v4544_v12  ;;  %v12972_v42 = vld [vmem:[#allocation96_spill] sm:$0xff] }
 0x2bc   : > { %v3091_v34 = vpop.f32.mrf.mxu0  ;;  %v3504_v21 = vpop.f32.mrf.mxu1 }
 0x2bd   : > { %12969 = vst [vmem:[#allocation81_spill] sm:$0xff] %v10177_v38  ;;  %v10183_v43 = vadd.f32 %v3091_v34, %v12970_v52  ;;  %v10186_v24 = vadd.f32 %v3504_v21, %v9861_v26  ;;  %v10207_v56 = vsel %vm4524_vm7, %v4542_v59, %v4546_v41  ;;  %v12975_v21 = vld [vmem:[#allocation97_spill] sm:$0xff]  ;;  %v12977_v52 = vld [vmem:[#allocation26_spill] sm:$0xff] }
 0x2be   : > { %v3095_v50 = vpop.f32.mrf.mxu0  ;;  %v3508_v16 = vpop.f32.mrf.mxu1  ;;  %6709 = vmatmul.mubr.msk.bf16.gmra.mxu0 %vm509_vm1, %v9858_v2  ;;  %6741 = vmatmul.mubr.msk.bf16.gmra.mxu1 %vm509_vm1, %v10180_v17 }
 0x2bf   : > { %12971 = vst [vmem:[#allocation53_spill] sm:$0xff] %v10186_v24  ;;  %v10193_v8 = vadd.f32 %v3095_v50, %v12972_v42  ;;  %v10196_v47 = vadd.f32 %v3508_v16, %v9871_v19  ;;  %4363 = vmatprep.mubr.bf16.mxu0 %v12563_v10  ;;  %4776 = vmatprep.mubr.bf16.mxu1 %v12563_v10  ;;  %v4548_v50 = vrot.slane %v12977_v52, 3  ;;  %v12978_v42 = vld [vmem:[#allocation24_spill] sm:$0xff]  ;;  %v12979_v24 = vld [vmem:[#allocation98_spill] sm:$0xff] }
 0x2c0   : > { %v3097_v26 = vpop.f32.mrf.mxu0  ;;  %v3510_v3 = vpop.f32.mrf.mxu1  ;;  %v12983_v52 = vld [vmem:[#allocation100_spill] sm:$0xff] }
 0x2c1   : > { %12973 = vst [vmem:[#allocation13_spill] sm:$0xff] %v10196_v47  ;;  %v10201_v11 = vadd.f32 %v3097_v26, %v9577_v20  ;;  %v10204_v2 = vadd.f32 %v3510_v3, %v9880_v29  ;;  %v4549_v47 = vrot.slane %v12978_v42, 4 }
 0x2c2   : > { %v3099_v34 = vpop.f32.mrf.mxu0  ;;  %v3512_v12 = vpop.f32.mrf.mxu1 }
 0x2c3   : > { %12974 = vst [vmem:[#allocation83_spill] sm:$0xff] %v10204_v2  ;;  %v10210_v19 = vadd.f32 %v3099_v34, %v12975_v21  ;;  %v10213_v16 = vadd.f32 %v3512_v12, %v9886_v5  ;;  %v12981_v5 = vld [vmem:[#allocation99_spill] sm:$0xff] }
 0x2c4   : > { %v3101_v20 = vpop.f32.mrf.mxu0  ;;  %v3514_v26 = vpop.f32.mrf.mxu1 }
 0x2c5   : > { %12976 = vst [vmem:[#allocation54_spill] sm:$0xff] %v10213_v16  ;;  %v10218_v29 = vadd.f32 %v3101_v20, %v12979_v24  ;;  %v10221_v3 = vadd.f32 %v3514_v26, %v9895_v33  ;;  %v4550_v33 = vor.u32 %v4549_v47, %v4548_v50 }
 0x2c6   : > { %v3105_v59 = vpop.f32.mrf.mxu0  ;;  %v3518_v2 = vpop.f32.mrf.mxu1  ;;  %6710 = vmatmul.mubr.msk.bf16.gmra.mxu0 %vm509_vm1, %v9892_v22  ;;  %6742 = vmatmul.mubr.msk.bf16.gmra.mxu1 %vm509_vm1, %v10207_v56 }
 0x2c7   : > { %12980 = vst [vmem:[#allocation16_spill] sm:$0xff] %v10221_v3  ;;  %v10228_v34 = vadd.f32 %v3105_v59, %v12981_v5  ;;  %v10231_v12 = vadd.f32 %v3518_v2, %v9905_v45  ;;  %4373 = vmatprep.mubr.bf16.mxu0 %v12563_v10  ;;  %4786 = vmatprep.mubr.bf16.mxu1 %v12563_v10  ;;  %v12985_v59 = vld [vmem:[#allocation29_spill] sm:$0xff]  ;;  %v12986_v3 = vld [vmem:[#allocation27_spill] sm:$0xff] }
 0x2c8   : > { %v3107_v24 = vpop.f32.mrf.mxu0  ;;  %v3520_v21 = vpop.f32.mrf.mxu1  ;;  %v4552_v5 = vrot.slane %v12985_v59, 3  ;;  %v4553_v45 = vrot.slane %v12986_v3, 4  ;;  %v12987_v2 = vld [vmem:[#allocation101_spill] sm:$0xff]  ;;  %v10250_v47 = vsel %vm4524_vm7, %v4546_v41, %v4550_v33  ;;  %v12991_v3 = vld [vmem:[#allocation103_spill] sm:$0xff] }
 0x2c9   : > { %12982 = vst [vmem:[#allocation84_spill] sm:$0xff] %v10231_v12  ;;  %v10236_v42 = vadd.f32 %v3107_v24, %v12983_v52  ;;  %v10239_v22 = vadd.f32 %v3520_v21, %v9914_v57  ;;  %v12989_v52 = vld [vmem:[#allocation102_spill] sm:$0xff] }
 0x2ca   : > { %v3109_v20 = vpop.f32.mrf.mxu0  ;;  %v3522_v26 = vpop.f32.mrf.mxu1 }
 0x2cb   : > { %12984 = vst [vmem:[#allocation55_spill] sm:$0xff] %v10239_v22  ;;  %v10244_v12 = vadd.f32 %v3109_v20, %v12987_v2  ;;  %v10247_v16 = vadd.f32 %v3522_v26, %v9920_v37  ;;  %v4554_v37 = vor.u32 %v4553_v45, %v4552_v5  ;;  %v12993_v2 = vld [vmem:[#allocation104_spill] sm:$0xff] }
 0x2cc   : > { %v3111_v50 = vpop.f32.mrf.mxu0  ;;  %v3524_v24 = vpop.f32.mrf.mxu1 }
 0x2cd   : > { %12988 = vst [vmem:[#allocation85_spill] sm:$0xff] %v10247_v16  ;;  %v10253_v57 = vadd.f32 %v3111_v50, %v12989_v52  ;;  %v10256_v21 = vadd.f32 %v3524_v24, %v9929_v1  ;;  %v10277_v45 = vsel %vm4524_vm7, %v4550_v33, %v4554_v37  ;;  %v12995_v52 = vld [vmem:[#allocation105_spill] sm:$0xff]  ;;  %v12999_v16 = vld [vmem:[#allocation106_spill] sm:$0xff] }
 0x2ce   : > { %v3115_v59 = vpop.f32.mrf.mxu0  ;;  %v3528_v22 = vpop.f32.mrf.mxu1  ;;  %6711 = vmatmul.mubr.msk.bf16.gmra.mxu0 %vm509_vm1, %v9926_v39  ;;  %6743 = vmatmul.mubr.msk.bf16.gmra.mxu1 %vm509_vm1, %v10250_v47 }
 0x2cf   : > { %12990 = vst [vmem:[#allocation56_spill] sm:$0xff] %v10256_v21  ;;  %v10263_v41 = vadd.f32 %v3115_v59, %v12991_v3  ;;  %v10266_v20 = vadd.f32 %v3528_v22, %v9939_v30  ;;  %4383 = vmatprep.mubr.bf16.mxu0 %v12563_v10  ;;  %4796 = vmatprep.mubr.bf16.mxu1 %v12563_v10  ;;  %v12997_v59 = vld [vmem:[#allocation82_spill] sm:$0xff] }
 0x2d0   : > { %v3117_v1 = vpop.f32.mrf.mxu0  ;;  %v3530_v26 = vpop.f32.mrf.mxu1  ;;  %v4556_v3 = vrot.slane %v12997_v59, 3 }
 0x2d1   : > { %12992 = vst [vmem:[#allocation19_spill] sm:$0xff] %v10266_v20  ;;  %v10271_v50 = vadd.f32 %v3117_v1, %v12993_v2  ;;  %v10274_v39 = vadd.f32 %v3530_v26, %v9948_v27  ;;  %v12998_v20 = vld [vmem:[#allocation30_spill] sm:$0xff]  ;;  %v13000_v26 = vld [vmem:[#allocation75_spill] sm:$0xff] }
 0x2d2   : > { %v3119_v24 = vpop.f32.mrf.mxu0  ;;  %v3532_v5 = vpop.f32.mrf.mxu1  ;;  %v4557_v21 = vrot.slane %v12998_v20, 4  ;;  %v13004_v20 = vld [vmem:[#allocation76_spill] sm:$0xff] }
 0x2d3   : > { %12994 = vst [vmem:[#allocation86_spill] sm:$0xff] %v10274_v39  ;;  %v10280_v30 = vadd.f32 %v3119_v24, %v12995_v52  ;;  %v10283_v22 = vadd.f32 %v3532_v5, %v9954_v32  ;;  %v13003_v32 = vld [vmem:[#allocation107_spill] sm:$0xff] }
 0x2d4   : > { %v3121_v1 = vpop.f32.mrf.mxu0  ;;  %v3534_v2 = vpop.f32.mrf.mxu1 }
 0x2d5   : > { %12996 = vst [vmem:[#allocation58_spill] sm:$0xff] %v10283_v22  ;;  %v10288_v27 = vadd.f32 %v3121_v1, %v12999_v16  ;;  %v10291_v39 = vadd.f32 %v3534_v2, %v13000_v26  ;;  %v4558_v16 = vor.u32 %v4557_v21, %v4556_v3  ;;  %v13006_v1 = vld [vmem:[#allocation108_spill] sm:$0xff] }
 0x2d6   : > { %v3125_v33 = vpop.f32.mrf.mxu0  ;;  %v3538_v38 = vpop.f32.mrf.mxu1  ;;  %6712 = vmatmul.mubr.msk.bf16.gmra.mxu0 %vm509_vm1, %v13002_v23  ;;  %6744 = vmatmul.mubr.msk.bf16.gmra.mxu1 %vm509_vm1, %v10277_v45 }
 0x2d7   : > { %13001 = vst [vmem:[#allocation87_spill] sm:$0xff] %v10291_v39  ;;  %v10298_v24 = vadd.f32 %v3125_v33, %v13003_v32  ;;  %v10301_v5 = vadd.f32 %v3538_v38, %v13004_v20  ;;  %4393 = vmatprep.mubr.bf16.mxu0 %v12563_v10  ;;  %4806 = vmatprep.mubr.bf16.mxu1 %v12563_v10  ;;  %v13007_v33 = vld [vmem:[#allocation109_spill] sm:$0xff] }
 0x2d8   : > { %v3127_v52 = vpop.f32.mrf.mxu0  ;;  %v3540_v59 = vpop.f32.mrf.mxu1  ;;  %v10318_v20 = vsel %vm4524_vm7, %v4554_v37, %v4558_v16  ;;  %v13012_v16 = vld [vmem:[#allocation112_spill] sm:$0xff] }
 0x2d9   : > { %13005 = vst [vmem:[#allocation59_spill] sm:$0xff] %v10301_v5  ;;  %v10306_v2 = vadd.f32 %v3127_v52, %v13006_v1  ;;  %v10309_v23 = vadd.f32 %v3540_v59, %v9982_v61  ;;  %v13008_v5 = vld [vmem:[#allocation110_spill] sm:$0xff] }
 0x2da   : > { %v3129_v26 = vpop.f32.mrf.mxu0  ;;  %v3542_v39 = vpop.f32.mrf.mxu1 }
 0x2db   : > { %v10312_v32 = vadd.f32 %v3129_v26, %v13007_v33  ;;  %v10315_v38 = vadd.f32 %v3542_v39, %v9992_v54  ;;  %v13010_v54 = vld [vmem:[#allocation111_spill] sm:$0xff] }
 0x2dc   : > { %v3131_v21 = vpop.f32.mrf.mxu0  ;;  %v3544_v3 = vpop.f32.mrf.mxu1 }
 0x2dd   : > { %v10321_v22 = vadd.f32 %v3131_v21, %v13008_v5  ;;  %v10324_v52 = vadd.f32 %v3544_v3, %v10001_v28  ;;  %v13014_v21 = vld [vmem:[#allocation113_spill] sm:$0xff] }
 0x2de   : > { %v3135_v61 = vpop.f32.mrf.mxu0  ;;  %v3548_v59 = vpop.f32.mrf.mxu1  ;;  %6713 = vmatmul.mubr.msk.bf16.gmra.mxu0 %vm509_vm1, %v9998_v18  ;;  %6745 = vmatmul.mubr.msk.bf16.gmra.mxu1 %vm509_vm1, %v10318_v20 }
 0x2df   : > { %13009 = vst [vmem:[#allocation22_spill] sm:$0xff] %v10324_v52  ;;  %v10331_v39 = vadd.f32 %v3135_v61, %v13010_v54  ;;  %v10334_v37 = vadd.f32 %v3548_v59, %v10011_v58  ;;  %4849 = vmatprep.mubr.bf16.mxu0 %v12563_v10  ;;  %4962 = vmatprep.mubr.bf16.mxu1 %v12563_v10  ;;  %v13016_v54 = vld [vmem:[#allocation114_spill] sm:$0xff] }
 0x2e0   : > { %v3137_v28 = vpop.f32.mrf.mxu0  ;;  %v3550_v5 = vpop.f32.mrf.mxu1 }
 0x2e1   : > { %13011 = vst [vmem:[#allocation57_spill] sm:$0xff] %v10334_v37  ;;  %v10339_v1 = vadd.f32 %v3137_v28, %v13012_v16  ;;  %v10342_v18 = vadd.f32 %v3550_v5, %v10019_v40  ;;  %v13018_v40 = vld [vmem:[#allocation115_spill] sm:$0xff] }
 0x2e2   : > { %v3139_v26 = vpop.f32.mrf.mxu0  ;;  %v3552_v33 = vpop.f32.mrf.mxu1 }
 0x2e3   : > { %13013 = vst [vmem:[#allocation60_spill] sm:$0xff] %v10342_v18  ;;  %v10345_v3 = vadd.f32 %v3139_v26, %v13014_v21  ;;  %v10348_v58 = vadd.f32 %v3552_v33, %v10028_v53  ;;  %v13019_v53 = vld [vmem:[#allocation51_spill] sm:$0xff]  ;;  %v13021_v21 = vld [vmem:[#allocation116_spill] sm:$0xff] }
 0x2e4   : > { %v3141_v61 = vpop.f32.mrf.mxu0  ;;  %v3554_v59 = vpop.f32.mrf.mxu1 }
 0x2e5   : > { %13015 = vst [vmem:[#allocation88_spill] sm:$0xff] %v10348_v58  ;;  %v10351_v37 = vadd.f32 %v3141_v61, %v13016_v54  ;;  %v10354_v52 = vadd.f32 %v3554_v59, %v10042_v62 }
 0x2e6   : > { %v3591_v28 = vpop.f32.mrf.mxu0  ;;  %v3704_v16 = vpop.f32.mrf.mxu1  ;;  %6746 = vmatmul.mubr.msk.bf16.vlgmr.msra.gmra.mxu0 %vm509_vm1, %v10025_v7  ;;  %6754 = vmatmul.mubr.msk.bf16.vlgmr.msra.gmra.mxu1 %vm509_vm1, %v10025_v7 }
 0x2e7   : > { %13017 = vst [vmem:[#allocation62_spill] sm:$0xff] %v10354_v52  ;;  %v10361_v5 = vadd.f32 %v3591_v28, %v13018_v40  ;;  %v10364_v26 = vadd.f32 %v3704_v16, %v13019_v53  ;;  %4859 = vmatprep.mubr.bf16.mxu0 %v12563_v10  ;;  %4972 = vmatprep.mubr.bf16.mxu1 %v12563_v10  ;;  %v13022_v52 = vld [vmem:[#allocation117_spill] sm:$0xff] }
 0x2e8   : > { %v3593_v62 = vpop.f32.mrf.mxu0  ;;  %v3706_v33 = vpop.f32.mrf.mxu1 }
 0x2e9   : > { %13020 = vst [vmem:[#allocation25_spill] sm:$0xff] %v10364_v26  ;;  %v10369_v61 = vadd.f32 %v3593_v62, %v13021_v21  ;;  %v10372_v59 = vadd.f32 %v3706_v33, %v10078_v60  ;;  %v13024_v26 = vld [vmem:[#allocation31_spill] sm:$0xff]  ;;  %v13026_v60 = vld [vmem:[#allocation32_spill] sm:$0xff]  ;;  %v13028_v33 = vld [vmem:[#allocation69_spill] sm:$0xff] }
 0x2ea   : > { %v3595_v54 = vpop.f32.mrf.mxu0  ;;  %v3708_v7 = vpop.f32.mrf.mxu1 }
 0x2eb   : > { %v10375_v28 = vadd.f32 %v3595_v54, %v13022_v52  ;;  %v10378_v16 = vadd.f32 %v3708_v7, %v10086_v9 }
 0x2ec   : > { %v3597_v40 = vpop.f32.mrf.mxu0  ;;  %v3710_v53 = vpop.f32.mrf.mxu1 }
 0x2ed   : > { %13023 = vst [vmem:[#allocation89_spill] sm:$0xff] %v10378_v16  ;;  %v10381_v58 = vadd.f32 %v3597_v40, %v13024_v26  ;;  %v10384_v18 = vadd.f32 %v3710_v53, %v10101_v63  ;;  %v13029_v53 = vld [vmem:[#allocation33_spill] sm:$0xff] }
 0x2ee   : > { %v3601_v62 = vpop.f32.mrf.mxu0  ;;  %v3714_v21 = vpop.f32.mrf.mxu1  ;;  %6747 = vmatmul.mubr.msk.bf16.gmra.mxu0 %vm509_vm1, %v10092_v0  ;;  %6755 = vmatmul.mubr.msk.bf16.gmra.mxu1 %vm509_vm1, %v10092_v0 }
 0x2ef   : > { %13025 = vst [vmem:[#allocation64_spill] sm:$0xff] %v10384_v18  ;;  %v10391_v52 = vadd.f32 %v3601_v62, %v13026_v60  ;;  %v10394_v9 = vadd.f32 %v3714_v21, %v10117_v13  ;;  %4869 = vmatprep.mubr.bf16.mxu0 %v12563_v10  ;;  %4982 = vmatprep.mubr.bf16.mxu1 %v12563_v10 }
 0x2f0   : > { %v3603_v63 = vpop.f32.mrf.mxu0  ;;  %v3716_v26 = vpop.f32.mrf.mxu1 }
 0x2f1   : > { %13027 = vst [vmem:[#allocation61_spill] sm:$0xff] %v10394_v9  ;;  %v10399_v54 = vadd.f32 %v3603_v63, %v13028_v33  ;;  %v10402_v7 = vadd.f32 %v3716_v26, %v10131_v36  ;;  %v13031_v9 = vld [vmem:[#allocation34_spill] sm:$0xff]  ;;  %v13033_v36 = vld [vmem:[#allocation35_spill] sm:$0xff] }
 0x2f2   : > { %v3605_v40 = vpop.f32.mrf.mxu0  ;;  %v3718_v0 = vpop.f32.mrf.mxu1 }
 0x2f3   : > { %v10405_v62 = vadd.f32 %v3605_v40, %v13029_v53  ;;  %v10408_v13 = vadd.f32 %v3718_v0, %v10140_v44  ;;  %v13035_v40 = vld [vmem:[#allocation36_spill] sm:$0xff] }
 0x2f4   : > { %v3607_v21 = vpop.f32.mrf.mxu0  ;;  %v3720_v60 = vpop.f32.mrf.mxu1 }
 0x2f5   : > { %13030 = vst [vmem:[#allocation28_spill] sm:$0xff] %v10408_v13  ;;  %v10411_v18 = vadd.f32 %v3607_v21, %v13031_v9  ;;  %v10414_v16 = vadd.f32 %v3720_v60, %v10148_v14  ;;  %v13036_v60 = vld [vmem:[#allocation37_spill] sm:$0xff] }
 0x2f6   : > { %v3611_v63 = vpop.f32.mrf.mxu0  ;;  %v3724_v33 = vpop.f32.mrf.mxu1  ;;  %6748 = vmatmul.mubr.msk.bf16.gmra.mxu0 %vm509_vm1, %v10137_v15  ;;  %6756 = vmatmul.mubr.msk.bf16.gmra.mxu1 %vm509_vm1, %v10137_v15 }
 0x2f7   : > { %13032 = vst [vmem:[#allocation7_spill] sm:$0xff] %v10414_v16  ;;  %v10421_v26 = vadd.f32 %v3611_v63, %v13033_v36  ;;  %v10424_v44 = vadd.f32 %v3724_v33, %v10158_v48  ;;  %4879 = vmatprep.mubr.bf16.mxu0 %v12563_v10  ;;  %4992 = vmatprep.mubr.bf16.mxu1 %v12563_v10 }
 0x2f8   : > { %v3613_v14 = vpop.f32.mrf.mxu0  ;;  %v3726_v9 = vpop.f32.mrf.mxu1 }
 0x2f9   : > { %13034 = vst [vmem:[#allocation8_spill] sm:$0xff] %v10424_v44  ;;  %v10429_v0 = vadd.f32 %v3613_v14, %v13035_v40  ;;  %v10432_v53 = vadd.f32 %v3726_v9, %v10166_v35  ;;  %v13038_v44 = vld [vmem:[#allocation71_spill] sm:$0xff]  ;;  %v13040_v35 = vld [vmem:[#allocation38_spill] sm:$0xff] }
 0x2fa   : > { %v3615_v21 = vpop.f32.mrf.mxu0  ;;  %v3728_v15 = vpop.f32.mrf.mxu1 }
 0x2fb   : > { %v10435_v63 = vadd.f32 %v3615_v21, %v13036_v60  ;;  %v10438_v48 = vadd.f32 %v3728_v15, %v10174_v46  ;;  %v13042_v21 = vld [vmem:[#allocation39_spill] sm:$0xff] }
 0x2fc   : > { %v3617_v33 = vpop.f32.mrf.mxu0  ;;  %v3730_v36 = vpop.f32.mrf.mxu1 }
 0x2fd   : > { %13037 = vst [vmem:[#allocation11_spill] sm:$0xff] %v10438_v48  ;;  %v10441_v16 = vadd.f32 %v3617_v33, %v13038_v44  ;;  %v10444_v13 = vadd.f32 %v3730_v36, %v10183_v43  ;;  %v13043_v36 = vld [vmem:[#allocation40_spill] sm:$0xff] }
 0x2fe   : > { %v3621_v14 = vpop.f32.mrf.mxu0  ;;  %v3734_v40 = vpop.f32.mrf.mxu1  ;;  %6749 = vmatmul.mubr.msk.bf16.gmra.mxu0 %vm509_vm1, %v10180_v17  ;;  %6757 = vmatmul.mubr.msk.bf16.gmra.mxu1 %vm509_vm1, %v10180_v17 }
 0x2ff   : > { %13039 = vst [vmem:[#allocation9_spill] sm:$0xff] %v10444_v13  ;;  %v10451_v9 = vadd.f32 %v3621_v14, %v13040_v35  ;;  %v10454_v46 = vadd.f32 %v3734_v40, %v10193_v8  ;;  %4889 = vmatprep.mubr.bf16.mxu0 %v12563_v10  ;;  %5002 = vmatprep.mubr.bf16.mxu1 %v12563_v10 }
 0x300   : > { %v3623_v43 = vpop.f32.mrf.mxu0  ;;  %v3736_v44 = vpop.f32.mrf.mxu1 }
 0x301   : > { %13041 = vst [vmem:[#allocation67_spill] sm:$0xff] %v10454_v46  ;;  %v10459_v15 = vadd.f32 %v3623_v43, %v13042_v21  ;;  %v10462_v60 = vadd.f32 %v3736_v44, %v10201_v11  ;;  %v13045_v46 = vld [vmem:[#allocation41_spill] sm:$0xff]  ;;  %v13047_v11 = vld [vmem:[#allocation42_spill] sm:$0xff] }
 0x302   : > { %v3625_v33 = vpop.f32.mrf.mxu0  ;;  %v3738_v17 = vpop.f32.mrf.mxu1 }
 0x303   : > { %v10465_v14 = vadd.f32 %v3625_v33, %v13043_v36  ;;  %v10468_v8 = vadd.f32 %v3738_v17, %v10210_v19  ;;  %v13049_v33 = vld [vmem:[#allocation43_spill] sm:$0xff] }
 0x304   : > { %v3627_v40 = vpop.f32.mrf.mxu0  ;;  %v3740_v35 = vpop.f32.mrf.mxu1 }
 0x305   : > { %13044 = vst [vmem:[#allocation63_spill] sm:$0xff] %v10468_v8  ;;  %v10471_v13 = vadd.f32 %v3627_v40, %v13045_v46  ;;  %v10474_v48 = vadd.f32 %v3740_v35, %v10218_v29  ;;  %v13050_v35 = vld [vmem:[#allocation72_spill] sm:$0xff] }
 0x306   : > { %v3631_v43 = vpop.f32.mrf.mxu0  ;;  %v3744_v21 = vpop.f32.mrf.mxu1  ;;  %6750 = vmatmul.mubr.msk.bf16.gmra.mxu0 %vm509_vm1, %v10207_v56  ;;  %6758 = vmatmul.mubr.msk.bf16.gmra.mxu1 %vm509_vm1, %v10207_v56 }
 0x307   : > { %13046 = vst [vmem:[#allocation66_spill] sm:$0xff] %v10474_v48  ;;  %v10481_v44 = vadd.f32 %v3631_v43, %v13047_v11  ;;  %v10484_v19 = vadd.f32 %v3744_v21, %v10228_v34  ;;  %4899 = vmatprep.mubr.bf16.mxu0 %v12563_v10  ;;  %5012 = vmatprep.mubr.bf16.mxu1 %v12563_v10 }
 0x308   : > { %v3633_v29 = vpop.f32.mrf.mxu0  ;;  %v3746_v46 = vpop.f32.mrf.mxu1 }
 0x309   : > { %13048 = vst [vmem:[#allocation65_spill] sm:$0xff] %v10484_v19  ;;  %v10489_v17 = vadd.f32 %v3633_v29, %v13049_v33  ;;  %v10492_v36 = vadd.f32 %v3746_v46, %v10236_v42  ;;  %v13052_v19 = vld [vmem:[#allocation44_spill] sm:$0xff]  ;;  %v13054_v42 = vld [vmem:[#allocation73_spill] sm:$0xff] }
 0x30a   : > { %v3635_v40 = vpop.f32.mrf.mxu0  ;;  %v3748_v56 = vpop.f32.mrf.mxu1 }
 0x30b   : > { %v10495_v43 = vadd.f32 %v3635_v40, %v13050_v35  ;;  %v10498_v34 = vadd.f32 %v3748_v56, %v10244_v12  ;;  %v13056_v40 = vld [vmem:[#allocation45_spill] sm:$0xff] }
 0x30c   : > { %v3637_v21 = vpop.f32.mrf.mxu0  ;;  %v3750_v11 = vpop.f32.mrf.mxu1 }
 0x30d   : > { %13051 = vst [vmem:[#allocation68_spill] sm:$0xff] %v10498_v34  ;;  %v10501_v48 = vadd.f32 %v3637_v21, %v13052_v19  ;;  %v10504_v8 = vadd.f32 %v3750_v11, %v10253_v57  ;;  %v13057_v11 = vld [vmem:[#allocation74_spill] sm:$0xff] }
 0x30e   : > { %v3641_v29 = vpop.f32.mrf.mxu0  ;;  %v3754_v33 = vpop.f32.mrf.mxu1  ;;  %6751 = vmatmul.mubr.msk.bf16.gmra.mxu0 %vm509_vm1, %v10250_v47  ;;  %6759 = vmatmul.mubr.msk.bf16.gmra.mxu1 %vm509_vm1, %v10250_v47 }
 0x30f   : > { %13053 = vst [vmem:[#allocation14_spill] sm:$0xff] %v10504_v8  ;;  %v10511_v46 = vadd.f32 %v3641_v29, %v13054_v42  ;;  %v10514_v12 = vadd.f32 %v3754_v33, %v10263_v41  ;;  %4909 = vmatprep.mubr.bf16.mxu0 %v12563_v10  ;;  %5022 = vmatprep.mubr.bf16.mxu1 %v12563_v10 }
 0x310   : > { %v3643_v57 = vpop.f32.mrf.mxu0  ;;  %v3756_v19 = vpop.f32.mrf.mxu1 }
 0x311   : > { %13055 = vst [vmem:[#allocation12_spill] sm:$0xff] %v10514_v12  ;;  %v10519_v56 = vadd.f32 %v3643_v57, %v13056_v40  ;;  %v10522_v35 = vadd.f32 %v3756_v19, %v10271_v50  ;;  %v13058_v12 = vld [vmem:[#allocation47_spill] sm:$0xff]  ;;  %v13060_v50 = vld [vmem:[#allocation48_spill] sm:$0xff] }
 0x312   : > { %v3645_v21 = vpop.f32.mrf.mxu0  ;;  %v3758_v47 = vpop.f32.mrf.mxu1 }
 0x313   : > { %v10525_v29 = vadd.f32 %v3645_v21, %v13057_v11  ;;  %v10528_v41 = vadd.f32 %v3758_v47, %v10280_v30  ;;  %v13062_v21 = vld [vmem:[#allocation77_spill] sm:$0xff] }
 0x314   : > { %v3647_v33 = vpop.f32.mrf.mxu0  ;;  %v3760_v42 = vpop.f32.mrf.mxu1 }
 0x315   : > { %v10531_v8 = vadd.f32 %v3647_v33, %v13058_v12  ;;  %v10534_v34 = vadd.f32 %v3760_v42, %v10288_v27  ;;  %v13063_v42 = vld [vmem:[#allocation49_spill] sm:$0xff] }
 0x316   : > { %v3651_v57 = vpop.f32.mrf.mxu0  ;;  %v3764_v40 = vpop.f32.mrf.mxu1  ;;  %6752 = vmatmul.mubr.msk.bf16.gmra.mxu0 %vm509_vm1, %v10277_v45  ;;  %6760 = vmatmul.mubr.msk.bf16.gmra.mxu1 %vm509_vm1, %v10277_v45 }
 0x317   : > { %13059 = vst [vmem:[#allocation70_spill] sm:$0xff] %v10534_v34  ;;  %v10541_v19 = vadd.f32 %v3651_v57, %v13060_v50  ;;  %v10544_v30 = vadd.f32 %v3764_v40, %v10298_v24  ;;  %4919 = vmatprep.mubr.bf16.mxu0 %v12563_v10  ;;  %5032 = vmatprep.mubr.bf16.mxu1 %v12563_v10 }
 0x318   : > { %v3653_v27 = vpop.f32.mrf.mxu0  ;;  %v3766_v12 = vpop.f32.mrf.mxu1 }
 0x319   : > { %13061 = vst [vmem:[#allocation90_spill] sm:$0xff] %v10544_v30  ;;  %v10549_v47 = vadd.f32 %v3653_v27, %v13062_v21  ;;  %v10552_v11 = vadd.f32 %v3766_v12, %v10306_v2  ;;  %v13065_v30 = vld [vmem:[#allocation78_spill] sm:$0xff] }
 0x31a   : > { %v3655_v33 = vpop.f32.mrf.mxu0  ;;  %v3768_v45 = vpop.f32.mrf.mxu1  ;;  %v13067_v2 = vld [vmem:[#allocation50_spill] sm:$0xff] }
 0x31b   : > { %v10555_v57 = vadd.f32 %v3655_v33, %v13063_v42  ;;  %v10558_v24 = vadd.f32 %v3768_v45, %v10312_v32  ;;  %v13069_v45 = vld [vmem:[#allocation5_spill] sm:$0xff] }
 0x31c   : > { %v3657_v40 = vpop.f32.mrf.mxu0  ;;  %v3770_v50 = vpop.f32.mrf.mxu1 }
 0x31d   : > { %13064 = vst [vmem:[#allocation17_spill] sm:$0xff] %v10558_v24  ;;  %v10561_v10 = vadd.f32 %v3657_v40, %v13065_v30  ;;  %v10564_v34 = vadd.f32 %v3770_v50, %v10321_v22 }
 0x31e   : > { %v3661_v27 = vpop.f32.mrf.mxu0  ;;  %v3774_v21 = vpop.f32.mrf.mxu1  ;;  %6753 = vmatmul.mubr.msk.bf16.gmra.mxu0 %vm509_vm1, %v10318_v20  ;;  %6761 = vmatmul.mubr.msk.bf16.gmra.mxu1 %vm509_vm1, %v10318_v20 }
 0x31f   : > { %13066 = vst [vmem:[#allocation15_spill] sm:$0xff] %v10564_v34  ;;  %v10571_v12 = vadd.f32 %v3661_v27, %v13067_v2  ;;  %v10574_v32 = vadd.f32 %v3774_v21, %v10331_v39  ;;  %v13071_v34 = vld [vmem:[#allocation6_spill] sm:$0xff]  ;;  %v13072_v39 = vld [vmem:[#allocation79_spill] sm:$0xff] }
 0x320   : > { %v3663_v33 = vpop.f32.mrf.mxu0  ;;  %v3776_v30 = vpop.f32.mrf.mxu1 }
 0x321   : > { %13068 = vst [vmem:[#allocation91_spill] sm:$0xff] %v10574_v32  ;;  %v10577_v42 = vadd.f32 %v3663_v33, %v13069_v45  ;;  %v10580_v22 = vadd.f32 %v3776_v30, %v10339_v1  ;;  %v13073_v1 = vld [vmem:[#allocation80_spill] sm:$0xff] }
 0x322   : > { %v3665_v40 = vpop.f32.mrf.mxu0  ;;  %v3778_v50 = vpop.f32.mrf.mxu1 }
 0x323   : > { %13070 = vst [vmem:[#allocation92_spill] sm:$0xff] %v10580_v22  ;;  %v10583_v24 = vadd.f32 %v3665_v40, %v13071_v34  ;;  %v10586_v20 = vadd.f32 %v3778_v50, %v10345_v3 }
 0x324   : > { %v3667_v27 = vpop.f32.mrf.mxu0  ;;  %v3780_v2 = vpop.f32.mrf.mxu1 }
 0x325   : > { %v10589_v21 = vadd.f32 %v3667_v27, %v13072_v39  ;;  %v10592_v32 = vadd.f32 %v3780_v2, %v10351_v37 }
 0x326   : > { %v4099_v33 = vpop.f32.mrf.mxu0  ;;  %v4212_v45 = vpop.f32.mrf.mxu1 }
 0x327   : > { %v10595_v30 = vadd.f32 %v4099_v33, %v13073_v1  ;;  %v10598_v22 = vadd.f32 %v4212_v45, %v10361_v5 }
 0x328   : > { %v4101_v34 = vpop.f32.mrf.mxu0  ;;  %v4214_v40 = vpop.f32.mrf.mxu1 }
 0x329   : > { %v10601_v3 = vadd.f32 %v4101_v34, %v10081_v55  ;;  %v10604_v50 = vadd.f32 %v4214_v40, %v10369_v61 }
 0x32a   : > { %v4103_v27 = vpop.f32.mrf.mxu0  ;;  %v4216_v39 = vpop.f32.mrf.mxu1 }
 0x32b   : > { %v10607_v37 = vadd.f32 %v4103_v27, %v10089_v4  ;;  %v10610_v2 = vadd.f32 %v4216_v39, %v10375_v28 }
 0x32c   : > { %v4105_v33 = vpop.f32.mrf.mxu0  ;;  %v4218_v1 = vpop.f32.mrf.mxu1 }
 0x32d   : > { %v10613_v5 = vadd.f32 %v4105_v33, %v10104_v49  ;;  %v10616_v45 = vadd.f32 %v4218_v1, %v10381_v58 }
 0x32e   : > { %v4109_v55 = vpop.f32.mrf.mxu0  ;;  %v4222_v34 = vpop.f32.mrf.mxu1 }
 0x32f   : > { %v10619_v61 = vadd.f32 %v4109_v55, %v10120_v31  ;;  %v10622_v40 = vadd.f32 %v4222_v34, %v10391_v52 }
 0x330   : > { %v4111_v4 = vpop.f32.mrf.mxu0  ;;  %v4224_v27 = vpop.f32.mrf.mxu1 }
 0x331   : > { %13074 = vst [vmem:[#allocation20_spill] sm:$0xff] %v10622_v40  ;;  %v10625_v28 = vadd.f32 %v4111_v4, %v10134_v25  ;;  %v10628_v39 = vadd.f32 %v4224_v27, %v10399_v54  ;;  %v13078_v54 = vld [vmem:[#allocation52_spill] sm:$0xff] }
 0x332   : > { %v4113_v49 = vpop.f32.mrf.mxu0  ;;  %v4226_v33 = vpop.f32.mrf.mxu1 }
 0x333   : > { %13075 = vst [vmem:[#allocation18_spill] sm:$0xff] %v10628_v39  ;;  %v10631_v58 = vadd.f32 %v4113_v49, %v10143_v6  ;;  %v10634_v1 = vadd.f32 %v4226_v33, %v10405_v62  ;;  %v13080_v62 = vld [vmem:[#allocation10_spill] sm:$0xff] }
 0x334   : > { %v4115_v31 = vpop.f32.mrf.mxu0  ;;  %v4228_v55 = vpop.f32.mrf.mxu1 }
 0x335   : > { %13076 = vst [vmem:[#allocation93_spill] sm:$0xff] %v10634_v1  ;;  %v10637_v52 = vadd.f32 %v4115_v31, %v10151_v51  ;;  %v10640_v34 = vadd.f32 %v4228_v55, %v10411_v18  ;;  %v13082_v18 = vld [vmem:[#allocation81_spill] sm:$0xff] }
 0x336   : > { %v4119_v25 = vpop.f32.mrf.mxu0  ;;  %v4232_v4 = vpop.f32.mrf.mxu1 }
 0x337   : > { %13077 = vst [vmem:[#allocation23_spill] sm:$0xff] %v10640_v34  ;;  %v10643_v27 = vadd.f32 %v4119_v25, %v13078_v54  ;;  %v10646_v39 = vadd.f32 %v4232_v4, %v10421_v26  ;;  %v13084_v26 = vld [vmem:[#allocation53_spill] sm:$0xff] }
 0x338   : > { %v4121_v6 = vpop.f32.mrf.mxu0  ;;  %v4234_v49 = vpop.f32.mrf.mxu1 }
 0x339   : > { %13079 = vst [vmem:[#allocation21_spill] sm:$0xff] %v10646_v39  ;;  %v10649_v33 = vadd.f32 %v4121_v6, %v13080_v62  ;;  %v10652_v1 = vadd.f32 %v4234_v49, %v10429_v0  ;;  %v13086_v0 = vld [vmem:[#allocation13_spill] sm:$0xff] }
 0x33a   : > { %v4123_v51 = vpop.f32.mrf.mxu0  ;;  %v4236_v31 = vpop.f32.mrf.mxu1 }
 0x33b   : > { %13081 = vst [vmem:[#allocation94_spill] sm:$0xff] %v10652_v1  ;;  %v10655_v55 = vadd.f32 %v4123_v51, %v13082_v18  ;;  %v10658_v34 = vadd.f32 %v4236_v31, %v10435_v63  ;;  %v13088_v63 = vld [vmem:[#allocation83_spill] sm:$0xff] }
 0x33c   : > { %v4125_v25 = vpop.f32.mrf.mxu0  ;;  %v4238_v54 = vpop.f32.mrf.mxu1 }
 0x33d   : > { %13083 = vst [vmem:[#allocation95_spill] sm:$0xff] %v10658_v34  ;;  %v10661_v4 = vadd.f32 %v4125_v25, %v13084_v26  ;;  %v10664_v39 = vadd.f32 %v4238_v54, %v10441_v16  ;;  %v13090_v16 = vld [vmem:[#allocation54_spill] sm:$0xff] }
 0x33e   : > { %v4129_v6 = vpop.f32.mrf.mxu0  ;;  %v4242_v62 = vpop.f32.mrf.mxu1 }
 0x33f   : > { %13085 = vst [vmem:[#allocation96_spill] sm:$0xff] %v10664_v39  ;;  %v10667_v49 = vadd.f32 %v4129_v6, %v13086_v0  ;;  %v10670_v1 = vadd.f32 %v4242_v62, %v10451_v9  ;;  %v13092_v9 = vld [vmem:[#allocation16_spill] sm:$0xff] }
 0x340   : > { %v4131_v51 = vpop.f32.mrf.mxu0  ;;  %v4244_v18 = vpop.f32.mrf.mxu1 }
 0x341   : > { %13087 = vst [vmem:[#allocation97_spill] sm:$0xff] %v10670_v1  ;;  %v10673_v31 = vadd.f32 %v4131_v51, %v13088_v63  ;;  %v10676_v34 = vadd.f32 %v4244_v18, %v10459_v15  ;;  %v13094_v15 = vld [vmem:[#allocation84_spill] sm:$0xff] }
 0x342   : > { %v4133_v25 = vpop.f32.mrf.mxu0  ;;  %v4246_v26 = vpop.f32.mrf.mxu1 }
 0x343   : > { %13089 = vst [vmem:[#allocation26_spill] sm:$0xff] %v10676_v34  ;;  %v10679_v54 = vadd.f32 %v4133_v25, %v13090_v16  ;;  %v10682_v39 = vadd.f32 %v4246_v26, %v10465_v14  ;;  %v13096_v14 = vld [vmem:[#allocation55_spill] sm:$0xff] }
 0x344   : > { %v4135_v6 = vpop.f32.mrf.mxu0  ;;  %v4248_v0 = vpop.f32.mrf.mxu1 }
 0x345   : > { %13091 = vst [vmem:[#allocation24_spill] sm:$0xff] %v10682_v39  ;;  %v10685_v62 = vadd.f32 %v4135_v6, %v13092_v9  ;;  %v10688_v1 = vadd.f32 %v4248_v0, %v10471_v13  ;;  %v13098_v13 = vld [vmem:[#allocation85_spill] sm:$0xff] }
 0x346   : > { %v4139_v51 = vpop.f32.mrf.mxu0  ;;  %v4252_v63 = vpop.f32.mrf.mxu1 }
 0x347   : > { %13093 = vst [vmem:[#allocation98_spill] sm:$0xff] %v10688_v1  ;;  %v10691_v18 = vadd.f32 %v4139_v51, %v13094_v15  ;;  %v10694_v34 = vadd.f32 %v4252_v63, %v10481_v44  ;;  %v13100_v44 = vld [vmem:[#allocation56_spill] sm:$0xff] }
 0x348   : > { %v4141_v25 = vpop.f32.mrf.mxu0  ;;  %v4254_v16 = vpop.f32.mrf.mxu1 }
 0x349   : > { %13095 = vst [vmem:[#allocation99_spill] sm:$0xff] %v10694_v34  ;;  %v10697_v26 = vadd.f32 %v4141_v25, %v13096_v14  ;;  %v10700_v39 = vadd.f32 %v4254_v16, %v10489_v17  ;;  %v13102_v17 = vld [vmem:[#allocation19_spill] sm:$0xff] }
 0x34a   : > { %v4143_v6 = vpop.f32.mrf.mxu0  ;;  %v4256_v9 = vpop.f32.mrf.mxu1 }
 0x34b   : > { %13097 = vst [vmem:[#allocation100_spill] sm:$0xff] %v10700_v39  ;;  %v10703_v0 = vadd.f32 %v4143_v6, %v13098_v13  ;;  %v10706_v1 = vadd.f32 %v4256_v9, %v10495_v43  ;;  %v13104_v43 = vld [vmem:[#allocation86_spill] sm:$0xff] }
 0x34c   : > { %v4145_v51 = vpop.f32.mrf.mxu0  ;;  %v4258_v15 = vpop.f32.mrf.mxu1 }
 0x34d   : > { %13099 = vst [vmem:[#allocation29_spill] sm:$0xff] %v10706_v1  ;;  %v10709_v63 = vadd.f32 %v4145_v51, %v13100_v44  ;;  %v10712_v34 = vadd.f32 %v4258_v15, %v10501_v48  ;;  %v13106_v48 = vld [vmem:[#allocation58_spill] sm:$0xff] }
 0x34e   : > { %v4149_v25 = vpop.f32.mrf.mxu0  ;;  %v4262_v14 = vpop.f32.mrf.mxu1 }
 0x34f   : > { %13101 = vst [vmem:[#allocation27_spill] sm:$0xff] %v10712_v34  ;;  %v10715_v16 = vadd.f32 %v4149_v25, %v13102_v17  ;;  %v10718_v39 = vadd.f32 %v4262_v14, %v10511_v46  ;;  %v13108_v46 = vld [vmem:[#allocation87_spill] sm:$0xff] }
 0x350   : > { %v4151_v6 = vpop.f32.mrf.mxu0  ;;  %v4264_v13 = vpop.f32.mrf.mxu1 }
 0x351   : > { %13103 = vst [vmem:[#allocation101_spill] sm:$0xff] %v10718_v39  ;;  %v10721_v9 = vadd.f32 %v4151_v6, %v13104_v43  ;;  %v10724_v1 = vadd.f32 %v4264_v13, %v10519_v56  ;;  %v13110_v56 = vld [vmem:[#allocation59_spill] sm:$0xff] }
 0x352   : > { %v4153_v51 = vpop.f32.mrf.mxu0  ;;  %v4266_v44 = vpop.f32.mrf.mxu1 }
 0x353   : > { %13105 = vst [vmem:[#allocation102_spill] sm:$0xff] %v10724_v1  ;;  %v10727_v15 = vadd.f32 %v4153_v51, %v13106_v48  ;;  %v10730_v34 = vadd.f32 %v4266_v44, %v10525_v29 }
 0x354   : > { %v4155_v25 = vpop.f32.mrf.mxu0  ;;  %v4268_v17 = vpop.f32.mrf.mxu1 }
 0x355   : > { %13107 = vst [vmem:[#allocation103_spill] sm:$0xff] %v10730_v34  ;;  %v10733_v14 = vadd.f32 %v4155_v25, %v13108_v46  ;;  %v10736_v39 = vadd.f32 %v4268_v17, %v10531_v8 }
 0x356   : > { %v4159_v6 = vpop.f32.mrf.mxu0  ;;  %v4272_v43 = vpop.f32.mrf.mxu1 }
 0x357   : > { %13109 = vst [vmem:[#allocation104_spill] sm:$0xff] %v10736_v39  ;;  %v10739_v13 = vadd.f32 %v4159_v6, %v13110_v56  ;;  %v10742_v1 = vadd.f32 %v4272_v43, %v10541_v19  ;;  %v13114_v19 = vld [vmem:[#allocation22_spill] sm:$0xff] }
 0x358   : > { %v4161_v51 = vpop.f32.mrf.mxu0  ;;  %v4274_v48 = vpop.f32.mrf.mxu1 }
 0x359   : > { %13111 = vst [vmem:[#allocation105_spill] sm:$0xff] %v10742_v1  ;;  %v10745_v29 = vadd.f32 %v4161_v51, %v10309_v23  ;;  %v10748_v44 = vadd.f32 %v4274_v48, %v10549_v47  ;;  %v13116_v47 = vld [vmem:[#allocation57_spill] sm:$0xff] }
 0x35a   : > { %v4163_v25 = vpop.f32.mrf.mxu0  ;;  %v4276_v46 = vpop.f32.mrf.mxu1 }
 0x35b   : > { %13112 = vst [vmem:[#allocation82_spill] sm:$0xff] %v10748_v44  ;;  %v10751_v8 = vadd.f32 %v4163_v25, %v10315_v38  ;;  %v10754_v17 = vadd.f32 %v4276_v46, %v10555_v57  ;;  %v13118_v57 = vld [vmem:[#allocation60_spill] sm:$0xff] }
 0x35c   : > { %v4165_v6 = vpop.f32.mrf.mxu0  ;;  %v4278_v56 = vpop.f32.mrf.mxu1 }
 0x35d   : > { %13113 = vst [vmem:[#allocation30_spill] sm:$0xff] %v10754_v17  ;;  %v10757_v43 = vadd.f32 %v4165_v6, %v13114_v19  ;;  %v10760_v1 = vadd.f32 %v4278_v56, %v10561_v10  ;;  %v13120_v10 = vld [vmem:[#allocation88_spill] sm:$0xff] }
 0x35e   : > { %v4169_v23 = vpop.f32.mrf.mxu0  ;;  %v4282_v51 = vpop.f32.mrf.mxu1 }
 0x35f   : > { %13115 = vst [vmem:[#allocation106_spill] sm:$0xff] %v10760_v1  ;;  %v10763_v48 = vadd.f32 %v4169_v23, %v13116_v47  ;;  %v10766_v44 = vadd.f32 %v4282_v51, %v10571_v12  ;;  %v13122_v12 = vld [vmem:[#allocation62_spill] sm:$0xff] }
 0x360   : > { %v4171_v38 = vpop.f32.mrf.mxu0  ;;  %v4284_v25 = vpop.f32.mrf.mxu1 }
 0x361   : > { %13117 = vst [vmem:[#allocation75_spill] sm:$0xff] %v10766_v44  ;;  %v10769_v46 = vadd.f32 %v4171_v38, %v13118_v57  ;;  %v10772_v17 = vadd.f32 %v4284_v25, %v10577_v42  ;;  %v13124_v42 = vld [vmem:[#allocation25_spill] sm:$0xff] }
 0x362   : > { %v4173_v6 = vpop.f32.mrf.mxu0  ;;  %v4286_v19 = vpop.f32.mrf.mxu1 }
 0x363   : > { %13119 = vst [vmem:[#allocation46_spill] sm:$0xff] %v10772_v17  ;;  %v10775_v56 = vadd.f32 %v4173_v6, %v13120_v10  ;;  %v10778_v1 = vadd.f32 %v4286_v19, %v10583_v24 }
 0x364   : > { %v4175_v23 = vpop.f32.mrf.mxu0  ;;  %v4288_v47 = vpop.f32.mrf.mxu1 }
 0x365   : > { %13121 = vst [vmem:[#allocation107_spill] sm:$0xff] %v10778_v1  ;;  %v10781_v51 = vadd.f32 %v4175_v23, %v13122_v12  ;;  %v10784_v44 = vadd.f32 %v4288_v47, %v10589_v21  ;;  %v13125_v12 = vld [vmem:[#allocation89_spill] sm:$0xff] }
 0x366   : > { %v4325_v38 = vpop.f32.mrf.mxu0  ;;  %v4738_v57 = vpop.f32.mrf.mxu1 }
 0x367   : > { %13123 = vst [vmem:[#allocation76_spill] sm:$0xff] %v10784_v44  ;;  %v10787_v25 = vadd.f32 %v4325_v38, %v13124_v42  ;;  %v10790_v17 = vadd.f32 %v4738_v57, %v10595_v30  ;;  %v13126_v42 = vld [vmem:[#allocation64_spill] sm:$0xff] }
 0x368   : > { %v4327_v6 = vpop.f32.mrf.mxu0  ;;  %v10792_v10 = vpop.f32.mrf.mxu1 }
 0x369   : > { %v10795_v24 = vadd.f32 %v4327_v6, %v10372_v59  ;;  %v13127_v59 = vld [vmem:[#allocation61_spill] sm:$0xff] }
 0x36a   : > { %v4329_v19 = vpop.f32.mrf.mxu0  ;;  %v4742_v23 = vpop.f32.mrf.mxu1 }
 0x36b   : > { %v10798_v1 = vadd.f32 %v4329_v19, %v13125_v12  ;;  %v10801_v21 = vadd.f32 %v4742_v23, %v10607_v37 }
 0x36c   : > { %v4331_v47 = vpop.f32.mrf.mxu0  ;;  %v4744_v38 = vpop.f32.mrf.mxu1 }
 0x36d   : > { %v10804_v44 = vadd.f32 %v4331_v47, %v13126_v42  ;;  %v10807_v30 = vadd.f32 %v4744_v38, %v10613_v5  ;;  %v13130_v5 = vld [vmem:[#allocation28_spill] sm:$0xff] }
 0x36e   : > { %v4335_v57 = vpop.f32.mrf.mxu0  ;;  %v4748_v39 = vpop.f32.mrf.mxu1 }
 0x36f   : > { %v10810_v6 = vadd.f32 %v4335_v57, %v13127_v59  ;;  %v10813_v34 = vadd.f32 %v4748_v39, %v10619_v61  ;;  %v13131_v61 = vld [vmem:[#allocation7_spill] sm:$0xff] }
 0x370   : > { %v4337_v19 = vpop.f32.mrf.mxu0  ;;  %v4750_v12 = vpop.f32.mrf.mxu1 }
 0x371   : > { %13128 = vst [vmem:[#allocation108_spill] sm:$0xff] %v10810_v6  ;;  %v10816_v37 = vadd.f32 %v4337_v19, %v10402_v7  ;;  %v10819_v23 = vadd.f32 %v4750_v12, %v10625_v28  ;;  %v13133_v28 = vld [vmem:[#allocation8_spill] sm:$0xff] }
 0x372   : > { %v4339_v47 = vpop.f32.mrf.mxu0  ;;  %v4752_v42 = vpop.f32.mrf.mxu1 }
 0x373   : > { %13129 = vst [vmem:[#allocation109_spill] sm:$0xff] %v10816_v37  ;;  %v10822_v38 = vadd.f32 %v4339_v47, %v13130_v5  ;;  %v10825_v40 = vadd.f32 %v4752_v42, %v10631_v58 }
 0x374   : > { %v4341_v57 = vpop.f32.mrf.mxu0  ;;  %v4754_v59 = vpop.f32.mrf.mxu1 }
 0x375   : > { %v10828_v39 = vadd.f32 %v4341_v57, %v13131_v61  ;;  %v10831_v6 = vadd.f32 %v4754_v59, %v10637_v52  ;;  %v13136_v52 = vld [vmem:[#allocation11_spill] sm:$0xff] }
 0x376   : > { %v4345_v7 = vpop.f32.mrf.mxu0  ;;  %v4758_v19 = vpop.f32.mrf.mxu1 }
 0x377   : > { %13132 = vst [vmem:[#allocation110_spill] sm:$0xff] %v10828_v39  ;;  %v10834_v12 = vadd.f32 %v4345_v7, %v13133_v28  ;;  %v10837_v37 = vadd.f32 %v4758_v19, %v10643_v27  ;;  %v13137_v27 = vld [vmem:[#allocation9_spill] sm:$0xff] }
 0x378   : > { %v4347_v47 = vpop.f32.mrf.mxu0  ;;  %v4760_v5 = vpop.f32.mrf.mxu1 }
 0x379   : > { %13134 = vst [vmem:[#allocation111_spill] sm:$0xff] %v10834_v12  ;;  %v10840_v58 = vadd.f32 %v4347_v47, %v10432_v53  ;;  %v10843_v42 = vadd.f32 %v4760_v5, %v10649_v33  ;;  %v13139_v33 = vld [vmem:[#allocation67_spill] sm:$0xff] }
 0x37a   : > { %v4349_v57 = vpop.f32.mrf.mxu0  ;;  %v4762_v61 = vpop.f32.mrf.mxu1 }
 0x37b   : > { %13135 = vst [vmem:[#allocation112_spill] sm:$0xff] %v10840_v58  ;;  %v10846_v59 = vadd.f32 %v4349_v57, %v13136_v52  ;;  %v10849_v39 = vadd.f32 %v4762_v61, %v10655_v55 }
 0x37c   : > { %v4351_v7 = vpop.f32.mrf.mxu0  ;;  %v4764_v28 = vpop.f32.mrf.mxu1 }
 0x37d   : > { %v10852_v19 = vadd.f32 %v4351_v7, %v13137_v27  ;;  %v10855_v12 = vadd.f32 %v4764_v28, %v10661_v4  ;;  %v13142_v4 = vld [vmem:[#allocation63_spill] sm:$0xff] }
 0x37e   : > { %v4355_v53 = vpop.f32.mrf.mxu0  ;;  %v4768_v47 = vpop.f32.mrf.mxu1 }
 0x37f   : > { %13138 = vst [vmem:[#allocation113_spill] sm:$0xff] %v10852_v19  ;;  %v10858_v5 = vadd.f32 %v4355_v53, %v13139_v33  ;;  %v10861_v58 = vadd.f32 %v4768_v47, %v10667_v49  ;;  %v13143_v49 = vld [vmem:[#allocation66_spill] sm:$0xff] }
 0x380   : > { %v4357_v57 = vpop.f32.mrf.mxu0  ;;  %v4770_v52 = vpop.f32.mrf.mxu1 }
 0x381   : > { %13140 = vst [vmem:[#allocation114_spill] sm:$0xff] %v10858_v5  ;;  %v10864_v55 = vadd.f32 %v4357_v57, %v10462_v60  ;;  %v10867_v61 = vadd.f32 %v4770_v52, %v10673_v31  ;;  %v13145_v31 = vld [vmem:[#allocation65_spill] sm:$0xff] }
 0x382   : > { %v4359_v7 = vpop.f32.mrf.mxu0  ;;  %v4772_v27 = vpop.f32.mrf.mxu1 }
 0x383   : > { %13141 = vst [vmem:[#allocation115_spill] sm:$0xff] %v10864_v55  ;;  %v10870_v28 = vadd.f32 %v4359_v7, %v13142_v4  ;;  %v10873_v19 = vadd.f32 %v4772_v27, %v10679_v54 }
 0x384   : > { %v4361_v53 = vpop.f32.mrf.mxu0  ;;  %v4774_v33 = vpop.f32.mrf.mxu1 }
 0x385   : > { %v10876_v47 = vadd.f32 %v4361_v53, %v13143_v49  ;;  %v10879_v5 = vadd.f32 %v4774_v33, %v10685_v62  ;;  %v13148_v62 = vld [vmem:[#allocation68_spill] sm:$0xff] }
 0x386   : > { %v4365_v60 = vpop.f32.mrf.mxu0  ;;  %v4778_v57 = vpop.f32.mrf.mxu1 }
 0x387   : > { %13144 = vst [vmem:[#allocation51_spill] sm:$0xff] %v10876_v47  ;;  %v10882_v52 = vadd.f32 %v4365_v60, %v13145_v31  ;;  %v10885_v55 = vadd.f32 %v4778_v57, %v10691_v18  ;;  %v13150_v18 = vld [vmem:[#allocation14_spill] sm:$0xff] }
 0x388   : > { %v4367_v7 = vpop.f32.mrf.mxu0  ;;  %v4780_v4 = vpop.f32.mrf.mxu1 }
 0x389   : > { %13146 = vst [vmem:[#allocation116_spill] sm:$0xff] %v10882_v52  ;;  %v10888_v54 = vadd.f32 %v4367_v7, %v10492_v36  ;;  %v10891_v27 = vadd.f32 %v4780_v4, %v10697_v26  ;;  %v13152_v26 = vld [vmem:[#allocation12_spill] sm:$0xff] }
 0x38a   : > { %v4369_v53 = vpop.f32.mrf.mxu0  ;;  %v4782_v49 = vpop.f32.mrf.mxu1 }
 0x38b   : > { %13147 = vst [vmem:[#allocation117_spill] sm:$0xff] %v10888_v54  ;;  %v10894_v33 = vadd.f32 %v4369_v53, %v13148_v62  ;;  %v10897_v47 = vadd.f32 %v4782_v49, %v10703_v0 }
 0x38c   : > { %v4371_v60 = vpop.f32.mrf.mxu0  ;;  %v4784_v31 = vpop.f32.mrf.mxu1 }
 0x38d   : > { %13149 = vst [vmem:[#allocation31_spill] sm:$0xff] %v10894_v33  ;;  %v10900_v57 = vadd.f32 %v4371_v60, %v13150_v18  ;;  %v10903_v52 = vadd.f32 %v4784_v31, %v10709_v63  ;;  %v5619_v63 = vlaneseq }
 0x38e   : > { %v4375_v36 = vpop.f32.mrf.mxu0  ;;  %v4788_v7 = vpop.f32.mrf.mxu1 }
 0x38f   : > { %13151 = vst [vmem:[#allocation32_spill] sm:$0xff] %v10900_v57  ;;  %v10906_v4 = vadd.f32 %v4375_v36, %v13152_v26  ;;  %v10909_v54 = vadd.f32 %v4788_v7, %v10715_v16  ;;  %v13156_v7 = vld [vmem:[#allocation70_spill] sm:$0xff] }
 0x390   : > { %v4377_v53 = vpop.f32.mrf.mxu0  ;;  %v4790_v62 = vpop.f32.mrf.mxu1 }
 0x391   : > { %13153 = vst [vmem:[#allocation69_spill] sm:$0xff] %v10906_v4  ;;  %v10912_v0 = vadd.f32 %v4377_v53, %v10522_v35  ;;  %v10915_v49 = vadd.f32 %v4790_v62, %v10721_v9  ;;  %v10929_v62 = vand.u32 127, %v5619_v63 }
 0x392   : > { %v4379_v60 = vpop.f32.mrf.mxu0  ;;  %v4792_v18 = vpop.f32.mrf.mxu1 }
 0x393   : > { %13154 = vst [vmem:[#allocation33_spill] sm:$0xff] %v10912_v0  ;;  %v10918_v31 = vadd.f32 %v4379_v60, %v10528_v41  ;;  %v10921_v36 = vadd.f32 %v4792_v18, %v10727_v15  ;;  %13158 = vst [vmem:[#allocation36_spill] sm:$0xff] %v10929_v62  ;;  %v13159_v0 = vld [vmem:[#allocation90_spill] sm:$0xff]  ;;  %v5622_v63 = vadd.s32 256, %v10929_v62 }
 0x394   : > { %v4381_v26 = vpop.f32.mrf.mxu0  ;;  %v4794_v16 = vpop.f32.mrf.mxu1 }
 0x395   : > { %13155 = vst [vmem:[#allocation34_spill] sm:$0xff] %v10918_v31  ;;  %v10924_v4 = vadd.f32 %v4381_v26, %v13156_v7  ;;  %v10927_v35 = vadd.f32 %v4794_v16, %v10733_v14  ;;  %v5621_v7 = vadd.s32 128, %v10929_v62  ;;  %v5625_v33 = vcvt.s32.f32 %v5622_v63 }
 0x396   : > { %v4385_v53 = vpop.f32.mrf.mxu0  ;;  %v4798_v9 = vpop.f32.mrf.mxu1 }
 0x397   : > { %13157 = vst [vmem:[#allocation35_spill] sm:$0xff] %v10924_v4  ;;  %v10932_v57 = vadd.f32 %v4385_v53, %v13159_v0  ;;  %v10935_v41 = vadd.f32 %v4798_v9, %v10739_v13  ;;  %v13162_v4 = vld [vmem:[#allocation17_spill] sm:$0xff]  ;;  %v5624_v31 = vcvt.s32.f32 %v5621_v7  ;;  %v5139_v7 = vmul.f32 %v10790_v17, %v10790_v17 }
 0x398   : > { %v4387_v15 = vpop.f32.mrf.mxu0  ;;  %v4800_v60 = vpop.f32.mrf.mxu1  ;;  %v5143_v17 = vmul.f32 %v10807_v30, %v10807_v30  ;;  %v11010_v30 = vmul.f32 %v10837_v37, %v10837_v37  ;;  %v11032_v37 = vmul.f32 %v10861_v58, %v10861_v58  ;;  %v11050_v58 = vmul.f32 %v10885_v55, %v10885_v55 }
 0x399   : > { %13160 = vst [vmem:[#allocation37_spill] sm:$0xff] %v10932_v57  ;;  %v10938_v18 = vadd.f32 %v4387_v15, %v10552_v11  ;;  %v10941_v26 = vadd.f32 %v4800_v60, %v10745_v29  ;;  %v13163_v57 = vld [vmem:[#allocation15_spill] sm:$0xff] }
 0x39a   : > { %v4389_v14 = vpop.f32.mrf.mxu0  ;;  %v4802_v16 = vpop.f32.mrf.mxu1 }
 0x39b   : > { %13161 = vst [vmem:[#allocation71_spill] sm:$0xff] %v10938_v18  ;;  %v10946_v0 = vadd.f32 %v4389_v14, %v13162_v4  ;;  %v10949_v13 = vadd.f32 %v4802_v16, %v10751_v8  ;;  %v5623_v18 = vcvt.s32.f32 %v10929_v62  ;;  %v5044_v4 = vadd.f32 %v10792_v10, %v10601_v3  ;;  %v13165_v14 = vld [vmem:[#allocation91_spill] sm:$0xff] }
 0x39c   : > { %v4391_v53 = vpop.f32.mrf.mxu0  ;;  %v4804_v9 = vpop.f32.mrf.mxu1  ;;  %v10976_v10 = vmul.f32 86.13281, %v5624_v31  ;;  %v10994_v31 = vmul.f32 %v10813_v34, %v10813_v34 }
 0x39d   : > { %v10952_v11 = vadd.f32 %v4391_v53, %v13163_v57  ;;  %v10955_v29 = vadd.f32 %v4804_v9, %v10757_v43  ;;  %v10974_v3 = vmul.f32 86.13281, %v5623_v18 }
 0x39e   : > { %v4395_v15 = vpop.f32.mrf.mxu0  ;;  %v4808_v60 = vpop.f32.mrf.mxu1 }
 0x39f   : > { %13164 = vst [vmem:[#allocation38_spill] sm:$0xff] %v10952_v11  ;;  %v10961_v8 = vadd.f32 %v4395_v15, %v13165_v14  ;;  %v10964_v16 = vadd.f32 %v4808_v60, %v10763_v48  ;;  %v13167_v11 = vld [vmem:[#allocation92_spill] sm:$0xff]  ;;  %v10978_v15 = vmul.f32 86.13281, %v5625_v33  ;;  %v5140_v48 = vmul.f32 %v5044_v4, %v5044_v4 }
 0x3a0   : > { %v4397_v57 = vpop.f32.mrf.mxu0  ;;  %v4810_v53 = vpop.f32.mrf.mxu1  ;;  %v10982_v60 = vmul.f32 %v10801_v21, %v10801_v21  ;;  %v10998_v33 = vmul.f32 %v10819_v23, %v10819_v23  ;;  %v11002_v21 = vmul.f32 %v10825_v40, %v10825_v40  ;;  %v11020_v40 = vmul.f32 %v10843_v42, %v10843_v42 }
 0x3a1   : > { %13166 = vst [vmem:[#allocation39_spill] sm:$0xff] %v10961_v8  ;;  %v10967_v43 = vadd.f32 %v4397_v57, %v13167_v11  ;;  %v10970_v9 = vadd.f32 %v4810_v53, %v10769_v46  ;;  %v11040_v42 = vmul.f32 %v10873_v19, %v10873_v19  ;;  %v11058_v19 = vmul.f32 %v10897_v47, %v10897_v47 }
 0x3a2   : > { %v4399_v63 = vpop.f32.mrf.mxu0  ;;  %v4812_v62 = vpop.f32.mrf.mxu1  ;;  %v11076_v47 = vmul.f32 %v10921_v36, %v10921_v36 }
 0x3a3   : > { %13168 = vst [vmem:[#allocation40_spill] sm:$0xff] %v10967_v43  ;;  %v10985_v11 = vadd.f32 %v4399_v63, %v10586_v20  ;;  %v10988_v46 = vadd.f32 %v4812_v62, %v10775_v56  ;;  %v11006_v56 = vmul.f32 %v10831_v6, %v10831_v6  ;;  %v11024_v62 = vmul.f32 %v10849_v39, %v10849_v39 }
 0x3a4   : > { %v4401_v20 = vpop.f32.mrf.mxu0  ;;  %v4814_v18 = vpop.f32.mrf.mxu1  ;;  %v11028_v6 = vmul.f32 %v10855_v12, %v10855_v12  ;;  %v11046_v12 = vmul.f32 %v10879_v5, %v10879_v5  ;;  %v11068_v63 = vmul.f32 %v10909_v54, %v10909_v54 }
 0x3a5   : > { %13169 = vst [vmem:[#allocation41_spill] sm:$0xff] %v10985_v11  ;;  %v11013_v34 = vadd.f32 %v4401_v20, %v10592_v32  ;;  %v11016_v23 = vadd.f32 %v4814_v18, %v10781_v51  ;;  %v11036_v51 = vmul.f32 %v10867_v61, %v10867_v61  ;;  %v11054_v61 = vmul.f32 %v10891_v27, %v10891_v27 }
 0x3a6   : > { %v4851_v32 = vpop.f32.mrf.mxu0  ;;  %v4964_v4 = vpop.f32.mrf.mxu1  ;;  %v11072_v27 = vmul.f32 %v10915_v49, %v10915_v49  ;;  %v11090_v49 = vmul.f32 %v10941_v26, %v10941_v26  ;;  %v11105_v26 = vmul.f32 %v10955_v29, %v10955_v29 }
 0x3a7   : > { %13170 = vst [vmem:[#allocation42_spill] sm:$0xff] %v11013_v34  ;;  %v5045_v39 = vadd.f32 %v4851_v32, %v10598_v22  ;;  %v5047_v14 = vadd.f32 %v4964_v4, %v10787_v25  ;;  %v11062_v25 = vmul.f32 %v10903_v52, %v10903_v52  ;;  %v11080_v52 = vmul.f32 %v10927_v35, %v10927_v35  ;;  %v13177_v34 = vld [vmem:[#allocation109_spill] sm:$0xff] }
 0x3a8   : > { %v4853_v57 = vpop.f32.mrf.mxu0  ;;  %v4966_v22 = vpop.f32.mrf.mxu1  ;;  %v11086_v4 = vmul.f32 %v10935_v41, %v10935_v41 }
 0x3a9   : > { %v5188_v5 = vmul.f32 %v5047_v14, %v5047_v14  ;;  %v5046_v53 = vadd.f32 %v4853_v57, %v10604_v50  ;;  %v5048_v55 = vadd.f32 %v4966_v22, %v10795_v24  ;;  %v5141_v18 = vmul.f32 %v5045_v39, %v5045_v39 }
 0x3aa   : > { %v4855_v20 = vpop.f32.mrf.mxu0  ;;  %v4968_v50 = vpop.f32.mrf.mxu1 }
 0x3ab   : > { %v11082_v24 = vadd.f32 %v5188_v5, %v5140_v48  ;;  %v5187_v32 = vmul.f32 %v5046_v53, %v5046_v53  ;;  %v5189_v54 = vmul.f32 %v5048_v55, %v5048_v55  ;;  %v5051_v36 = vadd.f32 %v4855_v20, %v10610_v2  ;;  %v13174_v20 = vld [vmem:[#allocation108_spill] sm:$0xff] }
 0x3ac   : > { %v5053_v35 = vadd.f32 %v4968_v50, %v10798_v1  ;;  %v4857_v14 = vpop.f32.mrf.mxu0  ;;  %v4970_v57 = vpop.f32.mrf.mxu1  ;;  %v11096_v48 = vmul.f32 %v10949_v13, %v10949_v13  ;;  %v11111_v13 = vmul.f32 %v10964_v16, %v10964_v16  ;;  %v13176_v16 = vld [vmem:[#allocation18_spill] sm:$0xff] }
 0x3ad   : > { %7118 = vrsqrt.f32 %v11082_v24  ;;  %v11099_v39 = vadd.f32 %v5187_v32, %v5139_v7  ;;  %v11101_v41 = vadd.f32 %v5189_v54, %v5141_v18  ;;  %v5052_v2 = vadd.f32 %v4857_v14, %v10616_v45  ;;  %v13173_v7 = vld [vmem:[#allocation20_spill] sm:$0xff] }
 0x3ae   : > { %13171 = vst [vmem:[#allocation43_spill] sm:$0xff] %v11096_v48  ;;  %v5191_v22 = vmul.f32 %v5053_v35, %v5053_v35  ;;  %v5054_v1 = vadd.f32 %v4970_v57, %v10804_v44  ;;  %v4861_v5 = vpop.f32.mrf.mxu0  ;;  %v4974_v53 = vpop.f32.mrf.mxu1  ;;  %13172 = vst [vmem:[#allocation72_spill] sm:$0xff] %v11111_v13  ;;  %v5144_v18 = vmul.f32 %v5051_v36, %v5051_v36  ;;  %vm5292_vm10 = vcmp.eq.f32.partialorder %v11082_v24, inf  ;;  %v13207_v48 = vld [vmem:[#allocation116_spill] sm:$0xff] }
 0x3af   : > { %7120 = vrsqrt.f32 %v11099_v39  ;;  %v5057_v55 = vadd.f32 %v4861_v5, %v13173_v7  ;;  %v5059_v50 = vadd.f32 %v4974_v53, %v13174_v20  ;;  %v5190_v32 = vmul.f32 %v5052_v2, %v5052_v2  ;;  %v13178_v7 = vld [vmem:[#allocation93_spill] sm:$0xff] }
 0x3b0   : > { %v11116_v29 = vadd.f32 %v5191_v22, %v5143_v17  ;;  %v5192_v54 = vmul.f32 %v5054_v1, %v5054_v1  ;;  %v4863_v45 = vpop.f32.mrf.mxu0  ;;  %v4976_v35 = vpop.f32.mrf.mxu1  ;;  %v11120_v44 = vmul.f32 %v10970_v9, %v10970_v9  ;;  %7122 = vrsqrt.f32 %v11101_v41 }
 0x3b1   : > { %v5194_v14 = vmul.f32 %v5059_v50, %v5059_v50  ;;  %v5058_v57 = vadd.f32 %v4863_v45, %v13176_v16  ;;  %v5060_v13 = vadd.f32 %v4976_v35, %v13177_v34  ;;  %v11126_v5 = vadd.f32 %v5190_v32, %v10982_v60  ;;  %v13182_v45 = vld [vmem:[#allocation110_spill] sm:$0xff] }
 0x3b2   : > { %13175 = vst [vmem:[#allocation44_spill] sm:$0xff] %v11120_v44  ;;  %v11128_v17 = vadd.f32 %v5192_v54, %v5144_v18  ;;  %v5147_v36 = vmul.f32 %v5057_v55, %v5057_v55  ;;  %v4865_v22 = vpop.f32.mrf.mxu0  ;;  %v4978_v2 = vpop.f32.mrf.mxu1  ;;  %v11136_v34 = vmul.f32 %v10988_v46, %v10988_v46  ;;  %v11140_v60 = vmul.f32 %v11016_v23, %v11016_v23  ;;  %v13181_v23 = vld [vmem:[#allocation23_spill] sm:$0xff] }
 0x3b3   : > { %v11131_v1 = vadd.f32 %v5194_v14, %v10998_v33  ;;  %v5193_v9 = vmul.f32 %v5058_v57, %v5058_v57  ;;  %v5195_v53 = vmul.f32 %v5060_v13, %v5060_v13  ;;  %v5063_v20 = vadd.f32 %v4865_v22, %v13178_v7  ;;  %v13183_v57 = vld [vmem:[#allocation21_spill] sm:$0xff] }
 0x3b4   : > { %13179 = vst [vmem:[#allocation73_spill] sm:$0xff] %v11136_v34  ;;  %13180 = vst [vmem:[#allocation45_spill] sm:$0xff] %v11140_v60  ;;  %7124 = vrsqrt.f32 %v11116_v29  ;;  %v5065_v55 = vadd.f32 %v4978_v2, %v10822_v38  ;;  %v4867_v50 = vpop.f32.mrf.mxu0  ;;  %v4980_v18 = vpop.f32.mrf.mxu1  ;;  %vm5285_vm8 = vcmp.eq.f32.partialorder %v11099_v39, inf  ;;  %vm5287_vm9 = vcmp.eq.f32.partialorder %v11099_v39, 0.0 }
 0x3b5   : > { %7126 = vrsqrt.f32 %v11126_v5  ;;  %v11146_v33 = vadd.f32 %v5193_v9, %v10994_v31  ;;  %v11148_v13 = vadd.f32 %v5195_v53, %v5147_v36  ;;  %v5064_v54 = vadd.f32 %v4867_v50, %v13181_v23  ;;  %v13184_v31 = vld [vmem:[#allocation111_spill] sm:$0xff] }
 0x3b6   : > { %7128 = vrsqrt.f32 %v11128_v17  ;;  %v5197_v32 = vmul.f32 %v5065_v55, %v5065_v55  ;;  %v5066_v35 = vadd.f32 %v4980_v18, %v13182_v45  ;;  %v4871_v14 = vpop.f32.mrf.mxu0  ;;  %v4984_v38 = vpop.f32.mrf.mxu1  ;;  %v5150_v16 = vmul.f32 %v5063_v20, %v5063_v20  ;;  %v13185_v18 = vld [vmem:[#allocation94_spill] sm:$0xff]  ;;  %v13186_v45 = vld [vmem:[#allocation112_spill] sm:$0xff] }
 0x3b7   : > { %7130 = vrsqrt.f32 %v11131_v1  ;;  %v5069_v22 = vadd.f32 %v4871_v14, %v13183_v57  ;;  %v5071_v2 = vadd.f32 %v4984_v38, %v13184_v31  ;;  %v5196_v9 = vmul.f32 %v5064_v54, %v5064_v54 }
 0x3b8   : > { %7132 = vrsqrt.f32 %v11146_v33  ;;  %v11159_v36 = vadd.f32 %v5197_v32, %v11006_v56  ;;  %v5198_v53 = vmul.f32 %v5066_v35, %v5066_v35  ;;  %v4873_v7 = vpop.f32.mrf.mxu0  ;;  %v4986_v55 = vpop.f32.mrf.mxu1  ;;  %vm5294_vm11 = vcmp.eq.f32.partialorder %v11082_v24, 0.0 }
 0x3b9   : > { %7134 = vrsqrt.f32 %v11148_v13  ;;  %v5200_v50 = vmul.f32 %v5071_v2, %v5071_v2  ;;  %v5070_v23 = vadd.f32 %v4873_v7, %v13185_v18  ;;  %v5072_v20 = vadd.f32 %v4986_v55, %v13186_v45  ;;  %v13187_v7 = vld [vmem:[#allocation95_spill] sm:$0xff] }
 0x3ba   : > { %v7119_v14 = vpop.eup %7118  ;;  %7136 = vrsqrt.f32 %v11159_v36  ;;  %v11167_v38 = vadd.f32 %v5196_v9, %v11002_v21  ;;  %v11169_v56 = vadd.f32 %v5198_v53, %v5150_v16  ;;  %v5153_v32 = vmul.f32 %v5069_v22, %v5069_v22  ;;  %v4875_v54 = vpop.f32.mrf.mxu0 }
 0x3bb   : > { %v4988_v35 = vpop.f32.mrf.mxu1  ;;  %v11172_v57 = vadd.f32 %v5200_v50, %v11020_v40  ;;  %v5199_v31 = vmul.f32 %v5070_v23, %v5070_v23  ;;  %v5201_v2 = vmul.f32 %v5072_v20, %v5072_v20  ;;  %v5075_v55 = vadd.f32 %v4875_v54, %v13187_v7  ;;  %v13188_v20 = vld [vmem:[#allocation96_spill] sm:$0xff]  ;;  %v13190_v40 = vld [vmem:[#allocation97_spill] sm:$0xff] }
 0x3bc   : > { %v7121_v18 = vpop.eup %7120  ;;  %7138 = vrsqrt.f32 %v11167_v38  ;;  %v5077_v21 = vadd.f32 %v4988_v35, %v10846_v59  ;;  %v4877_v16 = vpop.f32.mrf.mxu0  ;;  %v5291_v9 = vmul.f32 %v7119_v14, %v11082_v24  ;;  %v13189_v59 = vld [vmem:[#allocation113_spill] sm:$0xff]  ;;  %vm5299_vm12 = vcmp.eq.f32.partialorder %v11101_v41, inf }
 0x3bd   : > { %v4990_v22 = vpop.f32.mrf.mxu1  ;;  %7140 = vrsqrt.f32 %v11169_v56  ;;  %v11183_v53 = vadd.f32 %v5199_v31, %v11010_v30  ;;  %v11185_v50 = vadd.f32 %v5201_v2, %v5153_v32  ;;  %v5156_v23 = vmul.f32 %v5075_v55, %v5075_v55  ;;  %v7123_v14 = vpop.eup %7122  ;;  %v13191_v31 = vld [vmem:[#allocation114_spill] sm:$0xff] }
 0x3be   : > { %7142 = vrsqrt.f32 %v11172_v57  ;;  %v5203_v45 = vmul.f32 %v5077_v21, %v5077_v21  ;;  %v5076_v54 = vadd.f32 %v4877_v16, %v13188_v20  ;;  %v5078_v35 = vadd.f32 %v4990_v22, %v13189_v59  ;;  %v4881_v7 = vpop.f32.mrf.mxu0 }
 0x3bf   : > { %v4994_v46 = vpop.f32.mrf.mxu1  ;;  %7144 = vrsqrt.f32 %v11183_v53  ;;  %v5081_v30 = vadd.f32 %v4881_v7, %v13190_v40  ;;  %v5284_v2 = vmul.f32 %v7121_v18, %v11099_v39  ;;  %v13192_v40 = vld [vmem:[#allocation26_spill] sm:$0xff]  ;;  %vm5301_vm13 = vcmp.eq.f32.partialorder %v11101_v41, 0.0 }
 0x3c0   : > { %v5083_v32 = vadd.f32 %v4994_v46, %v13191_v31  ;;  %7146 = vrsqrt.f32 %v11185_v50  ;;  %v11197_v55 = vadd.f32 %v5203_v45, %v11028_v6  ;;  %v5202_v21 = vmul.f32 %v5076_v54, %v5076_v54  ;;  %v4883_v22 = vpop.f32.mrf.mxu0  ;;  %v13193_v46 = vld [vmem:[#allocation115_spill] sm:$0xff] }
 0x3c1   : > { %v5204_v16 = vmul.f32 %v5078_v35, %v5078_v35  ;;  %v4996_v20 = vpop.f32.mrf.mxu1  ;;  %v11200_v59 = vpop.eup %7124  ;;  %v5159_v34 = vmul.f32 %v5081_v30, %v5081_v30  ;;  %v5082_v7 = vadd.f32 %v4883_v22, %v13192_v40  ;;  %v5286_v30 = vsel %vm5285_vm8, %v11099_v39, %v5284_v2 }
 0x3c2   : > { %v5206_v60 = vmul.f32 %v5083_v32, %v5083_v32  ;;  %v5084_v31 = vadd.f32 %v4996_v20, %v13193_v46  ;;  %v11205_v18 = vpop.eup %7126  ;;  %7148 = vrsqrt.f32 %v11197_v55  ;;  %v11209_v6 = vadd.f32 %v5202_v21, %v11024_v62  ;;  %v4885_v54 = vpop.f32.mrf.mxu0  ;;  %v13196_v46 = vld [vmem:[#allocation24_spill] sm:$0xff] }
 0x3c3   : > { %v11211_v45 = vadd.f32 %v5204_v16, %v5156_v23  ;;  %v4998_v35 = vpop.f32.mrf.mxu1  ;;  %v11216_v32 = vpop.eup %7128  ;;  %v5205_v20 = vmul.f32 %v5082_v7, %v5082_v7  ;;  %v5087_v11 = vadd.f32 %v4885_v54, %v13196_v46  ;;  %v13197_v16 = vand.u32 2147483648, %v11099_v39  ;;  %v13202_v46 = vld [vmem:[#allocation51_spill] sm:$0xff] }
 0x3c4   : > { %v11219_v22 = vadd.f32 %v5206_v60, %v11036_v51  ;;  %v5207_v40 = vmul.f32 %v5084_v31, %v5084_v31  ;;  %v11222_v44 = vpop.eup %7130  ;;  %7150 = vrsqrt.f32 %v11209_v6  ;;  %v5089_v62 = vadd.f32 %v4998_v35, %v10870_v28  ;;  %v4887_v23 = vpop.f32.mrf.mxu0  ;;  %v13201_v35 = vld [vmem:[#allocation98_spill] sm:$0xff] }
 0x3c5   : > { %13194 = vst [vmem:[#allocation74_spill] sm:$0xff] %v11211_v45  ;;  %v5000_v21 = vpop.f32.mrf.mxu1  ;;  %v11230_v2 = vsel %vm5287_vm9, %v13197_v16, %v5286_v30  ;;  %v5293_v51 = vsel %vm5292_vm10, %v11082_v24, %v5291_v9  ;;  %v11235_v60 = vpop.eup %7132  ;;  %7152 = vrsqrt.f32 %v11211_v45  ;;  %v11239_v7 = vadd.f32 %v5205_v20, %v11032_v37 }
 0x3c6   : > { %13195 = vst [vmem:[#allocation47_spill] sm:$0xff] %v11219_v22  ;;  %13198 = vst [vmem:[#allocation48_spill] sm:$0xff] %v11230_v2  ;;  %v11241_v28 = vadd.f32 %v5207_v40, %v5159_v34  ;;  %v5162_v31 = vmul.f32 %v5087_v11, %v5087_v11  ;;  %v11243_v54 = vpop.eup %7134  ;;  %7154 = vrsqrt.f32 %v11219_v22  ;;  %v5209_v39 = vmul.f32 %v5089_v62, %v5089_v62  ;;  %v4891_v9 = vpop.f32.mrf.mxu0 }
 0x3c7   : > { %13199 = vst [vmem:[#allocation77_spill] sm:$0xff] %v11239_v7  ;;  %v5088_v30 = vadd.f32 %v4887_v23, %v13201_v35  ;;  %v5090_v16 = vadd.f32 %v5000_v21, %v13202_v46  ;;  %v5004_v43 = vpop.f32.mrf.mxu1  ;;  %v11248_v8 = vpop.eup %7136  ;;  %7156 = vrsqrt.f32 %v11239_v7  ;;  %v13203_v37 = vand.u32 2147483648, %v11082_v24 }
 0x3c8   : > { %13200 = vst [vmem:[#allocation49_spill] sm:$0xff] %v11241_v28  ;;  %v5298_v34 = vmul.f32 %v7123_v14, %v11101_v41  ;;  %v5302_v20 = vand.u32 2147483648, %v11101_v41  ;;  %7158 = vrsqrt.f32 %v11241_v28  ;;  %v11261_v40 = vadd.f32 %v5209_v39, %v11046_v12  ;;  %v4893_v21 = vpop.f32.mrf.mxu0 }
 0x3c9   : > { %v11255_v11 = vsel %vm5294_vm11, %v13203_v37, %v5293_v51  ;;  %v5208_v62 = vmul.f32 %v5088_v30, %v5088_v30  ;;  %v5210_v23 = vmul.f32 %v5090_v16, %v5090_v16  ;;  %v5006_v35 = vpop.f32.mrf.mxu1  ;;  %v11263_v46 = vpop.eup %7138  ;;  %v13206_v51 = vld [vmem:[#allocation99_spill] sm:$0xff]  ;;  %v5095_v28 = vadd.f32 %v5004_v43, %v13207_v48  ;;  %v13209_v43 = vld [vmem:[#allocation100_spill] sm:$0xff] }
 0x3ca   : > { %13204 = vst [vmem:[#allocation78_spill] sm:$0xff] %v11255_v11  ;;  %13205 = vst [vmem:[#allocation50_spill] sm:$0xff] %v11261_v40  ;;  %v5300_v24 = vsel %vm5299_vm12, %v11101_v41, %v5298_v34  ;;  %v5629_v14 = vadd.f32 %v11255_v11, %v11230_v2  ;;  %v5093_v37 = vadd.f32 %v4891_v9, %v13206_v51  ;;  %v11272_v22 = vpop.eup %7140  ;;  %7160 = vrsqrt.f32 %v11261_v40  ;;  %v4895_v7 = vpop.f32.mrf.mxu0 }
 0x3cb   : > { %v11276_v12 = vadd.f32 %v5208_v62, %v11040_v42  ;;  %v11278_v39 = vadd.f32 %v5210_v23, %v5162_v31  ;;  %v11282_v30 = vsel %vm5301_vm13, %v5302_v20, %v5300_v24  ;;  %v11284_v16 = vpop.eup %7142  ;;  %v5212_v51 = vmul.f32 %v5095_v28, %v5095_v28  ;;  %v5008_v45 = vpop.f32.mrf.mxu1  ;;  %v13210_v42 = vld [vmem:[#allocation117_spill] sm:$0xff] }
 0x3cc   : > { %13208 = vst [vmem:[#allocation5_spill] sm:$0xff] %v11282_v30  ;;  %v5630_v34 = vadd.f32 %v5629_v14, %v11282_v30  ;;  %v5165_v9 = vmul.f32 %v5093_v37, %v5093_v37  ;;  %v5094_v48 = vadd.f32 %v4893_v21, %v13209_v43  ;;  %v11288_v40 = vpop.eup %7144  ;;  %v5096_v31 = vadd.f32 %v5006_v35, %v13210_v42  ;;  %v13212_v14 = vld [vmem:[#allocation29_spill] sm:$0xff]  ;;  %v13213_v43 = vld [vmem:[#allocation31_spill] sm:$0xff] }
 0x3cd   : > { %7162 = vrsqrt.f32 %v11276_v12  ;;  %v5709_v41 = vmul.f32 %v10974_v3, %v11230_v2  ;;  %v5710_v20 = vmul.f32 %v10976_v10, %v11255_v11  ;;  %v11296_v62 = vpop.eup %7146  ;;  %v11300_v28 = vadd.f32 %v5212_v51, %v11054_v61 }
 0x3ce   : > { %7164 = vrsqrt.f32 %v11278_v39  ;;  %5631 = vadd.xlane.f32.xlu0 %v5630_v34  ;;  %v5211_v23 = vmul.f32 %v5094_v48, %v5094_v48  ;;  %v5711_v21 = vmul.f32 %v10978_v15, %v11282_v30  ;;  %v5213_v24 = vmul.f32 %v5096_v31, %v5096_v31 }
 0x3cf   : > { %13211 = vst [vmem:[#allocation6_spill] sm:$0xff] %v11300_v28  ;;  %v5757_v35 = vadd.f32 %v5710_v20, %v5709_v41  ;;  %v5099_v37 = vadd.f32 %v4895_v7, %v13212_v14  ;;  %v5101_v42 = vadd.f32 %v5008_v45, %v13213_v43  ;;  %v11306_v2 = vpop.eup %7148  ;;  %7166 = vrsqrt.f32 %v11300_v28  ;;  %v4897_v7 = vpop.f32.mrf.mxu0 }
 0x3d0   : > { %v11310_v11 = vadd.f32 %v5211_v23, %v11050_v58  ;;  %v5305_v61 = vmul.f32 %v11205_v18, %v11126_v5  ;;  %vm5306_vm14 = vcmp.eq.f32.partialorder %v11126_v5, inf  ;;  %v11315_v34 = vadd.f32 %v5213_v24, %v5165_v9  ;;  %v5010_v41 = vpop.f32.mrf.mxu1 }
 0x3d1   : > { %v5758_v51 = vadd.f32 %v5757_v35, %v5711_v21  ;;  %v5168_v48 = vmul.f32 %v5099_v37, %v5099_v37  ;;  %v5215_v31 = vmul.f32 %v5101_v42, %v5101_v42  ;;  %v11317_v45 = vpop.eup %7150  ;;  %vm5308_vm15 = vcmp.eq.f32.partialorder %v11126_v5, 0.0 }
 0x3d2   : > { %13214 = vst [vmem:[#allocation79_spill] sm:$0xff] %v11310_v11  ;;  %13215 = vst [vmem:[#allocation80_spill] sm:$0xff] %v11315_v34  ;;  %7168 = vrsqrt.f32 %v11310_v11  ;;  %v5307_v20 = vsel %vm5306_vm14, %v11126_v5, %v5305_v61  ;;  %v5309_v58 = vand.u32 2147483648, %v11126_v5  ;;  %v11323_v18 = vpop.eup %7152  ;;  %v5312_v23 = vmul.f32 %v11200_v59, %v11116_v29  ;;  %v4901_v59 = vpop.f32.mrf.mxu0 }
 0x3d3   : > { %7170 = vrsqrt.f32 %v11315_v34  ;;  %5759 = vadd.xlane.f32.xlu0 %v5758_v51  ;;  %v11327_v9 = vadd.f32 %v5215_v31, %v11062_v25  ;;  %vm5313_vm0 = vcmp.eq.f32.partialorder %v11116_v29, inf  ;;  %v11332_v21 = vpop.eup %7154  ;;  %vm5315_vm1 = vcmp.eq.f32.partialorder %v11116_v29, 0.0  ;;  %v5014_v37 = vpop.f32.mrf.mxu1  ;;  %v13219_v31 = vld [vmem:[#allocation27_spill] sm:$0xff] }
 0x3d4   : > { %v11334_v24 = vsel %vm5308_vm15, %v5309_v58, %v5307_v20  ;;  %v5316_v5 = vand.u32 2147483648, %v11116_v29  ;;  %v5319_v35 = vmul.f32 %v11216_v32, %v11128_v17  ;;  %v11340_v14 = vpop.eup %7156  ;;  %v5314_v25 = vsel %vm5313_vm0, %v11116_v29, %v5312_v23  ;;  %v13220_v58 = vld [vmem:[#allocation32_spill] sm:$0xff] }
 0x3d5   : > { %13216 = vst [vmem:[#allocation52_spill] sm:$0xff] %v11327_v9  ;;  %13217 = vst [vmem:[#allocation10_spill] sm:$0xff] %v11334_v24  ;;  %7172 = vrsqrt.f32 %v11327_v9  ;;  %vm5320_vm2 = vcmp.eq.f32.partialorder %v11128_v17, inf  ;;  %vm5322_vm3 = vcmp.eq.f32.partialorder %v11128_v17, 0.0  ;;  %v11346_v43 = vpop.eup %7158  ;;  %v5323_v32 = vand.u32 2147483648, %v11128_v17 }
 0x3d6   : > { %v11348_v42 = vsel %vm5315_vm1, %v5316_v5, %v5314_v25  ;;  %v5321_v61 = vsel %vm5320_vm2, %v11128_v17, %v5319_v35  ;;  %v5712_v51 = vmul.f32 %v10974_v3, %v11334_v24  ;;  %v5100_v20 = vadd.f32 %v4897_v7, %v13219_v31  ;;  %v13222_v35 = vld [vmem:[#allocation101_spill] sm:$0xff] }
 0x3d7   : > { %13218 = vst [vmem:[#allocation81_spill] sm:$0xff] %v11348_v42  ;;  %v5713_v29 = vmul.f32 %v10976_v10, %v11348_v42  ;;  %v5102_v23 = vadd.f32 %v5010_v41, %v13220_v58  ;;  %v5633_v30 = vadd.f32 %v11348_v42, %v11334_v24  ;;  %v11360_v9 = vpop.eup %7160  ;;  %v11362_v5 = vsel %vm5322_vm3, %v5323_v32, %v5321_v61  ;;  %v13223_v17 = vld [vmem:[#allocation69_spill] sm:$0xff] }
 0x3d8   : > { %13221 = vst [vmem:[#allocation53_spill] sm:$0xff] %v11362_v5  ;;  %v5105_v25 = vadd.f32 %v4901_v59, %v13222_v35  ;;  %v5107_v34 = vadd.f32 %v5014_v37, %v13223_v17  ;;  %v5326_v28 = vmul.f32 %v11235_v60, %v11146_v33  ;;  %v5714_v11 = vmul.f32 %v10978_v15, %v11362_v5  ;;  %v4903_v59 = vpop.f32.mrf.mxu0 }
 0x3d9   : > { %v5761_v7 = vadd.f32 %v5713_v29, %v5712_v51  ;;  %v5214_v31 = vmul.f32 %v5100_v20, %v5100_v20  ;;  %v5216_v41 = vmul.f32 %v5102_v23, %v5102_v23  ;;  %v5634_v42 = vadd.f32 %v5633_v30, %v11362_v5  ;;  %v5016_v29 = vpop.f32.mrf.mxu1 }
 0x3da   : > { %v11370_v58 = vpop.eup %7162  ;;  %v5171_v24 = vmul.f32 %v5105_v25, %v5105_v25  ;;  %v5218_v61 = vmul.f32 %v5107_v34, %v5107_v34  ;;  %vm5327_vm4 = vcmp.eq.f32.partialorder %v11146_v33, inf  ;;  %vm5329_vm5 = vcmp.eq.f32.partialorder %v11146_v33, 0.0 }
 0x3db   : > { %v11374_v32 = vpop.eup %7164  ;;  %v5762_v37 = vadd.f32 %v5761_v7, %v5714_v11  ;;  %v11377_v60 = vadd.f32 %v5214_v31, %v11058_v19  ;;  %v11379_v35 = vadd.f32 %v5216_v41, %v5168_v48  ;;  %v5328_v51 = vsel %vm5327_vm4, %v11146_v33, %v5326_v28  ;;  %5635 = vadd.xlane.f32.xlu0 %v5634_v42  ;;  %v4905_v28 = vpop.f32.mrf.mxu0  ;;  %v13226_v7 = vld [vmem:[#allocation102_spill] sm:$0xff]  ;;  %v13227_v41 = vld [vmem:[#allocation33_spill] sm:$0xff] }
 0x3dc   : > { %v11383_v20 = vadd.f32 %v5218_v61, %v11072_v27  ;;  %v5330_v30 = vand.u32 2147483648, %v11146_v33  ;;  %v5333_v34 = vmul.f32 %v11222_v44, %v11131_v1  ;;  %v11389_v11 = vpop.eup %7166  ;;  %vm5334_vm6 = vcmp.eq.f32.partialorder %v11131_v1, inf  ;;  %v5018_v23 = vpop.f32.mrf.mxu1 }
 0x3dd   : > { %5763 = vadd.xlane.f32.xlu1 %v5762_v37  ;;  %7174 = vrsqrt.f32 %v11377_v60  ;;  %vm5336_vm7 = vcmp.eq.f32.partialorder %v11131_v1, 0.0  ;;  %v5337_v19 = vand.u32 2147483648, %v11131_v1  ;;  %v5340_v44 = vmul.f32 %v11243_v54, %v11148_v13 }
 0x3de   : > { %7176 = vrsqrt.f32 %v11379_v35  ;;  %v11396_v27 = vsel %vm5329_vm5, %v5330_v30, %v5328_v51  ;;  %v5335_v33 = vsel %vm5334_vm6, %v11131_v1, %v5333_v34  ;;  %vm5341_vm8 = vcmp.eq.f32.partialorder %v11148_v13, inf  ;;  %v13228_v30 = vld [vmem:[#allocation103_spill] sm:$0xff] }
 0x3df   : > { %13224 = vst [vmem:[#allocation13_spill] sm:$0xff] %v11396_v27  ;;  %v11401_v48 = vpop.eup %7168  ;;  %7178 = vrsqrt.f32 %v11383_v20  ;;  %v11404_v42 = vsel %vm5336_vm7, %v5337_v19, %v5335_v33  ;;  %vm5343_vm9 = vcmp.eq.f32.partialorder %v11148_v13, 0.0  ;;  %v5342_v17 = vsel %vm5341_vm8, %v11148_v13, %v5340_v44  ;;  %v13229_v44 = vld [vmem:[#allocation34_spill] sm:$0xff] }
 0x3e0   : > { %13225 = vst [vmem:[#allocation83_spill] sm:$0xff] %v11404_v42  ;;  %v11408_v25 = vpop.eup %7170  ;;  %v5344_v1 = vand.u32 2147483648, %v11148_v13  ;;  %v5637_v54 = vadd.f32 %v11404_v42, %v11396_v27  ;;  %v5106_v31 = vadd.f32 %v4903_v59, %v13226_v7  ;;  %v5108_v61 = vadd.f32 %v5016_v29, %v13227_v41 }
 0x3e1   : > { %v5715_v37 = vmul.f32 %v10974_v3, %v11396_v27  ;;  %v5716_v51 = vmul.f32 %v10976_v10, %v11404_v42  ;;  %v5111_v34 = vadd.f32 %v4905_v28, %v13228_v30  ;;  %v5113_v5 = vadd.f32 %v5018_v23, %v13229_v44  ;;  %v13233_v44 = vld [vmem:[#allocation35_spill] sm:$0xff] }
 0x3e2   : > { %v11421_v19 = vpop.eup %7172  ;;  %v11423_v33 = vsel %vm5343_vm9, %v5344_v1, %v5342_v17  ;;  %v5217_v13 = vmul.f32 %v5106_v31, %v5106_v31  ;;  %v5347_v59 = vmul.f32 %v11263_v46, %v11167_v38  ;;  %v5219_v7 = vmul.f32 %v5108_v61, %v5108_v61 }
 0x3e3   : > { %v5638_v29 = vadd.f32 %v5637_v54, %v11423_v33  ;;  %v5717_v41 = vmul.f32 %v10978_v15, %v11423_v33  ;;  %v5765_v27 = vadd.f32 %v5716_v51, %v5715_v37  ;;  %v5174_v28 = vmul.f32 %v5111_v34, %v5111_v34  ;;  %v4907_v54 = vpop.f32.mrf.mxu0 }
 0x3e4   : > { %v11432_v42 = vadd.f32 %v5217_v13, %v11068_v63  ;;  %v5221_v30 = vmul.f32 %v5113_v5, %v5113_v5  ;;  %vm5348_vm10 = vcmp.eq.f32.partialorder %v11167_v38, inf  ;;  %v11435_v17 = vadd.f32 %v5219_v7, %v5171_v24  ;;  %v13232_v13 = vld [vmem:[#allocation104_spill] sm:$0xff] }
 0x3e5   : > { %5639 = vadd.xlane.f32.xlu1 %v5638_v29  ;;  %v5766_v23 = vadd.f32 %v5765_v27, %v5717_v41  ;;  %v5349_v46 = vsel %vm5348_vm10, %v11167_v38, %v5347_v59  ;;  %vm5350_vm11 = vcmp.eq.f32.partialorder %v11167_v38, 0.0  ;;  %v5351_v63 = vand.u32 2147483648, %v11167_v38  ;;  %v5020_v27 = vpop.f32.mrf.mxu1 }
 0x3e6   : > { %7180 = vrsqrt.f32 %v11432_v42  ;;  %v11441_v1 = vadd.f32 %v5221_v30, %v11080_v52  ;;  %v5354_v5 = vmul.f32 %v11248_v8, %v11159_v36  ;;  %vm5355_vm12 = vcmp.eq.f32.partialorder %v11159_v36, inf }
 0x3e7   : > { %7182 = vrsqrt.f32 %v11435_v17  ;;  %5767 = vadd.xlane.f32.xlu0 %v5766_v23  ;;  %vm5357_vm13 = vcmp.eq.f32.partialorder %v11159_v36, 0.0  ;;  %v5358_v24 = vand.u32 2147483648, %v11159_v36  ;;  %v11451_v52 = vsel %vm5350_vm11, %v5351_v63, %v5349_v46 }
 0x3e8   : > { %7184 = vrsqrt.f32 %v11441_v1  ;;  %13230 = vst [vmem:[#allocation54_spill] sm:$0xff] %v11451_v52  ;;  %v5356_v38 = vsel %vm5355_vm12, %v11159_v36, %v5354_v5  ;;  %v5361_v8 = vmul.f32 %v11272_v22, %v11169_v56  ;;  %vm5362_vm14 = vcmp.eq.f32.partialorder %v11169_v56, inf  ;;  %v4911_v22 = vpop.f32.mrf.mxu0 }
 0x3e9   : > { %v11456_v31 = vsel %vm5357_vm13, %v5358_v24, %v5356_v38  ;;  %vm5364_vm15 = vcmp.eq.f32.partialorder %v11169_v56, 0.0  ;;  %v5365_v61 = vand.u32 2147483648, %v11169_v56  ;;  %v5112_v36 = vadd.f32 %v4907_v54, %v13232_v13 }
 0x3ea   : > { %13231 = vst [vmem:[#allocation16_spill] sm:$0xff] %v11456_v31  ;;  %v11461_v37 = vpop.eup %7174  ;;  %v5363_v51 = vsel %vm5362_vm14, %v11169_v56, %v5361_v8  ;;  %v5641_v34 = vadd.f32 %v11456_v31, %v11451_v52  ;;  %v5114_v59 = vadd.f32 %v5020_v27, %v13233_v44  ;;  %v5368_v41 = vmul.f32 %v11288_v40, %v11183_v53  ;;  %v5024_v56 = vpop.f32.mrf.mxu1 }
 0x3eb   : > { %v11468_v29 = vpop.eup %7176  ;;  %v11470_v7 = vsel %vm5364_vm15, %v5365_v61, %v5363_v51  ;;  %vm5369_vm0 = vcmp.eq.f32.partialorder %v11183_v53, inf  ;;  %vm5371_vm1 = vcmp.eq.f32.partialorder %v11183_v53, 0.0  ;;  %v5220_v46 = vmul.f32 %v5112_v36, %v5112_v36  ;;  %v4913_v61 = vpop.f32.mrf.mxu0  ;;  %v13238_v36 = vld [vmem:[#allocation37_spill] sm:$0xff] }
 0x3ec   : > { %13234 = vst [vmem:[#allocation84_spill] sm:$0xff] %v11470_v7  ;;  %v11476_v30 = vpop.eup %7178  ;;  %v5642_v23 = vadd.f32 %v5641_v34, %v11470_v7  ;;  %v5222_v63 = vmul.f32 %v5114_v59, %v5114_v59  ;;  %v5372_v5 = vand.u32 2147483648, %v11183_v53  ;;  %v5370_v54 = vsel %vm5369_vm0, %v11183_v53, %v5368_v41  ;;  %v5026_v51 = vpop.f32.mrf.mxu1  ;;  %v13237_v34 = vld [vmem:[#allocation105_spill] sm:$0xff] }
 0x3ed   : > { %v5375_v24 = vmul.f32 %v11284_v16, %v11172_v57  ;;  %vm5376_vm2 = vcmp.eq.f32.partialorder %v11172_v57, inf  ;;  %vm5378_vm3 = vcmp.eq.f32.partialorder %v11172_v57, 0.0  ;;  %v11486_v40 = vadd.f32 %v5220_v46, %v11076_v47 }
 0x3ee   : > { %5643 = vadd.xlane.f32.xlu1 %v5642_v23  ;;  %v11488_v27 = vadd.f32 %v5222_v63, %v5174_v28  ;;  %v11490_v38 = vsel %vm5371_vm1, %v5372_v5, %v5370_v54  ;;  %v5379_v8 = vand.u32 2147483648, %v11172_v57  ;;  %v5382_v16 = vmul.f32 %v11296_v62, %v11185_v50  ;;  %v4915_v63 = vpop.f32.mrf.mxu0 }
 0x3ef   : > { %13235 = vst [vmem:[#allocation55_spill] sm:$0xff] %v11490_v38  ;;  %v5377_v53 = vsel %vm5376_vm2, %v11172_v57, %v5375_v24  ;;  %vm5383_vm4 = vcmp.eq.f32.partialorder %v11185_v50, inf  ;;  %vm5385_vm5 = vcmp.eq.f32.partialorder %v11185_v50, 0.0  ;;  %7186 = vrsqrt.f32 %v11486_v40  ;;  %v13240_v24 = vld [vmem:[#allocation82_spill] sm:$0xff] }
 0x3f0   : > { %v11499_v47 = vsel %vm5378_vm3, %v5379_v8, %v5377_v53  ;;  %v5386_v28 = vand.u32 2147483648, %v11185_v50  ;;  %v5117_v13 = vadd.f32 %v4911_v22, %v13237_v34  ;;  %7188 = vrsqrt.f32 %v11488_v27  ;;  %v5028_v8 = vpop.f32.mrf.mxu1 }
 0x3f1   : > { %13236 = vst [vmem:[#allocation85_spill] sm:$0xff] %v11499_v47  ;;  %v5384_v57 = vsel %vm5383_vm4, %v11185_v50, %v5382_v16  ;;  %v5645_v62 = vadd.f32 %v11499_v47, %v11490_v38  ;;  %v5119_v44 = vadd.f32 %v5024_v56, %v13238_v36  ;;  %v5718_v23 = vmul.f32 %v10974_v3, %v11451_v52 }
 0x3f2   : > { %v11508_v59 = vsel %vm5385_vm5, %v5386_v28, %v5384_v57  ;;  %v5177_v41 = vmul.f32 %v5117_v13, %v5117_v13  ;;  %v5719_v46 = vmul.f32 %v10976_v10, %v11456_v31  ;;  %v5720_v54 = vmul.f32 %v10978_v15, %v11470_v7  ;;  %v13241_v28 = vld [vmem:[#allocation71_spill] sm:$0xff] }
 0x3f3   : > { %13239 = vst [vmem:[#allocation56_spill] sm:$0xff] %v11508_v59  ;;  %v11514_v22 = vpop.eup %7180  ;;  %v5646_v5 = vadd.f32 %v5645_v62, %v11508_v59  ;;  %v5224_v50 = vmul.f32 %v5119_v44, %v5119_v44  ;;  %v5118_v56 = vadd.f32 %v4913_v61, %v13240_v24  ;;  %v5120_v34 = vadd.f32 %v5026_v51, %v13241_v28  ;;  %v13242_v24 = vld [vmem:[#allocation30_spill] sm:$0xff] }
 0x3f4   : > { %v11520_v53 = vpop.eup %7182  ;;  %v5769_v16 = vadd.f32 %v5719_v46, %v5718_v23  ;;  %v5721_v13 = vmul.f32 %v10974_v3, %v11490_v38  ;;  %v5722_v57 = vmul.f32 %v10976_v10, %v11499_v47  ;;  %v5723_v61 = vmul.f32 %v10978_v15, %v11508_v59 }
 0x3f5   : > { %v11527_v36 = vpop.eup %7184  ;;  %5647 = vadd.xlane.f32.xlu0 %v5646_v5  ;;  %v11530_v62 = vadd.f32 %v5224_v50, %v11090_v49  ;;  %v5223_v44 = vmul.f32 %v5118_v56, %v5118_v56  ;;  %v5123_v23 = vadd.f32 %v4915_v63, %v13242_v24  ;;  %v5225_v51 = vmul.f32 %v5120_v34, %v5120_v34  ;;  %v5030_v63 = vpop.f32.mrf.mxu1 }
 0x3f6   : > { %v5770_v46 = vadd.f32 %v5769_v16, %v5720_v54  ;;  %v5773_v28 = vadd.f32 %v5722_v57, %v5721_v13  ;;  %v5125_v38 = vadd.f32 %v5028_v8, %v10946_v0  ;;  %v5389_v49 = vmul.f32 %v11317_v45, %v11209_v6  ;;  %v13246_v57 = vld [vmem:[#allocation106_spill] sm:$0xff] }
 0x3f7   : > { %7190 = vrsqrt.f32 %v11530_v62  ;;  %v11538_v47 = vadd.f32 %v5223_v44, %v11086_v4  ;;  %v5180_v5 = vmul.f32 %v5123_v23, %v5123_v23  ;;  %v11542_v50 = vadd.f32 %v5225_v51, %v5177_v41  ;;  %v13248_v23 = vld [vmem:[#allocation77_spill] sm:$0xff] }
 0x3f8   : > { %5771 = vadd.xlane.f32.xlu1 %v5770_v46  ;;  %v5774_v56 = vadd.f32 %v5773_v28, %v5723_v61  ;;  %v5227_v59 = vmul.f32 %v5125_v38, %v5125_v38  ;;  %vm5390_vm6 = vcmp.eq.f32.partialorder %v11209_v6, inf  ;;  %vm5392_vm7 = vcmp.eq.f32.partialorder %v11209_v6, 0.0  ;;  %v4917_v38 = vpop.f32.mrf.mxu0  ;;  %v5034_v28 = vpop.f32.mrf.mxu1 }
 0x3f9   : > { %7192 = vrsqrt.f32 %v11538_v47  ;;  %v5391_v0 = vsel %vm5390_vm6, %v11209_v6, %v5389_v49  ;;  %v5393_v4 = vand.u32 2147483648, %v11209_v6  ;;  %v5396_v41 = vmul.f32 %v11306_v2, %v11197_v55  ;;  %v13244_v6 = vld [vmem:[#allocation74_spill] sm:$0xff] }
 0x3fa   : > { %7194 = vrsqrt.f32 %v11542_v50  ;;  %5775 = vadd.xlane.f32.xlu0 %v5774_v56  ;;  %v11551_v45 = vadd.f32 %v5227_v59, %v11105_v26  ;;  %vm5397_vm8 = vcmp.eq.f32.partialorder %v11197_v55, inf  ;;  %vm5399_vm9 = vcmp.eq.f32.partialorder %v11197_v55, 0.0  ;;  %v4921_v51 = vpop.f32.mrf.mxu0 }
 0x3fb   : > { %v11556_v54 = vsel %vm5392_vm7, %v5393_v4, %v5391_v0  ;;  %v5400_v8 = vand.u32 2147483648, %v11197_v55  ;;  %v5403_v16 = vmul.f32 %v11323_v18, %v13244_v6  ;;  %v5398_v26 = vsel %vm5397_vm8, %v11197_v55, %v5396_v41  ;;  %v13247_v55 = vld [vmem:[#allocation38_spill] sm:$0xff] }
 0x3fc   : > { %13243 = vst [vmem:[#allocation19_spill] sm:$0xff] %v11556_v54  ;;  %7196 = vrsqrt.f32 %v11551_v45  ;;  %vm5404_vm10 = vcmp.eq.f32.partialorder %v13244_v6, inf  ;;  %vm5406_vm11 = vcmp.eq.f32.partialorder %v13244_v6, 0.0  ;;  %v11566_v2 = vpop.eup %7186  ;;  %v5407_v13 = vand.u32 2147483648, %v13244_v6 }
 0x3fd   : > { %v11568_v59 = vsel %vm5399_vm9, %v5400_v8, %v5398_v26  ;;  %v5405_v34 = vsel %vm5404_vm10, %v13244_v6, %v5403_v16  ;;  %v5124_v44 = vadd.f32 %v4917_v38, %v13246_v57  ;;  %v11573_v61 = vpop.eup %7188  ;;  %v5126_v24 = vadd.f32 %v5030_v63, %v13247_v55  ;;  %v13250_v63 = vld [vmem:[#allocation47_spill] sm:$0xff]  ;;  %v13253_v57 = vld [vmem:[#allocation49_spill] sm:$0xff] }
 0x3fe   : > { %13245 = vst [vmem:[#allocation86_spill] sm:$0xff] %v11568_v59  ;;  %v5649_v18 = vadd.f32 %v11568_v59, %v11556_v54  ;;  %v5410_v46 = vmul.f32 %v11340_v14, %v13248_v23  ;;  %vm5411_vm12 = vcmp.eq.f32.partialorder %v13248_v23, inf  ;;  %v11581_v49 = vsel %vm5406_vm11, %v5407_v13, %v5405_v34  ;;  %v13251_v14 = vld [vmem:[#allocation43_spill] sm:$0xff] }
 0x3ff   : > { %13249 = vst [vmem:[#allocation58_spill] sm:$0xff] %v11581_v49  ;;  %v5226_v56 = vmul.f32 %v5124_v44, %v5124_v44  ;;  %vm5413_vm13 = vcmp.eq.f32.partialorder %v13248_v23, 0.0  ;;  %v5414_v0 = vand.u32 2147483648, %v13248_v23  ;;  %v5228_v41 = vmul.f32 %v5126_v24, %v5126_v24 }
 0x400   : > { %v5650_v4 = vadd.f32 %v5649_v18, %v11581_v49  ;;  %v5412_v38 = vsel %vm5411_vm12, %v13248_v23, %v5410_v46  ;;  %v5417_v8 = vmul.f32 %v11332_v21, %v13250_v63  ;;  %vm5418_vm14 = vcmp.eq.f32.partialorder %v13250_v63, inf  ;;  %v4923_v21 = vpop.f32.mrf.mxu0  ;;  %v5036_v18 = vpop.f32.mrf.mxu1  ;;  %v13255_v46 = vld [vmem:[#allocation75_spill] sm:$0xff] }
 0x401   : > { %v11590_v6 = vadd.f32 %v5226_v56, %v13251_v14  ;;  %v11592_v16 = vsel %vm5413_vm13, %v5414_v0, %v5412_v38  ;;  %vm5420_vm15 = vcmp.eq.f32.partialorder %v13250_v63, 0.0  ;;  %v11596_v26 = vadd.f32 %v5228_v41, %v5180_v5 }
 0x402   : > { %13252 = vst [vmem:[#allocation87_spill] sm:$0xff] %v11592_v16  ;;  %5651 = vadd.xlane.f32.xlu1 %v5650_v4  ;;  %v5419_v34 = vsel %vm5418_vm14, %v13250_v63, %v5417_v8  ;;  %v5421_v13 = vand.u32 2147483648, %v13250_v63  ;;  %v5424_v44 = vmul.f32 %v11346_v43, %v13253_v57  ;;  %vm5425_vm0 = vcmp.eq.f32.partialorder %v13253_v57, inf  ;;  %v13257_v4 = vld [vmem:[#allocation39_spill] sm:$0xff] }
 0x403   : > { %7198 = vrsqrt.f32 %v11590_v6  ;;  %vm5427_vm1 = vcmp.eq.f32.partialorder %v13253_v57, 0.0  ;;  %v5428_v55 = vand.u32 2147483648, %v13253_v57  ;;  %v5129_v43 = vadd.f32 %v4921_v51, %v13255_v46  ;;  %v13258_v51 = vld [vmem:[#allocation46_spill] sm:$0xff]  ;;  %v13259_v46 = vld [vmem:[#allocation40_spill] sm:$0xff] }
 0x404   : > { %v11606_v24 = vpop.eup %7190  ;;  %7200 = vrsqrt.f32 %v11596_v26  ;;  %v11609_v5 = vsel %vm5420_vm15, %v5421_v13, %v5419_v34  ;;  %v5426_v23 = vsel %vm5425_vm0, %v13253_v57, %v5424_v44  ;;  %v5131_v41 = vadd.f32 %v5034_v28, %v13257_v4  ;;  %v4925_v57 = vpop.f32.mrf.mxu0 }
 0x405   : > { %13254 = vst [vmem:[#allocation59_spill] sm:$0xff] %v11609_v5  ;;  %v11613_v56 = vsel %vm5427_vm1, %v5428_v55, %v5426_v23  ;;  %v5653_v0 = vadd.f32 %v11609_v5, %v11592_v16  ;;  %v5724_v38 = vmul.f32 %v10974_v3, %v11556_v54  ;;  %v5183_v8 = vmul.f32 %v5129_v43, %v5129_v43  ;;  %v5038_v44 = vpop.f32.mrf.mxu1 }
 0x406   : > { %13256 = vst [vmem:[#allocation22_spill] sm:$0xff] %v11613_v56  ;;  %v11620_v63 = vpop.eup %7192  ;;  %v5725_v14 = vmul.f32 %v10976_v10, %v11568_v59  ;;  %v5726_v34 = vmul.f32 %v10978_v15, %v11581_v49  ;;  %v5130_v13 = vadd.f32 %v4923_v21, %v13258_v51  ;;  %v5230_v23 = vmul.f32 %v5131_v41, %v5131_v41  ;;  %v13260_v49 = vld [vmem:[#allocation44_spill] sm:$0xff]  ;;  %v13261_v41 = vld [vmem:[#allocation107_spill] sm:$0xff] }
 0x407   : > { %v11627_v55 = vpop.eup %7194  ;;  %v5654_v28 = vadd.f32 %v5653_v0, %v11613_v56  ;;  %v5132_v4 = vadd.f32 %v5036_v18, %v13259_v46  ;;  %v5727_v43 = vmul.f32 %v10974_v3, %v11592_v16  ;;  %v5728_v59 = vmul.f32 %v10976_v10, %v11609_v5  ;;  %v13262_v46 = vld [vmem:[#allocation41_spill] sm:$0xff] }
 0x408   : > { %v5777_v54 = vadd.f32 %v5725_v14, %v5724_v38  ;;  %v5229_v7 = vmul.f32 %v5130_v13, %v5130_v13  ;;  %v5729_v21 = vmul.f32 %v10978_v15, %v11613_v56  ;;  %v11640_v31 = vadd.f32 %v5230_v23, %v13260_v49  ;;  %v13263_v38 = vld [vmem:[#allocation72_spill] sm:$0xff] }
 0x409   : > { %v11637_v51 = vpop.eup %7196  ;;  %5655 = vadd.xlane.f32.xlu0 %v5654_v28  ;;  %v5231_v0 = vmul.f32 %v5132_v4, %v5132_v4  ;;  %v5135_v18 = vadd.f32 %v4925_v57, %v13261_v41  ;;  %v5137_v52 = vadd.f32 %v5038_v44, %v13262_v46  ;;  %v5781_v13 = vadd.f32 %v5728_v59, %v5727_v43  ;;  %v5040_v44 = vpop.f32.mrf.mxu1  ;;  %v13266_v43 = vld [vmem:[#allocation76_spill] sm:$0xff]  ;;  %v13267_v46 = vld [vmem:[#allocation42_spill] sm:$0xff] }
 0x40a   : > { %v5778_v16 = vadd.f32 %v5777_v54, %v5726_v34  ;;  %v11645_v14 = vadd.f32 %v5229_v7, %v13263_v38  ;;  %v5431_v5 = vmul.f32 %v11370_v58, %v11276_v12  ;;  %7202 = vrsqrt.f32 %v11640_v31  ;;  %v13264_v7 = vld [vmem:[#allocation45_spill] sm:$0xff]  ;;  %v13268_v38 = vld [vmem:[#allocation79_spill] sm:$0xff] }
 0x40b   : > { %v11650_v56 = vadd.f32 %v5231_v0, %v5183_v8  ;;  %v5186_v28 = vmul.f32 %v5135_v18, %v5135_v18  ;;  %v5233_v49 = vmul.f32 %v5137_v52, %v5137_v52  ;;  %v5782_v57 = vadd.f32 %v5781_v13, %v5729_v21  ;;  %v4927_v8 = vpop.f32.mrf.mxu0  ;;  %v13265_v52 = vld [vmem:[#allocation50_spill] sm:$0xff] }
 0x40c   : > { %5779 = vadd.xlane.f32.xlu1 %v5778_v16  ;;  %7204 = vrsqrt.f32 %v11645_v14  ;;  %vm5432_vm2 = vcmp.eq.f32.partialorder %v11276_v12, inf  ;;  %vm5434_vm3 = vcmp.eq.f32.partialorder %v11276_v12, 0.0  ;;  %v5435_v59 = vand.u32 2147483648, %v11276_v12 }
 0x40d   : > { %7206 = vrsqrt.f32 %v11650_v56  ;;  %v11657_v54 = vadd.f32 %v5233_v49, %v13264_v7  ;;  %v5433_v58 = vsel %vm5432_vm2, %v11276_v12, %v5431_v5  ;;  %5783 = vadd.xlane.f32.xlu0 %v5782_v57  ;;  %v5438_v16 = vmul.f32 %v11360_v9, %v13265_v52 }
 0x40e   : > { %vm5439_vm4 = vcmp.eq.f32.partialorder %v13265_v52, inf  ;;  %vm5441_vm5 = vcmp.eq.f32.partialorder %v13265_v52, 0.0  ;;  %v5442_v34 = vand.u32 2147483648, %v13265_v52  ;;  %v11667_v23 = vsel %vm5434_vm3, %v5435_v59, %v5433_v58 }
 0x40f   : > { %7208 = vrsqrt.f32 %v11657_v54  ;;  %v5445_v5 = vmul.f32 %v11374_v32, %v11278_v39  ;;  %vm5446_vm6 = vcmp.eq.f32.partialorder %v11278_v39, inf  ;;  %v5440_v9 = vsel %vm5439_vm4, %v13265_v52, %v5438_v16  ;;  %v13269_v52 = vld [vmem:[#allocation73_spill] sm:$0xff] }
 0x410   : > { %v11672_v12 = vpop.eup %7198  ;;  %vm5448_vm7 = vcmp.eq.f32.partialorder %v11278_v39, 0.0  ;;  %v5449_v4 = vand.u32 2147483648, %v11278_v39  ;;  %v5136_v21 = vadd.f32 %v4927_v8, %v13266_v43  ;;  %v11680_v41 = vsel %vm5441_vm5, %v5442_v34, %v5440_v9  ;;  %v13271_v43 = vld [vmem:[#allocation80_spill] sm:$0xff] }
 0x411   : > { %v11678_v0 = vpop.eup %7200  ;;  %v5447_v18 = vsel %vm5446_vm6, %v11278_v39, %v5445_v5  ;;  %v5138_v32 = vadd.f32 %v5040_v44, %v13267_v46  ;;  %v5452_v13 = vmul.f32 %v11401_v48, %v13268_v38  ;;  %v5657_v57 = vadd.f32 %v11680_v41, %v11667_v23  ;;  %v13270_v48 = vld [vmem:[#allocation6_spill] sm:$0xff] }
 0x412   : > { %v11686_v49 = vsel %vm5448_vm7, %v5449_v4, %v5447_v18  ;;  %v5232_v7 = vmul.f32 %v5136_v21, %v5136_v21  ;;  %vm5453_vm8 = vcmp.eq.f32.partialorder %v13268_v38, inf  ;;  %vm5455_vm9 = vcmp.eq.f32.partialorder %v13268_v38, 0.0 }
 0x413   : > { %v5234_v58 = vmul.f32 %v5138_v32, %v5138_v32  ;;  %v5454_v59 = vsel %vm5453_vm8, %v13268_v38, %v5452_v13  ;;  %v5456_v39 = vand.u32 2147483648, %v13268_v38  ;;  %v5658_v8 = vadd.f32 %v5657_v57, %v11686_v49 }
 0x414   : > { %v11696_v16 = vadd.f32 %v5232_v7, %v13269_v52  ;;  %v5459_v34 = vmul.f32 %v11389_v11, %v13270_v48  ;;  %vm5460_vm10 = vcmp.eq.f32.partialorder %v13270_v48, inf  ;;  %vm5462_vm11 = vcmp.eq.f32.partialorder %v13270_v48, 0.0 }
 0x415   : > { %v11701_v44 = vadd.f32 %v5234_v58, %v5186_v28  ;;  %v11703_v5 = vsel %vm5455_vm9, %v5456_v39, %v5454_v59  ;;  %v5463_v9 = vand.u32 2147483648, %v13270_v48  ;;  %5659 = vadd.xlane.f32.xlu1 %v5658_v8  ;;  %v5466_v21 = vmul.f32 %v11408_v25, %v13271_v43 }
 0x416   : > { %7210 = vrsqrt.f32 %v11696_v16  ;;  %v5461_v4 = vsel %vm5460_vm10, %v13270_v48, %v5459_v34  ;;  %vm5467_vm12 = vcmp.eq.f32.partialorder %v13271_v43, inf  ;;  %vm5469_vm13 = vcmp.eq.f32.partialorder %v13271_v43, 0.0  ;;  %v13272_v34 = vld [vmem:[#allocation52_spill] sm:$0xff] }
 0x417   : > { %7212 = vrsqrt.f32 %v11701_v44  ;;  %v11713_v11 = vsel %vm5462_vm11, %v5463_v9, %v5461_v4  ;;  %v5470_v28 = vand.u32 2147483648, %v13271_v43  ;;  %v11717_v18 = vpop.eup %7202  ;;  %v5468_v46 = vsel %vm5467_vm12, %v13271_v43, %v5466_v21 }
 0x418   : > { %v5661_v32 = vadd.f32 %v11713_v11, %v11703_v5  ;;  %v5730_v25 = vmul.f32 %v10974_v3, %v11667_v23  ;;  %v5731_v38 = vmul.f32 %v10976_v10, %v11680_v41  ;;  %v5732_v7 = vmul.f32 %v10978_v15, %v11686_v49 }
 0x419   : > { %v11726_v13 = vpop.eup %7204  ;;  %v11728_v57 = vsel %vm5469_vm13, %v5470_v28, %v5468_v46  ;;  %v5473_v58 = vmul.f32 %v11461_v37, %v11377_v60  ;;  %vm5474_vm14 = vcmp.eq.f32.partialorder %v11377_v60, inf  ;;  %vm5476_vm15 = vcmp.eq.f32.partialorder %v11377_v60, 0.0 }
 0x41a   : > { %v11735_v59 = vpop.eup %7206  ;;  %v5662_v39 = vadd.f32 %v5661_v32, %v11728_v57  ;;  %v5785_v8 = vadd.f32 %v5731_v38, %v5730_v25  ;;  %v5477_v52 = vand.u32 2147483648, %v11377_v60  ;;  %v5480_v9 = vmul.f32 %v11421_v19, %v13272_v34 }
 0x41b   : > { %v5475_v48 = vsel %vm5474_vm14, %v11377_v60, %v5473_v58  ;;  %vm5481_vm0 = vcmp.eq.f32.partialorder %v13272_v34, inf  ;;  %vm5483_vm1 = vcmp.eq.f32.partialorder %v13272_v34, 0.0  ;;  %v5484_v21 = vand.u32 2147483648, %v13272_v34 }
 0x41c   : > { %v11745_v37 = vpop.eup %7208  ;;  %5663 = vadd.xlane.f32.xlu0 %v5662_v39  ;;  %v5786_v4 = vadd.f32 %v5785_v8, %v5732_v7  ;;  %v11747_v43 = vsel %vm5476_vm15, %v5477_v52, %v5475_v48  ;;  %v5487_v28 = vmul.f32 %v11468_v29, %v11379_v35  ;;  %v5482_v60 = vsel %vm5481_vm0, %v13272_v34, %v5480_v9 }
 0x41d   : > { %vm5488_vm2 = vcmp.eq.f32.partialorder %v11379_v35, inf  ;;  %vm5490_vm3 = vcmp.eq.f32.partialorder %v11379_v35, 0.0  ;;  %v5491_v19 = vand.u32 2147483648, %v11379_v35  ;;  %v11756_v46 = vsel %vm5483_vm1, %v5484_v21, %v5482_v60 }
 0x41e   : > { %5787 = vadd.xlane.f32.xlu1 %v5786_v4  ;;  %v5489_v32 = vsel %vm5488_vm2, %v11379_v35, %v5487_v28  ;;  %v5494_v25 = vmul.f32 %v11514_v22, %v11432_v42  ;;  %vm5495_vm4 = vcmp.eq.f32.partialorder %v11432_v42, inf  ;;  %v5665_v29 = vadd.f32 %v11756_v46, %v11747_v43 }
 0x41f   : > { %v11762_v38 = vsel %vm5490_vm3, %v5491_v19, %v5489_v32  ;;  %vm5497_vm5 = vcmp.eq.f32.partialorder %v11432_v42, 0.0  ;;  %v5498_v7 = vand.u32 2147483648, %v11432_v42  ;;  %v5501_v39 = vmul.f32 %v11476_v30, %v11383_v20 }
 0x420   : > { %v5496_v58 = vsel %vm5495_vm4, %v11432_v42, %v5494_v25  ;;  %vm5502_vm6 = vcmp.eq.f32.partialorder %v11383_v20, inf  ;;  %vm5504_vm7 = vcmp.eq.f32.partialorder %v11383_v20, 0.0  ;;  %v5666_v35 = vadd.f32 %v5665_v29, %v11762_v38 }
 0x421   : > { %v11774_v22 = vsel %vm5497_vm5, %v5498_v7, %v5496_v58  ;;  %v5505_v8 = vand.u32 2147483648, %v11383_v20  ;;  %v5508_v52 = vmul.f32 %v11520_v53, %v11435_v17  ;;  %v5503_v48 = vsel %vm5502_vm6, %v11383_v20, %v5501_v39 }
 0x422   : > { %vm5509_vm8 = vcmp.eq.f32.partialorder %v11435_v17, inf  ;;  %vm5511_vm9 = vcmp.eq.f32.partialorder %v11435_v17, 0.0  ;;  %v5512_v42 = vand.u32 2147483648, %v11435_v17  ;;  %5667 = vadd.xlane.f32.xlu1 %v5666_v35  ;;  %v5515_v4 = vmul.f32 %v11566_v2, %v11486_v40 }
 0x423   : > { %v11783_v30 = vpop.eup %7210  ;;  %v11785_v34 = vsel %vm5504_vm7, %v5505_v8, %v5503_v48  ;;  %v5510_v9 = vsel %vm5509_vm8, %v11435_v17, %v5508_v52  ;;  %vm5516_vm10 = vcmp.eq.f32.partialorder %v11486_v40, inf  ;;  %vm5518_vm11 = vcmp.eq.f32.partialorder %v11486_v40, 0.0 }
 0x424   : > { %v11791_v53 = vpop.eup %7212  ;;  %v11793_v20 = vsel %vm5511_vm9, %v5512_v42, %v5510_v9  ;;  %v5669_v21 = vadd.f32 %v11785_v34, %v11774_v22  ;;  %v5519_v28 = vand.u32 2147483648, %v11486_v40  ;;  %v5517_v60 = vsel %vm5516_vm10, %v11486_v40, %v5515_v4 }
 0x425   : > { %v5522_v17 = vmul.f32 %v11527_v36, %v11441_v1  ;;  %vm5523_vm12 = vcmp.eq.f32.partialorder %v11441_v1, inf  ;;  %vm5525_vm13 = vcmp.eq.f32.partialorder %v11441_v1, 0.0  ;;  %v5526_v32 = vand.u32 2147483648, %v11441_v1 }
 0x426   : > { %v5670_v2 = vadd.f32 %v5669_v21, %v11793_v20  ;;  %v11805_v19 = vsel %vm5518_vm11, %v5519_v28, %v5517_v60  ;;  %v5529_v25 = vmul.f32 %v11573_v61, %v11488_v27  ;;  %vm5530_vm14 = vcmp.eq.f32.partialorder %v11488_v27, inf }
 0x427   : > { %v5524_v29 = vsel %vm5523_vm12, %v11441_v1, %v5522_v17  ;;  %vm5532_vm15 = vcmp.eq.f32.partialorder %v11488_v27, 0.0  ;;  %v5533_v40 = vand.u32 2147483648, %v11488_v27  ;;  %v5536_v58 = vmul.f32 %v11620_v63, %v11538_v47 }
 0x428   : > { %5671 = vadd.xlane.f32.xlu0 %v5670_v2  ;;  %v11814_v36 = vsel %vm5525_vm13, %v5526_v32, %v5524_v29  ;;  %v5531_v7 = vsel %vm5530_vm14, %v11488_v27, %v5529_v25  ;;  %vm5537_vm0 = vcmp.eq.f32.partialorder %v11538_v47, inf  ;;  %vm5539_vm1 = vcmp.eq.f32.partialorder %v11538_v47, 0.0 }
 0x429   : > { %v11820_v39 = vsel %vm5532_vm15, %v5533_v40, %v5531_v7  ;;  %v5673_v1 = vadd.f32 %v11814_v36, %v11805_v19  ;;  %v5540_v61 = vand.u32 2147483648, %v11538_v47  ;;  %v5538_v35 = vsel %vm5537_vm0, %v11538_v47, %v5536_v58 }
 0x42a   : > { %v5543_v8 = vmul.f32 %v11606_v24, %v11530_v62  ;;  %vm5544_vm2 = vcmp.eq.f32.partialorder %v11530_v62, inf  ;;  %vm5546_vm3 = vcmp.eq.f32.partialorder %v11530_v62, 0.0  ;;  %v5547_v52 = vand.u32 2147483648, %v11530_v62 }
 0x42b   : > { %v5674_v27 = vadd.f32 %v5673_v1, %v11820_v39  ;;  %v11832_v63 = vsel %vm5539_vm1, %v5540_v61, %v5538_v35  ;;  %v5550_v48 = vmul.f32 %v11627_v55, %v11542_v50  ;;  %vm5551_vm4 = vcmp.eq.f32.partialorder %v11542_v50, inf }
 0x42c   : > { %v5545_v42 = vsel %vm5544_vm2, %v11530_v62, %v5543_v8  ;;  %vm5553_vm5 = vcmp.eq.f32.partialorder %v11542_v50, 0.0  ;;  %v5554_v47 = vand.u32 2147483648, %v11542_v50  ;;  %v5557_v4 = vmul.f32 %v11672_v12, %v11590_v6 }
 0x42d   : > { %5675 = vadd.xlane.f32.xlu1 %v5674_v27  ;;  %v11841_v24 = vsel %vm5546_vm3, %v5547_v52, %v5545_v42  ;;  %v5552_v9 = vsel %vm5551_vm4, %v11542_v50, %v5550_v48  ;;  %vm5558_vm6 = vcmp.eq.f32.partialorder %v11590_v6, inf  ;;  %vm5560_vm7 = vcmp.eq.f32.partialorder %v11590_v6, 0.0 }
 0x42e   : > { %v11847_v21 = vsel %vm5553_vm5, %v5554_v47, %v5552_v9  ;;  %v5677_v62 = vadd.f32 %v11841_v24, %v11832_v63  ;;  %v5561_v55 = vand.u32 2147483648, %v11590_v6  ;;  %v5559_v28 = vsel %vm5558_vm6, %v11590_v6, %v5557_v4 }
 0x42f   : > { %v5564_v60 = vmul.f32 %v11637_v51, %v11551_v45  ;;  %vm5565_vm8 = vcmp.eq.f32.partialorder %v11551_v45, inf  ;;  %vm5567_vm9 = vcmp.eq.f32.partialorder %v11551_v45, 0.0  ;;  %v5568_v17 = vand.u32 2147483648, %v11551_v45 }
 0x430   : > { %v5678_v50 = vadd.f32 %v5677_v62, %v11847_v21  ;;  %v11859_v12 = vsel %vm5560_vm7, %v5561_v55, %v5559_v28  ;;  %v5571_v2 = vmul.f32 %v11678_v0, %v11596_v26  ;;  %vm5572_vm10 = vcmp.eq.f32.partialorder %v11596_v26, inf }
 0x431   : > { %v5566_v32 = vsel %vm5565_vm8, %v11551_v45, %v5564_v60  ;;  %vm5574_vm11 = vcmp.eq.f32.partialorder %v11596_v26, 0.0  ;;  %v5575_v6 = vand.u32 2147483648, %v11596_v26  ;;  %v5578_v29 = vmul.f32 %v11726_v13, %v11645_v14 }
 0x432   : > { %5679 = vadd.xlane.f32.xlu0 %v5678_v50  ;;  %v11868_v51 = vsel %vm5567_vm9, %v5568_v17, %v5566_v32  ;;  %v5573_v25 = vsel %vm5572_vm10, %v11596_v26, %v5571_v2  ;;  %vm5579_vm12 = vcmp.eq.f32.partialorder %v11645_v14, inf  ;;  %vm5581_vm13 = vcmp.eq.f32.partialorder %v11645_v14, 0.0 }
 0x433   : > { %v11874_v40 = vsel %vm5574_vm11, %v5575_v6, %v5573_v25  ;;  %v5681_v45 = vadd.f32 %v11868_v51, %v11859_v12  ;;  %v5582_v0 = vand.u32 2147483648, %v11645_v14  ;;  %v5580_v7 = vsel %vm5579_vm12, %v11645_v14, %v5578_v29 }
 0x434   : > { %v5585_v58 = vmul.f32 %v11717_v18, %v11640_v31  ;;  %vm5586_vm14 = vcmp.eq.f32.partialorder %v11640_v31, inf  ;;  %vm5588_vm15 = vcmp.eq.f32.partialorder %v11640_v31, 0.0  ;;  %v5589_v1 = vand.u32 2147483648, %v11640_v31 }
 0x435   : > { %v5682_v26 = vadd.f32 %v5681_v45, %v11874_v40  ;;  %v11886_v13 = vsel %vm5581_vm13, %v5582_v0, %v5580_v7  ;;  %v5592_v61 = vmul.f32 %v11735_v59, %v11650_v56  ;;  %vm5593_vm0 = vcmp.eq.f32.partialorder %v11650_v56, inf }
 0x436   : > { %v5587_v35 = vsel %vm5586_vm14, %v11640_v31, %v5585_v58  ;;  %vm5595_vm1 = vcmp.eq.f32.partialorder %v11650_v56, 0.0  ;;  %v5596_v14 = vand.u32 2147483648, %v11650_v56  ;;  %v5599_v27 = vmul.f32 %v11783_v30, %v11696_v16 }
 0x437   : > { %5683 = vadd.xlane.f32.xlu1 %v5682_v26  ;;  %v11895_v18 = vsel %vm5588_vm15, %v5589_v1, %v5587_v35  ;;  %v5594_v8 = vsel %vm5593_vm0, %v11650_v56, %v5592_v61  ;;  %vm5600_vm2 = vcmp.eq.f32.partialorder %v11696_v16, inf  ;;  %vm5602_vm3 = vcmp.eq.f32.partialorder %v11696_v16, 0.0 }
 0x438   : > { %v11901_v52 = vsel %vm5595_vm1, %v5596_v14, %v5594_v8  ;;  %v5685_v31 = vadd.f32 %v11895_v18, %v11886_v13  ;;  %v5603_v59 = vand.u32 2147483648, %v11696_v16  ;;  %v5601_v48 = vsel %vm5600_vm2, %v11696_v16, %v5599_v27 }
 0x439   : > { %v5606_v42 = vmul.f32 %v11745_v37, %v11657_v54  ;;  %vm5607_vm4 = vcmp.eq.f32.partialorder %v11657_v54, inf  ;;  %vm5609_vm5 = vcmp.eq.f32.partialorder %v11657_v54, 0.0  ;;  %v5610_v47 = vand.u32 2147483648, %v11657_v54 }
 0x43a   : > { %v5686_v56 = vadd.f32 %v5685_v31, %v11901_v52  ;;  %v11913_v30 = vsel %vm5602_vm3, %v5603_v59, %v5601_v48  ;;  %v5613_v9 = vmul.f32 %v11791_v53, %v11701_v44  ;;  %vm5614_vm6 = vcmp.eq.f32.partialorder %v11701_v44, inf }
 0x43b   : > { %v5608_v4 = vsel %vm5607_vm4, %v11657_v54, %v5606_v42  ;;  %vm5616_vm7 = vcmp.eq.f32.partialorder %v11701_v44, 0.0  ;;  %v5617_v16 = vand.u32 2147483648, %v11701_v44  ;;  %v5733_v55 = vmul.f32 %v10974_v3, %v11703_v5 }
 0x43c   : > { %5687 = vadd.xlane.f32.xlu0 %v5686_v56  ;;  %v11922_v37 = vsel %vm5609_vm5, %v5610_v47, %v5608_v4  ;;  %v5615_v62 = vsel %vm5614_vm6, %v11701_v44, %v5613_v9  ;;  %v5734_v28 = vmul.f32 %v10976_v10, %v11713_v11  ;;  %v5736_v60 = vmul.f32 %v10974_v3, %v11747_v43 }
 0x43d   : > { %v11929_v53 = vsel %vm5616_vm7, %v5617_v16, %v5615_v62  ;;  %v5689_v54 = vadd.f32 %v11922_v37, %v11913_v30  ;;  %v5735_v50 = vmul.f32 %v10978_v15, %v11728_v57  ;;  %v5737_v44 = vmul.f32 %v10976_v10, %v11756_v46 }
 0x43e   : > { %v5789_v17 = vadd.f32 %v5734_v28, %v5733_v55  ;;  %v5739_v2 = vmul.f32 %v10974_v3, %v11774_v22  ;;  %v5740_v6 = vmul.f32 %v10976_v10, %v11785_v34  ;;  %v5742_v25 = vmul.f32 %v10974_v3, %v11805_v19 }
 0x43f   : > { %v5690_v32 = vadd.f32 %v5689_v54, %v11929_v53  ;;  %v5793_v45 = vadd.f32 %v5737_v44, %v5736_v60  ;;  %v5738_v0 = vmul.f32 %v10978_v15, %v11762_v38  ;;  %v5743_v58 = vmul.f32 %v10976_v10, %v11814_v36 }
 0x440   : > { %v5790_v29 = vadd.f32 %v5789_v17, %v5735_v50  ;;  %v5797_v7 = vadd.f32 %v5740_v6, %v5739_v2  ;;  %v5745_v26 = vmul.f32 %v10974_v3, %v11832_v63  ;;  %v5741_v1 = vmul.f32 %v10978_v15, %v11793_v20 }
 0x441   : > { %5691 = vadd.xlane.f32.xlu1 %v5690_v32  ;;  %v5746_v61 = vmul.f32 %v10976_v10, %v11841_v24  ;;  %v5794_v35 = vadd.f32 %v5793_v45, %v5738_v0  ;;  %v5801_v14 = vadd.f32 %v5743_v58, %v5742_v25  ;;  %v5748_v8 = vmul.f32 %v10974_v3, %v11859_v12 }
 0x442   : > { %5791 = vadd.xlane.f32.xlu0 %v5790_v29  ;;  %v5798_v27 = vadd.f32 %v5797_v7, %v5741_v1  ;;  %v5751_v59 = vmul.f32 %v10974_v3, %v11886_v13  ;;  %v5744_v48 = vmul.f32 %v10978_v15, %v11820_v39  ;;  %v5749_v42 = vmul.f32 %v10976_v10, %v11868_v51 }
 0x443   : > { %v5805_v31 = vadd.f32 %v5746_v61, %v5745_v26  ;;  %v5747_v56 = vmul.f32 %v10978_v15, %v11847_v21  ;;  %v5752_v47 = vmul.f32 %v10976_v10, %v11895_v18  ;;  %v5754_v16 = vmul.f32 %v10974_v3, %v11913_v30 }
 0x444   : > { %v5802_v9 = vadd.f32 %v5801_v14, %v5744_v48  ;;  %v5809_v4 = vadd.f32 %v5749_v42, %v5748_v8  ;;  %v5750_v28 = vmul.f32 %v10978_v15, %v11874_v40  ;;  %v5755_v54 = vmul.f32 %v10976_v10, %v11922_v37  ;;  %v13273_v14 = vld [vmem:[#allocation48_spill] sm:$0xff] }
 0x445   : > { %5795 = vadd.xlane.f32.xlu1 %v5794_v35  ;;  %v5806_v62 = vadd.f32 %v5805_v31, %v5747_v56  ;;  %v5813_v55 = vadd.f32 %v5752_v47, %v5751_v59  ;;  %v5753_v60 = vmul.f32 %v10978_v15, %v11901_v52  ;;  %v5756_v2 = vmul.f32 %v10978_v15, %v11929_v53  ;;  %v13275_v59 = vld [vmem:[#allocation5_spill] sm:$0xff] }
 0x446   : > { %5799 = vadd.xlane.f32.xlu0 %v5798_v27  ;;  %v5810_v50 = vadd.f32 %v5809_v4, %v5750_v28  ;;  %v5817_v17 = vadd.f32 %v5755_v54, %v5754_v16  ;;  %v13274_v27 = vld [vmem:[#allocation78_spill] sm:$0xff] }
 0x447   : > { %v5814_v44 = vadd.f32 %v5813_v55, %v5753_v60 }
 0x448   : > { %v5818_v32 = vadd.f32 %v5817_v17, %v5756_v2 }
 0x449   : > { %5803 = vadd.xlane.f32.xlu1 %v5802_v9 }
 0x44a   : > { %5807 = vadd.xlane.f32.xlu0 %v5806_v62 }
 0x44d   : > { %5811 = vadd.xlane.f32.xlu1 %v5810_v50 }
 0x44e   : > { %5815 = vadd.xlane.f32.xlu0 %v5814_v44 }
 0x451   : > { %5819 = vadd.xlane.f32.xlu1 %v5818_v32  ;;  %v13276_v32 = vld [vmem:[#allocation10_spill] sm:$0xff] }
 0x457   : > { %v5632_v6 = vpop.xlane.xlu0 %5631 }
 0x458   : > { %v5693_v25 = vadd.f32 1e-12, %v5632_v6 }
 0x45a   : > { %7214 = vrcp.f32 %v5693_v25  ;;  %v13277_v25 = vld [vmem:[#allocation81_spill] sm:$0xff] }
 0x45c   : > { %v5760_v29 = vpop.xlane.xlu0 %5759 }
 0x464   : > { %v5636_v45 = vpop.xlane.xlu0 %5635 }
 0x465   : > { %v5694_v0 = vadd.f32 1e-12, %v5636_v45  ;;  %v13278_v45 = vld [vmem:[#allocation53_spill] sm:$0xff] }
 0x466   : > { %v5764_v26 = vpop.xlane.xlu1 %5763 }
 0x467   : > { %v11978_v7 = vpop.eup %7214  ;;  %7216 = vrcp.f32 %v5694_v0 }
 0x468   : > { %v11981_v58 = vmul.f32 %v11978_v7, %v5760_v29 }
 0x46a   : > { %v5853_v1 = vsub.f32 %v10974_v3, %v11981_v58  ;;  %v5854_v61 = vsub.f32 %v10976_v10, %v11981_v58  ;;  %v5855_v35 = vsub.f32 %v10978_v15, %v11981_v58 }
 0x46c   : > { %v5901_v8 = vmul.f32 %v5853_v1, %v13273_v14  ;;  %v5902_v31 = vmul.f32 %v5854_v61, %v13274_v27  ;;  %v5903_v48 = vmul.f32 %v5855_v35, %v13275_v59 }
 0x46e   : > { %v5640_v42 = vpop.xlane.xlu1 %5639  ;;  %v5949_v56 = vmul.f32 %v5901_v8, %v5853_v1  ;;  %v5950_v47 = vmul.f32 %v5902_v31, %v5854_v61  ;;  %v5951_v4 = vmul.f32 %v5903_v48, %v5855_v35 }
 0x46f   : > { %v5695_v9 = vadd.f32 1e-12, %v5640_v42 }
 0x470   : > { %v5997_v16 = vadd.f32 %v5950_v47, %v5949_v56  ;;  %v5768_v60 = vpop.xlane.xlu0 %5767  ;;  %v13279_v47 = vld [vmem:[#allocation13_spill] sm:$0xff] }
 0x471   : > { %7218 = vrcp.f32 %v5695_v9 }
 0x472   : > { %v5998_v62 = vadd.f32 %v5997_v16, %v5951_v4  ;;  %v13280_v4 = vld [vmem:[#allocation83_spill] sm:$0xff] }
 0x474   : > { %5999 = vadd.xlane.f32.xlu0 %v5998_v62  ;;  %v11992_v55 = vpop.eup %7216 }
 0x475   : > { %v11995_v28 = vmul.f32 %v11992_v55, %v5764_v26 }
 0x477   : > { %v5644_v54 = vpop.xlane.xlu1 %5643  ;;  %v5856_v17 = vsub.f32 %v10974_v3, %v11995_v28  ;;  %v5857_v44 = vsub.f32 %v10976_v10, %v11995_v28  ;;  %v5858_v2 = vsub.f32 %v10978_v15, %v11995_v28 }
 0x478   : > { %v5696_v50 = vadd.f32 1e-12, %v5644_v54 }
 0x479   : > { %v5904_v6 = vmul.f32 %v5856_v17, %v13276_v32  ;;  %v5905_v29 = vmul.f32 %v5857_v44, %v13277_v25  ;;  %v5906_v0 = vmul.f32 %v5858_v2, %v13278_v45 }
 0x47a   : > { %7220 = vrcp.f32 %v5696_v50 }
 0x47b   : > { %v5952_v26 = vmul.f32 %v5904_v6, %v5856_v17  ;;  %v5953_v1 = vmul.f32 %v5905_v29, %v5857_v44  ;;  %v5954_v14 = vmul.f32 %v5906_v0, %v5858_v2 }
 0x47d   : > { %v6001_v8 = vadd.f32 %v5953_v1, %v5952_v26  ;;  %v13281_v1 = vld [vmem:[#allocation54_spill] sm:$0xff] }
 0x47e   : > { %v12006_v61 = vpop.eup %7218  ;;  %v5648_v35 = vpop.xlane.xlu0 %5647 }
 0x47f   : > { %v12009_v27 = vmul.f32 %v12006_v61, %v5768_v60  ;;  %v5697_v31 = vadd.f32 1e-12, %v5648_v35  ;;  %v6002_v59 = vadd.f32 %v6001_v8, %v5954_v14  ;;  %v13282_v14 = vld [vmem:[#allocation16_spill] sm:$0xff] }
 0x481   : > { %7222 = vrcp.f32 %v5697_v31  ;;  %v5859_v48 = vsub.f32 %v10974_v3, %v12009_v27  ;;  %v5860_v42 = vsub.f32 %v10976_v10, %v12009_v27  ;;  %6003 = vadd.xlane.f32.xlu1 %v6002_v59  ;;  %v5861_v56 = vsub.f32 %v10978_v15, %v12009_v27  ;;  %v5772_v54 = vpop.xlane.xlu1 %5771  ;;  %v13283_v31 = vld [vmem:[#allocation84_spill] sm:$0xff] }
 0x483   : > { %v5907_v9 = vmul.f32 %v5859_v48, %v13279_v47  ;;  %v5908_v16 = vmul.f32 %v5860_v42, %v13280_v4  ;;  %v5909_v62 = vmul.f32 %v5861_v56, %v11423_v33  ;;  %v5776_v0 = vpop.xlane.xlu0 %5775 }
 0x485   : > { %v5955_v60 = vmul.f32 %v5907_v9, %v5859_v48  ;;  %v5956_v50 = vmul.f32 %v5908_v16, %v5860_v42  ;;  %v5957_v44 = vmul.f32 %v5909_v62, %v5861_v56 }
 0x487   : > { %v12020_v17 = vpop.eup %7220  ;;  %v6005_v2 = vadd.f32 %v5956_v50, %v5955_v60 }
 0x488   : > { %v12023_v32 = vmul.f32 %v12020_v17, %v5772_v54 }
 0x489   : > { %v6006_v6 = vadd.f32 %v6005_v2, %v5957_v44  ;;  %v13284_v2 = vld [vmem:[#allocation55_spill] sm:$0xff] }
 0x48a   : > { %v5862_v25 = vsub.f32 %v10974_v3, %v12023_v32  ;;  %v5863_v29 = vsub.f32 %v10976_v10, %v12023_v32  ;;  %v5864_v33 = vsub.f32 %v10978_v15, %v12023_v32 }
 0x48b   : > { %v5652_v45 = vpop.xlane.xlu1 %5651  ;;  %6007 = vadd.xlane.f32.xlu0 %v6006_v6 }
 0x48c   : > { %v5698_v26 = vadd.f32 1e-12, %v5652_v45  ;;  %v5910_v35 = vmul.f32 %v5862_v25, %v13281_v1  ;;  %v5911_v8 = vmul.f32 %v5863_v29, %v13282_v14  ;;  %v5912_v59 = vmul.f32 %v5864_v33, %v13283_v31  ;;  %v13286_v45 = vld [vmem:[#allocation56_spill] sm:$0xff] }
 0x48e   : > { %v12034_v48 = vpop.eup %7222  ;;  %7224 = vrcp.f32 %v5698_v26  ;;  %v5958_v42 = vmul.f32 %v5910_v35, %v5862_v25  ;;  %v5959_v56 = vmul.f32 %v5911_v8, %v5863_v29  ;;  %v5960_v9 = vmul.f32 %v5912_v59, %v5864_v33  ;;  %v13285_v25 = vld [vmem:[#allocation85_spill] sm:$0xff] }
 0x48f   : > { %v12037_v47 = vmul.f32 %v12034_v48, %v5776_v0 }
 0x490   : > { %v6009_v4 = vadd.f32 %v5959_v56, %v5958_v42 }
 0x491   : > { %v5865_v16 = vsub.f32 %v10974_v3, %v12037_v47  ;;  %v5866_v62 = vsub.f32 %v10976_v10, %v12037_v47  ;;  %v5867_v54 = vsub.f32 %v10978_v15, %v12037_v47 }
 0x492   : > { %v5656_v60 = vpop.xlane.xlu0 %5655  ;;  %v6010_v50 = vadd.f32 %v6009_v4, %v5960_v9 }
 0x493   : > { %v5699_v44 = vadd.f32 1e-12, %v5656_v60  ;;  %v5913_v6 = vmul.f32 %v5865_v16, %v13284_v2  ;;  %v5914_v29 = vmul.f32 %v5866_v62, %v13285_v25  ;;  %v5915_v0 = vmul.f32 %v5867_v54, %v13286_v45  ;;  %v13288_v60 = vld [vmem:[#allocation86_spill] sm:$0xff] }
 0x494   : > { %6011 = vadd.xlane.f32.xlu1 %v6010_v50 }
 0x495   : > { %7226 = vrcp.f32 %v5699_v44  ;;  %v5961_v33 = vmul.f32 %v5913_v6, %v5865_v16  ;;  %v5962_v26 = vmul.f32 %v5914_v29, %v5866_v62  ;;  %v5963_v1 = vmul.f32 %v5915_v0, %v5867_v54  ;;  %v5780_v14 = vpop.xlane.xlu1 %5779  ;;  %v13287_v62 = vld [vmem:[#allocation19_spill] sm:$0xff]  ;;  %v13289_v44 = vld [vmem:[#allocation58_spill] sm:$0xff] }
 0x496   : > { %v5784_v25 = vpop.xlane.xlu0 %5783 }
 0x497   : > { %v6013_v35 = vadd.f32 %v5962_v26, %v5961_v33 }
 0x499   : > { %v6014_v8 = vadd.f32 %v6013_v35, %v5963_v1 }
 0x49b   : > { %v12048_v31 = vpop.eup %7224  ;;  %6015 = vadd.xlane.f32.xlu0 %v6014_v8 }
 0x49c   : > { %v12051_v59 = vmul.f32 %v12048_v31, %v5780_v14 }
 0x49e   : > { %v5868_v42 = vsub.f32 %v10974_v3, %v12051_v59  ;;  %v5869_v56 = vsub.f32 %v10976_v10, %v12051_v59  ;;  %v5870_v9 = vsub.f32 %v10978_v15, %v12051_v59  ;;  %v5660_v4 = vpop.xlane.xlu1 %5659 }
 0x49f   : > { %v5700_v16 = vadd.f32 1e-12, %v5660_v4  ;;  %v13290_v4 = vld [vmem:[#allocation87_spill] sm:$0xff] }
 0x4a0   : > { %v5916_v54 = vmul.f32 %v5868_v42, %v13287_v62  ;;  %v5917_v50 = vmul.f32 %v5869_v56, %v13288_v60  ;;  %v5918_v2 = vmul.f32 %v5870_v9, %v13289_v44 }
 0x4a1   : > { %7228 = vrcp.f32 %v5700_v16  ;;  %v13291_v16 = vld [vmem:[#allocation59_spill] sm:$0xff] }
 0x4a2   : > { %v12062_v6 = vpop.eup %7226  ;;  %v5964_v29 = vmul.f32 %v5916_v54, %v5868_v42  ;;  %v5965_v45 = vmul.f32 %v5917_v50, %v5869_v56  ;;  %v5966_v33 = vmul.f32 %v5918_v2, %v5870_v9  ;;  %v13292_v56 = vld [vmem:[#allocation22_spill] sm:$0xff] }
 0x4a3   : > { %v12065_v0 = vmul.f32 %v12062_v6, %v5784_v25 }
 0x4a4   : > { %v6017_v26 = vadd.f32 %v5965_v45, %v5964_v29 }
 0x4a5   : > { %v5871_v1 = vsub.f32 %v10974_v3, %v12065_v0  ;;  %v5872_v35 = vsub.f32 %v10976_v10, %v12065_v0  ;;  %v5873_v14 = vsub.f32 %v10978_v15, %v12065_v0 }
 0x4a6   : > { %v6018_v8 = vadd.f32 %v6017_v26, %v5966_v33 }
 0x4a7   : > { %v5919_v62 = vmul.f32 %v5871_v1, %v13290_v4  ;;  %v5920_v42 = vmul.f32 %v5872_v35, %v13291_v16  ;;  %v5921_v54 = vmul.f32 %v5873_v14, %v13292_v56  ;;  %v5788_v29 = vpop.xlane.xlu1 %5787  ;;  %v5664_v16 = vpop.xlane.xlu0 %5663 }
 0x4a8   : > { %6019 = vadd.xlane.f32.xlu1 %v6018_v8 }
 0x4a9   : > { %v5967_v60 = vmul.f32 %v5919_v62, %v5871_v1  ;;  %v5968_v9 = vmul.f32 %v5920_v42, %v5872_v35  ;;  %v5969_v50 = vmul.f32 %v5921_v54, %v5873_v14  ;;  %v5701_v54 = vadd.f32 1e-12, %v5664_v16 }
 0x4ab   : > { %v6021_v44 = vadd.f32 %v5968_v9, %v5967_v60  ;;  %v5668_v60 = vpop.xlane.xlu1 %5667  ;;  %7230 = vrcp.f32 %v5701_v54 }
 0x4ad   : > { %v6022_v2 = vadd.f32 %v6021_v44, %v5969_v50  ;;  %v5702_v44 = vadd.f32 1e-12, %v5668_v60 }
 0x4ae   : > { %v12076_v25 = vpop.eup %7228 }
 0x4af   : > { %6023 = vadd.xlane.f32.xlu0 %v6022_v2  ;;  %v12079_v45 = vmul.f32 %v12076_v25, %v5788_v29  ;;  %7232 = vrcp.f32 %v5702_v44 }
 0x4b1   : > { %13293 = vst [vmem:[#allocation57_spill] sm:$0xff] %v12079_v45  ;;  %v5874_v33 = vsub.f32 %v10974_v3, %v12079_v45  ;;  %v5875_v26 = vsub.f32 %v10976_v10, %v12079_v45  ;;  %v5876_v1 = vsub.f32 %v10978_v15, %v12079_v45  ;;  %v5672_v50 = vpop.xlane.xlu0 %5671 }
 0x4b2   : > { %v5703_v2 = vadd.f32 1e-12, %v5672_v50 }
 0x4b3   : > { %v5922_v35 = vmul.f32 %v5874_v33, %v11667_v23  ;;  %v5923_v14 = vmul.f32 %v5875_v26, %v11680_v41  ;;  %v5924_v8 = vmul.f32 %v5876_v1, %v11686_v49 }
 0x4b4   : > { %7234 = vrcp.f32 %v5703_v2 }
 0x4b5   : > { %v5970_v4 = vmul.f32 %v5922_v35, %v5874_v33  ;;  %v5971_v62 = vmul.f32 %v5923_v14, %v5875_v26  ;;  %v5972_v42 = vmul.f32 %v5924_v8, %v5876_v1 }
 0x4b6   : > { %v5676_v29 = vpop.xlane.xlu1 %5675 }
 0x4b7   : > { %v6025_v56 = vadd.f32 %v5971_v62, %v5970_v4  ;;  %v5704_v23 = vadd.f32 1e-12, %v5676_v29 }
 0x4b8   : > { %v12090_v14 = vpop.eup %7230 }
 0x4b9   : > { %v6026_v9 = vadd.f32 %v6025_v56, %v5972_v42  ;;  %7236 = vrcp.f32 %v5704_v23 }
 0x4bb   : > { %6027 = vadd.xlane.f32.xlu1 %v6026_v9  ;;  %v5680_v45 = vpop.xlane.xlu0 %5679 }
 0x4bc   : > { %v5705_v41 = vadd.f32 1e-12, %v5680_v45  ;;  %v12095_v16 = vpop.eup %7232 }
 0x4be   : > { %7238 = vrcp.f32 %v5705_v41 }
 0x4c0   : > { %v5684_v49 = vpop.xlane.xlu1 %5683 }
 0x4c1   : > { %v5706_v1 = vadd.f32 1e-12, %v5684_v49  ;;  %v12103_v60 = vpop.eup %7234 }
 0x4c2   : > { %13295 = vst [vmem:[#allocation88_spill] sm:$0xff] %v12103_v60 }
 0x4c5   : > { %v5688_v33 = vpop.xlane.xlu0 %5687 }
 0x4c6   : > { %v5707_v26 = vadd.f32 1e-12, %v5688_v33 }
 0x4c8   : > { %7240 = vrcp.f32 %v5707_v26  ;;  %v12120_v26 = vpop.eup %7236 }
 0x4c9   : > { %7242 = vrcp.f32 %v5706_v1  ;;  %13297 = vst [vmem:[#allocation25_spill] sm:$0xff] %v12120_v26 }
 0x4ca   : > { %v5692_v35 = vpop.xlane.xlu1 %5691 }
 0x4cb   : > { %v5708_v8 = vadd.f32 1e-12, %v5692_v35  ;;  %v5792_v4 = vpop.xlane.xlu0 %5791 }
 0x4cc   : > { %v12093_v62 = vmul.f32 %v12090_v14, %v5792_v4 }
 0x4cd   : > { %7244 = vrcp.f32 %v5708_v8 }
 0x4ce   : > { %13294 = vst [vmem:[#allocation60_spill] sm:$0xff] %v12093_v62  ;;  %v5796_v45 = vpop.xlane.xlu1 %5795  ;;  %v5877_v42 = vsub.f32 %v10974_v3, %v12093_v62  ;;  %v5878_v56 = vsub.f32 %v10976_v10, %v12093_v62  ;;  %v5879_v54 = vsub.f32 %v10978_v15, %v12093_v62 }
 0x4cf   : > { %v12106_v9 = vmul.f32 %v12095_v16, %v5796_v45  ;;  %v5800_v50 = vpop.xlane.xlu0 %5799 }
 0x4d0   : > { %v12109_v44 = vmul.f32 %v12103_v60, %v5800_v50  ;;  %v5925_v2 = vmul.f32 %v5877_v42, %v11703_v5  ;;  %v5926_v29 = vmul.f32 %v5878_v56, %v11713_v11  ;;  %v5927_v23 = vmul.f32 %v5879_v54, %v11728_v57 }
 0x4d1   : > { %13296 = vst [vmem:[#allocation62_spill] sm:$0xff] %v12106_v9  ;;  %v5880_v41 = vsub.f32 %v10974_v3, %v12106_v9  ;;  %v5881_v49 = vsub.f32 %v10976_v10, %v12106_v9  ;;  %v5882_v33 = vsub.f32 %v10978_v15, %v12106_v9 }
 0x4d2   : > { %v5804_v1 = vpop.xlane.xlu1 %5803  ;;  %v5973_v35 = vmul.f32 %v5925_v2, %v5877_v42  ;;  %v5974_v8 = vmul.f32 %v5926_v29, %v5878_v56  ;;  %v5975_v50 = vmul.f32 %v5927_v23, %v5879_v54  ;;  %v5883_v9 = vsub.f32 %v10974_v3, %v12109_v44  ;;  %v12132_v42 = vpop.eup %7238 }
 0x4d3   : > { %v12123_v5 = vmul.f32 %v12120_v26, %v5804_v1  ;;  %v5808_v11 = vpop.xlane.xlu0 %5807  ;;  %v5928_v57 = vmul.f32 %v5880_v41, %v11747_v43  ;;  %v5929_v4 = vmul.f32 %v5881_v49, %v11756_v46  ;;  %v5930_v45 = vmul.f32 %v5882_v33, %v11762_v38 }
 0x4d4   : > { %v6029_v62 = vadd.f32 %v5974_v8, %v5973_v35  ;;  %v5884_v60 = vsub.f32 %v10976_v10, %v12109_v44  ;;  %v12135_v29 = vmul.f32 %v12132_v42, %v5808_v11  ;;  %v5885_v46 = vsub.f32 %v10978_v15, %v12109_v44 }
 0x4d5   : > { %v5976_v56 = vmul.f32 %v5928_v57, %v5880_v41  ;;  %v5977_v2 = vmul.f32 %v5929_v4, %v5881_v49  ;;  %v5931_v38 = vmul.f32 %v5883_v9, %v11774_v22  ;;  %v12140_v54 = vpop.eup %7240  ;;  %v5978_v35 = vmul.f32 %v5930_v45, %v5882_v33 }
 0x4d6   : > { %v5812_v43 = vpop.xlane.xlu1 %5811  ;;  %v6030_v1 = vadd.f32 %v6029_v62, %v5975_v50  ;;  %v5932_v26 = vmul.f32 %v5884_v60, %v11785_v34  ;;  %v5886_v41 = vsub.f32 %v10974_v3, %v12123_v5  ;;  %v5933_v49 = vmul.f32 %v5885_v46, %v11793_v20  ;;  %v12148_v57 = vpop.eup %7242 }
 0x4d7   : > { %v5816_v23 = vpop.xlane.xlu0 %5815  ;;  %v6033_v8 = vadd.f32 %v5977_v2, %v5976_v56  ;;  %v5979_v11 = vmul.f32 %v5931_v38, %v5883_v9  ;;  %v5887_v62 = vsub.f32 %v10976_v10, %v12123_v5  ;;  %v5888_v33 = vsub.f32 %v10978_v15, %v12123_v5 }
 0x4d8   : > { %6031 = vadd.xlane.f32.xlu0 %v6030_v1  ;;  %v5980_v4 = vmul.f32 %v5932_v26, %v5884_v60  ;;  %v12155_v34 = vmul.f32 %v12148_v57, %v5812_v43  ;;  %v12158_v50 = vmul.f32 %v12140_v54, %v5816_v23  ;;  %v5934_v9 = vmul.f32 %v5886_v41, %v11805_v19 }
 0x4d9   : > { %v6034_v22 = vadd.f32 %v6033_v8, %v5978_v35  ;;  %v5935_v56 = vmul.f32 %v5887_v62, %v11814_v36  ;;  %v5981_v2 = vmul.f32 %v5933_v49, %v5885_v46  ;;  %v5936_v60 = vmul.f32 %v5888_v33, %v11820_v39 }
 0x4da   : > { %v12152_v45 = vpop.eup %7244  ;;  %v5820_v20 = vpop.xlane.xlu1 %5819  ;;  %v6037_v1 = vadd.f32 %v5980_v4, %v5979_v11  ;;  %v5889_v26 = vsub.f32 %v10974_v3, %v12135_v29  ;;  %v5982_v38 = vmul.f32 %v5934_v9, %v5886_v41  ;;  %v5890_v43 = vsub.f32 %v10976_v10, %v12135_v29 }
 0x4db   : > { %6035 = vadd.xlane.f32.xlu1 %v6034_v22  ;;  %v5983_v35 = vmul.f32 %v5935_v56, %v5887_v62  ;;  %v5891_v23 = vsub.f32 %v10978_v15, %v12135_v29  ;;  %v12170_v19 = vmul.f32 %v12152_v45, %v5820_v20  ;;  %v5984_v8 = vmul.f32 %v5936_v60, %v5888_v33 }
 0x4dc   : > { %v6038_v36 = vadd.f32 %v6037_v1, %v5981_v2  ;;  %v5937_v46 = vmul.f32 %v5889_v26, %v11832_v63  ;;  %v5938_v39 = vmul.f32 %v5890_v43, %v11841_v24  ;;  %v5892_v41 = vsub.f32 %v10974_v3, %v12155_v34 }
 0x4dd   : > { %v6041_v49 = vadd.f32 %v5983_v35, %v5982_v38  ;;  %v5939_v11 = vmul.f32 %v5891_v23, %v11847_v21  ;;  %v5893_v22 = vsub.f32 %v10976_v10, %v12155_v34  ;;  %v5894_v4 = vsub.f32 %v10978_v15, %v12155_v34 }
 0x4de   : > { %6039 = vadd.xlane.f32.xlu0 %v6038_v36  ;;  %v5985_v62 = vmul.f32 %v5937_v46, %v5889_v26  ;;  %v5895_v33 = vsub.f32 %v10974_v3, %v12158_v50  ;;  %v5986_v20 = vmul.f32 %v5938_v39, %v5890_v43  ;;  %v5940_v24 = vmul.f32 %v5892_v41, %v11859_v12 }
 0x4df   : > { %v6042_v63 = vadd.f32 %v6041_v49, %v5984_v8  ;;  %v5987_v9 = vmul.f32 %v5939_v11, %v5891_v23  ;;  %v5941_v21 = vmul.f32 %v5893_v22, %v11868_v51  ;;  %v5942_v56 = vmul.f32 %v5894_v4, %v11874_v40 }
 0x4e0   : > { %v5896_v2 = vsub.f32 %v10976_v10, %v12158_v50  ;;  %v5897_v1 = vsub.f32 %v10978_v15, %v12158_v50  ;;  %v6045_v60 = vadd.f32 %v5986_v20, %v5985_v62  ;;  %v5988_v26 = vmul.f32 %v5940_v24, %v5892_v41  ;;  %v13298_v24 = vld [vmem:[#allocation36_spill] sm:$0xff] }
 0x4e1   : > { %6043 = vadd.xlane.f32.xlu1 %v6042_v63  ;;  %v5943_v38 = vmul.f32 %v5895_v33, %v11886_v13  ;;  %v5898_v35 = vsub.f32 %v10974_v3, %v12170_v19  ;;  %v5989_v43 = vmul.f32 %v5941_v21, %v5893_v22  ;;  %v5899_v36 = vsub.f32 %v10976_v10, %v12170_v19 }
 0x4e2   : > { %v5944_v12 = vmul.f32 %v5896_v2, %v11895_v18  ;;  %v5945_v51 = vmul.f32 %v5897_v1, %v11901_v52  ;;  %v6046_v40 = vadd.f32 %v6045_v60, %v5987_v9  ;;  %v5900_v8 = vsub.f32 %v10978_v15, %v12170_v19 }
 0x4e3   : > { %v5991_v23 = vmul.f32 %v5943_v38, %v5895_v33  ;;  %v5990_v46 = vmul.f32 %v5942_v56, %v5894_v4  ;;  %v6049_v49 = vadd.f32 %v5989_v43, %v5988_v26  ;;  %v5946_v13 = vmul.f32 %v5898_v35, %v11913_v30 }
 0x4e4   : > { %v5992_v39 = vmul.f32 %v5944_v12, %v5896_v2  ;;  %6047 = vadd.xlane.f32.xlu0 %v6046_v40  ;;  %v5947_v3 = vmul.f32 %v5899_v36, %v11922_v37  ;;  %v5948_v18 = vmul.f32 %v5900_v8, %v11929_v53  ;;  %v5993_v52 = vmul.f32 %v5945_v51, %v5897_v1 }
 0x4e5   : > { %v6050_v11 = vadd.f32 %v6049_v49, %v5990_v46  ;;  %v5994_v62 = vmul.f32 %v5946_v13, %v5898_v35  ;;  %vm6189_vm8 = vcmp.eq.s32.totalorder %v13298_v24, 0  ;;  %vm6206_vm9 = vcmp.eq.s32.totalorder %v13298_v24, 1 }
 0x4e6   : > { %v6053_v41 = vadd.f32 %v5992_v39, %v5991_v23  ;;  %v5995_v22 = vmul.f32 %v5947_v3, %v5899_v36  ;;  %v5996_v33 = vmul.f32 %v5948_v18, %v5900_v8  ;;  %v6191_v23 = vsel %vm6189_vm8, %v11995_v28, 0.0 }
 0x4e7   : > { %6051 = vadd.xlane.f32.xlu1 %v6050_v11  ;;  %v6192_v28 = vsel %vm6189_vm8, %v12009_v27, 0.0 }
 0x4e8   : > { %v6054_v10 = vadd.f32 %v6053_v41, %v5993_v52  ;;  %v6057_v15 = vadd.f32 %v5995_v22, %v5994_v62 }
 0x4ea   : > { %6055 = vadd.xlane.f32.xlu0 %v6054_v10  ;;  %v6058_v4 = vadd.f32 %v6057_v15, %v5996_v33  ;;  %v6193_v33 = vsel %vm6189_vm8, %v12023_v32, 0.0  ;;  %v6194_v32 = vsel %vm6189_vm8, %v12037_v47, 0.0  ;;  %v6195_v47 = vsel %vm6189_vm8, %v12051_v59, 0.0 }
 0x4eb   : > { %v6196_v59 = vsel %vm6189_vm8, %v12065_v0, 0.0 }
 0x4ec   : > { %6059 = vadd.xlane.f32.xlu1 %v6058_v4 }
 0x4fd   : > { %v6000_v30 = vpop.xlane.xlu0 %5999 }
 0x4fe   : > { %v6061_v63 = vmul.f32 %v11978_v7, %v6000_v30  ;;  %v6190_v7 = vsel %vm6189_vm8, %v11981_v58, 0.0 }
 0x500   : > { %7246 = vrsqrt.f32 %v6061_v63  ;;  %vm6079_vm10 = vcmp.eq.f32.partialorder %v6061_v63, inf  ;;  %v6082_v21 = vand.u32 2147483648, %v6061_v63  ;;  %vm6081_vm11 = vcmp.eq.f32.partialorder %v6061_v63, 0.0 }
 0x50a   : > { %v6004_v37 = vpop.xlane.xlu1 %6003 }
 0x50b   : > { %v6062_v53 = vmul.f32 %v11992_v55, %v6004_v37 }
 0x50d   : > { %v7247_v20 = vpop.eup %7246  ;;  %7248 = vrsqrt.f32 %v6062_v53  ;;  %vm6086_vm12 = vcmp.eq.f32.partialorder %v6062_v53, inf  ;;  %v6089_v43 = vand.u32 2147483648, %v6062_v53  ;;  %vm6088_vm13 = vcmp.eq.f32.partialorder %v6062_v53, 0.0 }
 0x50e   : > { %v6078_v9 = vmul.f32 %v7247_v20, %v6061_v63 }
 0x510   : > { %v6080_v56 = vsel %vm6079_vm10, %v6061_v63, %v6078_v9 }
 0x511   : > { %v6083_v2 = vsel %vm6081_vm11, %v6082_v21, %v6080_v56 }
 0x512   : > { %v6207_v55 = vsel %vm6206_vm9, %v6083_v2, 0.0 }
 0x513   : > { %v6223_v1 = vadd.f32 %v6207_v55, %v6190_v7 }
 0x514   : > { %v6008_v60 = vpop.xlane.xlu0 %6007 }
 0x515   : > { %6239 = vst [vmem:[%s12214_s19] sm:$0xff] %v6223_v1  ;;  %v6063_v26 = vmul.f32 %v12006_v61, %v6008_v60 }
 0x517   : > { %7250 = vrsqrt.f32 %v6063_v26  ;;  %vm6093_vm14 = vcmp.eq.f32.partialorder %v6063_v26, inf  ;;  %v6096_v13 = vand.u32 2147483648, %v6063_v26  ;;  %vm6095_vm15 = vcmp.eq.f32.partialorder %v6063_v26, 0.0 }
 0x51a   : > { %v7249_v38 = vpop.eup %7248 }
 0x51b   : > { %v6085_v35 = vmul.f32 %v7249_v38, %v6062_v53 }
 0x51d   : > { %v6012_v12 = vpop.xlane.xlu1 %6011  ;;  %v6087_v51 = vsel %vm6086_vm12, %v6062_v53, %v6085_v35 }
 0x51e   : > { %v6064_v58 = vmul.f32 %v12020_v17, %v6012_v12  ;;  %v6090_v40 = vsel %vm6088_vm13, %v6089_v43, %v6087_v51 }
 0x51f   : > { %v6208_v36 = vsel %vm6206_vm9, %v6090_v40, 0.0 }
 0x520   : > { %7252 = vrsqrt.f32 %v6064_v58  ;;  %v6224_v61 = vadd.f32 %v6208_v36, %v6191_v23  ;;  %vm6100_vm0 = vcmp.eq.f32.partialorder %v6064_v58, inf  ;;  %vm6102_vm1 = vcmp.eq.f32.partialorder %v6064_v58, 0.0 }
 0x522   : > { %6240 = vst [vmem:[%s12214_s19 + $0x8] sm:$0xff] %v6224_v61 }
 0x524   : > { %v7251_v8 = vpop.eup %7250  ;;  %v6016_v46 = vpop.xlane.xlu0 %6015 }
 0x525   : > { %v6092_v49 = vmul.f32 %v7251_v8, %v6063_v26  ;;  %v6065_v39 = vmul.f32 %v12034_v48, %v6016_v46  ;;  %v6103_v48 = vand.u32 2147483648, %v6064_v58 }
 0x527   : > { %v6094_v17 = vsel %vm6093_vm14, %v6063_v26, %v6092_v49  ;;  %7254 = vrsqrt.f32 %v6065_v39  ;;  %vm6107_vm2 = vcmp.eq.f32.partialorder %v6065_v39, inf  ;;  %v6110_v37 = vand.u32 2147483648, %v6065_v39 }
 0x528   : > { %v6097_v3 = vsel %vm6095_vm15, %v6096_v13, %v6094_v17  ;;  %vm6109_vm3 = vcmp.eq.f32.partialorder %v6065_v39, 0.0 }
 0x529   : > { %v6209_v18 = vsel %vm6206_vm9, %v6097_v3, 0.0 }
 0x52a   : > { %v6225_v11 = vadd.f32 %v6209_v18, %v6192_v28 }
 0x52c   : > { %6241 = vst [vmem:[%s12214_s19 + $0x10] sm:$0xff] %v6225_v11 }
 0x52d   : > { %v7253_v52 = vpop.eup %7252 }
 0x52e   : > { %v6099_v41 = vmul.f32 %v7253_v52, %v6064_v58 }
 0x530   : > { %v6101_v62 = vsel %vm6100_vm0, %v6064_v58, %v6099_v41  ;;  %v13300_v41 = vld [vmem:[#allocation88_spill] sm:$0xff] }
 0x531   : > { %v6104_v22 = vsel %vm6102_vm1, %v6103_v48, %v6101_v62  ;;  %v6020_v10 = vpop.xlane.xlu1 %6019 }
 0x532   : > { %v6210_v27 = vsel %vm6206_vm9, %v6104_v22, 0.0  ;;  %v6066_v15 = vmul.f32 %v12048_v31, %v6020_v10  ;;  %v13301_v22 = vld [vmem:[#allocation25_spill] sm:$0xff] }
 0x533   : > { %v6226_v4 = vadd.f32 %v6210_v27, %v6193_v33 }
 0x534   : > { %v7255_v30 = vpop.eup %7254  ;;  %7256 = vrsqrt.f32 %v6066_v15  ;;  %vm6114_vm4 = vcmp.eq.f32.partialorder %v6066_v15, inf  ;;  %v6117_v55 = vand.u32 2147483648, %v6066_v15  ;;  %vm6116_vm5 = vcmp.eq.f32.partialorder %v6066_v15, 0.0 }
 0x535   : > { %6242 = vst [vmem:[%s12214_s19 + $0x18] sm:$0xff] %v6226_v4  ;;  %v6106_v63 = vmul.f32 %v7255_v30, %v6065_v39 }
 0x537   : > { %v6108_v53 = vsel %vm6107_vm2, %v6065_v39, %v6106_v63  ;;  %v13299_v39 = vld [vmem:[#allocation57_spill] sm:$0xff] }
 0x538   : > { %v6111_v20 = vsel %vm6109_vm3, %v6110_v37, %v6108_v53  ;;  %v6024_v9 = vpop.xlane.xlu0 %6023  ;;  %v6197_v13 = vsel %vm6189_vm8, %v13299_v39, 0.0 }
 0x539   : > { %v6211_v21 = vsel %vm6206_vm9, %v6111_v20, 0.0  ;;  %v6067_v31 = vmul.f32 %v12062_v6, %v6024_v9  ;;  %v13302_v20 = vld [vmem:[#allocation60_spill] sm:$0xff] }
 0x53a   : > { %v6227_v56 = vadd.f32 %v6211_v21, %v6194_v32  ;;  %v6198_v9 = vsel %vm6189_vm8, %v13302_v20, 0.0 }
 0x53b   : > { %7258 = vrsqrt.f32 %v6067_v31  ;;  %vm6121_vm6 = vcmp.eq.f32.partialorder %v6067_v31, inf  ;;  %v6124_v51 = vand.u32 2147483648, %v6067_v31  ;;  %vm6123_vm7 = vcmp.eq.f32.partialorder %v6067_v31, 0.0 }
 0x53c   : > { %6243 = vst [vmem:[%s12214_s19 + $0x20] sm:$0xff] %v6227_v56 }
 0x541   : > { %v7257_v2 = vpop.eup %7256 }
 0x542   : > { %v6113_v7 = vmul.f32 %v7257_v2, %v6066_v15 }
 0x544   : > { %v6115_v1 = vsel %vm6114_vm4, %v6066_v15, %v6113_v7  ;;  %v6028_v26 = vpop.xlane.xlu1 %6027 }
 0x545   : > { %v6118_v60 = vsel %vm6116_vm5, %v6117_v55, %v6115_v1  ;;  %v6068_v38 = vmul.f32 %v12076_v25, %v6028_v26 }
 0x546   : > { %v6212_v6 = vsel %vm6206_vm9, %v6118_v60, 0.0  ;;  %v13303_v60 = vld [vmem:[#allocation62_spill] sm:$0xff] }
 0x547   : > { %v6228_v35 = vadd.f32 %v6212_v6, %v6195_v47  ;;  %7260 = vrsqrt.f32 %v6068_v38  ;;  %vm6128_vm10 = vcmp.eq.f32.partialorder %v6068_v38, inf  ;;  %v6131_v8 = vand.u32 2147483648, %v6068_v38 }
 0x548   : > { %v7259_v43 = vpop.eup %7258  ;;  %vm6130_vm11 = vcmp.eq.f32.partialorder %v6068_v38, 0.0  ;;  %v6199_v26 = vsel %vm6189_vm8, %v13303_v60, 0.0 }
 0x549   : > { %6244 = vst [vmem:[%s12214_s19 + $0x28] sm:$0xff] %v6228_v35  ;;  %v6120_v12 = vmul.f32 %v7259_v43, %v6067_v31 }
 0x54b   : > { %v6122_v58 = vsel %vm6121_vm6, %v6067_v31, %v6120_v12 }
 0x54c   : > { %v6125_v40 = vsel %vm6123_vm7, %v6124_v51, %v6122_v58 }
 0x54d   : > { %v6213_v23 = vsel %vm6206_vm9, %v6125_v40, 0.0  ;;  %v6200_v40 = vsel %vm6189_vm8, %v12109_v44, 0.0 }
 0x54e   : > { %v6229_v36 = vadd.f32 %v6213_v23, %v6196_v59 }
 0x550   : > { %6245 = vst [vmem:[%s12214_s19 + $0x30] sm:$0xff] %v6229_v36 }
 0x554   : > { %v7261_v25 = vpop.eup %7260 }
 0x555   : > { %v6127_v61 = vmul.f32 %v7261_v25, %v6068_v38 }
 0x557   : > { %v6129_v46 = vsel %vm6128_vm10, %v6068_v38, %v6127_v61 }
 0x558   : > { %v6132_v49 = vsel %vm6130_vm11, %v6131_v8, %v6129_v46  ;;  %v6201_v8 = vsel %vm6189_vm8, %v12123_v5, 0.0 }
 0x559   : > { %v6214_v17 = vsel %vm6206_vm9, %v6132_v49, 0.0 }
 0x55a   : > { %v6230_v0 = vadd.f32 %v6214_v17, %v6197_v13 }
 0x55c   : > { %6246 = vst [vmem:[%s12214_s19 + $0x38] sm:$0xff] %v6230_v0 }
 0x561   : > { %v6032_v3 = vpop.xlane.xlu0 %6031 }
 0x562   : > { %v6069_v28 = vmul.f32 %v12090_v14, %v6032_v3  ;;  %v6202_v3 = vsel %vm6189_vm8, %v12135_v29, 0.0  ;;  %v6203_v29 = vsel %vm6189_vm8, %v12155_v34, 0.0 }
 0x564   : > { %7262 = vrsqrt.f32 %v6069_v28  ;;  %v6036_v18 = vpop.xlane.xlu1 %6035  ;;  %vm6135_vm12 = vcmp.eq.f32.partialorder %v6069_v28, inf  ;;  %vm6137_vm13 = vcmp.eq.f32.partialorder %v6069_v28, 0.0 }
 0x565   : > { %v6070_v11 = vmul.f32 %v12095_v16, %v6036_v18  ;;  %v6138_v16 = vand.u32 2147483648, %v6069_v28 }
 0x567   : > { %7264 = vrsqrt.f32 %v6070_v11  ;;  %v6040_v52 = vpop.xlane.xlu0 %6039  ;;  %vm6142_vm14 = vcmp.eq.f32.partialorder %v6070_v11, inf  ;;  %v6145_v31 = vand.u32 2147483648, %v6070_v11  ;;  %vm6144_vm15 = vcmp.eq.f32.partialorder %v6070_v11, 0.0 }
 0x568   : > { %v6071_v48 = vmul.f32 %v13300_v41, %v6040_v52 }
 0x56a   : > { %7266 = vrsqrt.f32 %v6071_v48  ;;  %v6044_v62 = vpop.xlane.xlu1 %6043  ;;  %vm6149_vm0 = vcmp.eq.f32.partialorder %v6071_v48, inf  ;;  %v6152_v35 = vand.u32 2147483648, %v6071_v48  ;;  %vm6151_vm1 = vcmp.eq.f32.partialorder %v6071_v48, 0.0 }
 0x56b   : > { %v6072_v10 = vmul.f32 %v13301_v22, %v6044_v62 }
 0x56d   : > { %7268 = vrsqrt.f32 %v6072_v10  ;;  %v6048_v33 = vpop.xlane.xlu0 %6047  ;;  %vm6156_vm2 = vcmp.eq.f32.partialorder %v6072_v10, inf  ;;  %v6159_v59 = vand.u32 2147483648, %v6072_v10  ;;  %vm6158_vm3 = vcmp.eq.f32.partialorder %v6072_v10, 0.0 }
 0x56e   : > { %v12270_v27 = vmul.f32 %v12132_v42, %v6048_v33 }
 0x570   : > { %7270 = vrsqrt.f32 %v12270_v27  ;;  %v6052_v14 = vpop.xlane.xlu1 %6051  ;;  %vm6163_vm4 = vcmp.eq.f32.partialorder %v12270_v27, inf  ;;  %v6166_v39 = vand.u32 2147483648, %v12270_v27  ;;  %vm6165_vm5 = vcmp.eq.f32.partialorder %v12270_v27, 0.0 }
 0x571   : > { %v7263_v15 = vpop.eup %7262  ;;  %v12274_v30 = vmul.f32 %v12148_v57, %v6052_v14  ;;  %v6204_v14 = vsel %vm6189_vm8, %v12158_v50, 0.0  ;;  %v6205_v50 = vsel %vm6189_vm8, %v12170_v19, 0.0 }
 0x572   : > { %v6134_v4 = vmul.f32 %v7263_v15, %v6069_v28 }
 0x573   : > { %v6056_v53 = vpop.xlane.xlu0 %6055  ;;  %7272 = vrsqrt.f32 %v12274_v30  ;;  %vm6170_vm6 = vcmp.eq.f32.partialorder %v12274_v30, inf  ;;  %v6173_v18 = vand.u32 2147483648, %v12274_v30  ;;  %vm6172_vm7 = vcmp.eq.f32.partialorder %v12274_v30, 0.0 }
 0x574   : > { %v7265_v63 = vpop.eup %7264  ;;  %v6136_v37 = vsel %vm6135_vm12, %v6069_v28, %v6134_v4  ;;  %v12283_v57 = vmul.f32 %v12140_v54, %v6056_v53 }
 0x575   : > { %v6139_v42 = vsel %vm6137_vm13, %v6138_v16, %v6136_v37  ;;  %v6141_v32 = vmul.f32 %v7265_v63, %v6070_v11  ;;  %v6060_v7 = vpop.xlane.xlu1 %6059 }
 0x576   : > { %v6215_v21 = vsel %vm6206_vm9, %v6139_v42, 0.0  ;;  %7274 = vrsqrt.f32 %v12283_v57  ;;  %v12293_v54 = vmul.f32 %v12152_v45, %v6060_v7  ;;  %vm6177_vm10 = vcmp.eq.f32.partialorder %v12283_v57, inf }
 0x577   : > { %v6231_v56 = vadd.f32 %v6215_v21, %v6198_v9  ;;  %v6143_v2 = vsel %vm6142_vm14, %v6070_v11, %v6141_v32  ;;  %v7267_v55 = vpop.eup %7266  ;;  %vm6179_vm11 = vcmp.eq.f32.partialorder %v12283_v57, 0.0 }
 0x578   : > { %v6146_v1 = vsel %vm6144_vm15, %v6145_v31, %v6143_v2  ;;  %v6148_v6 = vmul.f32 %v7267_v55, %v6071_v48  ;;  %7276 = vrsqrt.f32 %v12293_v54  ;;  %vm6184_vm12 = vcmp.eq.f32.partialorder %v12293_v54, inf }
 0x579   : > { %6247 = vst [vmem:[%s12214_s19 + $0x40] sm:$0xff] %v6231_v56  ;;  %v6216_v47 = vsel %vm6206_vm9, %v6146_v1, 0.0  ;;  %vm6186_vm13 = vcmp.eq.f32.partialorder %v12293_v54, 0.0 }
 0x57a   : > { %v6232_v38 = vadd.f32 %v6216_v47, %v6199_v26  ;;  %v7269_v43 = vpop.eup %7268  ;;  %v6150_v12 = vsel %vm6149_vm0, %v6071_v48, %v6148_v6 }
 0x57b   : > { %v6153_v51 = vsel %vm6151_vm1, %v6152_v35, %v6150_v12  ;;  %v6155_v58 = vmul.f32 %v7269_v43, %v6072_v10 }
 0x57c   : > { %6248 = vst [vmem:[%s12214_s19 + $0x48] sm:$0xff] %v6232_v38  ;;  %v6217_v45 = vsel %vm6206_vm9, %v6153_v51, 0.0 }
 0x57d   : > { %v6233_v23 = vadd.f32 %v6217_v45, %v6200_v40  ;;  %v6157_v36 = vsel %vm6156_vm2, %v6072_v10, %v6155_v58  ;;  %v7271_v25 = vpop.eup %7270  ;;  %v6180_v10 = vand.u32 2147483648, %v12283_v57 }
 0x57e   : > { %v6160_v61 = vsel %vm6158_vm3, %v6159_v59, %v6157_v36  ;;  %v6162_v44 = vmul.f32 %v7271_v25, %v12270_v27 }
 0x57f   : > { %6249 = vst [vmem:[%s12214_s19 + $0x50] sm:$0xff] %v6233_v23  ;;  %v6218_v46 = vsel %vm6206_vm9, %v6160_v61, 0.0 }
 0x580   : > { %v6234_v49 = vadd.f32 %v6218_v46, %v6201_v8  ;;  %v7273_v13 = vpop.eup %7272  ;;  %v6164_v17 = vsel %vm6163_vm4, %v12270_v27, %v6162_v44 }
 0x581   : > { %v6167_v0 = vsel %vm6165_vm5, %v6166_v39, %v6164_v17  ;;  %v6169_v5 = vmul.f32 %v7273_v13, %v12274_v30 }
 0x582   : > { %6250 = vst [vmem:[%s12214_s19 + $0x58] sm:$0xff] %v6234_v49  ;;  %v6219_v28 = vsel %vm6206_vm9, %v6167_v0, 0.0 }
 0x583   : > { %v7275_v11 = vpop.eup %7274  ;;  %v6235_v52 = vadd.f32 %v6219_v28, %v6202_v3  ;;  %v6171_v41 = vsel %vm6170_vm6, %v12274_v30, %v6169_v5  ;;  %v6187_v30 = vand.u32 2147483648, %v12293_v54 }
 0x584   : > { %v6174_v48 = vsel %vm6172_vm7, %v6173_v18, %v6171_v41  ;;  %v6176_v62 = vmul.f32 %v7275_v11, %v12283_v57 }
 0x585   : > { %6251 = vst [vmem:[%s12214_s19 + $0x60] sm:$0xff] %v6235_v52  ;;  %v6220_v22 = vsel %vm6206_vm9, %v6174_v48, 0.0  ;;  %v7277_v33 = vpop.eup %7276 }
 0x586   : > { %v6236_v27 = vadd.f32 %v6220_v22, %v6203_v29  ;;  %v6178_v15 = vsel %vm6177_vm10, %v12283_v57, %v6176_v62  ;;  %v6183_v34 = vmul.f32 %v7277_v33, %v12293_v54 }
 0x587   : > { %v6181_v4 = vsel %vm6179_vm11, %v6180_v10, %v6178_v15 }
 0x588   : > { %6252 = vst [vmem:[%s12214_s19 + $0x68] sm:$0xff] %v6236_v27  ;;  %v6221_v16 = vsel %vm6206_vm9, %v6181_v4, 0.0  ;;  %v6185_v37 = vsel %vm6184_vm12, %v12293_v54, %v6183_v34 }
 0x589   : > { %v6237_v63 = vadd.f32 %v6221_v16, %v6204_v14  ;;  %v6188_v53 = vsel %vm6186_vm13, %v6187_v30, %v6185_v37 }
 0x58a   : > { %v6222_v20 = vsel %vm6206_vm9, %v6188_v53, 0.0 }
 0x58b   : > { %6253 = vst [vmem:[%s12214_s19 + $0x70] sm:$0xff] %v6237_v63  ;;  %v6238_v9 = vadd.f32 %v6222_v20, %v6205_v50 }
 0x58d   : > { %6254 = vst [vmem:[%s12214_s19 + $0x78] sm:$0xff] %v6238_v9 }
 0x58e   : > { %7291 = shalt.err (!%p7288_p5)
}
 0x58f   : > { %s7292_s4 = scalar_lea.hbm %s12357_s15, 2048  ;;  %s7296_s8 = scalar_lea.hbm %s12412_s3, 4096 }
 0x590   : > { %p7293_p6 = scmp.ne.s32.totalorder %s12357_s15, %s7292_s4  ;;  %p7297_p10 = scmp.lt.s32.totalorder %s12357_s15, %s12412_s3 }
 0x591   : > { %p7298_p11 = scmp.lt.s32.totalorder %s7296_s8, %s7292_s4 }
 0x592   : > { %p7294_p7 = pnand %p7293_p6, %p7420_p4 }
 0x593   : > { %p7299_p12 = por %p7298_p11, %p7297_p10 }
 0x594   : > { %p7295_p9 = pneg %p7294_p7 }
 0x596   : > { %p7300_p13 = pnand %p7299_p12, %p7295_p9 }
 0x598   : > { %7303 = shalt.err (!%p7300_p13)
}
 0x599   : > { %s7358_s18 = smov 128   ;;  %s7359_s19 = smov 8  }
 0x59a   : > { %6772 = dma.vmem_to_hbm [thread:$0]  (%p7420_p4), %s12359_s11, 2048, %s12357_s15, %s12364_s21, %s7358_s18, %s7358_s18, %s7359_s19  }
 0x59b PF: > { %p6778_p0 = scmp.ge.s32.totalorder %s7354_s17, 2  ;;  %s6286_s23 = sand.u32 1, %s7334_s12  }
 0x59c   : > { %s6287_s26 = scalar_lea.sflag [#allocation3], %s6286_s23 }
 0x59d   : > { %p6775_p1 = pnand %p6778_p0, %p7427_p8 }
 0x59f   : > { %p6776_p2 = pneg %p6775_p1 }
 0x5a1   : > { %7329 = dma.done.wait (%p6776_p2), %s6287_s26, 2048  }
 0x5a2   : > { %7331 = vsyncadd (%p6776_p2), %s6287_s26, 4294965248  ;;  %s16_s17 = sadd.s32 1, %s7354_s17   ;;  %s13304_s12 = smov %s7338_s13 }
 0x5a3   : > { %p13_p3 = scmp.ge.s32.totalorder %s16_s17, 4   ;;  %s13305_s13 = smov %s7342_s14 }
 0x5a4   : > { %s13306_s14 = smov %s7433_s25  ;;  %s13307_s15 = smov %s7350_s16 }
 0x5a5   : > { %s13308_s16 = smov %s13310_s20  ;;  %15 = sbr.rel (!%p13_p3) target bundleno = 4 (0x4), region = 70 }
 0x5aa   :  { %6292 = vsyncpa [#allocation3], 1 }
 0x5ab   :  { %6294 = vsyncpa [#allocation3 + $0x1], 1 }

</bundles_post_ra>
